<compile_context>
chip_gen: v5e
topology: v5e:2x2
jax: 0.10.0
libtpu: 0.0.40
codegen_flags: <defaults>
</compile_context>

<pallas_src>
import functools

import numpy as np
import jax
import jax.numpy as jnp
from jax import lax
from jax.experimental import pallas as pl
from jax.experimental.pallas import tpu as pltpu


# ---------------------------------------------------------------------------
# Kernel 1: fused Conv2d(5x5, 'same') + bias + ReLU + MaxPool2d(2,2)
#           (one image per grid step)
# ---------------------------------------------------------------------------

def _conv5_relu_pool_kernel(x_ref, t_ref, b_ref, o_ref, *, Ho):
    """
    x_ref: (1, 2, Ho+2, (W+4)*C) bf16  row-parity planes of the zero-padded,
                                       row-major (lane = W*C) input image
    t_ref: (2, 5, (W+4)*C, Wo*O) bf16  column-Toeplitz weights [col-window, row-tap]
    b_ref: (1, Wo*O)             f32   bias tiled across output columns
    o_ref: (1, Ho, Wo*O)         bf16  pooled output (lane-dense, Wo*O % 128 == 0)
    """
    no = o_ref.shape[-1]
    accs = [[jnp.zeros((Ho, no), jnp.float32) for _ in range(2)] for _ in range(2)]

    # Conv output row 2i+wi needs padded input rows 2i+wi+di (di in [0,5)).
    # With u = wi + di those rows live in row-parity plane u%2 at rows
    # [u//2, u//2 + Ho) -- a contiguous, statically-offset ref slice.
    for wi in range(2):                      # row position inside the 2x2 pool window
        for di in range(5):                  # conv row tap
            u = wi + di
            lhs = x_ref[0, u % 2, pl.ds(u // 2, Ho), :]            # (Ho, K2) bf16
            for wj in range(2):              # col position inside the 2x2 pool window
                accs[wi][wj] += jnp.dot(lhs, t_ref[wj, di, :, :],
                                        preferred_element_type=jnp.float32)

    bias = b_ref[...]
    pooled = None
    for wi in range(2):
        for wj in range(2):
            a = jnp.maximum(accs[wi][wj] + bias, 0.0)              # bias + ReLU
            pooled = a if pooled is None else jnp.maximum(pooled, a)  # 2x2 max-pool
    o_ref[...] = pooled[None].astype(o_ref.dtype)


def conv5_relu_pool(x_packed, t, b, *, Ho):
    """x_packed: (N, 2, Ho+2, K2) bf16 -> (N, Ho, Wo*O) bf16 (pooled, NHWC order)."""
    N = x_packed.shape[0]
    NO = t.shape[-1]
    kernel = functools.partial(_conv5_relu_pool_kernel, Ho=Ho)
    return pl.pallas_call(
        kernel,
        out_shape=jax.ShapeDtypeStruct((N, Ho, NO), jnp.bfloat16),
        grid=(N,),
        in_specs=[
            pl.BlockSpec((1,) + x_packed.shape[1:], lambda n: (n, 0, 0, 0)),
            pl.BlockSpec(t.shape, lambda n: (0, 0, 0, 0)),
            pl.BlockSpec(b.shape, lambda n: (0, 0)),
        ],
        out_specs=pl.BlockSpec((1, Ho, NO), lambda n: (n, 0, 0)),
        compiler_params=pltpu.CompilerParams(
            dimension_semantics=("parallel",),   # v7x: shard batch across both TCs
            vmem_limit_bytes=32 * 1024 * 1024,
        ),
    )(x_packed, t, b)


# ---------------------------------------------------------------------------
# Kernel 2: fused fc1 -> ReLU -> fc2 -> ReLU -> fc3
# ---------------------------------------------------------------------------

def _mlp_kernel(x_ref, w1_ref, b1_ref, w2_ref, b2_ref, w3_ref, b3_ref, o_ref):
    h = jnp.dot(x_ref[...], w1_ref[...], preferred_element_type=jnp.float32)
    h = jnp.maximum(h + b1_ref[...], 0.0)
    h = jnp.dot(h.astype(jnp.bfloat16), w2_ref[...], preferred_element_type=jnp.float32)
    h = jnp.maximum(h + b2_ref[...], 0.0)
    h = jnp.dot(h.astype(jnp.bfloat16), w3_ref[...], preferred_element_type=jnp.float32)
    o_ref[...] = (h + b3_ref[...]).astype(o_ref.dtype)


def mlp_forward(flat, prep):
    M, K = flat.shape
    A = prep["wf3"].shape[1]
    TM = M if M <= 256 else 256
    Mp = ((M + TM - 1) // TM) * TM
    x = flat.astype(jnp.bfloat16)
    if Mp != M:
        x = jnp.pad(x, ((0, Mp - M), (0, 0)))
    args = (x, prep["wf1"], prep["bf1"], prep["wf2"], prep["bf2"],
            prep["wf3"], prep["bf3"])
    out = pl.pallas_call(
        _mlp_kernel,
        out_shape=jax.ShapeDtypeStruct((Mp, A), jnp.float32),
        grid=(Mp // TM,),
        in_specs=[pl.BlockSpec((TM, K), lambda i: (i, 0))]
        + [pl.BlockSpec(a.shape, lambda i: (0, 0)) for a in args[1:]],
        out_specs=pl.BlockSpec((TM, A), lambda i: (i, 0)),
        compiler_params=pltpu.CompilerParams(
            dimension_semantics=("parallel",),
            vmem_limit_bytes=32 * 1024 * 1024,
        ),
    )(*args)
    return out[:M]


# ---------------------------------------------------------------------------
# One-time (init) weight/layout preparation  -- nothing below runs per forward
# ---------------------------------------------------------------------------

def _build_col_toeplitz(conv_w, in_w):
    """conv_w: PyTorch (O, C, 5, 5). Returns (2, 5, (in_w+4)*C, (in_w//2)*O) bf16.

    t[wj, di, col*C + c, j*O + o] = conv_w[o, c, di, col - (2j+wj)] when the tap
    offset dj = col - (2j+wj) is in [0, 5), else 0 -- i.e. one matmul of a padded
    input row against t[wj, di] contracts the kw and channel dims for every
    even (wj=0) / odd (wj=1) output column at once.
    """
    w = np.asarray(conv_w, dtype=np.float32)
    O, C, KH, KW = w.shape
    Wo, Wp = in_w // 2, in_w + 4
    w_hwio = np.transpose(w, (2, 3, 1, 0))           # (kh, kw, C, O)
    t = np.zeros((2, KH, Wp * C, Wo * O), np.float32)
    for wj in range(2):
        for di in range(KH):
            for j in range(Wo):
                for dj in range(KW):
                    col = 2 * j + wj + dj            # padded input column
                    t[wj, di, col * C:(col + 1) * C, j * O:(j + 1) * O] = w_hwio[di, dj]
    return jnp.asarray(t, dtype=jnp.bfloat16)


def prepare_params(params, obs_h, obs_w):
    """Hoist all weight re-layouts out of the jitted forward."""
    assert obs_h % 4 == 0 and obs_w % 4 == 0, "MaxPool2d(2,2) x2 needs H,W % 4 == 0"
    Hq, Wq = obs_h // 4, obs_w // 4
    # fc1: permute input columns from PyTorch NCHW-flatten order (c*Hq*Wq + h*Wq + w)
    # to our NHWC-flatten order ((h*Wq + w)*64 + c), and store as [K, N].
    w1 = params["fc1_w"].reshape(512, 64, Hq, Wq)
    w1 = jnp.transpose(w1, (2, 3, 1, 0)).reshape(Hq * Wq * 64, 512)
    return {
        "t1": _build_col_toeplitz(params["conv1_w"], obs_w),
        "bc1": jnp.tile(params["conv1_b"], obs_w // 2).reshape(1, -1).astype(jnp.float32),
        "t2": _build_col_toeplitz(params["conv2_w"], obs_w // 2),
        "bc2": jnp.tile(params["conv2_b"], obs_w // 4).reshape(1, -1).astype(jnp.float32),
        "wf1": w1.astype(jnp.bfloat16),
        "bf1": params["fc1_b"].reshape(1, -1).astype(jnp.float32),
        "wf2": params["fc2_w"].T.astype(jnp.bfloat16),
        "bf2": params["fc2_b"].reshape(1, -1).astype(jnp.float32),
        "wf3": params["fc3_w"].T.astype(jnp.bfloat16),
        "bf3": params["fc3_b"].reshape(1, -1).astype(jnp.float32),
    }


# ---------------------------------------------------------------------------
# Forward pass (JAX glue = cheap single-pass layout packing between kernels)
# ---------------------------------------------------------------------------

def _rows_parity_pack(x_nhwc):
    """(N, H, W, C) -> (N, 2, H//2 + 2, (W+4)*C): zero-pad by 2, flatten each row
    to a lane-dense (W+4)*C vector, and split rows by parity so the conv kernel's
    tap slices are contiguous. One elementwise-copy-sized pass (no 25x im2col)."""
    N, H, W, C = x_nhwc.shape
    xp = jnp.pad(x_nhwc, ((0, 0), (2, 2), (2, 2), (0, 0)))
    Hp, Wp = H + 4, W + 4
    x2 = xp.reshape(N, Hp, Wp * C)
    x2 = x2.reshape(N, Hp // 2, 2, Wp * C)
    return jnp.transpose(x2, (0, 2, 1, 3))           # (N, 2, Hp//2, Wp*C)


def feature_net_forward(x_nchw, prep):
    N, C, H, W = x_nchw.shape
    assert C == 3 and H % 4 == 0 and W % 4 == 0
    Ho1, Wo1 = H // 2, W // 2
    Ho2, Wo2 = H // 4, W // 4

    x = jnp.transpose(x_nchw, (0, 2, 3, 1)).astype(jnp.bfloat16)      # NHWC, bf16

    # conv1 + ReLU + maxpool (fused)
    y1 = conv5_relu_pool(_rows_parity_pack(x), prep["t1"], prep["bc1"], Ho=Ho1)
    y1 = y1.reshape(N, Ho1, Wo1, 32)                                  # NHWC

    # conv2 + ReLU + maxpool (fused)
    y2 = conv5_relu_pool(_rows_parity_pack(y1), prep["t2"], prep["bc2"], Ho=Ho2)

    # NHWC flatten (fc1 columns were pre-permuted to match, so no NCHW transpose)
    flat = y2.reshape(N, Ho2 * Wo2 * 64)

    # fc1 -> ReLU -> fc2 -> ReLU -> fc3 (single fused kernel)
    return mlp_forward(flat, prep)                                    # (N, action_dim) f32


# ---------------------------------------------------------------------------
# Parameters + pure-JAX f32 reference (PyTorch semantics) for validation
# ---------------------------------------------------------------------------

def init_params(key, obs_h, obs_w, action_dim):
    ks = jax.random.split(key, 10)
    flat = (obs_w // 4) * (obs_h // 4) * 64

    def u(k, shape, fan_in):
        bound = 1.0 / jnp.sqrt(fan_in)
        return jax.random.uniform(k, shape, jnp.float32, -bound, bound)

    return {
        "conv1_w": u(ks[0], (32, 3, 5, 5), 3 * 25),
        "conv1_b": u(ks[1], (32,), 3 * 25),
        "conv2_w": u(ks[2], (64, 32, 5, 5), 32 * 25),
        "conv2_b": u(ks[3], (64,), 32 * 25),
        "fc1_w": u(ks[4], (512, flat), flat),
        "fc1_b": u(ks[5], (512,), flat),
        "fc2_w": u(ks[6], (256, 512), 512),
        "fc2_b": u(ks[7], (256,), 512),
        "fc3_w": u(ks[8], (action_dim, 256), 256),
        "fc3_b": u(ks[9], (action_dim,), 256),
    }


def reference_forward(x_nchw, params):
    dn = ("NCHW", "OIHW", "NCHW")
    y = lax.conv_general_dilated(x_nchw, params["conv1_w"], (1, 1), "SAME",
                                 dimension_numbers=dn)
    y = jnp.maximum(y + params["conv1_b"][None, :, None, None], 0.0)
    y = lax.reduce_window(y, -jnp.inf, lax.max, (1, 1, 2, 2), (1, 1, 2, 2), "VALID")
    y = lax.conv_general_dilated(y, params["conv2_w"], (1, 1), "SAME",
                                 dimension_numbers=dn)
    y = jnp.maximum(y + params["conv2_b"][None, :, None, None], 0.0)
    y = lax.reduce_window(y, -jnp.inf, lax.max, (1, 1, 2, 2), (1, 1, 2, 2), "VALID")
    flat = y.reshape(y.shape[0], -1)                     # PyTorch NCHW flatten order
    h = jnp.maximum(flat @ params["fc1_w"].T + params["fc1_b"], 0.0)
    h = jnp.maximum(h @ params["fc2_w"].T + params["fc2_b"], 0.0)
    return h @ params["fc3_w"].T + params["fc3_b"]


if __name__ == "__main__":
    OBS_H, OBS_W, ACTION_DIM, BATCH = 16, 16, 4, 2

    key = jax.random.PRNGKey(0)
    k_x, k_p = jax.random.split(key)
    x = jax.random.normal(k_x, (BATCH, 3, OBS_H, OBS_W), dtype=jnp.float32)
    params = init_params(k_p, OBS_H, OBS_W, ACTION_DIM)
    prep = prepare_params(params, OBS_H, OBS_W)          # one-time weight re-layout

    out = jax.jit(feature_net_forward)(x, prep)
    out = jax.block_until_ready(out)

    assert out.shape == (BATCH, ACTION_DIM), out.shape
    assert out.dtype == jnp.float32
    assert bool(jnp.all(jnp.isfinite(out)))

    # Validate against the f32 reference (kernels use bf16 operands, f32 accum).
    ref = jax.jit(reference_forward)(x, params)
    err = float(jnp.max(jnp.abs(out - ref)))
    assert err < 5e-2, f"max |out - ref| = {err}"

    print("KERNEL_OK")
</pallas_src>

<mosaic_0001>
module attributes {stable_mosaic.version = 11 : i64} {
  func.func @_conv5_relu_pool_kernel(%arg0: i32, %arg1: memref<1x2x10x60xbf16, #tpu.memory_space<vmem>>, %arg2: memref<2x5x60x256xbf16, #tpu.memory_space<vmem>>, %arg3: memref<1x256xf32, #tpu.memory_space<vmem>>, %arg4: memref<1x8x256xbf16, #tpu.memory_space<vmem>>) attributes {dimension_semantics = [#tpu.dimension_semantics<parallel>], iteration_bounds = array<i64: 2>, scalar_prefetch = 0 : i64, scratch_operands = 0 : i64, tpu.core_type = #tpu.core_type<tc>, window_params = [{transform_indices = @transform_0, window_bounds = array<i64: 1, 2, 10, 60>}, {pipeline_mode = #tpu.pipeline_mode<synchronous>, transform_indices = @transform_1, window_bounds = array<i64: 2, 5, 60, 256>}, {pipeline_mode = #tpu.pipeline_mode<synchronous>, transform_indices = @transform_2, window_bounds = array<i64: 1, 256>}, {transform_indices = @transform_3, window_bounds = array<i64: 1, 8, 256>}]} {
    %cst = arith.constant 0.000000e+00 : f32
    %0 = vector.broadcast %cst : f32 to vector<8x256xf32>
    %cst_0 = arith.constant 0.000000e+00 : f32
    %1 = vector.broadcast %cst_0 : f32 to vector<8x256xf32>
    %cst_1 = arith.constant 0.000000e+00 : f32
    %2 = vector.broadcast %cst_1 : f32 to vector<8x256xf32>
    %cst_2 = arith.constant 0.000000e+00 : f32
    %3 = vector.broadcast %cst_2 : f32 to vector<8x256xf32>
    %c0 = arith.constant 0 : index
    %c0_3 = arith.constant 0 : index
    %c0_4 = arith.constant 0 : index
    %c0_5 = arith.constant 0 : index
    %4 = vector.load %arg1[%c0, %c0_3, %c0_4, %c0_5] : memref<1x2x10x60xbf16, #tpu.memory_space<vmem>>, vector<1x1x8x60xbf16>
    %5 = vector.shape_cast %4 : vector<1x1x8x60xbf16> to vector<8x60xbf16>
    %c0_6 = arith.constant 0 : index
    %c0_7 = arith.constant 0 : index
    %c0_8 = arith.constant 0 : index
    %c0_9 = arith.constant 0 : index
    %6 = vector.load %arg2[%c0_6, %c0_7, %c0_8, %c0_9] : memref<2x5x60x256xbf16, #tpu.memory_space<vmem>>, vector<1x1x60x256xbf16>
    %7 = vector.shape_cast %6 : vector<1x1x60x256xbf16> to vector<60x256xbf16>
    %cst_10 = arith.constant dense<0.000000e+00> : vector<8x256xf32>
    %8 = tpu.matmul %5, %7, %cst_10 {dimension_numbers = #tpu.dot_dimension_numbers<[1], [0], [0], [1], [0, 0, 1, 1], [], []>} : vector<8x60xbf16>, vector<60x256xbf16>, vector<8x256xf32> -> vector<8x256xf32>
    %9 = arith.addf %0, %8 : vector<8x256xf32>
    %c1 = arith.constant 1 : index
    %c0_11 = arith.constant 0 : index
    %c0_12 = arith.constant 0 : index
    %c0_13 = arith.constant 0 : index
    %10 = vector.load %arg2[%c1, %c0_11, %c0_12, %c0_13] : memref<2x5x60x256xbf16, #tpu.memory_space<vmem>>, vector<1x1x60x256xbf16>
    %11 = vector.shape_cast %10 : vector<1x1x60x256xbf16> to vector<60x256xbf16>
    %cst_14 = arith.constant dense<0.000000e+00> : vector<8x256xf32>
    %12 = tpu.matmul %5, %11, %cst_14 {dimension_numbers = #tpu.dot_dimension_numbers<[1], [0], [0], [1], [0, 0, 1, 1], [], []>} : vector<8x60xbf16>, vector<60x256xbf16>, vector<8x256xf32> -> vector<8x256xf32>
    %13 = arith.addf %1, %12 : vector<8x256xf32>
    %c0_15 = arith.constant 0 : index
    %c1_16 = arith.constant 1 : index
    %c0_17 = arith.constant 0 : index
    %c0_18 = arith.constant 0 : index
    %14 = vector.load %arg1[%c0_15, %c1_16, %c0_17, %c0_18] : memref<1x2x10x60xbf16, #tpu.memory_space<vmem>>, vector<1x1x8x60xbf16>
    %15 = vector.shape_cast %14 : vector<1x1x8x60xbf16> to vector<8x60xbf16>
    %c0_19 = arith.constant 0 : index
    %c1_20 = arith.constant 1 : index
    %c0_21 = arith.constant 0 : index
    %c0_22 = arith.constant 0 : index
    %16 = vector.load %arg2[%c0_19, %c1_20, %c0_21, %c0_22] : memref<2x5x60x256xbf16, #tpu.memory_space<vmem>>, vector<1x1x60x256xbf16>
    %17 = vector.shape_cast %16 : vector<1x1x60x256xbf16> to vector<60x256xbf16>
    %cst_23 = arith.constant dense<0.000000e+00> : vector<8x256xf32>
    %18 = tpu.matmul %15, %17, %cst_23 {dimension_numbers = #tpu.dot_dimension_numbers<[1], [0], [0], [1], [0, 0, 1, 1], [], []>} : vector<8x60xbf16>, vector<60x256xbf16>, vector<8x256xf32> -> vector<8x256xf32>
    %19 = arith.addf %9, %18 : vector<8x256xf32>
    %c1_24 = arith.constant 1 : index
    %c1_25 = arith.constant 1 : index
    %c0_26 = arith.constant 0 : index
    %c0_27 = arith.constant 0 : index
    %20 = vector.load %arg2[%c1_24, %c1_25, %c0_26, %c0_27] : memref<2x5x60x256xbf16, #tpu.memory_space<vmem>>, vector<1x1x60x256xbf16>
    %21 = vector.shape_cast %20 : vector<1x1x60x256xbf16> to vector<60x256xbf16>
    %cst_28 = arith.constant dense<0.000000e+00> : vector<8x256xf32>
    %22 = tpu.matmul %15, %21, %cst_28 {dimension_numbers = #tpu.dot_dimension_numbers<[1], [0], [0], [1], [0, 0, 1, 1], [], []>} : vector<8x60xbf16>, vector<60x256xbf16>, vector<8x256xf32> -> vector<8x256xf32>
    %23 = arith.addf %13, %22 : vector<8x256xf32>
    %c0_29 = arith.constant 0 : index
    %c0_30 = arith.constant 0 : index
    %c1_31 = arith.constant 1 : index
    %c0_32 = arith.constant 0 : index
    %24 = vector.load %arg1[%c0_29, %c0_30, %c1_31, %c0_32] : memref<1x2x10x60xbf16, #tpu.memory_space<vmem>>, vector<1x1x8x60xbf16>
    %25 = vector.shape_cast %24 : vector<1x1x8x60xbf16> to vector<8x60xbf16>
    %c0_33 = arith.constant 0 : index
    %c2 = arith.constant 2 : index
    %c0_34 = arith.constant 0 : index
    %c0_35 = arith.constant 0 : index
    %26 = vector.load %arg2[%c0_33, %c2, %c0_34, %c0_35] : memref<2x5x60x256xbf16, #tpu.memory_space<vmem>>, vector<1x1x60x256xbf16>
    %27 = vector.shape_cast %26 : vector<1x1x60x256xbf16> to vector<60x256xbf16>
    %cst_36 = arith.constant dense<0.000000e+00> : vector<8x256xf32>
    %28 = tpu.matmul %25, %27, %cst_36 {dimension_numbers = #tpu.dot_dimension_numbers<[1], [0], [0], [1], [0, 0, 1, 1], [], []>} : vector<8x60xbf16>, vector<60x256xbf16>, vector<8x256xf32> -> vector<8x256xf32>
    %29 = arith.addf %19, %28 : vector<8x256xf32>
    %c1_37 = arith.constant 1 : index
    %c2_38 = arith.constant 2 : index
    %c0_39 = arith.constant 0 : index
    %c0_40 = arith.constant 0 : index
    %30 = vector.load %arg2[%c1_37, %c2_38, %c0_39, %c0_40] : memref<2x5x60x256xbf16, #tpu.memory_space<vmem>>, vector<1x1x60x256xbf16>
    %31 = vector.shape_cast %30 : vector<1x1x60x256xbf16> to vector<60x256xbf16>
    %cst_41 = arith.constant dense<0.000000e+00> : vector<8x256xf32>
    %32 = tpu.matmul %25, %31, %cst_41 {dimension_numbers = #tpu.dot_dimension_numbers<[1], [0], [0], [1], [0, 0, 1, 1], [], []>} : vector<8x60xbf16>, vector<60x256xbf16>, vector<8x256xf32> -> vector<8x256xf32>
    %33 = arith.addf %23, %32 : vector<8x256xf32>
    %c0_42 = arith.constant 0 : index
    %c1_43 = arith.constant 1 : index
    %c1_44 = arith.constant 1 : index
    %c0_45 = arith.constant 0 : index
    %34 = vector.load %arg1[%c0_42, %c1_43, %c1_44, %c0_45] : memref<1x2x10x60xbf16, #tpu.memory_space<vmem>>, vector<1x1x8x60xbf16>
    %35 = vector.shape_cast %34 : vector<1x1x8x60xbf16> to vector<8x60xbf16>
    %c0_46 = arith.constant 0 : index
    %c3 = arith.constant 3 : index
    %c0_47 = arith.constant 0 : index
    %c0_48 = arith.constant 0 : index
    %36 = vector.load %arg2[%c0_46, %c3, %c0_47, %c0_48] : memref<2x5x60x256xbf16, #tpu.memory_space<vmem>>, vector<1x1x60x256xbf16>
    %37 = vector.shape_cast %36 : vector<1x1x60x256xbf16> to vector<60x256xbf16>
    %cst_49 = arith.constant dense<0.000000e+00> : vector<8x256xf32>
    %38 = tpu.matmul %35, %37, %cst_49 {dimension_numbers = #tpu.dot_dimension_numbers<[1], [0], [0], [1], [0, 0, 1, 1], [], []>} : vector<8x60xbf16>, vector<60x256xbf16>, vector<8x256xf32> -> vector<8x256xf32>
    %39 = arith.addf %29, %38 : vector<8x256xf32>
    %c1_50 = arith.constant 1 : index
    %c3_51 = arith.constant 3 : index
    %c0_52 = arith.constant 0 : index
    %c0_53 = arith.constant 0 : index
    %40 = vector.load %arg2[%c1_50, %c3_51, %c0_52, %c0_53] : memref<2x5x60x256xbf16, #tpu.memory_space<vmem>>, vector<1x1x60x256xbf16>
    %41 = vector.shape_cast %40 : vector<1x1x60x256xbf16> to vector<60x256xbf16>
    %cst_54 = arith.constant dense<0.000000e+00> : vector<8x256xf32>
    %42 = tpu.matmul %35, %41, %cst_54 {dimension_numbers = #tpu.dot_dimension_numbers<[1], [0], [0], [1], [0, 0, 1, 1], [], []>} : vector<8x60xbf16>, vector<60x256xbf16>, vector<8x256xf32> -> vector<8x256xf32>
    %43 = arith.addf %33, %42 : vector<8x256xf32>
    %c0_55 = arith.constant 0 : index
    %c0_56 = arith.constant 0 : index
    %c2_57 = arith.constant 2 : index
    %c0_58 = arith.constant 0 : index
    %44 = vector.load %arg1[%c0_55, %c0_56, %c2_57, %c0_58] : memref<1x2x10x60xbf16, #tpu.memory_space<vmem>>, vector<1x1x8x60xbf16>
    %45 = vector.shape_cast %44 : vector<1x1x8x60xbf16> to vector<8x60xbf16>
    %c0_59 = arith.constant 0 : index
    %c4 = arith.constant 4 : index
    %c0_60 = arith.constant 0 : index
    %c0_61 = arith.constant 0 : index
    %46 = vector.load %arg2[%c0_59, %c4, %c0_60, %c0_61] : memref<2x5x60x256xbf16, #tpu.memory_space<vmem>>, vector<1x1x60x256xbf16>
    %47 = vector.shape_cast %46 : vector<1x1x60x256xbf16> to vector<60x256xbf16>
    %cst_62 = arith.constant dense<0.000000e+00> : vector<8x256xf32>
    %48 = tpu.matmul %45, %47, %cst_62 {dimension_numbers = #tpu.dot_dimension_numbers<[1], [0], [0], [1], [0, 0, 1, 1], [], []>} : vector<8x60xbf16>, vector<60x256xbf16>, vector<8x256xf32> -> vector<8x256xf32>
    %49 = arith.addf %39, %48 : vector<8x256xf32>
    %c1_63 = arith.constant 1 : index
    %c4_64 = arith.constant 4 : index
    %c0_65 = arith.constant 0 : index
    %c0_66 = arith.constant 0 : index
    %50 = vector.load %arg2[%c1_63, %c4_64, %c0_65, %c0_66] : memref<2x5x60x256xbf16, #tpu.memory_space<vmem>>, vector<1x1x60x256xbf16>
    %51 = vector.shape_cast %50 : vector<1x1x60x256xbf16> to vector<60x256xbf16>
    %cst_67 = arith.constant dense<0.000000e+00> : vector<8x256xf32>
    %52 = tpu.matmul %45, %51, %cst_67 {dimension_numbers = #tpu.dot_dimension_numbers<[1], [0], [0], [1], [0, 0, 1, 1], [], []>} : vector<8x60xbf16>, vector<60x256xbf16>, vector<8x256xf32> -> vector<8x256xf32>
    %53 = arith.addf %43, %52 : vector<8x256xf32>
    %c0_68 = arith.constant 0 : index
    %c1_69 = arith.constant 1 : index
    %c0_70 = arith.constant 0 : index
    %c0_71 = arith.constant 0 : index
    %54 = vector.load %arg1[%c0_68, %c1_69, %c0_70, %c0_71] : memref<1x2x10x60xbf16, #tpu.memory_space<vmem>>, vector<1x1x8x60xbf16>
    %55 = vector.shape_cast %54 : vector<1x1x8x60xbf16> to vector<8x60xbf16>
    %c0_72 = arith.constant 0 : index
    %c0_73 = arith.constant 0 : index
    %c0_74 = arith.constant 0 : index
    %c0_75 = arith.constant 0 : index
    %56 = vector.load %arg2[%c0_72, %c0_73, %c0_74, %c0_75] : memref<2x5x60x256xbf16, #tpu.memory_space<vmem>>, vector<1x1x60x256xbf16>
    %57 = vector.shape_cast %56 : vector<1x1x60x256xbf16> to vector<60x256xbf16>
    %cst_76 = arith.constant dense<0.000000e+00> : vector<8x256xf32>
    %58 = tpu.matmul %55, %57, %cst_76 {dimension_numbers = #tpu.dot_dimension_numbers<[1], [0], [0], [1], [0, 0, 1, 1], [], []>} : vector<8x60xbf16>, vector<60x256xbf16>, vector<8x256xf32> -> vector<8x256xf32>
    %59 = arith.addf %2, %58 : vector<8x256xf32>
    %c1_77 = arith.constant 1 : index
    %c0_78 = arith.constant 0 : index
    %c0_79 = arith.constant 0 : index
    %c0_80 = arith.constant 0 : index
    %60 = vector.load %arg2[%c1_77, %c0_78, %c0_79, %c0_80] : memref<2x5x60x256xbf16, #tpu.memory_space<vmem>>, vector<1x1x60x256xbf16>
    %61 = vector.shape_cast %60 : vector<1x1x60x256xbf16> to vector<60x256xbf16>
    %cst_81 = arith.constant dense<0.000000e+00> : vector<8x256xf32>
    %62 = tpu.matmul %55, %61, %cst_81 {dimension_numbers = #tpu.dot_dimension_numbers<[1], [0], [0], [1], [0, 0, 1, 1], [], []>} : vector<8x60xbf16>, vector<60x256xbf16>, vector<8x256xf32> -> vector<8x256xf32>
    %63 = arith.addf %3, %62 : vector<8x256xf32>
    %c0_82 = arith.constant 0 : index
    %c0_83 = arith.constant 0 : index
    %c1_84 = arith.constant 1 : index
    %c0_85 = arith.constant 0 : index
    %64 = vector.load %arg1[%c0_82, %c0_83, %c1_84, %c0_85] : memref<1x2x10x60xbf16, #tpu.memory_space<vmem>>, vector<1x1x8x60xbf16>
    %65 = vector.shape_cast %64 : vector<1x1x8x60xbf16> to vector<8x60xbf16>
    %c0_86 = arith.constant 0 : index
    %c1_87 = arith.constant 1 : index
    %c0_88 = arith.constant 0 : index
    %c0_89 = arith.constant 0 : index
    %66 = vector.load %arg2[%c0_86, %c1_87, %c0_88, %c0_89] : memref<2x5x60x256xbf16, #tpu.memory_space<vmem>>, vector<1x1x60x256xbf16>
    %67 = vector.shape_cast %66 : vector<1x1x60x256xbf16> to vector<60x256xbf16>
    %cst_90 = arith.constant dense<0.000000e+00> : vector<8x256xf32>
    %68 = tpu.matmul %65, %67, %cst_90 {dimension_numbers = #tpu.dot_dimension_numbers<[1], [0], [0], [1], [0, 0, 1, 1], [], []>} : vector<8x60xbf16>, vector<60x256xbf16>, vector<8x256xf32> -> vector<8x256xf32>
    %69 = arith.addf %59, %68 : vector<8x256xf32>
    %c1_91 = arith.constant 1 : index
    %c1_92 = arith.constant 1 : index
    %c0_93 = arith.constant 0 : index
    %c0_94 = arith.constant 0 : index
    %70 = vector.load %arg2[%c1_91, %c1_92, %c0_93, %c0_94] : memref<2x5x60x256xbf16, #tpu.memory_space<vmem>>, vector<1x1x60x256xbf16>
    %71 = vector.shape_cast %70 : vector<1x1x60x256xbf16> to vector<60x256xbf16>
    %cst_95 = arith.constant dense<0.000000e+00> : vector<8x256xf32>
    %72 = tpu.matmul %65, %71, %cst_95 {dimension_numbers = #tpu.dot_dimension_numbers<[1], [0], [0], [1], [0, 0, 1, 1], [], []>} : vector<8x60xbf16>, vector<60x256xbf16>, vector<8x256xf32> -> vector<8x256xf32>
    %73 = arith.addf %63, %72 : vector<8x256xf32>
    %c0_96 = arith.constant 0 : index
    %c1_97 = arith.constant 1 : index
    %c1_98 = arith.constant 1 : index
    %c0_99 = arith.constant 0 : index
    %74 = vector.load %arg1[%c0_96, %c1_97, %c1_98, %c0_99] : memref<1x2x10x60xbf16, #tpu.memory_space<vmem>>, vector<1x1x8x60xbf16>
    %75 = vector.shape_cast %74 : vector<1x1x8x60xbf16> to vector<8x60xbf16>
    %c0_100 = arith.constant 0 : index
    %c2_101 = arith.constant 2 : index
    %c0_102 = arith.constant 0 : index
    %c0_103 = arith.constant 0 : index
    %76 = vector.load %arg2[%c0_100, %c2_101, %c0_102, %c0_103] : memref<2x5x60x256xbf16, #tpu.memory_space<vmem>>, vector<1x1x60x256xbf16>
    %77 = vector.shape_cast %76 : vector<1x1x60x256xbf16> to vector<60x256xbf16>
    %cst_104 = arith.constant dense<0.000000e+00> : vector<8x256xf32>
    %78 = tpu.matmul %75, %77, %cst_104 {dimension_numbers = #tpu.dot_dimension_numbers<[1], [0], [0], [1], [0, 0, 1, 1], [], []>} : vector<8x60xbf16>, vector<60x256xbf16>, vector<8x256xf32> -> vector<8x256xf32>
    %79 = arith.addf %69, %78 : vector<8x256xf32>
    %c1_105 = arith.constant 1 : index
    %c2_106 = arith.constant 2 : index
    %c0_107 = arith.constant 0 : index
    %c0_108 = arith.constant 0 : index
    %80 = vector.load %arg2[%c1_105, %c2_106, %c0_107, %c0_108] : memref<2x5x60x256xbf16, #tpu.memory_space<vmem>>, vector<1x1x60x256xbf16>
    %81 = vector.shape_cast %80 : vector<1x1x60x256xbf16> to vector<60x256xbf16>
    %cst_109 = arith.constant dense<0.000000e+00> : vector<8x256xf32>
    %82 = tpu.matmul %75, %81, %cst_109 {dimension_numbers = #tpu.dot_dimension_numbers<[1], [0], [0], [1], [0, 0, 1, 1], [], []>} : vector<8x60xbf16>, vector<60x256xbf16>, vector<8x256xf32> -> vector<8x256xf32>
    %83 = arith.addf %73, %82 : vector<8x256xf32>
    %c0_110 = arith.constant 0 : index
    %c0_111 = arith.constant 0 : index
    %c2_112 = arith.constant 2 : index
    %c0_113 = arith.constant 0 : index
    %84 = vector.load %arg1[%c0_110, %c0_111, %c2_112, %c0_113] : memref<1x2x10x60xbf16, #tpu.memory_space<vmem>>, vector<1x1x8x60xbf16>
    %85 = vector.shape_cast %84 : vector<1x1x8x60xbf16> to vector<8x60xbf16>
    %c0_114 = arith.constant 0 : index
    %c3_115 = arith.constant 3 : index
    %c0_116 = arith.constant 0 : index
    %c0_117 = arith.constant 0 : index
    %86 = vector.load %arg2[%c0_114, %c3_115, %c0_116, %c0_117] : memref<2x5x60x256xbf16, #tpu.memory_space<vmem>>, vector<1x1x60x256xbf16>
    %87 = vector.shape_cast %86 : vector<1x1x60x256xbf16> to vector<60x256xbf16>
    %cst_118 = arith.constant dense<0.000000e+00> : vector<8x256xf32>
    %88 = tpu.matmul %85, %87, %cst_118 {dimension_numbers = #tpu.dot_dimension_numbers<[1], [0], [0], [1], [0, 0, 1, 1], [], []>} : vector<8x60xbf16>, vector<60x256xbf16>, vector<8x256xf32> -> vector<8x256xf32>
    %89 = arith.addf %79, %88 : vector<8x256xf32>
    %c1_119 = arith.constant 1 : index
    %c3_120 = arith.constant 3 : index
    %c0_121 = arith.constant 0 : index
    %c0_122 = arith.constant 0 : index
    %90 = vector.load %arg2[%c1_119, %c3_120, %c0_121, %c0_122] : memref<2x5x60x256xbf16, #tpu.memory_space<vmem>>, vector<1x1x60x256xbf16>
    %91 = vector.shape_cast %90 : vector<1x1x60x256xbf16> to vector<60x256xbf16>
    %cst_123 = arith.constant dense<0.000000e+00> : vector<8x256xf32>
    %92 = tpu.matmul %85, %91, %cst_123 {dimension_numbers = #tpu.dot_dimension_numbers<[1], [0], [0], [1], [0, 0, 1, 1], [], []>} : vector<8x60xbf16>, vector<60x256xbf16>, vector<8x256xf32> -> vector<8x256xf32>
    %93 = arith.addf %83, %92 : vector<8x256xf32>
    %c0_124 = arith.constant 0 : index
    %c1_125 = arith.constant 1 : index
    %c2_126 = arith.constant 2 : index
    %c0_127 = arith.constant 0 : index
    %94 = vector.load %arg1[%c0_124, %c1_125, %c2_126, %c0_127] : memref<1x2x10x60xbf16, #tpu.memory_space<vmem>>, vector<1x1x8x60xbf16>
    %95 = vector.shape_cast %94 : vector<1x1x8x60xbf16> to vector<8x60xbf16>
    %c0_128 = arith.constant 0 : index
    %c4_129 = arith.constant 4 : index
    %c0_130 = arith.constant 0 : index
    %c0_131 = arith.constant 0 : index
    %96 = vector.load %arg2[%c0_128, %c4_129, %c0_130, %c0_131] : memref<2x5x60x256xbf16, #tpu.memory_space<vmem>>, vector<1x1x60x256xbf16>
    %97 = vector.shape_cast %96 : vector<1x1x60x256xbf16> to vector<60x256xbf16>
    %cst_132 = arith.constant dense<0.000000e+00> : vector<8x256xf32>
    %98 = tpu.matmul %95, %97, %cst_132 {dimension_numbers = #tpu.dot_dimension_numbers<[1], [0], [0], [1], [0, 0, 1, 1], [], []>} : vector<8x60xbf16>, vector<60x256xbf16>, vector<8x256xf32> -> vector<8x256xf32>
    %99 = arith.addf %89, %98 : vector<8x256xf32>
    %c1_133 = arith.constant 1 : index
    %c4_134 = arith.constant 4 : index
    %c0_135 = arith.constant 0 : index
    %c0_136 = arith.constant 0 : index
    %100 = vector.load %arg2[%c1_133, %c4_134, %c0_135, %c0_136] : memref<2x5x60x256xbf16, #tpu.memory_space<vmem>>, vector<1x1x60x256xbf16>
    %101 = vector.shape_cast %100 : vector<1x1x60x256xbf16> to vector<60x256xbf16>
    %cst_137 = arith.constant dense<0.000000e+00> : vector<8x256xf32>
    %102 = tpu.matmul %95, %101, %cst_137 {dimension_numbers = #tpu.dot_dimension_numbers<[1], [0], [0], [1], [0, 0, 1, 1], [], []>} : vector<8x60xbf16>, vector<60x256xbf16>, vector<8x256xf32> -> vector<8x256xf32>
    %103 = arith.addf %93, %102 : vector<8x256xf32>
    %c0_138 = arith.constant 0 : index
    %c0_139 = arith.constant 0 : index
    %104 = vector.load %arg3[%c0_138, %c0_139] : memref<1x256xf32, #tpu.memory_space<vmem>>, vector<1x256xf32>
    %105 = vector.broadcast %104 : vector<1x256xf32> to vector<8x256xf32>
    %106 = arith.addf %49, %105 : vector<8x256xf32>
    %cst_140 = arith.constant 0.000000e+00 : f32
    %107 = vector.broadcast %cst_140 : f32 to vector<8x256xf32>
    %108 = arith.maximumf %106, %107 : vector<8x256xf32>
    %109 = vector.broadcast %104 : vector<1x256xf32> to vector<8x256xf32>
    %110 = arith.addf %53, %109 : vector<8x256xf32>
    %cst_141 = arith.constant 0.000000e+00 : f32
    %111 = vector.broadcast %cst_141 : f32 to vector<8x256xf32>
    %112 = arith.maximumf %110, %111 : vector<8x256xf32>
    %113 = arith.maximumf %108, %112 : vector<8x256xf32>
    %114 = vector.broadcast %104 : vector<1x256xf32> to vector<8x256xf32>
    %115 = arith.addf %99, %114 : vector<8x256xf32>
    %cst_142 = arith.constant 0.000000e+00 : f32
    %116 = vector.broadcast %cst_142 : f32 to vector<8x256xf32>
    %117 = arith.maximumf %115, %116 : vector<8x256xf32>
    %118 = arith.maximumf %113, %117 : vector<8x256xf32>
    %119 = vector.broadcast %104 : vector<1x256xf32> to vector<8x256xf32>
    %120 = arith.addf %103, %119 : vector<8x256xf32>
    %cst_143 = arith.constant 0.000000e+00 : f32
    %121 = vector.broadcast %cst_143 : f32 to vector<8x256xf32>
    %122 = arith.maximumf %120, %121 : vector<8x256xf32>
    %123 = arith.maximumf %118, %122 : vector<8x256xf32>
    %124 = vector.shape_cast %123 : vector<8x256xf32> to vector<1x8x256xf32>
    %125 = arith.truncf %124 : vector<1x8x256xf32> to vector<1x8x256xbf16>
    %c0_144 = arith.constant 0 : index
    %c0_145 = arith.constant 0 : index
    %c0_146 = arith.constant 0 : index
    %126 = vector.load %arg4[%c0_144, %c0_145, %c0_146] : memref<1x8x256xbf16, #tpu.memory_space<vmem>>, vector<1x8x256xbf16>
    tpu.vector_store %arg4[%c0_144, %c0_145, %c0_146], %125 {strides = array<i32>} : memref<1x8x256xbf16, #tpu.memory_space<vmem>>, vector<1x8x256xbf16>,
    return
  }
  func.func @transform_0(%arg0: i32) -> (i32, i32, i32, i32) {
    %c0_i32 = arith.constant 0 : i32
    %c0_i32_0 = arith.constant 0 : i32
    %c0_i32_1 = arith.constant 0 : i32
    %c0_i32_2 = arith.constant 0 : i32
    return %arg0, %c0_i32, %c0_i32_0, %c0_i32_1 : i32, i32, i32, i32
  }
  func.func @transform_1(%arg0: i32) -> (i32, i32, i32, i32) {
    %c0_i32 = arith.constant 0 : i32
    %c0_i32_0 = arith.constant 0 : i32
    %c0_i32_1 = arith.constant 0 : i32
    %c0_i32_2 = arith.constant 0 : i32
    %c0_i32_3 = arith.constant 0 : i32
    return %c0_i32, %c0_i32_0, %c0_i32_1, %c0_i32_2 : i32, i32, i32, i32
  }
  func.func @transform_2(%arg0: i32) -> (i32, i32) {
    %c0_i32 = arith.constant 0 : i32
    %c0_i32_0 = arith.constant 0 : i32
    %c0_i32_1 = arith.constant 0 : i32
    return %c0_i32, %c0_i32_0 : i32, i32
  }
  func.func @transform_3(%arg0: i32) -> (i32, i32, i32) {
    %c0_i32 = arith.constant 0 : i32
    %c0_i32_0 = arith.constant 0 : i32
    %c0_i32_1 = arith.constant 0 : i32
    return %arg0, %c0_i32, %c0_i32_0 : i32, i32, i32
  }
}

module attributes {stable_mosaic.version = 11 : i64} {
  func.func @_conv5_relu_pool_kernel(%arg0: i32, %arg1: memref<1x2x6x384xbf16, #tpu.memory_space<vmem>>, %arg2: memref<2x5x384x256xbf16, #tpu.memory_space<vmem>>, %arg3: memref<1x256xf32, #tpu.memory_space<vmem>>, %arg4: memref<1x4x256xbf16, #tpu.memory_space<vmem>>) attributes {dimension_semantics = [#tpu.dimension_semantics<parallel>], iteration_bounds = array<i64: 2>, scalar_prefetch = 0 : i64, scratch_operands = 0 : i64, tpu.core_type = #tpu.core_type<tc>, window_params = [{transform_indices = @transform_0, window_bounds = array<i64: 1, 2, 6, 384>}, {pipeline_mode = #tpu.pipeline_mode<synchronous>, transform_indices = @transform_1, window_bounds = array<i64: 2, 5, 384, 256>}, {pipeline_mode = #tpu.pipeline_mode<synchronous>, transform_indices = @transform_2, window_bounds = array<i64: 1, 256>}, {transform_indices = @transform_3, window_bounds = array<i64: 1, 4, 256>}]} {
    %cst = arith.constant 0.000000e+00 : f32
    %0 = vector.broadcast %cst : f32 to vector<4x256xf32>
    %cst_0 = arith.constant 0.000000e+00 : f32
    %1 = vector.broadcast %cst_0 : f32 to vector<4x256xf32>
    %cst_1 = arith.constant 0.000000e+00 : f32
    %2 = vector.broadcast %cst_1 : f32 to vector<4x256xf32>
    %cst_2 = arith.constant 0.000000e+00 : f32
    %3 = vector.broadcast %cst_2 : f32 to vector<4x256xf32>
    %c0 = arith.constant 0 : index
    %c0_3 = arith.constant 0 : index
    %c0_4 = arith.constant 0 : index
    %c0_5 = arith.constant 0 : index
    %4 = vector.load %arg1[%c0, %c0_3, %c0_4, %c0_5] : memref<1x2x6x384xbf16, #tpu.memory_space<vmem>>, vector<1x1x4x384xbf16>
    %5 = vector.shape_cast %4 : vector<1x1x4x384xbf16> to vector<4x384xbf16>
    %c0_6 = arith.constant 0 : index
    %c0_7 = arith.constant 0 : index
    %c0_8 = arith.constant 0 : index
    %c0_9 = arith.constant 0 : index
    %6 = vector.load %arg2[%c0_6, %c0_7, %c0_8, %c0_9] : memref<2x5x384x256xbf16, #tpu.memory_space<vmem>>, vector<1x1x384x256xbf16>
    %7 = vector.shape_cast %6 : vector<1x1x384x256xbf16> to vector<384x256xbf16>
    %cst_10 = arith.constant dense<0.000000e+00> : vector<4x256xf32>
    %8 = tpu.matmul %5, %7, %cst_10 {dimension_numbers = #tpu.dot_dimension_numbers<[1], [0], [0], [1], [0, 0, 1, 1], [], []>} : vector<4x384xbf16>, vector<384x256xbf16>, vector<4x256xf32> -> vector<4x256xf32>
    %9 = arith.addf %0, %8 : vector<4x256xf32>
    %c1 = arith.constant 1 : index
    %c0_11 = arith.constant 0 : index
    %c0_12 = arith.constant 0 : index
    %c0_13 = arith.constant 0 : index
    %10 = vector.load %arg2[%c1, %c0_11, %c0_12, %c0_13] : memref<2x5x384x256xbf16, #tpu.memory_space<vmem>>, vector<1x1x384x256xbf16>
    %11 = vector.shape_cast %10 : vector<1x1x384x256xbf16> to vector<384x256xbf16>
    %cst_14 = arith.constant dense<0.000000e+00> : vector<4x256xf32>
    %12 = tpu.matmul %5, %11, %cst_14 {dimension_numbers = #tpu.dot_dimension_numbers<[1], [0], [0], [1], [0, 0, 1, 1], [], []>} : vector<4x384xbf16>, vector<384x256xbf16>, vector<4x256xf32> -> vector<4x256xf32>
    %13 = arith.addf %1, %12 : vector<4x256xf32>
    %c0_15 = arith.constant 0 : index
    %c1_16 = arith.constant 1 : index
    %c0_17 = arith.constant 0 : index
    %c0_18 = arith.constant 0 : index
    %14 = vector.load %arg1[%c0_15, %c1_16, %c0_17, %c0_18] : memref<1x2x6x384xbf16, #tpu.memory_space<vmem>>, vector<1x1x4x384xbf16>
    %15 = vector.shape_cast %14 : vector<1x1x4x384xbf16> to vector<4x384xbf16>
    %c0_19 = arith.constant 0 : index
    %c1_20 = arith.constant 1 : index
    %c0_21 = arith.constant 0 : index
    %c0_22 = arith.constant 0 : index
    %16 = vector.load %arg2[%c0_19, %c1_20, %c0_21, %c0_22] : memref<2x5x384x256xbf16, #tpu.memory_space<vmem>>, vector<1x1x384x256xbf16>
    %17 = vector.shape_cast %16 : vector<1x1x384x256xbf16> to vector<384x256xbf16>
    %cst_23 = arith.constant dense<0.000000e+00> : vector<4x256xf32>
    %18 = tpu.matmul %15, %17, %cst_23 {dimension_numbers = #tpu.dot_dimension_numbers<[1], [0], [0], [1], [0, 0, 1, 1], [], []>} : vector<4x384xbf16>, vector<384x256xbf16>, vector<4x256xf32> -> vector<4x256xf32>
    %19 = arith.addf %9, %18 : vector<4x256xf32>
    %c1_24 = arith.constant 1 : index
    %c1_25 = arith.constant 1 : index
    %c0_26 = arith.constant 0 : index
    %c0_27 = arith.constant 0 : index
    %20 = vector.load %arg2[%c1_24, %c1_25, %c0_26, %c0_27] : memref<2x5x384x256xbf16, #tpu.memory_space<vmem>>, vector<1x1x384x256xbf16>
    %21 = vector.shape_cast %20 : vector<1x1x384x256xbf16> to vector<384x256xbf16>
    %cst_28 = arith.constant dense<0.000000e+00> : vector<4x256xf32>
    %22 = tpu.matmul %15, %21, %cst_28 {dimension_numbers = #tpu.dot_dimension_numbers<[1], [0], [0], [1], [0, 0, 1, 1], [], []>} : vector<4x384xbf16>, vector<384x256xbf16>, vector<4x256xf32> -> vector<4x256xf32>
    %23 = arith.addf %13, %22 : vector<4x256xf32>
    %c0_29 = arith.constant 0 : index
    %c0_30 = arith.constant 0 : index
    %c1_31 = arith.constant 1 : index
    %c0_32 = arith.constant 0 : index
    %24 = vector.load %arg1[%c0_29, %c0_30, %c1_31, %c0_32] : memref<1x2x6x384xbf16, #tpu.memory_space<vmem>>, vector<1x1x4x384xbf16>
    %25 = vector.shape_cast %24 : vector<1x1x4x384xbf16> to vector<4x384xbf16>
    %c0_33 = arith.constant 0 : index
    %c2 = arith.constant 2 : index
    %c0_34 = arith.constant 0 : index
    %c0_35 = arith.constant 0 : index
    %26 = vector.load %arg2[%c0_33, %c2, %c0_34, %c0_35] : memref<2x5x384x256xbf16, #tpu.memory_space<vmem>>, vector<1x1x384x256xbf16>
    %27 = vector.shape_cast %26 : vector<1x1x384x256xbf16> to vector<384x256xbf16>
    %cst_36 = arith.constant dense<0.000000e+00> : vector<4x256xf32>
    %28 = tpu.matmul %25, %27, %cst_36 {dimension_numbers = #tpu.dot_dimension_numbers<[1], [0], [0], [1], [0, 0, 1, 1], [], []>} : vector<4x384xbf16>, vector<384x256xbf16>, vector<4x256xf32> -> vector<4x256xf32>
    %29 = arith.addf %19, %28 : vector<4x256xf32>
    %c1_37 = arith.constant 1 : index
    %c2_38 = arith.constant 2 : index
    %c0_39 = arith.constant 0 : index
    %c0_40 = arith.constant 0 : index
    %30 = vector.load %arg2[%c1_37, %c2_38, %c0_39, %c0_40] : memref<2x5x384x256xbf16, #tpu.memory_space<vmem>>, vector<1x1x384x256xbf16>
    %31 = vector.shape_cast %30 : vector<1x1x384x256xbf16> to vector<384x256xbf16>
    %cst_41 = arith.constant dense<0.000000e+00> : vector<4x256xf32>
    %32 = tpu.matmul %25, %31, %cst_41 {dimension_numbers = #tpu.dot_dimension_numbers<[1], [0], [0], [1], [0, 0, 1, 1], [], []>} : vector<4x384xbf16>, vector<384x256xbf16>, vector<4x256xf32> -> vector<4x256xf32>
    %33 = arith.addf %23, %32 : vector<4x256xf32>
    %c0_42 = arith.constant 0 : index
    %c1_43 = arith.constant 1 : index
    %c1_44 = arith.constant 1 : index
    %c0_45 = arith.constant 0 : index
    %34 = vector.load %arg1[%c0_42, %c1_43, %c1_44, %c0_45] : memref<1x2x6x384xbf16, #tpu.memory_space<vmem>>, vector<1x1x4x384xbf16>
    %35 = vector.shape_cast %34 : vector<1x1x4x384xbf16> to vector<4x384xbf16>
    %c0_46 = arith.constant 0 : index
    %c3 = arith.constant 3 : index
    %c0_47 = arith.constant 0 : index
    %c0_48 = arith.constant 0 : index
    %36 = vector.load %arg2[%c0_46, %c3, %c0_47, %c0_48] : memref<2x5x384x256xbf16, #tpu.memory_space<vmem>>, vector<1x1x384x256xbf16>
    %37 = vector.shape_cast %36 : vector<1x1x384x256xbf16> to vector<384x256xbf16>
    %cst_49 = arith.constant dense<0.000000e+00> : vector<4x256xf32>
    %38 = tpu.matmul %35, %37, %cst_49 {dimension_numbers = #tpu.dot_dimension_numbers<[1], [0], [0], [1], [0, 0, 1, 1], [], []>} : vector<4x384xbf16>, vector<384x256xbf16>, vector<4x256xf32> -> vector<4x256xf32>
    %39 = arith.addf %29, %38 : vector<4x256xf32>
    %c1_50 = arith.constant 1 : index
    %c3_51 = arith.constant 3 : index
    %c0_52 = arith.constant 0 : index
    %c0_53 = arith.constant 0 : index
    %40 = vector.load %arg2[%c1_50, %c3_51, %c0_52, %c0_53] : memref<2x5x384x256xbf16, #tpu.memory_space<vmem>>, vector<1x1x384x256xbf16>
    %41 = vector.shape_cast %40 : vector<1x1x384x256xbf16> to vector<384x256xbf16>
    %cst_54 = arith.constant dense<0.000000e+00> : vector<4x256xf32>
    %42 = tpu.matmul %35, %41, %cst_54 {dimension_numbers = #tpu.dot_dimension_numbers<[1], [0], [0], [1], [0, 0, 1, 1], [], []>} : vector<4x384xbf16>, vector<384x256xbf16>, vector<4x256xf32> -> vector<4x256xf32>
    %43 = arith.addf %33, %42 : vector<4x256xf32>
    %c0_55 = arith.constant 0 : index
    %c0_56 = arith.constant 0 : index
    %c2_57 = arith.constant 2 : index
    %c0_58 = arith.constant 0 : index
    %44 = vector.load %arg1[%c0_55, %c0_56, %c2_57, %c0_58] : memref<1x2x6x384xbf16, #tpu.memory_space<vmem>>, vector<1x1x4x384xbf16>
    %45 = vector.shape_cast %44 : vector<1x1x4x384xbf16> to vector<4x384xbf16>
    %c0_59 = arith.constant 0 : index
    %c4 = arith.constant 4 : index
    %c0_60 = arith.constant 0 : index
    %c0_61 = arith.constant 0 : index
    %46 = vector.load %arg2[%c0_59, %c4, %c0_60, %c0_61] : memref<2x5x384x256xbf16, #tpu.memory_space<vmem>>, vector<1x1x384x256xbf16>
    %47 = vector.shape_cast %46 : vector<1x1x384x256xbf16> to vector<384x256xbf16>
    %cst_62 = arith.constant dense<0.000000e+00> : vector<4x256xf32>
    %48 = tpu.matmul %45, %47, %cst_62 {dimension_numbers = #tpu.dot_dimension_numbers<[1], [0], [0], [1], [0, 0, 1, 1], [], []>} : vector<4x384xbf16>, vector<384x256xbf16>, vector<4x256xf32> -> vector<4x256xf32>
    %49 = arith.addf %39, %48 : vector<4x256xf32>
    %c1_63 = arith.constant 1 : index
    %c4_64 = arith.constant 4 : index
    %c0_65 = arith.constant 0 : index
    %c0_66 = arith.constant 0 : index
    %50 = vector.load %arg2[%c1_63, %c4_64, %c0_65, %c0_66] : memref<2x5x384x256xbf16, #tpu.memory_space<vmem>>, vector<1x1x384x256xbf16>
    %51 = vector.shape_cast %50 : vector<1x1x384x256xbf16> to vector<384x256xbf16>
    %cst_67 = arith.constant dense<0.000000e+00> : vector<4x256xf32>
    %52 = tpu.matmul %45, %51, %cst_67 {dimension_numbers = #tpu.dot_dimension_numbers<[1], [0], [0], [1], [0, 0, 1, 1], [], []>} : vector<4x384xbf16>, vector<384x256xbf16>, vector<4x256xf32> -> vector<4x256xf32>
    %53 = arith.addf %43, %52 : vector<4x256xf32>
    %c0_68 = arith.constant 0 : index
    %c1_69 = arith.constant 1 : index
    %c0_70 = arith.constant 0 : index
    %c0_71 = arith.constant 0 : index
    %54 = vector.load %arg1[%c0_68, %c1_69, %c0_70, %c0_71] : memref<1x2x6x384xbf16, #tpu.memory_space<vmem>>, vector<1x1x4x384xbf16>
    %55 = vector.shape_cast %54 : vector<1x1x4x384xbf16> to vector<4x384xbf16>
    %c0_72 = arith.constant 0 : index
    %c0_73 = arith.constant 0 : index
    %c0_74 = arith.constant 0 : index
    %c0_75 = arith.constant 0 : index
    %56 = vector.load %arg2[%c0_72, %c0_73, %c0_74, %c0_75] : memref<2x5x384x256xbf16, #tpu.memory_space<vmem>>, vector<1x1x384x256xbf16>
    %57 = vector.shape_cast %56 : vector<1x1x384x256xbf16> to vector<384x256xbf16>
    %cst_76 = arith.constant dense<0.000000e+00> : vector<4x256xf32>
    %58 = tpu.matmul %55, %57, %cst_76 {dimension_numbers = #tpu.dot_dimension_numbers<[1], [0], [0], [1], [0, 0, 1, 1], [], []>} : vector<4x384xbf16>, vector<384x256xbf16>, vector<4x256xf32> -> vector<4x256xf32>
    %59 = arith.addf %2, %58 : vector<4x256xf32>
    %c1_77 = arith.constant 1 : index
    %c0_78 = arith.constant 0 : index
    %c0_79 = arith.constant 0 : index
    %c0_80 = arith.constant 0 : index
    %60 = vector.load %arg2[%c1_77, %c0_78, %c0_79, %c0_80] : memref<2x5x384x256xbf16, #tpu.memory_space<vmem>>, vector<1x1x384x256xbf16>
    %61 = vector.shape_cast %60 : vector<1x1x384x256xbf16> to vector<384x256xbf16>
    %cst_81 = arith.constant dense<0.000000e+00> : vector<4x256xf32>
    %62 = tpu.matmul %55, %61, %cst_81 {dimension_numbers = #tpu.dot_dimension_numbers<[1], [0], [0], [1], [0, 0, 1, 1], [], []>} : vector<4x384xbf16>, vector<384x256xbf16>, vector<4x256xf32> -> vector<4x256xf32>
    %63 = arith.addf %3, %62 : vector<4x256xf32>
    %c0_82 = arith.constant 0 : index
    %c0_83 = arith.constant 0 : index
    %c1_84 = arith.constant 1 : index
    %c0_85 = arith.constant 0 : index
    %64 = vector.load %arg1[%c0_82, %c0_83, %c1_84, %c0_85] : memref<1x2x6x384xbf16, #tpu.memory_space<vmem>>, vector<1x1x4x384xbf16>
    %65 = vector.shape_cast %64 : vector<1x1x4x384xbf16> to vector<4x384xbf16>
    %c0_86 = arith.constant 0 : index
    %c1_87 = arith.constant 1 : index
    %c0_88 = arith.constant 0 : index
    %c0_89 = arith.constant 0 : index
    %66 = vector.load %arg2[%c0_86, %c1_87, %c0_88, %c0_89] : memref<2x5x384x256xbf16, #tpu.memory_space<vmem>>, vector<1x1x384x256xbf16>
    %67 = vector.shape_cast %66 : vector<1x1x384x256xbf16> to vector<384x256xbf16>
    %cst_90 = arith.constant dense<0.000000e+00> : vector<4x256xf32>
    %68 = tpu.matmul %65, %67, %cst_90 {dimension_numbers = #tpu.dot_dimension_numbers<[1], [0], [0], [1], [0, 0, 1, 1], [], []>} : vector<4x384xbf16>, vector<384x256xbf16>, vector<4x256xf32> -> vector<4x256xf32>
    %69 = arith.addf %59, %68 : vector<4x256xf32>
    %c1_91 = arith.constant 1 : index
    %c1_92 = arith.constant 1 : index
    %c0_93 = arith.constant 0 : index
    %c0_94 = arith.constant 0 : index
    %70 = vector.load %arg2[%c1_91, %c1_92, %c0_93, %c0_94] : memref<2x5x384x256xbf16, #tpu.memory_space<vmem>>, vector<1x1x384x256xbf16>
    %71 = vector.shape_cast %70 : vector<1x1x384x256xbf16> to vector<384x256xbf16>
    %cst_95 = arith.constant dense<0.000000e+00> : vector<4x256xf32>
    %72 = tpu.matmul %65, %71, %cst_95 {dimension_numbers = #tpu.dot_dimension_numbers<[1], [0], [0], [1], [0, 0, 1, 1], [], []>} : vector<4x384xbf16>, vector<384x256xbf16>, vector<4x256xf32> -> vector<4x256xf32>
    %73 = arith.addf %63, %72 : vector<4x256xf32>
    %c0_96 = arith.constant 0 : index
    %c1_97 = arith.constant 1 : index
    %c1_98 = arith.constant 1 : index
    %c0_99 = arith.constant 0 : index
    %74 = vector.load %arg1[%c0_96, %c1_97, %c1_98, %c0_99] : memref<1x2x6x384xbf16, #tpu.memory_space<vmem>>, vector<1x1x4x384xbf16>
    %75 = vector.shape_cast %74 : vector<1x1x4x384xbf16> to vector<4x384xbf16>
    %c0_100 = arith.constant 0 : index
    %c2_101 = arith.constant 2 : index
    %c0_102 = arith.constant 0 : index
    %c0_103 = arith.constant 0 : index
    %76 = vector.load %arg2[%c0_100, %c2_101, %c0_102, %c0_103] : memref<2x5x384x256xbf16, #tpu.memory_space<vmem>>, vector<1x1x384x256xbf16>
    %77 = vector.shape_cast %76 : vector<1x1x384x256xbf16> to vector<384x256xbf16>
    %cst_104 = arith.constant dense<0.000000e+00> : vector<4x256xf32>
    %78 = tpu.matmul %75, %77, %cst_104 {dimension_numbers = #tpu.dot_dimension_numbers<[1], [0], [0], [1], [0, 0, 1, 1], [], []>} : vector<4x384xbf16>, vector<384x256xbf16>, vector<4x256xf32> -> vector<4x256xf32>
    %79 = arith.addf %69, %78 : vector<4x256xf32>
    %c1_105 = arith.constant 1 : index
    %c2_106 = arith.constant 2 : index
    %c0_107 = arith.constant 0 : index
    %c0_108 = arith.constant 0 : index
    %80 = vector.load %arg2[%c1_105, %c2_106, %c0_107, %c0_108] : memref<2x5x384x256xbf16, #tpu.memory_space<vmem>>, vector<1x1x384x256xbf16>
    %81 = vector.shape_cast %80 : vector<1x1x384x256xbf16> to vector<384x256xbf16>
    %cst_109 = arith.constant dense<0.000000e+00> : vector<4x256xf32>
    %82 = tpu.matmul %75, %81, %cst_109 {dimension_numbers = #tpu.dot_dimension_numbers<[1], [0], [0], [1], [0, 0, 1, 1], [], []>} : vector<4x384xbf16>, vector<384x256xbf16>, vector<4x256xf32> -> vector<4x256xf32>
    %83 = arith.addf %73, %82 : vector<4x256xf32>
    %c0_110 = arith.constant 0 : index
    %c0_111 = arith.constant 0 : index
    %c2_112 = arith.constant 2 : index
    %c0_113 = arith.constant 0 : index
    %84 = vector.load %arg1[%c0_110, %c0_111, %c2_112, %c0_113] : memref<1x2x6x384xbf16, #tpu.memory_space<vmem>>, vector<1x1x4x384xbf16>
    %85 = vector.shape_cast %84 : vector<1x1x4x384xbf16> to vector<4x384xbf16>
    %c0_114 = arith.constant 0 : index
    %c3_115 = arith.constant 3 : index
    %c0_116 = arith.constant 0 : index
    %c0_117 = arith.constant 0 : index
    %86 = vector.load %arg2[%c0_114, %c3_115, %c0_116, %c0_117] : memref<2x5x384x256xbf16, #tpu.memory_space<vmem>>, vector<1x1x384x256xbf16>
    %87 = vector.shape_cast %86 : vector<1x1x384x256xbf16> to vector<384x256xbf16>
    %cst_118 = arith.constant dense<0.000000e+00> : vector<4x256xf32>
    %88 = tpu.matmul %85, %87, %cst_118 {dimension_numbers = #tpu.dot_dimension_numbers<[1], [0], [0], [1], [0, 0, 1, 1], [], []>} : vector<4x384xbf16>, vector<384x256xbf16>, vector<4x256xf32> -> vector<4x256xf32>
    %89 = arith.addf %79, %88 : vector<4x256xf32>
    %c1_119 = arith.constant 1 : index
    %c3_120 = arith.constant 3 : index
    %c0_121 = arith.constant 0 : index
    %c0_122 = arith.constant 0 : index
    %90 = vector.load %arg2[%c1_119, %c3_120, %c0_121, %c0_122] : memref<2x5x384x256xbf16, #tpu.memory_space<vmem>>, vector<1x1x384x256xbf16>
    %91 = vector.shape_cast %90 : vector<1x1x384x256xbf16> to vector<384x256xbf16>
    %cst_123 = arith.constant dense<0.000000e+00> : vector<4x256xf32>
    %92 = tpu.matmul %85, %91, %cst_123 {dimension_numbers = #tpu.dot_dimension_numbers<[1], [0], [0], [1], [0, 0, 1, 1], [], []>} : vector<4x384xbf16>, vector<384x256xbf16>, vector<4x256xf32> -> vector<4x256xf32>
    %93 = arith.addf %83, %92 : vector<4x256xf32>
    %c0_124 = arith.constant 0 : index
    %c1_125 = arith.constant 1 : index
    %c2_126 = arith.constant 2 : index
    %c0_127 = arith.constant 0 : index
    %94 = vector.load %arg1[%c0_124, %c1_125, %c2_126, %c0_127] : memref<1x2x6x384xbf16, #tpu.memory_space<vmem>>, vector<1x1x4x384xbf16>
    %95 = vector.shape_cast %94 : vector<1x1x4x384xbf16> to vector<4x384xbf16>
    %c0_128 = arith.constant 0 : index
    %c4_129 = arith.constant 4 : index
    %c0_130 = arith.constant 0 : index
    %c0_131 = arith.constant 0 : index
    %96 = vector.load %arg2[%c0_128, %c4_129, %c0_130, %c0_131] : memref<2x5x384x256xbf16, #tpu.memory_space<vmem>>, vector<1x1x384x256xbf16>
    %97 = vector.shape_cast %96 : vector<1x1x384x256xbf16> to vector<384x256xbf16>
    %cst_132 = arith.constant dense<0.000000e+00> : vector<4x256xf32>
    %98 = tpu.matmul %95, %97, %cst_132 {dimension_numbers = #tpu.dot_dimension_numbers<[1], [0], [0], [1], [0, 0, 1, 1], [], []>} : vector<4x384xbf16>, vector<384x256xbf16>, vector<4x256xf32> -> vector<4x256xf32>
    %99 = arith.addf %89, %98 : vector<4x256xf32>
    %c1_133 = arith.constant 1 : index
    %c4_134 = arith.constant 4 : index
    %c0_135 = arith.constant 0 : index
    %c0_136 = arith.constant 0 : index
    %100 = vector.load %arg2[%c1_133, %c4_134, %c0_135, %c0_136] : memref<2x5x384x256xbf16, #tpu.memory_space<vmem>>, vector<1x1x384x256xbf16>
    %101 = vector.shape_cast %100 : vector<1x1x384x256xbf16> to vector<384x256xbf16>
    %cst_137 = arith.constant dense<0.000000e+00> : vector<4x256xf32>
    %102 = tpu.matmul %95, %101, %cst_137 {dimension_numbers = #tpu.dot_dimension_numbers<[1], [0], [0], [1], [0, 0, 1, 1], [], []>} : vector<4x384xbf16>, vector<384x256xbf16>, vector<4x256xf32> -> vector<4x256xf32>
    %103 = arith.addf %93, %102 : vector<4x256xf32>
    %c0_138 = arith.constant 0 : index
    %c0_139 = arith.constant 0 : index
    %104 = vector.load %arg3[%c0_138, %c0_139] : memref<1x256xf32, #tpu.memory_space<vmem>>, vector<1x256xf32>
    %105 = vector.broadcast %104 : vector<1x256xf32> to vector<4x256xf32>
    %106 = arith.addf %49, %105 : vector<4x256xf32>
    %cst_140 = arith.constant 0.000000e+00 : f32
    %107 = vector.broadcast %cst_140 : f32 to vector<4x256xf32>
    %108 = arith.maximumf %106, %107 : vector<4x256xf32>
    %109 = vector.broadcast %104 : vector<1x256xf32> to vector<4x256xf32>
    %110 = arith.addf %53, %109 : vector<4x256xf32>
    %cst_141 = arith.constant 0.000000e+00 : f32
    %111 = vector.broadcast %cst_141 : f32 to vector<4x256xf32>
    %112 = arith.maximumf %110, %111 : vector<4x256xf32>
    %113 = arith.maximumf %108, %112 : vector<4x256xf32>
    %114 = vector.broadcast %104 : vector<1x256xf32> to vector<4x256xf32>
    %115 = arith.addf %99, %114 : vector<4x256xf32>
    %cst_142 = arith.constant 0.000000e+00 : f32
    %116 = vector.broadcast %cst_142 : f32 to vector<4x256xf32>
    %117 = arith.maximumf %115, %116 : vector<4x256xf32>
    %118 = arith.maximumf %113, %117 : vector<4x256xf32>
    %119 = vector.broadcast %104 : vector<1x256xf32> to vector<4x256xf32>
    %120 = arith.addf %103, %119 : vector<4x256xf32>
    %cst_143 = arith.constant 0.000000e+00 : f32
    %121 = vector.broadcast %cst_143 : f32 to vector<4x256xf32>
    %122 = arith.maximumf %120, %121 : vector<4x256xf32>
    %123 = arith.maximumf %118, %122 : vector<4x256xf32>
    %124 = vector.shape_cast %123 : vector<4x256xf32> to vector<1x4x256xf32>
    %125 = arith.truncf %124 : vector<1x4x256xf32> to vector<1x4x256xbf16>
    %c0_144 = arith.constant 0 : index
    %c0_145 = arith.constant 0 : index
    %c0_146 = arith.constant 0 : index
    %126 = vector.load %arg4[%c0_144, %c0_145, %c0_146] : memref<1x4x256xbf16, #tpu.memory_space<vmem>>, vector<1x4x256xbf16>
    tpu.vector_store %arg4[%c0_144, %c0_145, %c0_146], %125 {strides = array<i32>} : memref<1x4x256xbf16, #tpu.memory_space<vmem>>, vector<1x4x256xbf16>,
    return
  }
  func.func @transform_0(%arg0: i32) -> (i32, i32, i32, i32) {
    %c0_i32 = arith.constant 0 : i32
    %c0_i32_0 = arith.constant 0 : i32
    %c0_i32_1 = arith.constant 0 : i32
    %c0_i32_2 = arith.constant 0 : i32
    return %arg0, %c0_i32, %c0_i32_0, %c0_i32_1 : i32, i32, i32, i32
  }
  func.func @transform_1(%arg0: i32) -> (i32, i32, i32, i32) {
    %c0_i32 = arith.constant 0 : i32
    %c0_i32_0 = arith.constant 0 : i32
    %c0_i32_1 = arith.constant 0 : i32
    %c0_i32_2 = arith.constant 0 : i32
    %c0_i32_3 = arith.constant 0 : i32
    return %c0_i32, %c0_i32_0, %c0_i32_1, %c0_i32_2 : i32, i32, i32, i32
  }
  func.func @transform_2(%arg0: i32) -> (i32, i32) {
    %c0_i32 = arith.constant 0 : i32
    %c0_i32_0 = arith.constant 0 : i32
    %c0_i32_1 = arith.constant 0 : i32
    return %c0_i32, %c0_i32_0 : i32, i32
  }
  func.func @transform_3(%arg0: i32) -> (i32, i32, i32) {
    %c0_i32 = arith.constant 0 : i32
    %c0_i32_0 = arith.constant 0 : i32
    %c0_i32_1 = arith.constant 0 : i32
    return %arg0, %c0_i32, %c0_i32_0 : i32, i32, i32
  }
}

module attributes {stable_mosaic.version = 11 : i64} {
  func.func @_mlp_kernel(%arg0: i32, %arg1: memref<2x1024xbf16, #tpu.memory_space<vmem>>, %arg2: memref<1024x512xbf16, #tpu.memory_space<vmem>>, %arg3: memref<1x512xf32, #tpu.memory_space<vmem>>, %arg4: memref<512x256xbf16, #tpu.memory_space<vmem>>, %arg5: memref<1x256xf32, #tpu.memory_space<vmem>>, %arg6: memref<256x4xbf16, #tpu.memory_space<vmem>>, %arg7: memref<1x4xf32, #tpu.memory_space<vmem>>, %arg8: memref<2x4xf32, #tpu.memory_space<vmem>>) attributes {dimension_semantics = [#tpu.dimension_semantics<parallel>], iteration_bounds = array<i64: 1>, scalar_prefetch = 0 : i64, scratch_operands = 0 : i64, tpu.core_type = #tpu.core_type<tc>, window_params = [{transform_indices = @transform_0, window_bounds = array<i64: 2, 1024>}, {pipeline_mode = #tpu.pipeline_mode<synchronous>, transform_indices = @transform_1, window_bounds = array<i64: 1024, 512>}, {pipeline_mode = #tpu.pipeline_mode<synchronous>, transform_indices = @transform_2, window_bounds = array<i64: 1, 512>}, {pipeline_mode = #tpu.pipeline_mode<synchronous>, transform_indices = @transform_3, window_bounds = array<i64: 512, 256>}, {pipeline_mode = #tpu.pipeline_mode<synchronous>, transform_indices = @transform_4, window_bounds = array<i64: 1, 256>}, {pipeline_mode = #tpu.pipeline_mode<synchronous>, transform_indices = @transform_5, window_bounds = array<i64: 256, 4>}, {pipeline_mode = #tpu.pipeline_mode<synchronous>, transform_indices = @transform_6, window_bounds = array<i64: 1, 4>}, {transform_indices = @transform_7, window_bounds = array<i64: 2, 4>}]} {
    %c0 = arith.constant 0 : index
    %c0_0 = arith.constant 0 : index
    %0 = vector.load %arg1[%c0, %c0_0] : memref<2x1024xbf16, #tpu.memory_space<vmem>>, vector<2x1024xbf16>
    %c0_1 = arith.constant 0 : index
    %c0_2 = arith.constant 0 : index
    %1 = vector.load %arg2[%c0_1, %c0_2] : memref<1024x512xbf16, #tpu.memory_space<vmem>>, vector<1024x512xbf16>
    %cst = arith.constant dense<0.000000e+00> : vector<2x512xf32>
    %2 = tpu.matmul %0, %1, %cst {dimension_numbers = #tpu.dot_dimension_numbers<[1], [0], [0], [1], [0, 0, 1, 1], [], []>} : vector<2x1024xbf16>, vector<1024x512xbf16>, vector<2x512xf32> -> vector<2x512xf32>
    %c0_3 = arith.constant 0 : index
    %c0_4 = arith.constant 0 : index
    %3 = vector.load %arg3[%c0_3, %c0_4] : memref<1x512xf32, #tpu.memory_space<vmem>>, vector<1x512xf32>
    %4 = vector.broadcast %3 : vector<1x512xf32> to vector<2x512xf32>
    %5 = arith.addf %2, %4 : vector<2x512xf32>
    %cst_5 = arith.constant 0.000000e+00 : f32
    %6 = vector.broadcast %cst_5 : f32 to vector<2x512xf32>
    %7 = arith.maximumf %5, %6 : vector<2x512xf32>
    %8 = arith.truncf %7 : vector<2x512xf32> to vector<2x512xbf16>
    %c0_6 = arith.constant 0 : index
    %c0_7 = arith.constant 0 : index
    %9 = vector.load %arg4[%c0_6, %c0_7] : memref<512x256xbf16, #tpu.memory_space<vmem>>, vector<512x256xbf16>
    %cst_8 = arith.constant dense<0.000000e+00> : vector<2x256xf32>
    %10 = tpu.matmul %8, %9, %cst_8 {dimension_numbers = #tpu.dot_dimension_numbers<[1], [0], [0], [1], [0, 0, 1, 1], [], []>} : vector<2x512xbf16>, vector<512x256xbf16>, vector<2x256xf32> -> vector<2x256xf32>
    %c0_9 = arith.constant 0 : index
    %c0_10 = arith.constant 0 : index
    %11 = vector.load %arg5[%c0_9, %c0_10] : memref<1x256xf32, #tpu.memory_space<vmem>>, vector<1x256xf32>
    %12 = vector.broadcast %11 : vector<1x256xf32> to vector<2x256xf32>
    %13 = arith.addf %10, %12 : vector<2x256xf32>
    %cst_11 = arith.constant 0.000000e+00 : f32
    %14 = vector.broadcast %cst_11 : f32 to vector<2x256xf32>
    %15 = arith.maximumf %13, %14 : vector<2x256xf32>
    %16 = arith.truncf %15 : vector<2x256xf32> to vector<2x256xbf16>
    %c0_12 = arith.constant 0 : index
    %c0_13 = arith.constant 0 : index
    %17 = vector.load %arg6[%c0_12, %c0_13] : memref<256x4xbf16, #tpu.memory_space<vmem>>, vector<256x4xbf16>
    %cst_14 = arith.constant dense<0.000000e+00> : vector<2x4xf32>
    %18 = tpu.matmul %16, %17, %cst_14 {dimension_numbers = #tpu.dot_dimension_numbers<[1], [0], [0], [1], [0, 0, 1, 1], [], []>} : vector<2x256xbf16>, vector<256x4xbf16>, vector<2x4xf32> -> vector<2x4xf32>
    %c0_15 = arith.constant 0 : index
    %c0_16 = arith.constant 0 : index
    %19 = vector.load %arg7[%c0_15, %c0_16] : memref<1x4xf32, #tpu.memory_space<vmem>>, vector<1x4xf32>
    %20 = vector.broadcast %19 : vector<1x4xf32> to vector<2x4xf32>
    %21 = arith.addf %18, %20 : vector<2x4xf32>
    %c0_17 = arith.constant 0 : index
    %c0_18 = arith.constant 0 : index
    %22 = vector.load %arg8[%c0_17, %c0_18] : memref<2x4xf32, #tpu.memory_space<vmem>>, vector<2x4xf32>
    tpu.vector_store %arg8[%c0_17, %c0_18], %21 {strides = array<i32>} : memref<2x4xf32, #tpu.memory_space<vmem>>, vector<2x4xf32>,
    return
  }
  func.func @transform_0(%arg0: i32) -> (i32, i32) {
    %c0_i32 = arith.constant 0 : i32
    %c0_i32_0 = arith.constant 0 : i32
    return %arg0, %c0_i32 : i32, i32
  }
  func.func @transform_1(%arg0: i32) -> (i32, i32) {
    %c0_i32 = arith.constant 0 : i32
    %c0_i32_0 = arith.constant 0 : i32
    %c0_i32_1 = arith.constant 0 : i32
    return %c0_i32, %c0_i32_0 : i32, i32
  }
  func.func @transform_2(%arg0: i32) -> (i32, i32) {
    %c0_i32 = arith.constant 0 : i32
    %c0_i32_0 = arith.constant 0 : i32
    %c0_i32_1 = arith.constant 0 : i32
    return %c0_i32, %c0_i32_0 : i32, i32
  }
  func.func @transform_3(%arg0: i32) -> (i32, i32) {
    %c0_i32 = arith.constant 0 : i32
    %c0_i32_0 = arith.constant 0 : i32
    %c0_i32_1 = arith.constant 0 : i32
    return %c0_i32, %c0_i32_0 : i32, i32
  }
  func.func @transform_4(%arg0: i32) -> (i32, i32) {
    %c0_i32 = arith.constant 0 : i32
    %c0_i32_0 = arith.constant 0 : i32
    %c0_i32_1 = arith.constant 0 : i32
    return %c0_i32, %c0_i32_0 : i32, i32
  }
  func.func @transform_5(%arg0: i32) -> (i32, i32) {
    %c0_i32 = arith.constant 0 : i32
    %c0_i32_0 = arith.constant 0 : i32
    %c0_i32_1 = arith.constant 0 : i32
    return %c0_i32, %c0_i32_0 : i32, i32
  }
  func.func @transform_6(%arg0: i32) -> (i32, i32) {
    %c0_i32 = arith.constant 0 : i32
    %c0_i32_0 = arith.constant 0 : i32
    %c0_i32_1 = arith.constant 0 : i32
    return %c0_i32, %c0_i32_0 : i32, i32
  }
  func.func @transform_7(%arg0: i32) -> (i32, i32) {
    %c0_i32 = arith.constant 0 : i32
    %c0_i32_0 = arith.constant 0 : i32
    return %arg0, %c0_i32 : i32, i32
  }
}

</mosaic_0001>

<bundles_post_ra>
// kernel: feature_net_forward.3
= control target key start
LH: loop header
LB: loop body
LE: loop exit
PB: predicated region body
PF: predicated region fallthrough
CT: control target
= control target key end

     0   :  { %8 = vsyncpa [#allocation3], 0  ;;  %s2031_s12 = smov 0   ;;  %s3005_s0 = inlined_call_operand.vmem [shape: bf16[2,2,10,60], index: 0, kind: input, shape index: {}]   ;;  %s3006_s1 = inlined_call_operand.vmem [shape: bf16[2,5,60,256], index: 1, kind: input, shape index: {}]   ;;  %s3007_s2 = inlined_call_operand.hbm [shape: f32[1,256], index: 2, kind: input, shape index: {}]   ;;  %s3008_s3 = inlined_call_operand.vmem [shape: bf16[2,8,256], index: 3, kind: output, shape index: {}]  }
   0x1 LB: > { %s1418_s13 = sadd.s32 4294967295, %s2008_s12   ;;  %p1420_p0 = scmp.ge.s32.totalorder %s2008_s12, 1  ;;  %s2008_s12 = sphi %s2031_s12, %s14_s12  }
   0x2   : > { %p113_p1 = scmp.lt.s32.totalorder %s2008_s12, 3  ;;  %s128_s16 = sshll.u32 %s3007_s2, 4  ;;  %s129_s16 = int_to_ptr.hbm [resolvable:$true] %s128_s16 }
   0x3   : > { %p1957_p3 = scmp.eq.s32.totalorder %s1418_s13, 0  ;;  %s2010_s17 = smov [#allocation2]  }
   0x4   : > { %p114_p2 = pnand %p1420_p0, %p113_p1  ;;  %s130_s18 = sshll.u32 %s2010_s17, 4  ;;  %s131_s18 = int_to_ptr.vmem [resolvable:$true] %s130_s18 }
   0x6   : > { %p1953_p4 = pneg %p114_p2  ;;  %151 = sbr.rel (%p114_p2) target bundleno = 325 (0x145), region = 32 }
   0x8   : > { %p1954_p5 = pnand %p1957_p3, %p1953_p4 }
   0xa   : > { %1956 = dma.hbm_to_vmem [thread:$0]  (!%p1954_p5), %s129_s16, 32, %s131_s18, [#allocation3]  }
   0xb   : > { %2003 = dma.done.wait (%p1957_p3), [#allocation3], 32  }
   0xc   : > { %2005 = vsyncadd (%p1957_p3), [#allocation3], 4294967264  ;;  %p176_p6 = scmp.lt.s32.totalorder %s1418_s13, 1  ;;  %vm258_vm0 = vcmask 1045504   ;;  %v1472_v0 = vld [vmem:[%s3006_s1 + $0x70] sm:$0xf] }
   0xd   : > { %v1892_v1 = vld [vmem:[%s3006_s1 + $0x74] sm:$0x30]  ;;  %v1891_v2 = vld [vmem:[%s3006_s1 + $0x74] sm:$0xf]  ;;  %v1474_v4 = vld [vmem:[%s3006_s1 + $0x78] sm:$0x30] }
   0xe   : > { %s3107_s13 = smov (!%p176_p6, %s1418_s13), 1  ;;  %v1473_v3 = vor.u32 %v1892_v1, %v1472_v0  ;;  %v1506_v5 = vld [vmem:[%s3006_s1 + $0x30] sm:$0xf]  ;;  %v1876_v6 = vld [vmem:[%s3006_s1 + $0x34] sm:$0x30]  ;;  %v1477_v7 = vor.u32 %v1891_v2, %v1474_v4  ;;  %vm254_vm1 = vcmask 490496  }
   0xf   : > { %v1507_v8 = vor.u32 %v1876_v6, %v1506_v5  ;;  %v1875_v9 = vld [vmem:[%s3006_s1 + $0x34] sm:$0xf]  ;;  %v1508_v10 = vld [vmem:[%s3006_s1 + $0x38] sm:$0x30]  ;;  %v1464_v11 = vld [vmem:[%s3006_s1 + $0x60] sm:$0xf] }
  0x10   : > { %v2072_v12 = vsel %vm258_vm0, %v1473_v3, 0  ;;  %v1511_v13 = vor.u32 %v1875_v9, %v1508_v10  ;;  %v1890_v14 = vld [vmem:[%s3006_s1 + $0x64] sm:$0xf0]  ;;  %v1889_v15 = vld [vmem:[%s3006_s1 + $0x64] sm:$0xf]  ;;  %v2082_v16 = vsel %vm258_vm0, %v1477_v7, 0 }
  0x11   : > { %269 = vmatpush.bf16.msra.mxu0 %v2072_v12  ;;  %v2085_v17 = vsel %vm258_vm0, %v1507_v8, 0  ;;  %v2087_v18 = vor.u32 %v1890_v14, %v1464_v11  ;;  %v1466_v19 = vld [vmem:[%s3006_s1 + $0x68] sm:$0xf0]  ;;  %v1498_v20 = vld [vmem:[%s3006_s1 + $0x20] sm:$0xf]  ;;  %282 = vmatpush.bf16.msra.mxu1 %v2082_v16  ;;  %s1867_s24 = sshll.u32 %s3107_s13, 4 }
  0x12   : > { %342 = vmatpush.bf16.msra.mxu2 %v2085_v17  ;;  %v2098_v21 = vsel %vm258_vm0, %v1511_v13, 0  ;;  %v2100_v22 = vor.u32 %v1889_v15, %v1466_v19  ;;  %v1874_v23 = vld [vmem:[%s3006_s1 + $0x24] sm:$0xf0]  ;;  %v1873_v24 = vld [vmem:[%s3006_s1 + $0x24] sm:$0xf]  ;;  %s2182_s10 = scalar_lea.vmem %s3005_s0, %s1867_s24 }
  0x13   : > { %355 = vmatpush.bf16.msra.mxu3 %v2098_v21  ;;  %v2110_v25 = vor.u32 %v1874_v23, %v1498_v20  ;;  %v1500_v26 = vld [vmem:[%s3006_s1 + $0x28] sm:$0xf0]  ;;  %v1456_v27 = vld [vmem:[%s3006_s1 + $0x50] sm:$0xf]  ;;  %v1888_v28 = vld [vmem:[%s3006_s1 + $0x54] sm:$0xf0] }
  0x14   : > { %v2121_v29 = vor.u32 %v1873_v24, %v1500_v26  ;;  %v1887_v30 = vld [vmem:[%s3006_s1 + $0x54] sm:$0xf]  ;;  %v1458_v31 = vld [vmem:[%s3006_s1 + $0x58] sm:$0xf0]  ;;  %v1490_v32 = vld [vmem:[%s3006_s1 + $0x10] sm:$0xf]  ;;  %v2133_v33 = vor.u32 %v1888_v28, %v1456_v27 }
  0x15   : > { %270 = vmatpush.bf16.msra.mxu0 %v2087_v18  ;;  %v1872_v34 = vld [vmem:[%s3006_s1 + $0x14] sm:$0xf0]  ;;  %v1871_v35 = vld [vmem:[%s3006_s1 + $0x14] sm:$0xf]  ;;  %v1492_v36 = vld [vmem:[%s3006_s1 + $0x18] sm:$0xf0]  ;;  %283 = vmatpush.bf16.msra.mxu1 %v2100_v22  ;;  %v2146_v37 = vor.u32 %v1887_v30, %v1458_v31 }
  0x16   : > { %343 = vmatpush.bf16.msra.mxu2 %v2110_v25  ;;  %v2148_v38 = vor.u32 %v1872_v34, %v1490_v32  ;;  %v1448_v39 = vld [vmem:[%s3006_s1 + $0x40] sm:$0xf]  ;;  %v1886_v40 = vld [vmem:[%s3006_s1 + $0x44] sm:$0xf0]  ;;  %v1885_v41 = vld [vmem:[%s3006_s1 + $0x44] sm:$0xf]  ;;  %v2160_v42 = vor.u32 %v1871_v35, %v1492_v36 }
  0x17   : > { %356 = vmatpush.bf16.msra.mxu3 %v2121_v29  ;;  %v1450_v43 = vld [vmem:[%s3006_s1 + $0x48] sm:$0xf0]  ;;  %v1482_v44 = vld [vmem:[%s3006_s1] sm:$0xf]  ;;  %v1870_v45 = vld [vmem:[%s3006_s1 + $0x4] sm:$0xf0]  ;;  %v2185_v48 = vor.u32 %v1886_v40, %v1448_v39 }
  0x18   : > { %v1869_v46 = vld [vmem:[%s3006_s1 + $0x4] sm:$0xf]  ;;  %v1484_v47 = vld [vmem:[%s3006_s1 + $0x8] sm:$0xf0]  ;;  %v1582_v49 = vld [vmem:[%s3006_s1 + $0x170] sm:$0xf]  ;;  %v2195_v51 = vor.u32 %v1885_v41, %v1450_v43  ;;  %v2197_v52 = vor.u32 %v1870_v45, %v1482_v44 }
  0x19   : > { %271 = vmatpush.bf16.msra.mxu0 %v2133_v33  ;;  %v1884_v50 = vld [vmem:[%s3006_s1 + $0x174] sm:$0x30]  ;;  %284 = vmatpush.bf16.msra.mxu1 %v2146_v37  ;;  %v1883_v54 = vld [vmem:[%s3006_s1 + $0x174] sm:$0xf]  ;;  %v1584_v55 = vld [vmem:[%s3006_s1 + $0x178] sm:$0x30]  ;;  %v2209_v57 = vor.u32 %v1869_v46, %v1484_v47 }
  0x1a   : > { %344 = vmatpush.bf16.msra.mxu2 %v2148_v38  ;;  %v1583_v53 = vor.u32 %v1884_v50, %v1582_v49  ;;  %v1548_v56 = vld [vmem:[%s3006_s1 + $0x1b0] sm:$0xf]  ;;  %v2212_v58 = vld [vmem:[%s2182_s10 + $0x8] sm:$0xf]  ;;  %v1587_v59 = vor.u32 %v1883_v54, %v1584_v55  ;;  %v1900_v60 = vld [vmem:[%s3006_s1 + $0x1b4] sm:$0x30] }
  0x1b   : > { %357 = vmatpush.bf16.msra.mxu3 %v2160_v42  ;;  %v1899_v61 = vld [vmem:[%s3006_s1 + $0x1b4] sm:$0xf]  ;;  %v1550_v62 = vld [vmem:[%s3006_s1 + $0x1b8] sm:$0x30]  ;;  %v1549_v0 = vor.u32 %v1900_v60, %v1548_v56  ;;  %v1574_v2 = vld [vmem:[%s3006_s1 + $0x160] sm:$0xf] }
  0x1c   : > { %v2224_v63 = vsel %vm258_vm0, %v1583_v53, 0  ;;  %v1553_v1 = vor.u32 %v1899_v61, %v1550_v62  ;;  %v1882_v3 = vld [vmem:[%s3006_s1 + $0x164] sm:$0xf0]  ;;  %v2234_v4 = vsel %vm258_vm0, %v1587_v59, 0  ;;  %v1881_v5 = vld [vmem:[%s3006_s1 + $0x164] sm:$0xf] }
  0x1d   : > { %272 = vmatpush.bf16.msra.mxu0 %v2185_v48  ;;  %v1576_v6 = vld [vmem:[%s3006_s1 + $0x168] sm:$0xf0]  ;;  %285 = vmatpush.bf16.msra.mxu1 %v2195_v51  ;;  %v2245_v7 = vld [vmem:[%s2182_s10] sm:$0xf]  ;;  %v2248_v8 = vsel %vm258_vm0, %v1549_v0, 0  ;;  %v2255_v10 = vor.u32 %v1882_v3, %v1574_v2 }
  0x1e   : > { %345 = vmatpush.bf16.msra.mxu2 %v2197_v52  ;;  %v2251_v9 = vsel %vm258_vm0, %v1553_v1, 0  ;;  %v1540_v11 = vld [vmem:[%s3006_s1 + $0x1a0] sm:$0xf]  ;;  %v1898_v13 = vld [vmem:[%s3006_s1 + $0x1a4] sm:$0xf0]  ;;  %v2269_v15 = vor.u32 %v1881_v5, %v1576_v6 }
  0x1f   : > { %358 = vmatpush.bf16.msra.mxu3 %v2209_v57  ;;  %v1897_v14 = vld [vmem:[%s3006_s1 + $0x1a4] sm:$0xf]  ;;  %v1542_v19 = vld [vmem:[%s3006_s1 + $0x1a8] sm:$0xf0]  ;;  %v1566_v20 = vld [vmem:[%s3006_s1 + $0x150] sm:$0xf]  ;;  %v2293_v27 = vor.u32 %v1898_v13, %v1540_v11 }
  0x20   : > { %1478 = vmatmul.msk.bf16.vlgmr.msra.gmra.mxu0 %vm254_vm1, %v2212_v58  ;;  %v1880_v23 = vld [vmem:[%s3006_s1 + $0x154] sm:$0xf0]  ;;  %1479 = vmatmul.msk.bf16.vlgmr.msra.gmra.mxu1 %vm254_vm1, %v2212_v58  ;;  %v1879_v24 = vld [vmem:[%s3006_s1 + $0x154] sm:$0xf]  ;;  %v1568_v26 = vld [vmem:[%s3006_s1 + $0x158] sm:$0xf0]  ;;  %v2303_v31 = vor.u32 %v1897_v14, %v1542_v19 }
  0x21   : > { %1512 = vmatmul.msk.bf16.vlgmr.msra.gmra.mxu2 %vm254_vm1, %v2245_v7  ;;  %421 = vmatpush.bf16.msrb.mxu0 %v2248_v8  ;;  %v1532_v28 = vld [vmem:[%s3006_s1 + $0x190] sm:$0xf]  ;;  %v1896_v30 = vld [vmem:[%s3006_s1 + $0x194] sm:$0xf0]  ;;  %v2305_v32 = vor.u32 %v1880_v23, %v1566_v20  ;;  %v1895_v34 = vld [vmem:[%s3006_s1 + $0x194] sm:$0xf]  ;;  %v2317_v39 = vor.u32 %v1879_v24, %v1568_v26 }
  0x22   : > { %491 = vmatpush.bf16.msrb.mxu2 %v2224_v63  ;;  %1513 = vmatmul.msk.bf16.vlgmr.msra.gmra.mxu3 %vm254_vm1, %v2245_v7  ;;  %v1534_v35 = vld [vmem:[%s3006_s1 + $0x198] sm:$0xf0]  ;;  %v1558_v36 = vld [vmem:[%s3006_s1 + $0x140] sm:$0xf]  ;;  %v1878_v40 = vld [vmem:[%s3006_s1 + $0x144] sm:$0xf0]  ;;  %v2341_v49 = vor.u32 %v1896_v30, %v1532_v28 }
  0x23   : > { %504 = vmatpush.bf16.msrb.mxu3 %v2234_v4  ;;  %434 = vmatpush.bf16.msrb.mxu1 %v2251_v9  ;;  %v1877_v41 = vld [vmem:[%s3006_s1 + $0x144] sm:$0xf]  ;;  %v1560_v43 = vld [vmem:[%s3006_s1 + $0x148] sm:$0xf0]  ;;  %v1524_v44 = vld [vmem:[%s3006_s1 + $0x180] sm:$0xf]  ;;  %v2354_v56 = vor.u32 %v1895_v34, %v1534_v35  ;;  %v2356_v59 = vor.u32 %v1878_v40, %v1558_v36 }
  0x24   : > { %v1666_v45 = vld [vmem:[%s3006_s1 + $0x1f0] sm:$0xf]  ;;  %v1916_v46 = vld [vmem:[%s3006_s1 + $0x1f4] sm:$0x30]  ;;  %v1915_v47 = vld [vmem:[%s3006_s1 + $0x1f4] sm:$0xf]  ;;  %v2368_v1 = vor.u32 %v1877_v41, %v1560_v43 }
  0x25   : > { %422 = vmatpush.bf16.msrb.mxu0 %v2293_v27  ;;  %v1667_v50 = vor.u32 %v1916_v46, %v1666_v45  ;;  %v1668_v53 = vld [vmem:[%s3006_s1 + $0x1f8] sm:$0x30]  ;;  %v1624_v54 = vld [vmem:[%s3006_s1 + $0xb0] sm:$0xf]  ;;  %v1908_v55 = vld [vmem:[%s3006_s1 + $0xb4] sm:$0x30] }
  0x26   : > { %492 = vmatpush.bf16.msrb.mxu2 %v2255_v10  ;;  %v1894_v60 = vld [vmem:[%s3006_s1 + $0x184] sm:$0xf0]  ;;  %v1671_v61 = vor.u32 %v1915_v47, %v1668_v53  ;;  %v1907_v62 = vld [vmem:[%s3006_s1 + $0xb4] sm:$0xf]  ;;  %v1626_v0 = vld [vmem:[%s3006_s1 + $0xb8] sm:$0x30]  ;;  %v1625_v5 = vor.u32 %v1908_v55, %v1624_v54 }
  0x27   : > { %505 = vmatpush.bf16.msrb.mxu3 %v2269_v15  ;;  %435 = vmatpush.bf16.msrb.mxu1 %v2303_v31  ;;  %v1893_v2 = vld [vmem:[%s3006_s1 + $0x184] sm:$0xf]  ;;  %v1526_v3 = vld [vmem:[%s3006_s1 + $0x188] sm:$0xf0]  ;;  %v1629_v6 = vor.u32 %v1907_v62, %v1626_v0  ;;  %v2377_v11 = vsel %vm258_vm0, %v1667_v50, 0  ;;  %v2386_v19 = vor.u32 %v1894_v60, %v1524_v44 }
  0x28   : > { %v1658_v13 = vld [vmem:[%s3006_s1 + $0x1e0] sm:$0xf]  ;;  %v1914_v14 = vld [vmem:[%s3006_s1 + $0x1e4] sm:$0xf0]  ;;  %v2389_v20 = vsel %vm258_vm0, %v1671_v61, 0  ;;  %v2393_v23 = vor.u32 %v1893_v2, %v1526_v3  ;;  %v2407_v30 = vsel %vm258_vm0, %v1625_v5, 0 }
  0x29   : > { %423 = vmatpush.bf16.msrb.mxu0 %v2341_v49  ;;  %v1913_v24 = vld [vmem:[%s3006_s1 + $0x1e4] sm:$0xf]  ;;  %v1660_v26 = vld [vmem:[%s3006_s1 + $0x1e8] sm:$0xf0]  ;;  %v1616_v28 = vld [vmem:[%s3006_s1 + $0xa0] sm:$0xf]  ;;  %v2412_v35 = vor.u32 %v1914_v14, %v1658_v13 }
  0x2a   : > { %493 = vmatpush.bf16.msrb.mxu2 %v2305_v32  ;;  %v2410_v34 = vsel %vm258_vm0, %v1629_v6, 0  ;;  %v1906_v36 = vld [vmem:[%s3006_s1 + $0xa4] sm:$0xf0]  ;;  %v1905_v40 = vld [vmem:[%s3006_s1 + $0xa4] sm:$0xf]  ;;  %v2442_v50 = vor.u32 %v1913_v24, %v1660_v26 }
  0x2b   : > { %506 = vmatpush.bf16.msrb.mxu3 %v2317_v39  ;;  %436 = vmatpush.bf16.msrb.mxu1 %v2354_v56  ;;  %3041 = vst [vmem:[#allocation5_spill] sm:$0xff] %v2412_v35  ;;  %v1618_v41 = vld [vmem:[%s3006_s1 + $0xa8] sm:$0xf0]  ;;  %v1650_v43 = vld [vmem:[%s3006_s1 + $0x1d0] sm:$0xf]  ;;  %v2444_v53 = vor.u32 %v1906_v36, %v1616_v28 }
  0x2c   : > { %v1912_v44 = vld [vmem:[%s3006_s1 + $0x1d4] sm:$0xf0]  ;;  %v1911_v45 = vld [vmem:[%s3006_s1 + $0x1d4] sm:$0xf]  ;;  %v1652_v46 = vld [vmem:[%s3006_s1 + $0x1d8] sm:$0xf0]  ;;  %v2457_v61 = vor.u32 %v1905_v40, %v1618_v41 }
  0x2d   : > { %424 = vmatpush.bf16.msrb.mxu0 %v2386_v19  ;;  %v1608_v47 = vld [vmem:[%s3006_s1 + $0x90] sm:$0xf]  ;;  %3042 = vst [vmem:[#allocation6_spill] sm:$0xff] %v2442_v50  ;;  %v1904_v54 = vld [vmem:[%s3006_s1 + $0x94] sm:$0xf0]  ;;  %v2459_v62 = vor.u32 %v1912_v44, %v1650_v43 }
  0x2e   : > { %494 = vmatpush.bf16.msrb.mxu2 %v2356_v59  ;;  %3043 = vst [vmem:[#allocation7_spill] sm:$0xff] %v2444_v53  ;;  %v1903_v55 = vld [vmem:[%s3006_s1 + $0x94] sm:$0xf]  ;;  %v1610_v60 = vld [vmem:[%s3006_s1 + $0x98] sm:$0xf0]  ;;  %v2502_v43 = vor.u32 %v1904_v54, %v1608_v47 }
  0x2f   : > { %507 = vmatpush.bf16.msrb.mxu3 %v2368_v1  ;;  %437 = vmatpush.bf16.msrb.mxu1 %v2393_v23  ;;  %3044 = vst [vmem:[#allocation8_spill] sm:$0xff] %v2457_v61  ;;  %v1642_v0 = vld [vmem:[%s3006_s1 + $0x1c0] sm:$0xf]  ;;  %v1910_v2 = vld [vmem:[%s3006_s1 + $0x1c4] sm:$0xf0]  ;;  %v2504_v44 = vor.u32 %v1903_v55, %v1610_v60 }
  0x30   : > { %3045 = vst [vmem:[#allocation9_spill] sm:$0xff] %v2459_v62  ;;  %v513_v3 = vld [vmem:[%s2182_s10] sm:$0xf]  ;;  %1554 = vmatmul.msk.bf16.vlgmr.msrb.gmra.mxu0 %vm254_vm1, %v2212_v58  ;;  %v2473_v5 = vld [vmem:[%s2182_s10 + $0x4] sm:$0x1] }
  0x31   : > { %587 = vmatpush.bf16.msra.mxu0 %v2407_v30  ;;  %1588 = vmatmul.msk.bf16.vlgmr.msrb.gmra.mxu2 %vm254_vm1, %v2245_v7  ;;  %v526_v6 = vunpack.c.l.b16 %v513_v3  ;;  %v1752_v13 = vld [vmem:[%s3006_s1 + $0x230] sm:$0xf]  ;;  %v1932_v14 = vld [vmem:[%s3006_s1 + $0x234] sm:$0x30]  ;;  %v1909_v24 = vld [vmem:[%s3006_s1 + $0x1c4] sm:$0xf]  ;;  %v3013_v26 = vunpack.c.l.b16 %v2473_v5 }
  0x32   : > { %668 = vmatpush.bf16.msra.mxu2 %v2377_v11  ;;  %1555 = vmatmul.msk.bf16.vlgmr.msrb.gmra.mxu1 %vm254_vm1, %v2212_v58  ;;  %v1753_v28 = vor.u32 %v1932_v14, %v1752_v13  ;;  %v1931_v36 = vld [vmem:[%s3006_s1 + $0x234] sm:$0xf]  ;;  %v1754_v40 = vld [vmem:[%s3006_s1 + $0x238] sm:$0x30]  ;;  %v1710_v41 = vld [vmem:[%s3006_s1 + $0xf0] sm:$0xf] }
  0x33   : > { %681 = vmatpush.bf16.msra.mxu3 %v2389_v20  ;;  %600 = vmatpush.bf16.msra.mxu1 %v2410_v34  ;;  %3047 = vst [vmem:[#allocation11_spill] sm:$0xff] %v2502_v43  ;;  %v1924_v3 = vld [vmem:[%s3006_s1 + $0xf4] sm:$0x30]  ;;  %v1923_v13 = vld [vmem:[%s3006_s1 + $0xf4] sm:$0xf]  ;;  %v528_v55 = vpack.c.b16 %v3013_v26, %v526_v6  ;;  %v1757_v60 = vor.u32 %v1931_v36, %v1754_v40 }
  0x34   : > { %1589 = vmatmul.msk.bf16.vlgmr.msrb.gmra.mxu3 %vm254_vm1, %v2245_v7  ;;  %v2500_v7 = vor.u32 %v1911_v45, %v1652_v46  ;;  %3048 = vst [vmem:[#allocation12_spill] sm:$0xff] %v2504_v44  ;;  %v1712_v14 = vld [vmem:[%s3006_s1 + $0xf8] sm:$0x30]  ;;  %v2517_v45 = vor.u32 %v1910_v2, %v1642_v0  ;;  %v1644_v46 = vld [vmem:[%s3006_s1 + $0x1c8] sm:$0xf0] }
  0x35   : > { %588 = vmatpush.bf16.msra.mxu0 %v2444_v53  ;;  %v1600_v47 = vld [vmem:[%s3006_s1 + $0x80] sm:$0xf]  ;;  %v1902_v54 = vld [vmem:[%s3006_s1 + $0x84] sm:$0xf0]  ;;  %v1901_v0 = vld [vmem:[%s3006_s1 + $0x84] sm:$0xf]  ;;  %v1711_v53 = vor.u32 %v1924_v3, %v1710_v41  ;;  %v2541_v6 = vor.u32 %v1909_v24, %v1644_v46 }
  0x36   : > { %669 = vmatpush.bf16.msra.mxu2 %v2412_v35  ;;  %3046 = vst [vmem:[#allocation10_spill] sm:$0xff] %v2500_v7  ;;  %v1602_v2 = vld [vmem:[%s3006_s1 + $0x88] sm:$0xf0]  ;;  %v2543_v36 = vor.u32 %v1902_v54, %v1600_v47  ;;  %v1744_v40 = vld [vmem:[%s3006_s1 + $0x220] sm:$0xf]  ;;  %v2556_v41 = vsel %vm258_vm0, %v1757_v60, 0 }
  0x37   : > { %682 = vmatpush.bf16.msra.mxu3 %v2442_v50  ;;  %601 = vmatpush.bf16.msra.mxu1 %v2457_v61  ;;  %3049 = vst [vmem:[#allocation13_spill] sm:$0xff] %v2517_v45  ;;  %v2537_v61 = vsel %vm258_vm0, %v1753_v28, 0  ;;  %v1715_v50 = vor.u32 %v1923_v13, %v1712_v14  ;;  %v1930_v26 = vld [vmem:[%s3006_s1 + $0x224] sm:$0xf0]  ;;  %v2553_v28 = vor.u32 %v1901_v0, %v1602_v2  ;;  %v530_v24 = vshrl.u32 %v528_v55, 16 }
  0x38   : > { %3050 = vst [vmem:[#allocation14_spill] sm:$0xff] %v2537_v61  ;;  %v1929_v13 = vld [vmem:[%s3006_s1 + $0x224] sm:$0xf]  ;;  %v1746_v14 = vld [vmem:[%s3006_s1 + $0x228] sm:$0xf0]  ;;  %v2566_v46 = vsel %vm258_vm0, %v1711_v53, 0  ;;  %v2571_v54 = vor.u32 %v1930_v26, %v1744_v40 }
  0x39   : > { %589 = vmatpush.bf16.msra.mxu0 %v2502_v43  ;;  %3051 = vst [vmem:[#allocation15_spill] sm:$0xff] %v2541_v6  ;;  %v2569_v47 = vsel %vm258_vm0, %v1715_v50, 0  ;;  %v1921_v50 = vld [vmem:[%s3006_s1 + $0xe4] sm:$0xf]  ;;  %v2586_v53 = vor.u32 %v1929_v13, %v1746_v14  ;;  %v1704_v26 = vld [vmem:[%s3006_s1 + $0xe8] sm:$0xf0] }
  0x3a   : > { %670 = vmatpush.bf16.msra.mxu2 %v2459_v62  ;;  %v532_v62 = vshll.u32 %v528_v55, 16  ;;  %3052 = vst [vmem:[#allocation16_spill] sm:$0xff] %v2543_v36  ;;  %v1922_v55 = vld [vmem:[%s3006_s1 + $0xe4] sm:$0xf0]  ;;  %v1736_v60 = vld [vmem:[%s3006_s1 + $0x210] sm:$0xf] }
  0x3b   : > { %683 = vmatpush.bf16.msra.mxu3 %v2500_v7  ;;  %602 = vmatpush.bf16.msra.mxu1 %v2504_v44  ;;  %3053 = vst [vmem:[#allocation17_spill] sm:$0xff] %v2553_v28  ;;  %v1928_v0 = vld [vmem:[%s3006_s1 + $0x214] sm:$0xf0]  ;;  %v1927_v40 = vld [vmem:[%s3006_s1 + $0x214] sm:$0xf] }
  0x3c   : > { %3054 = vst [vmem:[#allocation18_spill] sm:$0xff] %v2556_v41  ;;  %v534_v3 = vrot.slane %v532_v62, 1  ;;  %v1702_v62 = vld [vmem:[%s3006_s1 + $0xe0] sm:$0xf]  ;;  %v1738_v13 = vld [vmem:[%s3006_s1 + $0x218] sm:$0xf0] }
  0x3d   : > { %3055 = vst [vmem:[#allocation19_spill] sm:$0xff] %v2566_v46  ;;  %590 = vmatpush.bf16.msra.mxu0 %v2543_v36  ;;  %v1674_v14 = vld [vmem:[%s2182_s10 + $0x8] sm:$0xf]  ;;  %v2629_v36 = vor.u32 %v1921_v50, %v1704_v26  ;;  %v1947_v44 = vld [vmem:[%s3006_s1 + $0x274] sm:$0xf] }
  0x3e   : > { %671 = vmatpush.bf16.msra.mxu2 %v2517_v45  ;;  %3056 = vst [vmem:[#allocation20_spill] sm:$0xff] %v2569_v47  ;;  %v2597_v2 = vor.u32 %v534_v3, %v530_v24  ;;  %v1694_v24 = vld [vmem:[%s3006_s1 + $0xd0] sm:$0xf]  ;;  %v1920_v3 = vld [vmem:[%s3006_s1 + $0xd4] sm:$0xf0] }
  0x3f   : > { %3057 = vst [vmem:[#allocation21_spill] sm:$0xff] %v2571_v54  ;;  %684 = vmatpush.bf16.msra.mxu3 %v2541_v6  ;;  %603 = vmatpush.bf16.msra.mxu1 %v2553_v28  ;;  %v2627_v28 = vor.u32 %v1922_v55, %v1702_v62  ;;  %v1948_v45 = vld [vmem:[%s3006_s1 + $0x274] sm:$0x30]  ;;  %v2642_v62 = vor.u32 %v1928_v0, %v1736_v60  ;;  %v1728_v50 = vld [vmem:[%s3006_s1 + $0x200] sm:$0xf] }
  0x40   : > { %3058 = vst [vmem:[#allocation22_spill] sm:$0xff] %v2586_v53  ;;  %v2644_v55 = vor.u32 %v1927_v40, %v1738_v13  ;;  %v1926_v26 = vld [vmem:[%s3006_s1 + $0x204] sm:$0xf0]  ;;  %v1925_v6 = vld [vmem:[%s3006_s1 + $0x204] sm:$0xf]  ;;  %1630 = vmatmul.msk.bf16.vlgmr.msra.gmra.mxu0 %vm254_vm1, %v2597_v2 }
  0x41   : > { %766 = vmatpush.bf16.msrb.mxu0 %v2566_v46  ;;  %v1696_v46 = vld [vmem:[%s3006_s1 + $0xd8] sm:$0xf0]  ;;  %3060 = vst [vmem:[#allocation24_spill] sm:$0xff] %v2642_v62  ;;  %1672 = vmatmul.msk.bf16.vlgmr.msra.gmra.mxu2 %vm254_vm1, %v2597_v2  ;;  %v1730_v60 = vld [vmem:[%s3006_s1 + $0x208] sm:$0xf0] }
  0x42   : > { %847 = vmatpush.bf16.msrb.mxu2 %v2537_v61  ;;  %v705_v61 = vunpack.c.l.b16 %v1674_v14  ;;  %v1838_v14 = vld [vmem:[%s3006_s1 + $0x278] sm:$0x30]  ;;  %3061 = vst [vmem:[#allocation25_spill] sm:$0xff] %v2644_v55  ;;  %v1794_v13 = vld [vmem:[%s3006_s1 + $0x130] sm:$0xf]  ;;  %1631 = vmatmul.msk.bf16.vlgmr.msra.gmra.mxu1 %vm254_vm1, %v2597_v2 }
  0x43   : > { %860 = vmatpush.bf16.msrb.mxu3 %v2556_v41  ;;  %779 = vmatpush.bf16.msrb.mxu1 %v2569_v47  ;;  %v1919_v47 = vld [vmem:[%s3006_s1 + $0xd4] sm:$0xf]  ;;  %v2622_v41 = vld [vmem:[%s2182_s10 + $0xc] sm:$0x1]  ;;  %v1841_v7 = vor.u32 %v1947_v44, %v1838_v14  ;;  %v1686_v44 = vld [vmem:[%s3006_s1 + $0xc0] sm:$0xf] }
  0x44   : > { %3059 = vst [vmem:[#allocation23_spill] sm:$0xff] %v2622_v41  ;;  %v3062_v0 = vunpack.c.l.b16 %v2622_v41  ;;  %1673 = vmatmul.msk.bf16.vlgmr.msra.gmra.mxu3 %vm254_vm1, %v2597_v2  ;;  %v2682_v41 = vor.u32 %v1920_v3, %v1694_v24  ;;  %v2684_v35 = vor.u32 %v1919_v47, %v1696_v46  ;;  %v1918_v14 = vld [vmem:[%s3006_s1 + $0xc4] sm:$0xf0]  ;;  %v1917_v46 = vld [vmem:[%s3006_s1 + $0xc4] sm:$0xf] }
  0x45   : > { %767 = vmatpush.bf16.msrb.mxu0 %v2627_v28  ;;  %v1688_v47 = vld [vmem:[%s3006_s1 + $0xc8] sm:$0xf0] }
  0x46   : > { %848 = vmatpush.bf16.msrb.mxu2 %v2571_v54  ;;  %v1836_v54 = vld [vmem:[%s3006_s1 + $0x270] sm:$0xf]  ;;  %v707_v40 = vpack.c.b16 %v3062_v0, %v705_v61  ;;  %v1939_v61 = vld [vmem:[%s3006_s1 + $0x134] sm:$0xf]  ;;  %v1796_v0 = vld [vmem:[%s3006_s1 + $0x138] sm:$0x30] }
  0x47   : > { %861 = vmatpush.bf16.msrb.mxu3 %v2586_v53  ;;  %v1940_v53 = vld [vmem:[%s3006_s1 + $0x134] sm:$0x30]  ;;  %v1837_v43 = vor.u32 %v1948_v45, %v1836_v54  ;;  %780 = vmatpush.bf16.msrb.mxu1 %v2629_v36  ;;  %3063 = vst [vmem:[#allocation26_spill] sm:$0xff] %v2684_v35  ;;  %v2691_v45 = vor.u32 %v1926_v26, %v1728_v50  ;;  %v1946_v50 = vld [vmem:[%s3006_s1 + $0x264] sm:$0xf0] }
  0x48   : > { %v2693_v54 = vor.u32 %v1925_v6, %v1730_v60  ;;  %v1795_v24 = vor.u32 %v1940_v53, %v1794_v13  ;;  %v711_v3 = vshll.u32 %v707_v40, 16  ;;  %v1828_v6 = vld [vmem:[%s3006_s1 + $0x260] sm:$0xf]  ;;  %v2714_v60 = vsel %vm258_vm0, %v1841_v7, 0  ;;  %v1945_v53 = vld [vmem:[%s3006_s1 + $0x264] sm:$0xf] }
  0x49   : > { %v2711_v26 = vsel %vm258_vm0, %v1837_v43, 0  ;;  %3065 = vst [vmem:[#allocation28_spill] sm:$0xff] %v2714_v60  ;;  %v1830_v13 = vld [vmem:[%s3006_s1 + $0x268] sm:$0xf0]  ;;  %768 = vmatpush.bf16.msrb.mxu0 %v2682_v41  ;;  %v709_v7 = vshrl.u32 %v707_v40, 16  ;;  %v2744_v40 = vor.u32 %v1946_v50, %v1828_v6 }
  0x4a   : > { %849 = vmatpush.bf16.msrb.mxu2 %v2642_v62  ;;  %v1799_v62 = vor.u32 %v1939_v61, %v1796_v0  ;;  %3064 = vst [vmem:[#allocation27_spill] sm:$0xff] %v2711_v26  ;;  %v2724_v61 = vor.u32 %v1918_v14, %v1686_v44  ;;  %v2726_v0 = vor.u32 %v1917_v46, %v1688_v47  ;;  %v2731_v43 = vsel %vm258_vm0, %v1795_v24, 0  ;;  %v1937_v47 = vld [vmem:[%s3006_s1 + $0x124] sm:$0xf]  ;;  %v1788_v24 = vld [vmem:[%s3006_s1 + $0x128] sm:$0xf0] }
  0x4b   : > { %862 = vmatpush.bf16.msrb.mxu3 %v2644_v55  ;;  %781 = vmatpush.bf16.msrb.mxu1 %v2684_v35  ;;  %3067 = vst [vmem:[#allocation30_spill] sm:$0xff] %v2731_v43  ;;  %v1786_v55 = vld [vmem:[%s3006_s1 + $0x120] sm:$0xf]  ;;  %v1938_v35 = vld [vmem:[%s3006_s1 + $0x124] sm:$0xf0]  ;;  %v713_v44 = vrot.slane %v711_v3, 1  ;;  %v2746_v46 = vor.u32 %v1945_v53, %v1830_v13  ;;  %v2766_v50 = vor.u32 %v1937_v47, %v1788_v24 }
  0x4c   : > { %3066 = vst [vmem:[#allocation29_spill] sm:$0xff] %v2726_v0  ;;  %v2742_v14 = vsel %vm258_vm0, %v1799_v62, 0  ;;  %v1820_v62 = vld [vmem:[%s3006_s1 + $0x250] sm:$0xf]  ;;  %v1944_v3 = vld [vmem:[%s3006_s1 + $0x254] sm:$0xf0]  ;;  %v2764_v6 = vor.u32 %v1938_v35, %v1786_v55 }
  0x4d   : > { %3068 = vst [vmem:[#allocation31_spill] sm:$0xff] %v2742_v14  ;;  %769 = vmatpush.bf16.msrb.mxu0 %v2724_v61  ;;  %v1943_v53 = vld [vmem:[%s3006_s1 + $0x254] sm:$0xf]  ;;  %v1822_v13 = vld [vmem:[%s3006_s1 + $0x258] sm:$0xf0]  ;;  %v2790_v24 = vor.u32 %v1944_v3, %v1820_v62 }
  0x4e   : > { %850 = vmatpush.bf16.msrb.mxu2 %v2691_v45  ;;  %3069 = vst [vmem:[#allocation32_spill] sm:$0xff] %v2744_v40  ;;  %v1936_v35 = vld [vmem:[%s3006_s1 + $0x114] sm:$0xf0]  ;;  %v1935_v55 = vld [vmem:[%s3006_s1 + $0x114] sm:$0xf] }
  0x4f   : > { %863 = vmatpush.bf16.msrb.mxu3 %v2693_v54  ;;  %3070 = vst [vmem:[#allocation33_spill] sm:$0xff] %v2746_v46  ;;  %782 = vmatpush.bf16.msrb.mxu1 %v2726_v0  ;;  %v1780_v47 = vld [vmem:[%s3006_s1 + $0x118] sm:$0xf0]  ;;  %v1941_v62 = vld [vmem:[%s3006_s1 + $0x244] sm:$0xf] }
  0x50   : > { %3071 = vst [vmem:[#allocation34_spill] sm:$0xff] %v2764_v6  ;;  %v1814_v3 = vld [vmem:[%s3006_s1 + $0x248] sm:$0xf0] }
  0x51   : > { %936 = vmatpush.bf16.msra.mxu0 %v2731_v43  ;;  %3072 = vst [vmem:[#allocation35_spill] sm:$0xff] %v2766_v50 }
  0x52   : > { %1017 = vmatpush.bf16.msra.mxu2 %v2711_v26  ;;  %v2777_v26 = vor.u32 %v713_v44, %v709_v7  ;;  %v2792_v7 = vor.u32 %v1943_v53, %v1822_v13  ;;  %v1812_v44 = vld [vmem:[%s3006_s1 + $0x240] sm:$0xf]  ;;  %v1933_v13 = vld [vmem:[%s3006_s1 + $0x104] sm:$0xf] }
  0x53   : > { %1030 = vmatpush.bf16.msra.mxu3 %v2714_v60  ;;  %949 = vmatpush.bf16.msra.mxu1 %v2742_v14  ;;  %v1778_v60 = vld [vmem:[%s3006_s1 + $0x110] sm:$0xf]  ;;  %v2804_v14 = vor.u32 %v1935_v55, %v1780_v47  ;;  %v1770_v53 = vld [vmem:[%s3006_s1 + $0x100] sm:$0xf] }
  0x54   : > { %1716 = vmatmul.msk.bf16.vlgmr.msrb.gmra.mxu0 %vm254_vm1, %v2777_v26  ;;  %1758 = vmatmul.msk.bf16.vlgmr.msrb.gmra.mxu2 %vm254_vm1, %v2777_v26  ;;  %v871_v55 = vld [vmem:[%s2182_s10] sm:$0xe] }
  0x55   : > { %937 = vmatpush.bf16.msra.mxu0 %v2764_v6  ;;  %1717 = vmatmul.msk.bf16.vlgmr.msrb.gmra.mxu1 %vm254_vm1, %v2777_v26  ;;  %v882_v0 = vunpack.c.l.b16 %v871_v55 }
  0x56   : > { %1018 = vmatpush.bf16.msra.mxu2 %v2744_v40  ;;  %v2802_v40 = vor.u32 %v1936_v35, %v1778_v60  ;;  %v1934_v60 = vld [vmem:[%s3006_s1 + $0x104] sm:$0xf0]  ;;  %v1772_v35 = vld [vmem:[%s3006_s1 + $0x108] sm:$0xf0]  ;;  %1759 = vmatmul.msk.bf16.vlgmr.msrb.gmra.mxu3 %vm254_vm1, %v2777_v26 }
  0x57   : > { %1031 = vmatpush.bf16.msra.mxu3 %v2746_v46  ;;  %v1942_v46 = vld [vmem:[%s3006_s1 + $0x244] sm:$0xf0]  ;;  %950 = vmatpush.bf16.msra.mxu1 %v2766_v50  ;;  %v2837_v50 = vor.u32 %v1941_v62, %v1814_v3  ;;  %v2841_v6 = vor.u32 %v1934_v60, %v1770_v53  ;;  %v2843_v43 = vor.u32 %v1933_v13, %v1772_v35 }
  0x58   : > { %v2835_v47 = vor.u32 %v1942_v46, %v1812_v44  ;;  %v3073_v46 = vunpack.c.l.b16 %v2473_v5 }
  0x59   : > { %938 = vmatpush.bf16.msra.mxu0 %v2802_v40 }
  0x5a   : > { %1019 = vmatpush.bf16.msra.mxu2 %v2790_v24  ;;  %v883_v44 = vpack.c.b16 %v3073_v46, %v882_v0 }
  0x5b   : > { %1032 = vmatpush.bf16.msra.mxu3 %v2792_v7  ;;  %951 = vmatpush.bf16.msra.mxu1 %v2804_v14 }
  0x5c   : > { %v2855_v62 = vrot.slane %v883_v44, 1 }
  0x5d   : > { %939 = vmatpush.bf16.msra.mxu0 %v2841_v6 }
  0x5e   : > { %1020 = vmatpush.bf16.msra.mxu2 %v2835_v47 }
  0x5f   : > { %1033 = vmatpush.bf16.msra.mxu3 %v2837_v50  ;;  %952 = vmatpush.bf16.msra.mxu1 %v2843_v43 }
  0x61   : > { %1045 = vmatpush.bf16.msrb.mxu0 %v2072_v12  ;;  %v3074_v12 = vld [vmem:[#allocation5_spill] sm:$0xff] }
  0x62   : > { %1071 = vmatpush.bf16.msrb.mxu2 %v2085_v17  ;;  %v3076_v17 = vld [vmem:[#allocation7_spill] sm:$0xff] }
  0x63   : > { %1084 = vmatpush.bf16.msrb.mxu3 %v2098_v21  ;;  %1058 = vmatpush.bf16.msrb.mxu1 %v2082_v16  ;;  %v3075_v16 = vld [vmem:[#allocation6_spill] sm:$0xff]  ;;  %v3078_v21 = vld [vmem:[#allocation9_spill] sm:$0xff] }
  0x64   : > { %1800 = vmatmul.msk.bf16.vlgmr.msra.gmra.mxu0 %vm254_vm1, %v2855_v62  ;;  %1842 = vmatmul.msk.bf16.vlgmr.msra.gmra.mxu2 %vm254_vm1, %v2855_v62 }
  0x65   : > { %1046 = vmatpush.bf16.msrb.mxu0 %v2087_v18  ;;  %1801 = vmatmul.msk.bf16.vlgmr.msra.gmra.mxu1 %vm254_vm1, %v2855_v62  ;;  %v3077_v18 = vld [vmem:[#allocation8_spill] sm:$0xff] }
  0x66   : > { %1072 = vmatpush.bf16.msrb.mxu2 %v2110_v25  ;;  %1843 = vmatmul.msk.bf16.vlgmr.msra.gmra.mxu3 %vm254_vm1, %v2855_v62  ;;  %v3080_v25 = vld [vmem:[#allocation11_spill] sm:$0xff] }
  0x67   : > { %1085 = vmatpush.bf16.msrb.mxu3 %v2121_v29  ;;  %1059 = vmatpush.bf16.msrb.mxu1 %v2100_v22  ;;  %v3079_v22 = vld [vmem:[#allocation10_spill] sm:$0xff]  ;;  %v3081_v29 = vld [vmem:[#allocation12_spill] sm:$0xff] }
  0x69   : > { %1047 = vmatpush.bf16.msrb.mxu0 %v2133_v33  ;;  %v3082_v33 = vld [vmem:[#allocation13_spill] sm:$0xff] }
  0x6a   : > { %1073 = vmatpush.bf16.msrb.mxu2 %v2148_v38  ;;  %v3084_v38 = vld [vmem:[#allocation16_spill] sm:$0xff] }
  0x6b   : > { %1086 = vmatpush.bf16.msrb.mxu3 %v2160_v42  ;;  %1060 = vmatpush.bf16.msrb.mxu1 %v2146_v37  ;;  %v3083_v37 = vld [vmem:[#allocation15_spill] sm:$0xff]  ;;  %v3085_v42 = vld [vmem:[#allocation17_spill] sm:$0xff] }
  0x6d   : > { %1048 = vmatpush.bf16.msrb.mxu0 %v2185_v48  ;;  %v3086_v48 = vld [vmem:[#allocation14_spill] sm:$0xff] }
  0x6e   : > { %1074 = vmatpush.bf16.msrb.mxu2 %v2197_v52  ;;  %v3088_v52 = vld [vmem:[#allocation19_spill] sm:$0xff] }
  0x6f   : > { %1087 = vmatpush.bf16.msrb.mxu3 %v2209_v57  ;;  %1061 = vmatpush.bf16.msrb.mxu1 %v2195_v51  ;;  %v3087_v51 = vld [vmem:[#allocation18_spill] sm:$0xff]  ;;  %v3089_v57 = vld [vmem:[#allocation20_spill] sm:$0xff] }
  0x71   : > { %1097 = vmatpush.bf16.msra.mxu0 %v2248_v8  ;;  %v3093_v8 = vld [vmem:[#allocation25_spill] sm:$0xff] }
  0x72   : > { %1123 = vmatpush.bf16.msra.mxu2 %v2224_v63  ;;  %v3091_v63 = vld [vmem:[#allocation22_spill] sm:$0xff] }
  0x73   : > { %1136 = vmatpush.bf16.msra.mxu3 %v2234_v4  ;;  %1110 = vmatpush.bf16.msra.mxu1 %v2251_v9  ;;  %v3092_v4 = vld [vmem:[#allocation24_spill] sm:$0xff]  ;;  %v3094_v9 = vld [vmem:[#allocation26_spill] sm:$0xff] }
  0x74   : > { %1844 = vmatmul.msk.bf16.vlgmr.msrb.gmra.mxu0 %vm254_vm1, %v2597_v2  ;;  %1846 = vmatmul.msk.bf16.vlgmr.msrb.gmra.mxu2 %vm254_vm1, %v2212_v58 }
  0x75   : > { %1098 = vmatpush.bf16.msra.mxu0 %v2293_v27  ;;  %1845 = vmatmul.msk.bf16.vlgmr.msrb.gmra.mxu1 %vm254_vm1, %v2597_v2  ;;  %v3097_v27 = vld [vmem:[#allocation28_spill] sm:$0xff] }
  0x76   : > { %1124 = vmatpush.bf16.msra.mxu2 %v2255_v10  ;;  %1847 = vmatmul.msk.bf16.vlgmr.msrb.gmra.mxu3 %vm254_vm1, %v2212_v58  ;;  %v3095_v10 = vld [vmem:[#allocation29_spill] sm:$0xff] }
  0x77   : > { %1137 = vmatpush.bf16.msra.mxu3 %v2269_v15  ;;  %1111 = vmatpush.bf16.msra.mxu1 %v2303_v31  ;;  %v3096_v15 = vld [vmem:[#allocation27_spill] sm:$0xff]  ;;  %v3098_v31 = vld [vmem:[#allocation30_spill] sm:$0xff] }
  0x79   : > { %1099 = vmatpush.bf16.msra.mxu0 %v2341_v49  ;;  %v3100_v49 = vld [vmem:[#allocation32_spill] sm:$0xff] }
  0x7a   : > { %1125 = vmatpush.bf16.msra.mxu2 %v2305_v32  ;;  %v3099_v32 = vld [vmem:[#allocation31_spill] sm:$0xff] }
  0x7b   : > { %1138 = vmatpush.bf16.msra.mxu3 %v2317_v39  ;;  %1112 = vmatpush.bf16.msra.mxu1 %v2354_v56  ;;  %v3101_v56 = vld [vmem:[#allocation33_spill] sm:$0xff] }
  0x7d   : > { %1100 = vmatpush.bf16.msra.mxu0 %v2386_v19  ;;  %v1860_v19 = vld [vmem:[%s2182_s10 + $0x8] sm:$0xe]  ;;  %s1868_s10 = sshll.u32 %s3107_s13, 3 }
  0x7e   : > { %1126 = vmatpush.bf16.msra.mxu2 %v2356_v59  ;;  %v1259_v5 = vunpack.c.l.b16 %v1860_v19  ;;  %s185_s4 = scalar_lea.vmem %s3008_s3, %s1868_s10 }
  0x7f   : > { %1139 = vmatpush.bf16.msra.mxu3 %v2368_v1  ;;  %1113 = vmatpush.bf16.msra.mxu1 %v2393_v23  ;;  %v3102_v1 = vld [vmem:[#allocation34_spill] sm:$0xff] }
  0x81   : > { %1149 = vmatpush.bf16.msrb.mxu0 %v2407_v30 }
  0x82   : > { %1177 = vmatpush.bf16.msrb.mxu2 %v2377_v11  ;;  %v3103_v11 = vld [vmem:[#allocation35_spill] sm:$0xff] }
  0x83   : > { %1190 = vmatpush.bf16.msrb.mxu3 %v2389_v20  ;;  %1162 = vmatpush.bf16.msrb.mxu1 %v2410_v34 }
  0x84   : > { %1848 = vmatmul.msk.bf16.vlgmr.msra.gmra.mxu0 %vm254_vm1, %v2597_v2  ;;  %1850 = vmatmul.msk.bf16.vlgmr.msra.gmra.mxu2 %vm254_vm1, %v2212_v58 }
  0x85   : > { %1150 = vmatpush.bf16.msrb.mxu0 %v3076_v17  ;;  %1849 = vmatmul.msk.bf16.vlgmr.msra.gmra.mxu1 %vm254_vm1, %v2597_v2 }
  0x86   : > { %1178 = vmatpush.bf16.msrb.mxu2 %v3074_v12  ;;  %1851 = vmatmul.msk.bf16.vlgmr.msra.gmra.mxu3 %vm254_vm1, %v2212_v58  ;;  %v3090_v58 = vld [vmem:[#allocation21_spill] sm:$0xff] }
  0x87   : > { %1191 = vmatpush.bf16.msrb.mxu3 %v3075_v16  ;;  %1163 = vmatpush.bf16.msrb.mxu1 %v3077_v18 }
  0x89   : > { %1151 = vmatpush.bf16.msrb.mxu0 %v3080_v25 }
  0x8a   : > { %1179 = vmatpush.bf16.msrb.mxu2 %v3078_v21 }
  0x8b   : > { %1192 = vmatpush.bf16.msrb.mxu3 %v3079_v22  ;;  %1164 = vmatpush.bf16.msrb.mxu1 %v3081_v29 }
  0x8d   : > { %1152 = vmatpush.bf16.msrb.mxu0 %v3084_v38 }
  0x8e   : > { %1180 = vmatpush.bf16.msrb.mxu2 %v3082_v33 }
  0x8f   : > { %1193 = vmatpush.bf16.msrb.mxu3 %v3083_v37  ;;  %1165 = vmatpush.bf16.msrb.mxu1 %v3085_v42 }
  0x91   : > { %1205 = vmatpush.bf16.msra.mxu0 %v3088_v52 }
  0x92   : > { %1233 = vmatpush.bf16.msra.mxu2 %v3086_v48 }
  0x93   : > { %1246 = vmatpush.bf16.msra.mxu3 %v3087_v51  ;;  %1218 = vmatpush.bf16.msra.mxu1 %v3089_v57 }
  0x94   : > { %1852 = vmatmul.msk.bf16.vlgmr.msrb.gmra.mxu0 %vm254_vm1, %v2777_v26  ;;  %1854 = vmatmul.msk.bf16.vlgmr.msrb.gmra.mxu2 %vm254_vm1, %v2777_v26 }
  0x95   : > { %1206 = vmatpush.bf16.msra.mxu0 %v2627_v28  ;;  %1853 = vmatmul.msk.bf16.vlgmr.msrb.gmra.mxu1 %vm254_vm1, %v2777_v26 }
  0x96   : > { %1234 = vmatpush.bf16.msra.mxu2 %v3090_v58  ;;  %1855 = vmatmul.msk.bf16.vlgmr.msrb.gmra.mxu3 %vm254_vm1, %v2777_v26 }
  0x97   : > { %1247 = vmatpush.bf16.msra.mxu3 %v3091_v63  ;;  %1219 = vmatpush.bf16.msra.mxu1 %v2629_v36  ;;  %v1321_v63 = vld [vmem:[#allocation2] sm:$0x3] }
  0x99   : > { %1207 = vmatpush.bf16.msra.mxu0 %v2682_v41  ;;  %v3104_v41 = vld [vmem:[#allocation23_spill] sm:$0xff] }
  0x9a   : > { %1235 = vmatpush.bf16.msra.mxu2 %v3092_v4  ;;  %v3105_v2 = vunpack.c.l.b16 %v3104_v41 }
  0x9b   : > { %1248 = vmatpush.bf16.msra.mxu3 %v3093_v8  ;;  %1220 = vmatpush.bf16.msra.mxu1 %v3094_v9 }
  0x9d   : > { %1208 = vmatpush.bf16.msra.mxu0 %v2724_v61  ;;  %v274_v39 = vpop.f32.mrf.mxu0  ;;  %v287_v59 = vpop.f32.mrf.mxu1 }
  0x9e   : > { %1236 = vmatpush.bf16.msra.mxu2 %v2691_v45  ;;  %v1260_v45 = vpack.c.b16 %v3105_v2, %v1259_v5 }
  0x9f   : > { %1249 = vmatpush.bf16.msra.mxu3 %v2693_v54  ;;  %1221 = vmatpush.bf16.msra.mxu1 %v3095_v10  ;;  %v2980_v10 = vperm.slane %v1321_v63, 0 }
  0xa0   : > { %v1261_v61 = vrot.slane %v1260_v45, 1 }
  0xa1   : > { %1269 = vmatpush.bf16.msrb.mxu0 %v3098_v31 }
  0xa2   : > { %1297 = vmatpush.bf16.msrb.mxu2 %v3096_v15  ;;  %v2982_v15 = vperm.slane %v1321_v63, 1 }
  0xa3   : > { %1310 = vmatpush.bf16.msrb.mxu3 %v3097_v27  ;;  %1282 = vmatpush.bf16.msrb.mxu1 %v3099_v32 }
  0xa4   : > { %1856 = vmatmul.msk.bf16.vlgmr.msra.gmra.mxu0 %vm254_vm1, %v2855_v62  ;;  %1858 = vmatmul.msk.bf16.vlgmr.msra.gmra.mxu2 %vm254_vm1, %v2855_v62  ;;  %v347_v20 = vpop.f32.mrf.mxu2 }
  0xa5   : > { %1270 = vmatpush.bf16.msrb.mxu0 %v3102_v1  ;;  %1857 = vmatmul.msk.bf16.vlgmr.msra.gmra.mxu1 %vm254_vm1, %v2855_v62  ;;  %v348_v23 = vadd.f32 %v347_v20, %v274_v39  ;;  %v360_v30 = vpop.f32.mrf.mxu3  ;;  %v276_v34 = vpop.f32.mrf.mxu0 }
  0xa6   : > { %1298 = vmatpush.bf16.msrb.mxu2 %v3100_v49  ;;  %1859 = vmatmul.msk.bf16.vlgmr.msra.gmra.mxu3 %vm254_vm1, %v2855_v62  ;;  %v361_v36 = vadd.f32 %v360_v30, %v287_v59  ;;  %v289_v28 = vpop.f32.mrf.mxu1 }
  0xa7   : > { %1311 = vmatpush.bf16.msrb.mxu3 %v3101_v56  ;;  %1283 = vmatpush.bf16.msrb.mxu1 %v3103_v11 }
  0xa9   : > { %1271 = vmatpush.bf16.msrb.mxu0 %v2802_v40 }
  0xaa   : > { %1299 = vmatpush.bf16.msrb.mxu2 %v2790_v24 }
  0xab   : > { %1312 = vmatpush.bf16.msrb.mxu3 %v2792_v7  ;;  %1284 = vmatpush.bf16.msrb.mxu1 %v2804_v14 }
  0xac   : > { %v349_v54 = vpop.f32.mrf.mxu2 }
  0xad   : > { %1272 = vmatpush.bf16.msrb.mxu0 %v2841_v6  ;;  %v362_v26 = vpop.f32.mrf.mxu3  ;;  %v426_v0 = vpop.f32.mrf.mxu0 }
  0xae   : > { %1300 = vmatpush.bf16.msrb.mxu2 %v2835_v47 }
  0xaf   : > { %1313 = vmatpush.bf16.msrb.mxu3 %v2837_v50  ;;  %1285 = vmatpush.bf16.msrb.mxu1 %v2843_v43  ;;  %v439_v14 = vpop.f32.mrf.mxu1 }
  0xb4   : > { %1861 = vmatmul.msk.bf16.vlgmr.msrb.gmra.mxu0 %vm254_vm1, %v1261_v61  ;;  %1863 = vmatmul.msk.bf16.vlgmr.msrb.gmra.mxu2 %vm254_vm1, %v1261_v61  ;;  %v496_v40 = vpop.f32.mrf.mxu2 }
  0xb5   : > { %1862 = vmatmul.msk.bf16.vlgmr.msrb.gmra.mxu1 %vm254_vm1, %v1261_v61  ;;  %v497_v6 = vadd.f32 %v496_v40, %v426_v0  ;;  %v428_v24 = vpop.f32.mrf.mxu0 }
  0xb6   : > { %1864 = vmatmul.msk.bf16.vlgmr.msrb.gmra.mxu3 %vm254_vm1, %v1261_v61 }
  0xb7   : > { %v509_v50 = vpop.f32.mrf.mxu3  ;;  %v441_v7 = vpop.f32.mrf.mxu1 }
  0xb8   : > { %v510_v43 = vadd.f32 %v509_v50, %v439_v14 }
  0xbc   : > { %v498_v3 = vpop.f32.mrf.mxu2 }
  0xbd   : > { %v592_v60 = vpop.f32.mrf.mxu0 }
  0xbe   : > { %v609_v13 = vadd.f32 %v592_v60, %v348_v23 }
  0xbf   : > { %v511_v53 = vpop.f32.mrf.mxu3  ;;  %v605_v35 = vpop.f32.mrf.mxu1 }
  0xc0   : > { %v610_v55 = vadd.f32 %v605_v35, %v361_v36 }
  0xc4   : > { %v673_v47 = vpop.f32.mrf.mxu2 }
  0xc5   : > { %v690_v46 = vadd.f32 %v673_v47, %v497_v6  ;;  %v594_v12 = vpop.f32.mrf.mxu0 }
  0xc7   : > { %v686_v44 = vpop.f32.mrf.mxu3  ;;  %v607_v16 = vpop.f32.mrf.mxu1 }
  0xc8   : > { %v691_v62 = vadd.f32 %v686_v44, %v510_v43 }
  0xcc   : > { %v675_v17 = vpop.f32.mrf.mxu2 }
  0xcf   : > { %v688_v18 = vpop.f32.mrf.mxu3 }
  0xd1   : > { %v771_v21 = vpop.f32.mrf.mxu0 }
  0xd2   : > { %v788_v22 = vadd.f32 %v771_v21, %v609_v13  ;;  %v784_v25 = vpop.f32.mrf.mxu1 }
  0xd3   : > { %v789_v29 = vadd.f32 %v784_v25, %v610_v55 }
  0xd7   : > { %v852_v33 = vpop.f32.mrf.mxu2 }
  0xd8   : > { %v869_v37 = vadd.f32 %v852_v33, %v690_v46 }
  0xd9   : > { %v865_v38 = vpop.f32.mrf.mxu3  ;;  %v773_v48 = vpop.f32.mrf.mxu0 }
  0xda   : > { %v870_v42 = vadd.f32 %v865_v38, %v691_v62  ;;  %v786_v51 = vpop.f32.mrf.mxu1 }
  0xdf   : > { %v854_v52 = vpop.f32.mrf.mxu2 }
  0xe1   : > { %v867_v57 = vpop.f32.mrf.mxu3  ;;  %v941_v58 = vpop.f32.mrf.mxu0 }
  0xe2   : > { %v958_v4 = vadd.f32 %v941_v58, %v788_v22  ;;  %v954_v8 = vpop.f32.mrf.mxu1 }
  0xe3   : > { %v959_v9 = vadd.f32 %v954_v8, %v789_v29 }
  0xe4   : > { %v1327_v31 = vadd.f32 %v2980_v10, %v958_v4 }
  0xe5   : > { %v1328_v49 = vadd.f32 %v2982_v15, %v959_v9 }
  0xe6   : > { %v1329_v20 = vmax.f32 %v1327_v31, 0.0 }
  0xe7   : > { %v1022_v27 = vpop.f32.mrf.mxu2  ;;  %v1330_v30 = vmax.f32 %v1328_v49, 0.0 }
  0xe8   : > { %v1039_v32 = vadd.f32 %v1022_v27, %v869_v37 }
  0xe9   : > { %v1035_v39 = vpop.f32.mrf.mxu3  ;;  %v943_v59 = vpop.f32.mrf.mxu0 }
  0xea   : > { %v1040_v56 = vadd.f32 %v1035_v39, %v870_v42  ;;  %v1331_v1 = vadd.f32 %v2980_v10, %v1039_v32  ;;  %v956_v11 = vpop.f32.mrf.mxu1 }
  0xec   : > { %v1332_v19 = vadd.f32 %v2982_v15, %v1040_v56  ;;  %v1333_v23 = vmax.f32 %v1331_v1, 0.0 }
  0xee   : > { %v1334_v34 = vmax.f32 %v1332_v19, 0.0  ;;  %v2988_v5 = vmax.f32 %v1329_v20, %v1333_v23 }
  0xef   : > { %v1024_v28 = vpop.f32.mrf.mxu2 }
  0xf0   : > { %v2990_v36 = vmax.f32 %v1330_v30, %v1334_v34 }
  0xf1   : > { %v1037_v41 = vpop.f32.mrf.mxu3  ;;  %v1050_v2 = vpop.f32.mrf.mxu0 }
  0xf2   : > { %v1063_v45 = vpop.f32.mrf.mxu1 }
  0xf7   : > { %v1076_v54 = vpop.f32.mrf.mxu2 }
  0xf8   : > { %v1077_v29 = vadd.f32 %v1076_v54, %v1050_v2 }
  0xf9   : > { %v1089_v26 = vpop.f32.mrf.mxu3  ;;  %v1052_v61 = vpop.f32.mrf.mxu0 }
  0xfa   : > { %v1065_v0 = vpop.f32.mrf.mxu1  ;;  %v1090_v33 = vadd.f32 %v1089_v26, %v1063_v45 }
  0xff   : > { %v1078_v14 = vpop.f32.mrf.mxu2 }
 0x101   : > { %v1091_v40 = vpop.f32.mrf.mxu3  ;;  %v1102_v6 = vpop.f32.mrf.mxu0 }
 0x102   : > { %v1115_v50 = vpop.f32.mrf.mxu1 }
 0x107   : > { %v1128_v43 = vpop.f32.mrf.mxu2 }
 0x108   : > { %v1129_v58 = vadd.f32 %v1128_v43, %v1102_v6 }
 0x109   : > { %v1141_v24 = vpop.f32.mrf.mxu3  ;;  %v1104_v7 = vpop.f32.mrf.mxu0 }
 0x10a   : > { %v1117_v3 = vpop.f32.mrf.mxu1  ;;  %v1142_v8 = vadd.f32 %v1141_v24, %v1115_v50 }
 0x10f   : > { %v1130_v53 = vpop.f32.mrf.mxu2 }
 0x111   : > { %v1143_v60 = vpop.f32.mrf.mxu3  ;;  %v1154_v13 = vpop.f32.mrf.mxu0 }
 0x112   : > { %v1167_v35 = vpop.f32.mrf.mxu1  ;;  %v1171_v37 = vadd.f32 %v1154_v13, %v1077_v29 }
 0x113   : > { %v1172_v38 = vadd.f32 %v1167_v35, %v1090_v33 }
 0x117   : > { %v1182_v55 = vpop.f32.mrf.mxu2 }
 0x118   : > { %v1199_v27 = vadd.f32 %v1182_v55, %v1129_v58 }
 0x119   : > { %v1195_v47 = vpop.f32.mrf.mxu3  ;;  %v1156_v46 = vpop.f32.mrf.mxu0 }
 0x11a   : > { %v1169_v44 = vpop.f32.mrf.mxu1  ;;  %v1200_v32 = vadd.f32 %v1195_v47, %v1142_v8 }
 0x11f   : > { %v1184_v62 = vpop.f32.mrf.mxu2 }
 0x121   : > { %v1197_v12 = vpop.f32.mrf.mxu3  ;;  %v1210_v16 = vpop.f32.mrf.mxu0 }
 0x122   : > { %v1223_v17 = vpop.f32.mrf.mxu1  ;;  %v1227_v48 = vadd.f32 %v1210_v16, %v1171_v37 }
 0x123   : > { %v1228_v52 = vadd.f32 %v1223_v17, %v1172_v38 }
 0x127   : > { %v1238_v18 = vpop.f32.mrf.mxu2 }
 0x128   : > { %v1255_v49 = vadd.f32 %v1238_v18, %v1199_v27 }
 0x129   : > { %v1251_v21 = vpop.f32.mrf.mxu3  ;;  %v1212_v22 = vpop.f32.mrf.mxu0 }
 0x12a   : > { %v1225_v25 = vpop.f32.mrf.mxu1  ;;  %v1256_v56 = vadd.f32 %v1251_v21, %v1200_v32 }
 0x12f   : > { %v1240_v42 = vpop.f32.mrf.mxu2 }
 0x131   : > { %v1253_v51 = vpop.f32.mrf.mxu3  ;;  %v1274_v57 = vpop.f32.mrf.mxu0 }
 0x132   : > { %v1291_v63 = vadd.f32 %v1274_v57, %v1227_v48  ;;  %v1287_v4 = vpop.f32.mrf.mxu1 }
 0x133   : > { %v1292_v9 = vadd.f32 %v1287_v4, %v1228_v52 }
 0x134   : > { %v1337_v31 = vadd.f32 %v2980_v10, %v1291_v63 }
 0x135   : > { %v1338_v39 = vadd.f32 %v2982_v15, %v1292_v9 }
 0x136   : > { %v1339_v1 = vmax.f32 %v1337_v31, 0.0 }
 0x137   : > { %v1302_v59 = vpop.f32.mrf.mxu2  ;;  %v1340_v20 = vmax.f32 %v1338_v39, 0.0 }
 0x138   : > { %v1319_v11 = vadd.f32 %v1302_v59, %v1255_v49  ;;  %v1341_v2 = vmax.f32 %v2988_v5, %v1339_v1 }
 0x139   : > { %v1315_v19 = vpop.f32.mrf.mxu3  ;;  %v1276_v30 = vpop.f32.mrf.mxu0  ;;  %v1342_v54 = vmax.f32 %v2990_v36, %v1340_v20 }
 0x13a   : > { %v1320_v23 = vadd.f32 %v1315_v19, %v1256_v56  ;;  %v1343_v34 = vadd.f32 %v2980_v10, %v1319_v11  ;;  %v1289_v28 = vpop.f32.mrf.mxu1 }
 0x13c   : > { %v1344_v41 = vadd.f32 %v2982_v15, %v1320_v23  ;;  %v1345_v45 = vmax.f32 %v1343_v34, 0.0 }
 0x13e   : > { %v1346_v26 = vmax.f32 %v1344_v41, 0.0  ;;  %v1347_v61 = vmax.f32 %v1341_v2, %v1345_v45 }
 0x13f   : > { %v1304_v14 = vpop.f32.mrf.mxu2 }
 0x140   : > { %v1348_v0 = vmax.f32 %v1342_v54, %v1346_v26 }
 0x141   : > { %v1317_v40 = vpop.f32.mrf.mxu3 }
 0x142   : > { %v1349_v6 = vpack.c.bf16 %v1348_v0, %v1347_v61 }
 0x144   : > { %1350 = vst [vmem:[%s185_s4] sm:$0xff] %v1349_v6 }
 0x145 PF: > { %s14_s12 = sadd.s32 1, %s2008_s12  }
 0x146   : > { %p11_p7 = scmp.ge.s32.totalorder %s14_s12, 4  }
 0x148   :  { %13 = sbr.rel (!%p11_p7) target bundleno = 1 (0x1), region = 77 }
 0x14d   :  { %1372 = vsyncpa [#allocation3], 1 }
 0x14e   :  { %1374 = vsyncpa [#allocation3 + $0x1], 1 }

// kernel: feature_net_forward.5
= control target key start
LH: loop header
LB: loop body
LE: loop exit
PB: predicated region body
PF: predicated region fallthrough
CT: control target
= control target key end

     0   :  { %12 = vsyncpa [#allocation3], 0  ;;  %s4822_s0 = inlined_call_operand.vmem [shape: bf16[2,1024], index: 0, kind: input, shape index: {}]   ;;  %s4823_s1 = inlined_call_operand.hbm [shape: bf16[1024,512], index: 1, kind: input, shape index: {}]   ;;  %s4824_s2 = inlined_call_operand.hbm [shape: f32[1,512], index: 2, kind: input, shape index: {}]   ;;  %s4825_s3 = inlined_call_operand.hbm [shape: bf16[512,256], index: 3, kind: input, shape index: {}]   ;;  %s4826_s4 = inlined_call_operand.hbm [shape: f32[1,256], index: 4, kind: input, shape index: {}]   ;;  %s4827_s5 = inlined_call_operand.vmem [shape: bf16[256,4], index: 5, kind: input, shape index: {}]   ;;  %s4828_s6 = inlined_call_operand.hbm [shape: f32[1,4], index: 6, kind: input, shape index: {}]   ;;  %s4829_s7 = inlined_call_operand.hbm [shape: f32[2,4], index: 7, kind: output, shape index: {}]  }
   0x1   :  { %13 = vsyncpa [#allocation6], 0 }
   0x2   :  { %14 = vsyncpa [#allocation9], 0  ;;  %s36_s26 = sshll.u32 %s4824_s2, 4  ;;  %s37_s26 = int_to_ptr.hbm [resolvable:$true] %s36_s26 }
   0x3   :  { %15 = vsyncpa [#allocation4], 0  ;;  %s4617_s27 = smov [#allocation5]   ;;  %s60_s8 = sshll.u32 %s4826_s4, 4  ;;  %s61_s8 = int_to_ptr.hbm [resolvable:$true] %s60_s8 }
   0x4   :  { %s38_s28 = sshll.u32 %s4617_s27, 4  ;;  %s4618_s9 = smov [#allocation8]   ;;  %s39_s28 = int_to_ptr.vmem [resolvable:$true] %s38_s28 }
   0x5   :  { %41 = dma.hbm_to_vmem [thread:$0]  %s37_s26, 64, %s39_s28, [#allocation6]  }
   0x6   :  { %s62_s10 = sshll.u32 %s4618_s9, 4  ;;  %s22_s13 = sshll.u32 %s4823_s1, 4  ;;  %s63_s10 = int_to_ptr.vmem [resolvable:$true] %s62_s10  ;;  %s23_s13 = int_to_ptr.hbm [resolvable:$true] %s22_s13 }
   0x7   :  { %65 = dma.hbm_to_vmem [thread:$0]  %s61_s8, 32, %s63_s10, [#allocation9]  }
   0x8   :  { %s4619_s2 = smov [#allocation2]   ;;  %s46_s17 = sshll.u32 %s4825_s3, 4  ;;  %s47_s17 = int_to_ptr.hbm [resolvable:$true] %s46_s17 }
   0x9   :  { %s24_s14 = sshll.u32 %s4619_s2, 4  ;;  %s4620_s18 = smov 256   ;;  %s25_s14 = int_to_ptr.vmem [resolvable:$true] %s24_s14 }
   0xa   :  { %s4621_s4 = smov 16   ;;  %s4622_s19 = smov [#allocation7]  }
   0xb   :  { %30 = dma.hbm_to_vmem [thread:$0]  %s23_s13, 32768, %s25_s14, [#allocation3], %s4620_s18, %s4620_s18, %s4621_s4  }
   0xc   :  { %s48_s20 = sshll.u32 %s4622_s19, 4  ;;  %s4623_s21 = smov 128   ;;  %s49_s20 = int_to_ptr.vmem [resolvable:$true] %s48_s20 }
   0xd   :  { %s4624_s22 = smov 8   ;;  %s73_s24 = sshll.u32 %s4828_s6, 4  ;;  %s74_s24 = int_to_ptr.hbm [resolvable:$true] %s73_s24 }
   0xe   :  { %54 = dma.hbm_to_vmem [thread:$0]  %s47_s17, 8192, %s49_s20, [#allocation6], %s4623_s21, %s4623_s21, %s4624_s22  }
   0xf   :  { %s4625_s25 = smov [#allocation10]  }
  0x10   :  { %s75_s26 = sshll.u32 %s4625_s25, 4  ;;  %s76_s26 = int_to_ptr.vmem [resolvable:$true] %s75_s26 }
  0x11   :  { %78 = dma.hbm_to_vmem [thread:$0]  %s74_s24, 16, %s76_s26, [#allocation9]  }
  0x12   :  { %4609 = dma.done.wait [#allocation3], 32768  }
  0x13   :  { %4610 = vsyncadd [#allocation3], 4294934528 }
  0x14   :  { %4611 = dma.done.wait [#allocation6], 8256  }
  0x15   :  { %4612 = vsyncadd [#allocation6], 4294959040 }
  0x16   :  { %4613 = dma.done.wait [#allocation9], 48  }
  0x17   :  { %4614 = vsyncadd [#allocation9], 4294967248  ;;  %v2879_v0 = vld [vmem:[#allocation2 + $0xe0] sm:$0xf]  ;;  %v4139_v1 = vld [vmem:[#allocation2 + $0xec] sm:$0xf0] }
  0x18   :  { %v3007_v2 = vld [vmem:[#allocation2 + $0x1e0] sm:$0xf]  ;;  %v2880_v3 = vor.u32 %v4139_v1, %v2879_v0  ;;  %v4171_v4 = vld [vmem:[#allocation2 + $0x1ec] sm:$0xf0]  ;;  %s4626_s29 = smov [#allocation11]   ;;  %s2753_s9 = sshll.u32 %s4829_s7, 4  ;;  %s2754_s9 = int_to_ptr.hbm [resolvable:$true] %s2753_s9 }
  0x19   :  { %v3135_v5 = vld [vmem:[#allocation2 + $0x2e0] sm:$0xf]  ;;  %v4203_v6 = vld [vmem:[#allocation2 + $0x2ec] sm:$0xf0]  ;;  %v3008_v7 = vor.u32 %v4171_v4, %v3007_v2  ;;  %vm2744_vm0 = vcmask 25600  }
  0x1a   :  { %v3136_v8 = vor.u32 %v4203_v6, %v3135_v5  ;;  %v3263_v9 = vld [vmem:[#allocation2 + $0x3e0] sm:$0xf]  ;;  %v4235_v10 = vld [vmem:[#allocation2 + $0x3ec] sm:$0xf0]  ;;  %1664 = vmatpush.bf16.msra.mxu0 %v2880_v3 }
  0x1b   :  { %v2863_v11 = vld [vmem:[#allocation2 + $0xc0] sm:$0xf]  ;;  %v3264_v12 = vor.u32 %v4235_v10, %v3263_v9  ;;  %v4135_v13 = vld [vmem:[#allocation2 + $0xcc] sm:$0xf0]  ;;  %1677 = vmatpush.bf16.msra.mxu1 %v3008_v7 }
  0x1c   :  { %v2991_v14 = vld [vmem:[#allocation2 + $0x1c0] sm:$0xf]  ;;  %v4167_v15 = vld [vmem:[#allocation2 + $0x1cc] sm:$0xf0]  ;;  %1690 = vmatpush.bf16.msra.mxu2 %v3136_v8  ;;  %v2864_v16 = vor.u32 %v4135_v13, %v2863_v11 }
  0x1d   :  { %v2992_v17 = vor.u32 %v4167_v15, %v2991_v14  ;;  %v3119_v18 = vld [vmem:[#allocation2 + $0x2c0] sm:$0xf]  ;;  %v4199_v19 = vld [vmem:[#allocation2 + $0x2cc] sm:$0xf0]  ;;  %1703 = vmatpush.bf16.msra.mxu3 %v3264_v12 }
  0x1e   :  { %v3247_v20 = vld [vmem:[#allocation2 + $0x3c0] sm:$0xf]  ;;  %v3120_v21 = vor.u32 %v4199_v19, %v3119_v18  ;;  %v4231_v22 = vld [vmem:[#allocation2 + $0x3cc] sm:$0xf0]  ;;  %1665 = vmatpush.bf16.msra.mxu0 %v2864_v16 }
  0x1f   :  { %v2847_v23 = vld [vmem:[#allocation2 + $0xa0] sm:$0xf]  ;;  %v4131_v24 = vld [vmem:[#allocation2 + $0xac] sm:$0xf0]  ;;  %v3248_v25 = vor.u32 %v4231_v22, %v3247_v20  ;;  %1678 = vmatpush.bf16.msra.mxu1 %v2992_v17 }
  0x20   :  { %v2975_v26 = vld [vmem:[#allocation2 + $0x1a0] sm:$0xf]  ;;  %v4163_v27 = vld [vmem:[#allocation2 + $0x1ac] sm:$0xf0]  ;;  %v2848_v29 = vor.u32 %v4131_v24, %v2847_v23  ;;  %1691 = vmatpush.bf16.msra.mxu2 %v3120_v21 }
  0x21   :  { %v3103_v28 = vld [vmem:[#allocation2 + $0x2a0] sm:$0xf]  ;;  %v4195_v30 = vld [vmem:[#allocation2 + $0x2ac] sm:$0xf0]  ;;  %v2976_v33 = vor.u32 %v4163_v27, %v2975_v26  ;;  %1704 = vmatpush.bf16.msra.mxu3 %v3248_v25 }
  0x22   :  { %v3231_v31 = vld [vmem:[#allocation2 + $0x3a0] sm:$0xf]  ;;  %v4227_v32 = vld [vmem:[#allocation2 + $0x3ac] sm:$0xf0]  ;;  %v3104_v34 = vor.u32 %v4195_v30, %v3103_v28  ;;  %1666 = vmatpush.bf16.msra.mxu0 %v2848_v29 }
  0x23   :  { %v2831_v35 = vld [vmem:[#allocation2 + $0x80] sm:$0xf]  ;;  %v4127_v36 = vld [vmem:[#allocation2 + $0x8c] sm:$0xf0]  ;;  %v3232_v38 = vor.u32 %v4227_v32, %v3231_v31  ;;  %1679 = vmatpush.bf16.msra.mxu1 %v2976_v33 }
  0x24   :  { %v2959_v37 = vld [vmem:[#allocation2 + $0x180] sm:$0xf]  ;;  %v4159_v39 = vld [vmem:[#allocation2 + $0x18c] sm:$0xf0]  ;;  %v2832_v44 = vor.u32 %v4127_v36, %v2831_v35  ;;  %1692 = vmatpush.bf16.msra.mxu2 %v3104_v34 }
  0x25   :  { %v3087_v40 = vld [vmem:[#allocation2 + $0x280] sm:$0xf]  ;;  %v4191_v41 = vld [vmem:[#allocation2 + $0x28c] sm:$0xf0]  ;;  %v2960_v45 = vor.u32 %v4159_v39, %v2959_v37  ;;  %1705 = vmatpush.bf16.msra.mxu3 %v3232_v38 }
  0x26   :  { %v3215_v42 = vld [vmem:[#allocation2 + $0x380] sm:$0xf]  ;;  %v4223_v43 = vld [vmem:[#allocation2 + $0x38c] sm:$0xf0]  ;;  %v3088_v46 = vor.u32 %v4191_v41, %v3087_v40  ;;  %1667 = vmatpush.bf16.msra.mxu0 %v2832_v44 }
  0x27   :  { %v2815_v47 = vld [vmem:[#allocation2 + $0x60] sm:$0xf]  ;;  %v4123_v48 = vld [vmem:[#allocation2 + $0x6c] sm:$0xf0]  ;;  %v3216_v50 = vor.u32 %v4223_v43, %v3215_v42  ;;  %1680 = vmatpush.bf16.msra.mxu1 %v2960_v45 }
  0x28   :  { %v2943_v49 = vld [vmem:[#allocation2 + $0x160] sm:$0xf]  ;;  %v4155_v51 = vld [vmem:[#allocation2 + $0x16c] sm:$0xf0]  ;;  %v2816_v56 = vor.u32 %v4123_v48, %v2815_v47  ;;  %1693 = vmatpush.bf16.msra.mxu2 %v3088_v46 }
  0x29   :  { %v3071_v52 = vld [vmem:[#allocation2 + $0x260] sm:$0xf]  ;;  %v4187_v53 = vld [vmem:[#allocation2 + $0x26c] sm:$0xf0]  ;;  %v2944_v57 = vor.u32 %v4155_v51, %v2943_v49  ;;  %1706 = vmatpush.bf16.msra.mxu3 %v3216_v50 }
  0x2a   :  { %v3199_v54 = vld [vmem:[#allocation2 + $0x360] sm:$0xf]  ;;  %v4219_v55 = vld [vmem:[#allocation2 + $0x36c] sm:$0xf0]  ;;  %v3072_v58 = vor.u32 %v4187_v53, %v3071_v52  ;;  %1668 = vmatpush.bf16.msra.mxu0 %v2816_v56 }
  0x2b   :  { %v2799_v59 = vld [vmem:[#allocation2 + $0x40] sm:$0xf]  ;;  %v4119_v60 = vld [vmem:[#allocation2 + $0x4c] sm:$0xf0]  ;;  %v3200_v62 = vor.u32 %v4219_v55, %v3199_v54  ;;  %1681 = vmatpush.bf16.msra.mxu1 %v2944_v57 }
  0x2c   :  { %v2927_v61 = vld [vmem:[#allocation2 + $0x140] sm:$0xf]  ;;  %v4151_v63 = vld [vmem:[#allocation2 + $0x14c] sm:$0xf0]  ;;  %v2800_v4 = vor.u32 %v4119_v60, %v2799_v59  ;;  %1694 = vmatpush.bf16.msra.mxu2 %v3072_v58 }
  0x2d   :  { %v3055_v0 = vld [vmem:[#allocation2 + $0x240] sm:$0xf]  ;;  %v4183_v1 = vld [vmem:[#allocation2 + $0x24c] sm:$0xf0]  ;;  %v2928_v5 = vor.u32 %v4151_v63, %v2927_v61  ;;  %1707 = vmatpush.bf16.msra.mxu3 %v3200_v62 }
  0x2e   :  { %v3183_v2 = vld [vmem:[#allocation2 + $0x340] sm:$0xf]  ;;  %v4215_v3 = vld [vmem:[#allocation2 + $0x34c] sm:$0xf0]  ;;  %v3056_v6 = vor.u32 %v4183_v1, %v3055_v0  ;;  %1669 = vmatpush.bf16.msra.mxu0 %v2800_v4 }
  0x2f   :  { %v2783_v7 = vld [vmem:[#allocation2 + $0x20] sm:$0xf]  ;;  %v4115_v8 = vld [vmem:[#allocation2 + $0x2c] sm:$0xf0]  ;;  %v3184_v10 = vor.u32 %v4215_v3, %v3183_v2  ;;  %1682 = vmatpush.bf16.msra.mxu1 %v2928_v5  ;;  %v99_v2 = vld [vmem:[%s4822_s0] sm:$0xff] }
  0x30   :  { %v2911_v9 = vld [vmem:[#allocation2 + $0x120] sm:$0xf]  ;;  %v4147_v11 = vld [vmem:[#allocation2 + $0x12c] sm:$0xf0]  ;;  %v2784_v16 = vor.u32 %v4115_v8, %v2783_v7  ;;  %1695 = vmatpush.bf16.msra.mxu2 %v3056_v6  ;;  %367 = vst [vmem:[#allocation1] ss:$9 sm:$0xff] %v99_v2 }
  0x31   :  { %v3039_v12 = vld [vmem:[#allocation2 + $0x220] sm:$0xf]  ;;  %v4179_v13 = vld [vmem:[#allocation2 + $0x22c] sm:$0xf0]  ;;  %v2912_v19 = vor.u32 %v4147_v11, %v2911_v9  ;;  %1708 = vmatpush.bf16.msra.mxu3 %v3184_v10  ;;  %v2881_v2 = vld [vmem:[#allocation2 + $0xf0] sm:$0xf0] }
  0x32   :  { %v3167_v14 = vld [vmem:[#allocation2 + $0x320] sm:$0xf]  ;;  %v4211_v15 = vld [vmem:[#allocation2 + $0x32c] sm:$0xf0]  ;;  %v3040_v20 = vor.u32 %v4179_v13, %v3039_v12  ;;  %1670 = vmatpush.bf16.msra.mxu0 %v2784_v16 }
  0x33   :  { %v2767_v17 = vld [vmem:[#allocation2] sm:$0xf]  ;;  %v4111_v18 = vld [vmem:[#allocation2 + $0xc] sm:$0xf0]  ;;  %v3168_v24 = vor.u32 %v4211_v15, %v3167_v14  ;;  %1683 = vmatpush.bf16.msra.mxu1 %v2912_v19 }
  0x34   :  { %v2895_v21 = vld [vmem:[#allocation2 + $0x100] sm:$0xf]  ;;  %v4143_v22 = vld [vmem:[#allocation2 + $0x10c] sm:$0xf0]  ;;  %v2768_v31 = vor.u32 %v4111_v18, %v2767_v17  ;;  %1696 = vmatpush.bf16.msra.mxu2 %v3040_v20 }
  0x35   :  { %v3023_v23 = vld [vmem:[#allocation2 + $0x200] sm:$0xf]  ;;  %v4175_v25 = vld [vmem:[#allocation2 + $0x20c] sm:$0xf0]  ;;  %v2896_v35 = vor.u32 %v4143_v22, %v2895_v21  ;;  %1709 = vmatpush.bf16.msra.mxu3 %v3168_v24 }
  0x36   :  { %v3151_v26 = vld [vmem:[#allocation2 + $0x300] sm:$0xf]  ;;  %v4207_v27 = vld [vmem:[#allocation2 + $0x30c] sm:$0xf0]  ;;  %v3024_v36 = vor.u32 %v4175_v25, %v3023_v23  ;;  %1671 = vmatpush.bf16.msra.mxu0 %v2768_v31 }
  0x37   :  { %v3391_v28 = vld [vmem:[#allocation2 + $0x4e0] sm:$0xf]  ;;  %v4267_v29 = vld [vmem:[#allocation2 + $0x4ec] sm:$0xf0]  ;;  %v3152_v39 = vor.u32 %v4207_v27, %v3151_v26  ;;  %1684 = vmatpush.bf16.msra.mxu1 %v2896_v35 }
  0x38   :  { %v3519_v30 = vld [vmem:[#allocation2 + $0x5e0] sm:$0xf]  ;;  %v4299_v32 = vld [vmem:[#allocation2 + $0x5ec] sm:$0xf0]  ;;  %v3392_v40 = vor.u32 %v4267_v29, %v3391_v28  ;;  %1697 = vmatpush.bf16.msra.mxu2 %v3024_v36  ;;  %v4687_v28 = vld [vmem:[#allocation1] sm:$0xff] }
  0x39   :  { %v3647_v33 = vld [vmem:[#allocation2 + $0x6e0] sm:$0xf]  ;;  %v4331_v34 = vld [vmem:[#allocation2 + $0x6ec] sm:$0xf0]  ;;  %v3520_v41 = vor.u32 %v4299_v32, %v3519_v30  ;;  %1710 = vmatpush.bf16.msra.mxu3 %v3152_v39  ;;  %1672 = vmatmul.bf16.vlgmr.msra.gmra.mxu0 %v4687_v28 }
  0x3a   :  { %v3775_v37 = vld [vmem:[#allocation2 + $0x7e0] sm:$0xf]  ;;  %v4363_v38 = vld [vmem:[#allocation2 + $0x7ec] sm:$0xf0]  ;;  %v3648_v42 = vor.u32 %v4331_v34, %v3647_v33  ;;  %1716 = vmatpush.bf16.msrb.mxu0 %v3392_v40 }
  0x3b   :  { %v3375_v43 = vld [vmem:[#allocation2 + $0x4c0] sm:$0xf]  ;;  %v4263_v44 = vld [vmem:[#allocation2 + $0x4cc] sm:$0xf0]  ;;  %v3776_v46 = vor.u32 %v4363_v38, %v3775_v37  ;;  %1729 = vmatpush.bf16.msrb.mxu1 %v3520_v41 }
  0x3c   :  { %v3503_v45 = vld [vmem:[#allocation2 + $0x5c0] sm:$0xf]  ;;  %v4295_v47 = vld [vmem:[#allocation2 + $0x5cc] sm:$0xf0]  ;;  %v3376_v52 = vor.u32 %v4263_v44, %v3375_v43  ;;  %1742 = vmatpush.bf16.msrb.mxu2 %v3648_v42 }
  0x3d   :  { %v3631_v48 = vld [vmem:[#allocation2 + $0x6c0] sm:$0xf]  ;;  %v4327_v49 = vld [vmem:[#allocation2 + $0x6cc] sm:$0xf0]  ;;  %v3504_v53 = vor.u32 %v4295_v47, %v3503_v45  ;;  %1755 = vmatpush.bf16.msrb.mxu3 %v3776_v46 }
  0x3e   :  { %v3759_v50 = vld [vmem:[#allocation2 + $0x7c0] sm:$0xf]  ;;  %v4359_v51 = vld [vmem:[#allocation2 + $0x7cc] sm:$0xf0]  ;;  %v3632_v54 = vor.u32 %v4327_v49, %v3631_v48  ;;  %1717 = vmatpush.bf16.msrb.mxu0 %v3376_v52 }
  0x3f   :  { %v3359_v55 = vld [vmem:[#allocation2 + $0x4a0] sm:$0xf]  ;;  %v4259_v56 = vld [vmem:[#allocation2 + $0x4ac] sm:$0xf0]  ;;  %v3760_v58 = vor.u32 %v4359_v51, %v3759_v50  ;;  %1730 = vmatpush.bf16.msrb.mxu1 %v3504_v53 }
  0x40   :  { %v3487_v57 = vld [vmem:[#allocation2 + $0x5a0] sm:$0xf]  ;;  %v4291_v59 = vld [vmem:[#allocation2 + $0x5ac] sm:$0xf0]  ;;  %v3360_v0 = vor.u32 %v4259_v56, %v3359_v55  ;;  %1743 = vmatpush.bf16.msrb.mxu2 %v3632_v54 }
  0x41   :  { %v3615_v60 = vld [vmem:[#allocation2 + $0x6a0] sm:$0xf]  ;;  %v4323_v61 = vld [vmem:[#allocation2 + $0x6ac] sm:$0xf0]  ;;  %v3488_v3 = vor.u32 %v4291_v59, %v3487_v57  ;;  %1756 = vmatpush.bf16.msrb.mxu3 %v3760_v58 }
  0x42   :  { %v3743_v62 = vld [vmem:[#allocation2 + $0x7a0] sm:$0xf]  ;;  %v4355_v63 = vld [vmem:[#allocation2 + $0x7ac] sm:$0xf0]  ;;  %v3616_v4 = vor.u32 %v4323_v61, %v3615_v60  ;;  %1718 = vmatpush.bf16.msrb.mxu0 %v3360_v0 }
  0x43   :  { %v3343_v1 = vld [vmem:[#allocation2 + $0x480] sm:$0xf]  ;;  %v4255_v5 = vld [vmem:[#allocation2 + $0x48c] sm:$0xf0]  ;;  %v3744_v7 = vor.u32 %v4355_v63, %v3743_v62  ;;  %1731 = vmatpush.bf16.msrb.mxu1 %v3488_v3  ;;  %v4169_v3 = vld [vmem:[#allocation2 + $0x1e4] sm:$0xf] }
  0x44   :  { %v3471_v6 = vld [vmem:[#allocation2 + $0x580] sm:$0xf]  ;;  %v4287_v8 = vld [vmem:[#allocation2 + $0x58c] sm:$0xf0]  ;;  %v3344_v13 = vor.u32 %v4255_v5, %v3343_v1  ;;  %1744 = vmatpush.bf16.msrb.mxu2 %v3616_v4  ;;  %v4137_v1 = vld [vmem:[#allocation2 + $0xe4] sm:$0xf] }
  0x45   :  { %v3599_v9 = vld [vmem:[#allocation2 + $0x680] sm:$0xf]  ;;  %v4319_v10 = vld [vmem:[#allocation2 + $0x68c] sm:$0xf0]  ;;  %v3472_v14 = vor.u32 %v4287_v8, %v3471_v6  ;;  %1757 = vmatpush.bf16.msrb.mxu3 %v3744_v7  ;;  %v3009_v5 = vld [vmem:[#allocation2 + $0x1f0] sm:$0xf0] }
  0x46   :  { %v3727_v11 = vld [vmem:[#allocation2 + $0x780] sm:$0xf]  ;;  %v4351_v12 = vld [vmem:[#allocation2 + $0x78c] sm:$0xf0]  ;;  %v3600_v15 = vor.u32 %v4319_v10, %v3599_v9  ;;  %1719 = vmatpush.bf16.msrb.mxu0 %v3344_v13  ;;  %v4201_v6 = vld [vmem:[#allocation2 + $0x2e4] sm:$0xf]  ;;  %v2884_v13 = vor.u32 %v4137_v1, %v2881_v2 }
  0x47   :  { %v3327_v16 = vld [vmem:[#allocation2 + $0x460] sm:$0xf]  ;;  %v4251_v17 = vld [vmem:[#allocation2 + $0x46c] sm:$0xf0]  ;;  %v3728_v19 = vor.u32 %v4351_v12, %v3727_v11  ;;  %1732 = vmatpush.bf16.msrb.mxu1 %v3472_v14  ;;  %v3137_v7 = vld [vmem:[#allocation2 + $0x2f0] sm:$0xf0]  ;;  %v3012_v14 = vor.u32 %v4169_v3, %v3009_v5 }
  0x48   :  { %v3455_v18 = vld [vmem:[#allocation2 + $0x560] sm:$0xf]  ;;  %v4283_v20 = vld [vmem:[#allocation2 + $0x56c] sm:$0xf0]  ;;  %v3328_v26 = vor.u32 %v4251_v17, %v3327_v16  ;;  %1745 = vmatpush.bf16.msrb.mxu2 %v3600_v15  ;;  %v4233_v10 = vld [vmem:[#allocation2 + $0x3e4] sm:$0xf]  ;;  %v3140_v15 = vor.u32 %v4201_v6, %v3137_v7 }
  0x49   :  { %v3583_v21 = vld [vmem:[#allocation2 + $0x660] sm:$0xf]  ;;  %v4315_v22 = vld [vmem:[#allocation2 + $0x66c] sm:$0xf0]  ;;  %v3456_v30 = vor.u32 %v4283_v20, %v3455_v18  ;;  %1758 = vmatpush.bf16.msrb.mxu3 %v3728_v19  ;;  %v3265_v11 = vld [vmem:[#allocation2 + $0x3f0] sm:$0xf0] }
  0x4a   :  { %v3711_v23 = vld [vmem:[#allocation2 + $0x760] sm:$0xf]  ;;  %v4347_v24 = vld [vmem:[#allocation2 + $0x76c] sm:$0xf0]  ;;  %v3584_v31 = vor.u32 %v4315_v22, %v3583_v21  ;;  %1720 = vmatpush.bf16.msrb.mxu0 %v3328_v26  ;;  %v4133_v16 = vld [vmem:[#allocation2 + $0xc4] sm:$0xf]  ;;  %v3268_v19 = vor.u32 %v4233_v10, %v3265_v11 }
  0x4b   :  { %v3311_v25 = vld [vmem:[#allocation2 + $0x440] sm:$0xf]  ;;  %v4685_v27 = vld [vmem:[#allocation1 + $0x12] sm:$0xff]  ;;  %v4689_v29 = vld [vmem:[#allocation1 + $0x1b] sm:$0xff]  ;;  %v3712_v35 = vor.u32 %v4347_v24, %v3711_v23  ;;  %1733 = vmatpush.bf16.msrb.mxu1 %v3456_v30 }
  0x4c   :  { %v4247_v32 = vld [vmem:[#allocation2 + $0x44c] sm:$0xf0]  ;;  %v3439_v33 = vld [vmem:[#allocation2 + $0x540] sm:$0xf]  ;;  %1698 = vmatmul.bf16.vlgmr.msra.gmra.mxu2 %v4685_v27  ;;  %1711 = vmatmul.bf16.vlgmr.msra.gmra.mxu3 %v4689_v29  ;;  %v2865_v17 = vld [vmem:[#allocation2 + $0xd0] sm:$0xf0] }
  0x4d   :  { %v4691_v34 = vld [vmem:[#allocation1 + $0x9] sm:$0xff]  ;;  %v4279_v36 = vld [vmem:[#allocation2 + $0x54c] sm:$0xf0]  ;;  %v3312_v41 = vor.u32 %v4247_v32, %v3311_v25  ;;  %1746 = vmatpush.bf16.msrb.mxu2 %v3584_v31  ;;  %1759 = vmatpush.bf16.msrb.mxu3 %v3712_v35  ;;  %v2993_v20 = vld [vmem:[#allocation2 + $0x1d0] sm:$0xf0]  ;;  %v2868_v26 = vor.u32 %v4133_v16, %v2865_v17 }
  0x4e   :  { %v3567_v37 = vld [vmem:[#allocation2 + $0x640] sm:$0xf]  ;;  %v4311_v38 = vld [vmem:[#allocation2 + $0x64c] sm:$0xf0]  ;;  %1685 = vmatmul.bf16.vlgmr.msra.gmra.mxu1 %v4691_v34  ;;  %v3440_v42 = vor.u32 %v4279_v36, %v3439_v33  ;;  %v4165_v18 = vld [vmem:[#allocation2 + $0x1c4] sm:$0xf] }
  0x4f   :  { %v3695_v39 = vld [vmem:[#allocation2 + $0x740] sm:$0xf]  ;;  %v4343_v40 = vld [vmem:[#allocation2 + $0x74c] sm:$0xf0]  ;;  %v3568_v43 = vor.u32 %v4311_v38, %v3567_v37  ;;  %1721 = vmatpush.bf16.msrb.mxu0 %v3312_v41  ;;  %v4197_v21 = vld [vmem:[#allocation2 + $0x2c4] sm:$0xf]  ;;  %v2996_v33 = vor.u32 %v4165_v18, %v2993_v20 }
  0x50   :  { %v3295_v44 = vld [vmem:[#allocation2 + $0x420] sm:$0xf]  ;;  %v4243_v45 = vld [vmem:[#allocation2 + $0x42c] sm:$0xf0]  ;;  %v3696_v47 = vor.u32 %v4343_v40, %v3695_v39  ;;  %1734 = vmatpush.bf16.msrb.mxu1 %v3440_v42  ;;  %v3121_v22 = vld [vmem:[#allocation2 + $0x2d0] sm:$0xf0] }
  0x51   :  { %v3423_v46 = vld [vmem:[#allocation2 + $0x520] sm:$0xf]  ;;  %v4275_v48 = vld [vmem:[#allocation2 + $0x52c] sm:$0xf0]  ;;  %v3296_v53 = vor.u32 %v4243_v45, %v3295_v44  ;;  %1747 = vmatpush.bf16.msrb.mxu2 %v3568_v43  ;;  %v4229_v23 = vld [vmem:[#allocation2 + $0x3c4] sm:$0xf]  ;;  %v3124_v35 = vor.u32 %v4197_v21, %v3121_v22 }
  0x52   :  { %v3551_v49 = vld [vmem:[#allocation2 + $0x620] sm:$0xf]  ;;  %v4307_v50 = vld [vmem:[#allocation2 + $0x62c] sm:$0xf0]  ;;  %v3424_v56 = vor.u32 %v4275_v48, %v3423_v46  ;;  %1760 = vmatpush.bf16.msrb.mxu3 %v3696_v47  ;;  %v3249_v24 = vld [vmem:[#allocation2 + $0x3d0] sm:$0xf0] }
  0x53   :  { %v3679_v51 = vld [vmem:[#allocation2 + $0x720] sm:$0xf]  ;;  %v4339_v52 = vld [vmem:[#allocation2 + $0x72c] sm:$0xf0]  ;;  %v3552_v57 = vor.u32 %v4307_v50, %v3551_v49  ;;  %1722 = vmatpush.bf16.msrb.mxu0 %v3296_v53  ;;  %v4129_v30 = vld [vmem:[#allocation2 + $0xa4] sm:$0xf]  ;;  %v3252_v39 = vor.u32 %v4229_v23, %v3249_v24 }
  0x54   :  { %v3279_v54 = vld [vmem:[#allocation2 + $0x400] sm:$0xf]  ;;  %v4239_v55 = vld [vmem:[#allocation2 + $0x40c] sm:$0xf0]  ;;  %v3680_v61 = vor.u32 %v4339_v52, %v3679_v51  ;;  %1735 = vmatpush.bf16.msrb.mxu1 %v3424_v56  ;;  %v4701_v32 = vld [vmem:[#allocation1 + $0x3f] sm:$0xff] }
  0x55   :  { %v3407_v58 = vld [vmem:[#allocation2 + $0x500] sm:$0xf]  ;;  %v4271_v59 = vld [vmem:[#allocation2 + $0x50c] sm:$0xf0]  ;;  %v3280_v4 = vor.u32 %v4239_v55, %v3279_v54  ;;  %1748 = vmatpush.bf16.msrb.mxu2 %v3552_v57  ;;  %v2849_v36 = vld [vmem:[#allocation2 + $0xb0] sm:$0xf0] }
  0x56   :  { %v3535_v60 = vld [vmem:[#allocation2 + $0x600] sm:$0xf]  ;;  %v4303_v62 = vld [vmem:[#allocation2 + $0x60c] sm:$0xf0]  ;;  %v3408_v8 = vor.u32 %v4271_v59, %v3407_v58  ;;  %1761 = vmatpush.bf16.msrb.mxu3 %v3680_v61  ;;  %v4161_v37 = vld [vmem:[#allocation2 + $0x1a4] sm:$0xf]  ;;  %v2852_v45 = vor.u32 %v4129_v30, %v2849_v36 }
  0x57   :  { %v3663_v63 = vld [vmem:[#allocation2 + $0x700] sm:$0xf]  ;;  %v4335_v0 = vld [vmem:[#allocation2 + $0x70c] sm:$0xf0]  ;;  %v3536_v9 = vor.u32 %v4303_v62, %v3535_v60  ;;  %1723 = vmatpush.bf16.msrb.mxu0 %v3280_v4  ;;  %v4703_v38 = vld [vmem:[#allocation1 + $0x2d] sm:$0xff] }
  0x58   :  { %v3664_v12 = vor.u32 %v4335_v0, %v3663_v63  ;;  %1736 = vmatpush.bf16.msrb.mxu1 %v3408_v8  ;;  %v4697_v25 = vld [vmem:[#allocation1 + $0x36] sm:$0xff]  ;;  %v4699_v31 = vld [vmem:[#allocation1 + $0x24] sm:$0xff]  ;;  %v4193_v41 = vld [vmem:[#allocation2 + $0x2a4] sm:$0xf] }
  0x59   :  { %1749 = vmatpush.bf16.msrb.mxu2 %v3536_v9  ;;  %v2977_v40 = vld [vmem:[#allocation2 + $0x1b0] sm:$0xf0]  ;;  %v4225_v43 = vld [vmem:[#allocation2 + $0x3a4] sm:$0xf] }
  0x5a   :  { %1762 = vmatpush.bf16.msrb.mxu3 %v3664_v12  ;;  %v3105_v42 = vld [vmem:[#allocation2 + $0x2b0] sm:$0xf0]  ;;  %1724 = vmatmul.bf16.vlgmr.msrb.gmra.mxu0 %v4699_v31  ;;  %v2980_v46 = vor.u32 %v4161_v37, %v2977_v40  ;;  %v4125_v48 = vld [vmem:[#allocation2 + $0x84] sm:$0xf] }
  0x5b   :  { %1768 = vmatpush.bf16.msra.mxu0 %v2884_v13  ;;  %v3233_v44 = vld [vmem:[#allocation2 + $0x3b0] sm:$0xf0]  ;;  %v3108_v47 = vor.u32 %v4193_v41, %v3105_v42  ;;  %v4157_v50 = vld [vmem:[#allocation2 + $0x184] sm:$0xf] }
  0x5c   :  { %1781 = vmatpush.bf16.msra.mxu1 %v3012_v14  ;;  %1750 = vmatmul.bf16.vlgmr.msrb.gmra.mxu2 %v4697_v25  ;;  %v2833_v49 = vld [vmem:[#allocation2 + $0x90] sm:$0xf0]  ;;  %v3236_v51 = vor.u32 %v4225_v43, %v3233_v44  ;;  %v4189_v53 = vld [vmem:[#allocation2 + $0x284] sm:$0xf] }
  0x5d   :  { %1794 = vmatpush.bf16.msra.mxu2 %v3140_v15  ;;  %1763 = vmatmul.bf16.vlgmr.msrb.gmra.mxu3 %v4701_v32  ;;  %v2961_v52 = vld [vmem:[#allocation2 + $0x190] sm:$0xf0]  ;;  %v4221_v55 = vld [vmem:[#allocation2 + $0x384] sm:$0xf]  ;;  %v2836_v57 = vor.u32 %v4125_v48, %v2833_v49 }
  0x5e   :  { %1807 = vmatpush.bf16.msra.mxu3 %v3268_v19  ;;  %1737 = vmatmul.bf16.vlgmr.msrb.gmra.mxu1 %v4703_v38  ;;  %v3089_v54 = vld [vmem:[#allocation2 + $0x290] sm:$0xf0]  ;;  %v2964_v58 = vor.u32 %v4157_v50, %v2961_v52  ;;  %v4121_v60 = vld [vmem:[#allocation2 + $0x64] sm:$0xf] }
  0x5f   :  { %1769 = vmatpush.bf16.msra.mxu0 %v2868_v26  ;;  %v3217_v56 = vld [vmem:[#allocation2 + $0x390] sm:$0xf0]  ;;  %v3092_v59 = vor.u32 %v4189_v53, %v3089_v54  ;;  %v4153_v62 = vld [vmem:[#allocation2 + $0x164] sm:$0xf] }
  0x60   :  { %1782 = vmatpush.bf16.msra.mxu1 %v2996_v33  ;;  %v2817_v61 = vld [vmem:[#allocation2 + $0x70] sm:$0xf0]  ;;  %v3220_v63 = vor.u32 %v4221_v55, %v3217_v56  ;;  %v4185_v1 = vld [vmem:[#allocation2 + $0x264] sm:$0xf] }
  0x61   :  { %1795 = vmatpush.bf16.msra.mxu2 %v3124_v35  ;;  %v2945_v0 = vld [vmem:[#allocation2 + $0x170] sm:$0xf0]  ;;  %v4217_v3 = vld [vmem:[#allocation2 + $0x364] sm:$0xf]  ;;  %v2820_v5 = vor.u32 %v4121_v60, %v2817_v61 }
  0x62   :  { %1808 = vmatpush.bf16.msra.mxu3 %v3252_v39  ;;  %v3073_v2 = vld [vmem:[#allocation2 + $0x270] sm:$0xf0]  ;;  %v2948_v6 = vor.u32 %v4153_v62, %v2945_v0  ;;  %v4117_v8 = vld [vmem:[#allocation2 + $0x44] sm:$0xf] }
  0x63   :  { %1770 = vmatpush.bf16.msra.mxu0 %v2852_v45  ;;  %v3201_v4 = vld [vmem:[#allocation2 + $0x370] sm:$0xf0]  ;;  %v3076_v7 = vor.u32 %v4185_v1, %v3073_v2  ;;  %v4149_v10 = vld [vmem:[#allocation2 + $0x144] sm:$0xf] }
  0x64   :  { %1783 = vmatpush.bf16.msra.mxu1 %v2980_v46  ;;  %v2801_v9 = vld [vmem:[#allocation2 + $0x50] sm:$0xf0]  ;;  %v3204_v11 = vor.u32 %v4217_v3, %v3201_v4  ;;  %v4181_v13 = vld [vmem:[#allocation2 + $0x244] sm:$0xf] }
  0x65   :  { %1796 = vmatpush.bf16.msra.mxu2 %v3108_v47  ;;  %v2929_v12 = vld [vmem:[#allocation2 + $0x150] sm:$0xf0]  ;;  %v4213_v15 = vld [vmem:[#allocation2 + $0x344] sm:$0xf]  ;;  %v2804_v17 = vor.u32 %v4117_v8, %v2801_v9 }
  0x66   :  { %1809 = vmatpush.bf16.msra.mxu3 %v3236_v51  ;;  %v3057_v14 = vld [vmem:[#allocation2 + $0x250] sm:$0xf0]  ;;  %v2932_v18 = vor.u32 %v4149_v10, %v2929_v12  ;;  %v4113_v20 = vld [vmem:[#allocation2 + $0x24] sm:$0xf] }
  0x67   :  { %1771 = vmatpush.bf16.msra.mxu0 %v2836_v57  ;;  %v3185_v16 = vld [vmem:[#allocation2 + $0x350] sm:$0xf0]  ;;  %v3060_v19 = vor.u32 %v4181_v13, %v3057_v14  ;;  %v4145_v22 = vld [vmem:[#allocation2 + $0x124] sm:$0xf] }
  0x68   :  { %1784 = vmatpush.bf16.msra.mxu1 %v2964_v58  ;;  %v2785_v21 = vld [vmem:[#allocation2 + $0x30] sm:$0xf0]  ;;  %v3188_v23 = vor.u32 %v4213_v15, %v3185_v16  ;;  %v4177_v26 = vld [vmem:[#allocation2 + $0x224] sm:$0xf] }
  0x69   :  { %1797 = vmatpush.bf16.msra.mxu2 %v3092_v59  ;;  %v2913_v24 = vld [vmem:[#allocation2 + $0x130] sm:$0xf0]  ;;  %v4209_v33 = vld [vmem:[#allocation2 + $0x324] sm:$0xf]  ;;  %v2788_v36 = vor.u32 %v4113_v20, %v2785_v21 }
  0x6a   :  { %1810 = vmatpush.bf16.msra.mxu3 %v3220_v63  ;;  %v3041_v30 = vld [vmem:[#allocation2 + $0x230] sm:$0xf0]  ;;  %v4109_v37 = vld [vmem:[#allocation2 + $0x4] sm:$0xf]  ;;  %v2916_v41 = vor.u32 %v4145_v22, %v2913_v24 }
  0x6b   :  { %1772 = vmatpush.bf16.msra.mxu0 %v2820_v5  ;;  %v3169_v35 = vld [vmem:[#allocation2 + $0x330] sm:$0xf0]  ;;  %v4141_v40 = vld [vmem:[#allocation2 + $0x104] sm:$0xf]  ;;  %v3044_v42 = vor.u32 %v4177_v26, %v3041_v30 }
  0x6c   :  { %1785 = vmatpush.bf16.msra.mxu1 %v2948_v6  ;;  %v2769_v39 = vld [vmem:[#allocation2 + $0x10] sm:$0xf0]  ;;  %v4173_v44 = vld [vmem:[#allocation2 + $0x204] sm:$0xf]  ;;  %v3172_v46 = vor.u32 %v4209_v33, %v3169_v35 }
  0x6d   :  { %1798 = vmatpush.bf16.msra.mxu2 %v3076_v7  ;;  %v2897_v43 = vld [vmem:[#allocation2 + $0x110] sm:$0xf0]  ;;  %v4205_v47 = vld [vmem:[#allocation2 + $0x304] sm:$0xf]  ;;  %v2772_v52 = vor.u32 %v4109_v37, %v2769_v39 }
  0x6e   :  { %1811 = vmatpush.bf16.msra.mxu3 %v3204_v11  ;;  %v3025_v45 = vld [vmem:[#allocation2 + $0x210] sm:$0xf0]  ;;  %v4265_v49 = vld [vmem:[#allocation2 + $0x4e4] sm:$0xf]  ;;  %v2900_v56 = vor.u32 %v4141_v40, %v2897_v43 }
  0x6f   :  { %1773 = vmatpush.bf16.msra.mxu0 %v2804_v17  ;;  %v3153_v48 = vld [vmem:[#allocation2 + $0x310] sm:$0xf0]  ;;  %v4297_v51 = vld [vmem:[#allocation2 + $0x5e4] sm:$0xf]  ;;  %v3028_v57 = vor.u32 %v4173_v44, %v3025_v45 }
  0x70   :  { %1786 = vmatpush.bf16.msra.mxu1 %v2932_v18  ;;  %v3393_v50 = vld [vmem:[#allocation2 + $0x4f0] sm:$0xf0]  ;;  %v4329_v54 = vld [vmem:[#allocation2 + $0x6e4] sm:$0xf]  ;;  %v3156_v60 = vor.u32 %v4205_v47, %v3153_v48 }
  0x71   :  { %1799 = vmatpush.bf16.msra.mxu2 %v3060_v19  ;;  %v3521_v53 = vld [vmem:[#allocation2 + $0x5f0] sm:$0xf0]  ;;  %v4361_v58 = vld [vmem:[#allocation2 + $0x7e4] sm:$0xf]  ;;  %v3396_v61 = vor.u32 %v4265_v49, %v3393_v50 }
  0x72   :  { %1812 = vmatpush.bf16.msra.mxu3 %v3188_v23  ;;  %v3649_v55 = vld [vmem:[#allocation2 + $0x6f0] sm:$0xf0]  ;;  %v3524_v62 = vor.u32 %v4297_v51, %v3521_v53  ;;  %v4261_v0 = vld [vmem:[#allocation2 + $0x4c4] sm:$0xf] }
  0x73   :  { %1774 = vmatpush.bf16.msra.mxu0 %v2788_v36  ;;  %v3777_v59 = vld [vmem:[#allocation2 + $0x7f0] sm:$0xf0]  ;;  %v3652_v63 = vor.u32 %v4329_v54, %v3649_v55  ;;  %v4293_v2 = vld [vmem:[#allocation2 + $0x5c4] sm:$0xf] }
  0x74   :  { %1787 = vmatpush.bf16.msra.mxu1 %v2916_v41  ;;  %v3377_v1 = vld [vmem:[#allocation2 + $0x4d0] sm:$0xf0]  ;;  %v3780_v3 = vor.u32 %v4361_v58, %v3777_v59  ;;  %v4325_v5 = vld [vmem:[#allocation2 + $0x6c4] sm:$0xf] }
  0x75   :  { %1800 = vmatpush.bf16.msra.mxu2 %v3044_v42  ;;  %v3505_v4 = vld [vmem:[#allocation2 + $0x5d0] sm:$0xf0]  ;;  %v4357_v7 = vld [vmem:[#allocation2 + $0x7c4] sm:$0xf]  ;;  %v3380_v9 = vor.u32 %v4261_v0, %v3377_v1 }
  0x76   :  { %1813 = vmatpush.bf16.msra.mxu3 %v3172_v46  ;;  %v3633_v6 = vld [vmem:[#allocation2 + $0x6d0] sm:$0xf0]  ;;  %v3508_v10 = vor.u32 %v4293_v2, %v3505_v4  ;;  %v4257_v12 = vld [vmem:[#allocation2 + $0x4a4] sm:$0xf] }
  0x77   :  { %1775 = vmatpush.bf16.msra.mxu0 %v2772_v52  ;;  %v3761_v8 = vld [vmem:[#allocation2 + $0x7d0] sm:$0xf0]  ;;  %v3636_v11 = vor.u32 %v4325_v5, %v3633_v6  ;;  %v4289_v14 = vld [vmem:[#allocation2 + $0x5a4] sm:$0xf] }
  0x78   :  { %1788 = vmatpush.bf16.msra.mxu1 %v2900_v56  ;;  %v3361_v13 = vld [vmem:[#allocation2 + $0x4b0] sm:$0xf0]  ;;  %v3764_v15 = vor.u32 %v4357_v7, %v3761_v8  ;;  %v4321_v17 = vld [vmem:[#allocation2 + $0x6a4] sm:$0xf] }
  0x79   :  { %1801 = vmatpush.bf16.msra.mxu2 %v3028_v57  ;;  %v3489_v16 = vld [vmem:[#allocation2 + $0x5b0] sm:$0xf0]  ;;  %v4353_v19 = vld [vmem:[#allocation2 + $0x7a4] sm:$0xf]  ;;  %v3364_v21 = vor.u32 %v4257_v12, %v3361_v13 }
  0x7a   :  { %1814 = vmatpush.bf16.msra.mxu3 %v3156_v60  ;;  %v3617_v18 = vld [vmem:[#allocation2 + $0x6b0] sm:$0xf0]  ;;  %1776 = vmatmul.bf16.vlgmr.msra.gmra.mxu0 %v4687_v28  ;;  %v3492_v22 = vor.u32 %v4289_v14, %v3489_v16  ;;  %v4253_v24 = vld [vmem:[#allocation2 + $0x484] sm:$0xf] }
  0x7b   :  { %1820 = vmatpush.bf16.msrb.mxu0 %v3396_v61  ;;  %v3745_v20 = vld [vmem:[#allocation2 + $0x7b0] sm:$0xf0]  ;;  %1789 = vmatmul.bf16.vlgmr.msra.gmra.mxu1 %v4691_v34  ;;  %v3620_v23 = vor.u32 %v4321_v17, %v3617_v18  ;;  %v4285_v30 = vld [vmem:[#allocation2 + $0x584] sm:$0xf] }
  0x7c   :  { %1833 = vmatpush.bf16.msrb.mxu1 %v3524_v62  ;;  %1802 = vmatmul.bf16.vlgmr.msra.gmra.mxu2 %v4685_v27  ;;  %v3345_v26 = vld [vmem:[#allocation2 + $0x490] sm:$0xf0]  ;;  %v3748_v33 = vor.u32 %v4353_v19, %v3745_v20  ;;  %v4317_v36 = vld [vmem:[#allocation2 + $0x684] sm:$0xf] }
  0x7d   :  { %1846 = vmatpush.bf16.msrb.mxu2 %v3652_v63  ;;  %1815 = vmatmul.bf16.vlgmr.msra.gmra.mxu3 %v4689_v29  ;;  %v3473_v35 = vld [vmem:[#allocation2 + $0x590] sm:$0xf0]  ;;  %v4349_v39 = vld [vmem:[#allocation2 + $0x784] sm:$0xf]  ;;  %v3348_v41 = vor.u32 %v4253_v24, %v3345_v26  ;;  %v2887_v26 = vld [vmem:[#allocation2 + $0xe8] sm:$0xf] }
  0x7e   :  { %1859 = vmatpush.bf16.msrb.mxu3 %v3780_v3  ;;  %v3601_v37 = vld [vmem:[#allocation2 + $0x690] sm:$0xf0]  ;;  %v3476_v42 = vor.u32 %v4285_v30, %v3473_v35  ;;  %v4249_v44 = vld [vmem:[#allocation2 + $0x464] sm:$0xf]  ;;  %v4140_v30 = vld [vmem:[#allocation2 + $0xf4] sm:$0xf0] }
  0x7f   :  { %1821 = vmatpush.bf16.msrb.mxu0 %v3380_v9  ;;  %v3729_v40 = vld [vmem:[#allocation2 + $0x790] sm:$0xf0]  ;;  %v3604_v43 = vor.u32 %v4317_v36, %v3601_v37  ;;  %v4281_v46 = vld [vmem:[#allocation2 + $0x564] sm:$0xf]  ;;  %v4172_v36 = vld [vmem:[#allocation2 + $0x1f4] sm:$0xf0] }
  0x80   :  { %1834 = vmatpush.bf16.msrb.mxu1 %v3508_v10  ;;  %v3329_v45 = vld [vmem:[#allocation2 + $0x470] sm:$0xf0]  ;;  %v3732_v47 = vor.u32 %v4349_v39, %v3729_v40  ;;  %v4313_v49 = vld [vmem:[#allocation2 + $0x664] sm:$0xf]  ;;  %v3143_v37 = vld [vmem:[#allocation2 + $0x2e8] sm:$0xf] }
  0x81   :  { %1847 = vmatpush.bf16.msrb.mxu2 %v3636_v11  ;;  %v3457_v48 = vld [vmem:[#allocation2 + $0x570] sm:$0xf0]  ;;  %v4345_v51 = vld [vmem:[#allocation2 + $0x764] sm:$0xf]  ;;  %v3332_v53 = vor.u32 %v4249_v44, %v3329_v45  ;;  %v4204_v39 = vld [vmem:[#allocation2 + $0x2f4] sm:$0xf0]  ;;  %v2888_v45 = vor.u32 %v4140_v30, %v2887_v26 }
  0x82   :  { %1860 = vmatpush.bf16.msrb.mxu3 %v3764_v15  ;;  %v3585_v50 = vld [vmem:[#allocation2 + $0x670] sm:$0xf0]  ;;  %v3460_v54 = vor.u32 %v4281_v46, %v3457_v48  ;;  %v4245_v56 = vld [vmem:[#allocation2 + $0x444] sm:$0xf]  ;;  %v2871_v48 = vld [vmem:[#allocation2 + $0xc8] sm:$0xf] }
  0x83   :  { %1822 = vmatpush.bf16.msrb.mxu0 %v3364_v21  ;;  %v3713_v52 = vld [vmem:[#allocation2 + $0x770] sm:$0xf0]  ;;  %v3588_v55 = vor.u32 %v4313_v49, %v3585_v50  ;;  %v4277_v58 = vld [vmem:[#allocation2 + $0x544] sm:$0xf]  ;;  %v4136_v49 = vld [vmem:[#allocation2 + $0xd4] sm:$0xf0] }
  0x84   :  { %1835 = vmatpush.bf16.msrb.mxu1 %v3492_v22  ;;  %v3313_v57 = vld [vmem:[#allocation2 + $0x450] sm:$0xf0]  ;;  %v3716_v59 = vor.u32 %v4345_v51, %v3713_v52  ;;  %v4309_v61 = vld [vmem:[#allocation2 + $0x644] sm:$0xf]  ;;  %v2999_v50 = vld [vmem:[#allocation2 + $0x1c8] sm:$0xf] }
  0x85   :  { %1848 = vmatpush.bf16.msrb.mxu2 %v3620_v23  ;;  %v3441_v60 = vld [vmem:[#allocation2 + $0x550] sm:$0xf0]  ;;  %v4341_v63 = vld [vmem:[#allocation2 + $0x744] sm:$0xf]  ;;  %v3316_v1 = vor.u32 %v4245_v56, %v3313_v57  ;;  %v4168_v52 = vld [vmem:[#allocation2 + $0x1d4] sm:$0xf0]  ;;  %v2872_v57 = vor.u32 %v4136_v49, %v2871_v48 }
  0x86   :  { %1861 = vmatpush.bf16.msrb.mxu3 %v3748_v33  ;;  %v3569_v62 = vld [vmem:[#allocation2 + $0x650] sm:$0xf0]  ;;  %v3444_v2 = vor.u32 %v4277_v58, %v3441_v60  ;;  %v4241_v4 = vld [vmem:[#allocation2 + $0x424] sm:$0xf]  ;;  %v3015_v33 = vld [vmem:[#allocation2 + $0x1e8] sm:$0xf]  ;;  %v3000_v58 = vor.u32 %v4168_v52, %v2999_v50 }
  0x87   :  { %1823 = vmatpush.bf16.msrb.mxu0 %v3348_v41  ;;  %v3697_v0 = vld [vmem:[#allocation2 + $0x750] sm:$0xf0]  ;;  %v3572_v3 = vor.u32 %v4309_v61, %v3569_v62  ;;  %v4273_v6 = vld [vmem:[#allocation2 + $0x524] sm:$0xf]  ;;  %v3016_v46 = vor.u32 %v4172_v36, %v3015_v33  ;;  %v4232_v56 = vld [vmem:[#allocation2 + $0x3d4] sm:$0xf0] }
  0x88   :  { %1836 = vmatpush.bf16.msrb.mxu1 %v3476_v42  ;;  %v3297_v5 = vld [vmem:[#allocation2 + $0x430] sm:$0xf0]  ;;  %v3700_v7 = vor.u32 %v4341_v63, %v3697_v0  ;;  %v4305_v9 = vld [vmem:[#allocation2 + $0x624] sm:$0xf]  ;;  %v3271_v42 = vld [vmem:[#allocation2 + $0x3e8] sm:$0xf] }
  0x89   :  { %1849 = vmatpush.bf16.msrb.mxu2 %v3604_v43  ;;  %v3425_v8 = vld [vmem:[#allocation2 + $0x530] sm:$0xf0]  ;;  %v4337_v11 = vld [vmem:[#allocation2 + $0x724] sm:$0xf]  ;;  %v3300_v13 = vor.u32 %v4241_v4, %v3297_v5  ;;  %v4236_v43 = vld [vmem:[#allocation2 + $0x3f4] sm:$0xf0] }
  0x8a   :  { %1862 = vmatpush.bf16.msrb.mxu3 %v3732_v47  ;;  %v3553_v10 = vld [vmem:[#allocation2 + $0x630] sm:$0xf0]  ;;  %v4237_v14 = vld [vmem:[#allocation2 + $0x404] sm:$0xf]  ;;  %v3428_v16 = vor.u32 %v4273_v6, %v3425_v8  ;;  %v3144_v47 = vor.u32 %v4204_v39, %v3143_v37  ;;  %v3272_v51 = vor.u32 %v4236_v43, %v3271_v42  ;;  %v2855_v60 = vld [vmem:[#allocation2 + $0xa8] sm:$0xf] }
  0x8b   :  { %1824 = vmatpush.bf16.msrb.mxu0 %v3332_v53  ;;  %v3681_v12 = vld [vmem:[#allocation2 + $0x730] sm:$0xf0]  ;;  %v3556_v17 = vor.u32 %v4305_v9, %v3553_v10  ;;  %v4269_v18 = vld [vmem:[#allocation2 + $0x504] sm:$0xf]  ;;  %v3127_v53 = vld [vmem:[#allocation2 + $0x2c8] sm:$0xf] }
  0x8c   :  { %1837 = vmatpush.bf16.msrb.mxu1 %v3460_v54  ;;  %v3281_v15 = vld [vmem:[#allocation2 + $0x410] sm:$0xf0]  ;;  %v4301_v20 = vld [vmem:[#allocation2 + $0x604] sm:$0xf]  ;;  %v3684_v21 = vor.u32 %v4337_v11, %v3681_v12  ;;  %v4200_v54 = vld [vmem:[#allocation2 + $0x2d4] sm:$0xf0] }
  0x8d   :  { %1850 = vmatpush.bf16.msrb.mxu2 %v3588_v55  ;;  %v3409_v19 = vld [vmem:[#allocation2 + $0x510] sm:$0xf0]  ;;  %v4333_v23 = vld [vmem:[#allocation2 + $0x704] sm:$0xf]  ;;  %v3284_v35 = vor.u32 %v4237_v14, %v3281_v15  ;;  %v3255_v55 = vld [vmem:[#allocation2 + $0x3c8] sm:$0xf] }
  0x8e   :  { %1863 = vmatpush.bf16.msrb.mxu3 %v3716_v59  ;;  %v3537_v22 = vld [vmem:[#allocation2 + $0x610] sm:$0xf0]  ;;  %v3412_v40 = vor.u32 %v4269_v18, %v3409_v19  ;;  %v3128_v59 = vor.u32 %v4200_v54, %v3127_v53  ;;  %v4132_v61 = vld [vmem:[#allocation2 + $0xb4] sm:$0xf0]  ;;  %v2983_v62 = vld [vmem:[#allocation2 + $0x1a8] sm:$0xf]  ;;  %v3256_v63 = vor.u32 %v4232_v56, %v3255_v55 }
  0x8f   :  { %1825 = vmatpush.bf16.msrb.mxu0 %v3316_v1  ;;  %v3665_v24 = vld [vmem:[#allocation2 + $0x710] sm:$0xf0]  ;;  %v3540_v41 = vor.u32 %v4301_v20, %v3537_v22  ;;  %v4164_v0 = vld [vmem:[#allocation2 + $0x1b4] sm:$0xf0]  ;;  %v3111_v1 = vld [vmem:[#allocation2 + $0x2a8] sm:$0xf]  ;;  %v2856_v5 = vor.u32 %v4132_v61, %v2855_v60 }
  0x90   :  { %1838 = vmatpush.bf16.msrb.mxu1 %v3444_v2  ;;  %v3668_v44 = vor.u32 %v4333_v23, %v3665_v24  ;;  %v4196_v2 = vld [vmem:[#allocation2 + $0x2b4] sm:$0xf0]  ;;  %v2984_v6 = vor.u32 %v4164_v0, %v2983_v62  ;;  %v2839_v8 = vld [vmem:[#allocation2 + $0x88] sm:$0xf] }
  0x91   :  { %1851 = vmatpush.bf16.msrb.mxu2 %v3572_v3  ;;  %v3239_v3 = vld [vmem:[#allocation2 + $0x3a8] sm:$0xf]  ;;  %v4228_v4 = vld [vmem:[#allocation2 + $0x3b4] sm:$0xf0] }
  0x92   :  { %1864 = vmatpush.bf16.msrb.mxu3 %v3700_v7  ;;  %v3112_v7 = vor.u32 %v4196_v2, %v3111_v1  ;;  %v4128_v9 = vld [vmem:[#allocation2 + $0x94] sm:$0xf0]  ;;  %v3240_v10 = vor.u32 %v4228_v4, %v3239_v3  ;;  %v3095_v12 = vld [vmem:[#allocation2 + $0x288] sm:$0xf] }
  0x93   :  { %1826 = vmatpush.bf16.msrb.mxu0 %v3300_v13  ;;  %v4160_v11 = vld [vmem:[#allocation2 + $0x194] sm:$0xf0]  ;;  %v3223_v14 = vld [vmem:[#allocation2 + $0x388] sm:$0xf] }
  0x94   :  { %1839 = vmatpush.bf16.msrb.mxu1 %v3428_v16  ;;  %v4192_v13 = vld [vmem:[#allocation2 + $0x294] sm:$0xf0]  ;;  %v2823_v16 = vld [vmem:[#allocation2 + $0x68] sm:$0xf] }
  0x95   :  { %1852 = vmatpush.bf16.msrb.mxu2 %v3556_v17  ;;  %v4124_v17 = vld [vmem:[#allocation2 + $0x74] sm:$0xf0]  ;;  %v2951_v18 = vld [vmem:[#allocation2 + $0x168] sm:$0xf] }
  0x96   :  { %1865 = vmatpush.bf16.msrb.mxu3 %v3684_v21  ;;  %v4156_v20 = vld [vmem:[#allocation2 + $0x174] sm:$0xf0]  ;;  %v3079_v21 = vld [vmem:[#allocation2 + $0x268] sm:$0xf]  ;;  %v2824_v26 = vor.u32 %v4124_v17, %v2823_v16 }
  0x97   :  { %1827 = vmatpush.bf16.msrb.mxu0 %v3284_v35  ;;  %v4188_v22 = vld [vmem:[#allocation2 + $0x274] sm:$0xf0]  ;;  %v3207_v23 = vld [vmem:[#allocation2 + $0x368] sm:$0xf]  ;;  %v2952_v30 = vor.u32 %v4156_v20, %v2951_v18 }
  0x98   :  { %1840 = vmatpush.bf16.msrb.mxu1 %v3412_v40  ;;  %v4220_v24 = vld [vmem:[#allocation2 + $0x374] sm:$0xf0]  ;;  %v3080_v33 = vor.u32 %v4188_v22, %v3079_v21  ;;  %v2807_v35 = vld [vmem:[#allocation2 + $0x48] sm:$0xf] }
  0x99   :  { %1853 = vmatpush.bf16.msrb.mxu2 %v3540_v41  ;;  %v4120_v36 = vld [vmem:[#allocation2 + $0x54] sm:$0xf0]  ;;  %v2935_v37 = vld [vmem:[#allocation2 + $0x148] sm:$0xf]  ;;  %v3208_v39 = vor.u32 %v4220_v24, %v3207_v23 }
  0x9a   :  { %1866 = vmatpush.bf16.msrb.mxu3 %v3668_v44  ;;  %1828 = vmatmul.bf16.vlgmr.msrb.gmra.mxu0 %v4699_v31  ;;  %v4224_v31 = vld [vmem:[#allocation2 + $0x394] sm:$0xf0]  ;;  %v3063_v41 = vld [vmem:[#allocation2 + $0x248] sm:$0xf] }
  0x9b   :  { %1872 = vmatpush.bf16.msra.mxu0 %v2888_v45  ;;  %1841 = vmatmul.bf16.vlgmr.msrb.gmra.mxu1 %v4703_v38  ;;  %v3096_v38 = vor.u32 %v4192_v13, %v3095_v12  ;;  %v3224_v19 = vor.u32 %v4224_v31, %v3223_v14  ;;  %v4152_v40 = vld [vmem:[#allocation2 + $0x154] sm:$0xf0]  ;;  %v3191_v43 = vld [vmem:[#allocation2 + $0x348] sm:$0xf]  ;;  %v2808_v45 = vor.u32 %v4120_v36, %v2807_v35 }
  0x9c   :  { %1885 = vmatpush.bf16.msra.mxu1 %v3016_v46  ;;  %1854 = vmatmul.bf16.vlgmr.msrb.gmra.mxu2 %v4697_v25  ;;  %v2967_v25 = vld [vmem:[#allocation2 + $0x188] sm:$0xf]  ;;  %v4184_v42 = vld [vmem:[#allocation2 + $0x254] sm:$0xf0]  ;;  %v2936_v46 = vor.u32 %v4152_v40, %v2935_v37 }
  0x9d   :  { %1898 = vmatpush.bf16.msra.mxu2 %v3144_v47  ;;  %1867 = vmatmul.bf16.vlgmr.msrb.gmra.mxu3 %v4701_v32  ;;  %v2840_v32 = vor.u32 %v4128_v9, %v2839_v8  ;;  %v2968_v15 = vor.u32 %v4160_v11, %v2967_v25  ;;  %v4216_v44 = vld [vmem:[#allocation2 + $0x354] sm:$0xf0]  ;;  %v3064_v47 = vor.u32 %v4184_v42, %v3063_v41  ;;  %v2791_v48 = vld [vmem:[#allocation2 + $0x28] sm:$0xf] }
  0x9e   :  { %1911 = vmatpush.bf16.msra.mxu3 %v3272_v51  ;;  %v4116_v49 = vld [vmem:[#allocation2 + $0x34] sm:$0xf0]  ;;  %v2919_v50 = vld [vmem:[#allocation2 + $0x128] sm:$0xf]  ;;  %v3192_v51 = vor.u32 %v4216_v44, %v3191_v43 }
  0x9f   :  { %1873 = vmatpush.bf16.msra.mxu0 %v2872_v57  ;;  %v4148_v52 = vld [vmem:[#allocation2 + $0x134] sm:$0xf0]  ;;  %v3047_v53 = vld [vmem:[#allocation2 + $0x228] sm:$0xf]  ;;  %v2792_v57 = vor.u32 %v4116_v49, %v2791_v48 }
  0xa0   :  { %1886 = vmatpush.bf16.msra.mxu1 %v3000_v58  ;;  %v4180_v54 = vld [vmem:[#allocation2 + $0x234] sm:$0xf0]  ;;  %v3175_v55 = vld [vmem:[#allocation2 + $0x328] sm:$0xf]  ;;  %v2920_v60 = vor.u32 %v4148_v52, %v2919_v50 }
  0xa1   :  { %1899 = vmatpush.bf16.msra.mxu2 %v3128_v59  ;;  %v4212_v56 = vld [vmem:[#allocation2 + $0x334] sm:$0xf0]  ;;  %v2775_v58 = vld [vmem:[#allocation2 + $0x8] sm:$0xf]  ;;  %v3048_v61 = vor.u32 %v4180_v54, %v3047_v53 }
  0xa2   :  { %1912 = vmatpush.bf16.msra.mxu3 %v3256_v63  ;;  %v4112_v59 = vld [vmem:[#allocation2 + $0x14] sm:$0xf0]  ;;  %v2903_v62 = vld [vmem:[#allocation2 + $0x108] sm:$0xf]  ;;  %v3176_v1 = vor.u32 %v4212_v56, %v3175_v55 }
  0xa3   :  { %1874 = vmatpush.bf16.msra.mxu0 %v2856_v5  ;;  %v4144_v63 = vld [vmem:[#allocation2 + $0x114] sm:$0xf0]  ;;  %v3031_v0 = vld [vmem:[#allocation2 + $0x208] sm:$0xf]  ;;  %v2776_v8 = vor.u32 %v4112_v59, %v2775_v58 }
  0xa4   :  { %1887 = vmatpush.bf16.msra.mxu1 %v2984_v6  ;;  %v4176_v2 = vld [vmem:[#allocation2 + $0x214] sm:$0xf0]  ;;  %v3159_v3 = vld [vmem:[#allocation2 + $0x308] sm:$0xf]  ;;  %v2904_v11 = vor.u32 %v4144_v63, %v2903_v62 }
  0xa5   :  { %1900 = vmatpush.bf16.msra.mxu2 %v3112_v7  ;;  %v4208_v4 = vld [vmem:[#allocation2 + $0x314] sm:$0xf0]  ;;  %v3399_v5 = vld [vmem:[#allocation2 + $0x4e8] sm:$0xf]  ;;  %v3032_v12 = vor.u32 %v4176_v2, %v3031_v0 }
  0xa6   :  { %1913 = vmatpush.bf16.msra.mxu3 %v3240_v10  ;;  %v4268_v6 = vld [vmem:[#allocation2 + $0x4f4] sm:$0xf0]  ;;  %v3527_v7 = vld [vmem:[#allocation2 + $0x5e8] sm:$0xf]  ;;  %v3160_v31 = vor.u32 %v4208_v4, %v3159_v3 }
  0xa7   :  { %1875 = vmatpush.bf16.msra.mxu0 %v2840_v32  ;;  %v4300_v9 = vld [vmem:[#allocation2 + $0x5f4] sm:$0xf0]  ;;  %v3655_v25 = vld [vmem:[#allocation2 + $0x6e8] sm:$0xf]  ;;  %v3400_v32 = vor.u32 %v4268_v6, %v3399_v5 }
  0xa8   :  { %1888 = vmatpush.bf16.msra.mxu1 %v2968_v15  ;;  %v4332_v10 = vld [vmem:[#allocation2 + $0x6f4] sm:$0xf0]  ;;  %v3783_v13 = vld [vmem:[#allocation2 + $0x7e8] sm:$0xf]  ;;  %v3528_v15 = vor.u32 %v4300_v9, %v3527_v7 }
  0xa9   :  { %1901 = vmatpush.bf16.msra.mxu2 %v3096_v38  ;;  %v4364_v14 = vld [vmem:[#allocation2 + $0x7f4] sm:$0xf0]  ;;  %v3656_v38 = vor.u32 %v4332_v10, %v3655_v25  ;;  %v3383_v16 = vld [vmem:[#allocation2 + $0x4c8] sm:$0xf]  ;;  %v4721_v10 = vld [vmem:[#allocation5] sm:$0xf] }
  0xaa   :  { %1914 = vmatpush.bf16.msra.mxu3 %v3224_v19  ;;  %v4264_v17 = vld [vmem:[#allocation2 + $0x4d4] sm:$0xf0]  ;;  %v3511_v18 = vld [vmem:[#allocation2 + $0x5c8] sm:$0xf]  ;;  %v3784_v19 = vor.u32 %v4364_v14, %v3783_v13 }
  0xab   :  { %1876 = vmatpush.bf16.msra.mxu0 %v2824_v26  ;;  %v4296_v20 = vld [vmem:[#allocation2 + $0x5d4] sm:$0xf0]  ;;  %v3639_v21 = vld [vmem:[#allocation2 + $0x6c8] sm:$0xf]  ;;  %v3384_v26 = vor.u32 %v4264_v17, %v3383_v16  ;;  %v358_v16 = vperm.slane %v4721_v10, 0 }
  0xac   :  { %1889 = vmatpush.bf16.msra.mxu1 %v2952_v30  ;;  %v4328_v22 = vld [vmem:[#allocation2 + $0x6d4] sm:$0xf0]  ;;  %v3767_v23 = vld [vmem:[#allocation2 + $0x7c8] sm:$0xf]  ;;  %v3512_v30 = vor.u32 %v4296_v20, %v3511_v18 }
  0xad   :  { %1902 = vmatpush.bf16.msra.mxu2 %v3080_v33  ;;  %v4360_v24 = vld [vmem:[#allocation2 + $0x7d4] sm:$0xf0]  ;;  %v3640_v33 = vor.u32 %v4328_v22, %v3639_v21  ;;  %v3367_v35 = vld [vmem:[#allocation2 + $0x4a8] sm:$0xf] }
  0xae   :  { %1915 = vmatpush.bf16.msra.mxu3 %v3208_v39  ;;  %v4260_v36 = vld [vmem:[#allocation2 + $0x4b4] sm:$0xf0]  ;;  %v3495_v37 = vld [vmem:[#allocation2 + $0x5a8] sm:$0xf]  ;;  %v3768_v39 = vor.u32 %v4360_v24, %v3767_v23 }
  0xaf   :  { %1877 = vmatpush.bf16.msra.mxu0 %v2808_v45  ;;  %v4292_v40 = vld [vmem:[#allocation2 + $0x5b4] sm:$0xf0]  ;;  %v3623_v41 = vld [vmem:[#allocation2 + $0x6a8] sm:$0xf]  ;;  %v3368_v45 = vor.u32 %v4260_v36, %v3367_v35 }
  0xb0   :  { %1890 = vmatpush.bf16.msra.mxu1 %v2936_v46  ;;  %v4324_v42 = vld [vmem:[#allocation2 + $0x6b4] sm:$0xf0]  ;;  %v3751_v43 = vld [vmem:[#allocation2 + $0x7a8] sm:$0xf]  ;;  %v3496_v46 = vor.u32 %v4292_v40, %v3495_v37 }
  0xb1   :  { %1903 = vmatpush.bf16.msra.mxu2 %v3064_v47  ;;  %v4356_v44 = vld [vmem:[#allocation2 + $0x7b4] sm:$0xf0]  ;;  %v3624_v47 = vor.u32 %v4324_v42, %v3623_v41  ;;  %v3351_v48 = vld [vmem:[#allocation2 + $0x488] sm:$0xf] }
  0xb2   :  { %1916 = vmatpush.bf16.msra.mxu3 %v3192_v51  ;;  %v4256_v49 = vld [vmem:[#allocation2 + $0x494] sm:$0xf0]  ;;  %v3479_v50 = vld [vmem:[#allocation2 + $0x588] sm:$0xf]  ;;  %v3752_v51 = vor.u32 %v4356_v44, %v3751_v43 }
  0xb3   :  { %1878 = vmatpush.bf16.msra.mxu0 %v2792_v57  ;;  %v3607_v52 = vld [vmem:[#allocation2 + $0x688] sm:$0xf]  ;;  %v4320_v53 = vld [vmem:[#allocation2 + $0x694] sm:$0xf0] }
  0xb4   :  { %1891 = vmatpush.bf16.msra.mxu1 %v2920_v60  ;;  %v3735_v54 = vld [vmem:[#allocation2 + $0x788] sm:$0xf]  ;;  %v4252_v57 = vld [vmem:[#allocation2 + $0x474] sm:$0xf0] }
  0xb5   :  { %1904 = vmatpush.bf16.msra.mxu2 %v3048_v61  ;;  %v3335_v56 = vld [vmem:[#allocation2 + $0x468] sm:$0xf]  ;;  %v4284_v60 = vld [vmem:[#allocation2 + $0x574] sm:$0xf0] }
  0xb6   :  { %1917 = vmatpush.bf16.msra.mxu3 %v3176_v1  ;;  %v3463_v58 = vld [vmem:[#allocation2 + $0x568] sm:$0xf]  ;;  %v4316_v62 = vld [vmem:[#allocation2 + $0x674] sm:$0xf0]  ;;  %v3336_v1 = vor.u32 %v4252_v57, %v3335_v56 }
  0xb7   :  { %1879 = vmatpush.bf16.msra.mxu0 %v2776_v8  ;;  %v3591_v61 = vld [vmem:[#allocation2 + $0x668] sm:$0xf]  ;;  %v4348_v0 = vld [vmem:[#allocation2 + $0x774] sm:$0xf0]  ;;  %v3464_v3 = vor.u32 %v4284_v60, %v3463_v58 }
  0xb8   :  { %1892 = vmatpush.bf16.msra.mxu1 %v2904_v11  ;;  %v3719_v63 = vld [vmem:[#allocation2 + $0x768] sm:$0xf]  ;;  %v3592_v4 = vor.u32 %v4316_v62, %v3591_v61  ;;  %v4248_v5 = vld [vmem:[#allocation2 + $0x454] sm:$0xf0]  ;;  %v4134_v61 = vld [vmem:[#allocation2 + $0xcc] sm:$0xf] }
  0xb9   :  { %1905 = vmatpush.bf16.msra.mxu2 %v3032_v12  ;;  %v3319_v2 = vld [vmem:[#allocation2 + $0x448] sm:$0xf]  ;;  %v4280_v7 = vld [vmem:[#allocation2 + $0x554] sm:$0xf0]  ;;  %v3720_v8 = vor.u32 %v4348_v0, %v3719_v63  ;;  %v2873_v62 = vld [vmem:[#allocation2 + $0xd8] sm:$0xf0] }
  0xba   :  { %1918 = vmatpush.bf16.msra.mxu3 %v3160_v31  ;;  %1880 = vmatmul.bf16.vlgmr.msra.gmra.mxu0 %v4687_v28  ;;  %v4352_v28 = vld [vmem:[#allocation2 + $0x794] sm:$0xf0]  ;;  %v3447_v6 = vld [vmem:[#allocation2 + $0x548] sm:$0xf]  ;;  %v3320_v13 = vor.u32 %v4248_v5, %v3319_v2  ;;  %v4166_v63 = vld [vmem:[#allocation2 + $0x1cc] sm:$0xf] }
  0xbb   :  { %1924 = vmatpush.bf16.msrb.mxu0 %v3400_v32  ;;  %1893 = vmatmul.bf16.vlgmr.msra.gmra.mxu1 %v4691_v34  ;;  %v3608_v34 = vor.u32 %v4320_v53, %v3607_v52  ;;  %v3736_v59 = vor.u32 %v4352_v28, %v3735_v54  ;;  %v3575_v9 = vld [vmem:[#allocation2 + $0x648] sm:$0xf]  ;;  %v4312_v25 = vld [vmem:[#allocation2 + $0x654] sm:$0xf0]  ;;  %v3448_v31 = vor.u32 %v4280_v7, %v3447_v6  ;;  %v3145_v52 = vld [vmem:[#allocation2 + $0x2f8] sm:$0xf0] }
  0xbc   :  { %1937 = vmatpush.bf16.msrb.mxu1 %v3528_v15  ;;  %1906 = vmatmul.bf16.vlgmr.msra.gmra.mxu2 %v4685_v27  ;;  %v4288_v27 = vld [vmem:[#allocation2 + $0x594] sm:$0xf0]  ;;  %v3703_v11 = vld [vmem:[#allocation2 + $0x748] sm:$0xf]  ;;  %v3576_v32 = vor.u32 %v4312_v25, %v3575_v9  ;;  %v4234_v28 = vld [vmem:[#allocation2 + $0x3ec] sm:$0xf]  ;;  %v2876_v9 = vor.u32 %v4134_v61, %v2873_v62 }
  0xbd   :  { %1950 = vmatpush.bf16.msrb.mxu2 %v3656_v38  ;;  %1919 = vmatmul.bf16.vlgmr.msra.gmra.mxu3 %v4689_v29  ;;  %v3352_v29 = vor.u32 %v4256_v49, %v3351_v48  ;;  %v3480_v55 = vor.u32 %v4288_v27, %v3479_v50  ;;  %v4344_v12 = vld [vmem:[#allocation2 + $0x754] sm:$0xf0]  ;;  %v3303_v14 = vld [vmem:[#allocation2 + $0x428] sm:$0xf]  ;;  %v4170_v48 = vld [vmem:[#allocation2 + $0x1ec] sm:$0xf] }
  0xbe   :  { %1963 = vmatpush.bf16.msrb.mxu3 %v3784_v19  ;;  %v4244_v15 = vld [vmem:[#allocation2 + $0x434] sm:$0xf0]  ;;  %v3431_v38 = vld [vmem:[#allocation2 + $0x528] sm:$0xf]  ;;  %v3704_v17 = vor.u32 %v4344_v12, %v3703_v11  ;;  %v4202_v27 = vld [vmem:[#allocation2 + $0x2ec] sm:$0xf] }
  0xbf   :  { %1925 = vmatpush.bf16.msrb.mxu0 %v3384_v26  ;;  %v4276_v18 = vld [vmem:[#allocation2 + $0x534] sm:$0xf0]  ;;  %v3559_v19 = vld [vmem:[#allocation2 + $0x628] sm:$0xf]  ;;  %v3304_v23 = vor.u32 %v4244_v15, %v3303_v14  ;;  %v3148_v60 = vor.u32 %v4202_v27, %v3145_v52  ;;  %v4198_v2 = vld [vmem:[#allocation2 + $0x2cc] sm:$0xf] }
  0xc0   :  { %1938 = vmatpush.bf16.msrb.mxu1 %v3512_v30  ;;  %v4308_v20 = vld [vmem:[#allocation2 + $0x634] sm:$0xf0]  ;;  %v3687_v21 = vld [vmem:[#allocation2 + $0x728] sm:$0xf]  ;;  %v1673_v30 = vpop.f32.mrf.mxu0  ;;  %v4230_v6 = vld [vmem:[#allocation2 + $0x3cc] sm:$0xf] }
  0xc1   :  { %1951 = vmatpush.bf16.msrb.mxu2 %v3640_v33  ;;  %v4340_v22 = vld [vmem:[#allocation2 + $0x734] sm:$0xf0]  ;;  %v3287_v24 = vld [vmem:[#allocation2 + $0x408] sm:$0xf]  ;;  %v3432_v33 = vor.u32 %v4276_v18, %v3431_v38  ;;  %v3560_v35 = vor.u32 %v4308_v20, %v3559_v19  ;;  %v1674_v40 = vadd.f32 %v1673_v30, %v358_v16  ;;  %v3257_v7 = vld [vmem:[#allocation2 + $0x3d8] sm:$0xf0] }
  0xc2   :  { %1964 = vmatpush.bf16.msrb.mxu3 %v3768_v39  ;;  %v4240_v26 = vld [vmem:[#allocation2 + $0x414] sm:$0xf0]  ;;  %v3415_v36 = vld [vmem:[#allocation2 + $0x508] sm:$0xf]  ;;  %v3688_v42 = vor.u32 %v4340_v22, %v3687_v21  ;;  %v4130_v12 = vld [vmem:[#allocation2 + $0xac] sm:$0xf] }
  0xc3   :  { %1926 = vmatpush.bf16.msrb.mxu0 %v3368_v45  ;;  %v4272_v37 = vld [vmem:[#allocation2 + $0x514] sm:$0xf0]  ;;  %v3543_v39 = vld [vmem:[#allocation2 + $0x608] sm:$0xf]  ;;  %v3288_v50 = vor.u32 %v4240_v26, %v3287_v24  ;;  %v4162_v14 = vld [vmem:[#allocation2 + $0x1ac] sm:$0xf] }
  0xc4   :  { %1939 = vmatpush.bf16.msrb.mxu1 %v3496_v46  ;;  %v4304_v43 = vld [vmem:[#allocation2 + $0x614] sm:$0xf0]  ;;  %v3671_v44 = vld [vmem:[#allocation2 + $0x708] sm:$0xf]  ;;  %v4138_v46 = vld [vmem:[#allocation2 + $0xec] sm:$0xf]  ;;  %v3416_v53 = vor.u32 %v4272_v37, %v3415_v36 }
  0xc5   :  { %1952 = vmatpush.bf16.msrb.mxu2 %v3624_v47  ;;  %v4336_v45 = vld [vmem:[#allocation2 + $0x714] sm:$0xf0]  ;;  %v2889_v47 = vld [vmem:[#allocation2 + $0xf8] sm:$0xf0]  ;;  %v3544_v54 = vor.u32 %v4304_v43, %v3543_v39  ;;  %v4194_v38 = vld [vmem:[#allocation2 + $0x2ac] sm:$0xf] }
  0xc6   :  { %1965 = vmatpush.bf16.msrb.mxu3 %v3752_v51  ;;  %v3017_v51 = vld [vmem:[#allocation2 + $0x1f8] sm:$0xf0]  ;;  %v2892_v56 = vor.u32 %v4138_v46, %v2889_v47  ;;  %v4226_v19 = vld [vmem:[#allocation2 + $0x3ac] sm:$0xf] }
  0xc7   :  { %1927 = vmatpush.bf16.msrb.mxu0 %v3352_v29  ;;  %v3273_v29 = vld [vmem:[#allocation2 + $0x3f8] sm:$0xf0]  ;;  %v4733_v22 = vld [vmem:[#allocation1 + $0x2d] sm:$0xff] }
  0xc8   :  { %1940 = vmatpush.bf16.msrb.mxu1 %v3480_v55  ;;  %v3276_v0 = vor.u32 %v4234_v28, %v3273_v29  ;;  %v1675_v5 = vpop.f32.mrf.mxu0  ;;  %v2985_v15 = vld [vmem:[#allocation2 + $0x1b8] sm:$0xf0]  ;;  %v4158_v36 = vld [vmem:[#allocation2 + $0x18c] sm:$0xf] }
  0xc9   :  { %1953 = vmatpush.bf16.msrb.mxu2 %v3608_v34  ;;  %v3672_v34 = vor.u32 %v4336_v45, %v3671_v44  ;;  %v3113_v16 = vld [vmem:[#allocation2 + $0x2b8] sm:$0xf0]  ;;  %v2988_v26 = vor.u32 %v4162_v14, %v2985_v15  ;;  %v4218_v29 = vld [vmem:[#allocation2 + $0x36c] sm:$0xf] }
  0xca   :  { %1966 = vmatpush.bf16.msrb.mxu3 %v3736_v59  ;;  %v3020_v59 = vor.u32 %v4170_v48, %v3017_v51  ;;  %v4730_v18 = vld [vmem:[#allocation1 + $0x3f] sm:$0xff]  ;;  %v3116_v30 = vor.u32 %v4194_v38, %v3113_v16  ;;  %v4122_v48 = vld [vmem:[#allocation2 + $0x6c] sm:$0xf] }
  0xcb   :  { %1928 = vmatpush.bf16.msrb.mxu0 %v3336_v1  ;;  %v1686_v41 = vpop.f32.mrf.mxu1  ;;  %v3001_v1 = vld [vmem:[#allocation2 + $0x1d8] sm:$0xf0]  ;;  %v4150_v61 = vld [vmem:[#allocation2 + $0x14c] sm:$0xf] }
  0xcc   :  { %1941 = vmatpush.bf16.msrb.mxu1 %v3464_v3  ;;  %v1687_v49 = vadd.f32 %v1686_v41, %v1674_v40  ;;  %v3129_v3 = vld [vmem:[#allocation2 + $0x2d8] sm:$0xf0]  ;;  %v3004_v25 = vor.u32 %v4166_v63, %v3001_v1  ;;  %v4190_v40 = vld [vmem:[#allocation2 + $0x28c] sm:$0xf] }
  0xcd   :  { %1954 = vmatpush.bf16.msrb.mxu2 %v3592_v4  ;;  %v3132_v11 = vor.u32 %v4198_v2, %v3129_v3  ;;  %v3241_v20 = vld [vmem:[#allocation2 + $0x3b8] sm:$0xf0]  ;;  %v4182_v1 = vld [vmem:[#allocation2 + $0x24c] sm:$0xf] }
  0xce   :  { %1967 = vmatpush.bf16.msrb.mxu3 %v3720_v8  ;;  %v3244_v37 = vor.u32 %v4226_v19, %v3241_v20  ;;  %v2969_v39 = vld [vmem:[#allocation2 + $0x198] sm:$0xf0]  ;;  %v4214_v5 = vld [vmem:[#allocation2 + $0x34c] sm:$0xf] }
  0xcf   :  { %1929 = vmatpush.bf16.msrb.mxu0 %v3320_v13  ;;  %v1699_v55 = vpop.f32.mrf.mxu2  ;;  %v1712_v58 = vpop.f32.mrf.mxu3  ;;  %v2857_v13 = vld [vmem:[#allocation2 + $0xb8] sm:$0xf0]  ;;  %v2972_v46 = vor.u32 %v4158_v36, %v2969_v39  ;;  %v4146_v14 = vld [vmem:[#allocation2 + $0x12c] sm:$0xf] }
  0xd0   :  { %1942 = vmatpush.bf16.msrb.mxu1 %v3448_v31  ;;  %v1700_v57 = vadd.f32 %v1699_v55, %v1687_v49  ;;  %v4724_v31 = vld [vmem:[#allocation1 + $0x36] sm:$0xff]  ;;  %v3097_v41 = vld [vmem:[#allocation2 + $0x298] sm:$0xf0] }
  0xd1   :  { %1955 = vmatpush.bf16.msrb.mxu2 %v3576_v32  ;;  %v3260_v32 = vor.u32 %v4230_v6, %v3257_v7  ;;  %v3225_v43 = vld [vmem:[#allocation2 + $0x398] sm:$0xf0]  ;;  %v3100_v47 = vor.u32 %v4190_v40, %v3097_v41  ;;  %v4178_v16 = vld [vmem:[#allocation2 + $0x22c] sm:$0xf] }
  0xd2   :  { %1968 = vmatpush.bf16.msrb.mxu3 %v3704_v17  ;;  %v1713_v4 = vadd.f32 %v1712_v58, %v1700_v57  ;;  %v4727_v17 = vld [vmem:[#allocation1 + $0x24] sm:$0xff]  ;;  %v4210_v20 = vld [vmem:[#allocation2 + $0x32c] sm:$0xf] }
  0xd3   :  { %1930 = vmatpush.bf16.msrb.mxu0 %v3304_v23  ;;  %v1688_v8 = vpop.f32.mrf.mxu1  ;;  %v2860_v23 = vor.u32 %v4130_v12, %v2857_v13  ;;  %v2825_v49 = vld [vmem:[#allocation2 + $0x78] sm:$0xf0]  ;;  %v4114_v12 = vld [vmem:[#allocation2 + $0x2c] sm:$0xf] }
  0xd4   :  { %1943 = vmatpush.bf16.msrb.mxu1 %v3432_v33  ;;  %v4126_v33 = vld [vmem:[#allocation2 + $0x8c] sm:$0xf]  ;;  %v3081_v28 = vld [vmem:[#allocation2 + $0x278] sm:$0xf0] }
  0xd5   :  { %1956 = vmatpush.bf16.msrb.mxu2 %v3560_v35  ;;  %v2841_v35 = vld [vmem:[#allocation2 + $0x98] sm:$0xf0] }
  0xd6   :  { %1969 = vmatpush.bf16.msrb.mxu3 %v3688_v42  ;;  %v4222_v42 = vld [vmem:[#allocation2 + $0x38c] sm:$0xf]  ;;  %v2844_v44 = vor.u32 %v4126_v33, %v2841_v35  ;;  %v3209_v55 = vld [vmem:[#allocation2 + $0x378] sm:$0xf0] }
  0xd7   :  { %1931 = vmatpush.bf16.msrb.mxu0 %v3288_v50  ;;  %v1701_v21 = vpop.f32.mrf.mxu2  ;;  %v1714_v24 = vpop.f32.mrf.mxu3  ;;  %v4154_v50 = vld [vmem:[#allocation2 + $0x16c] sm:$0xf]  ;;  %v3228_v52 = vor.u32 %v4222_v42, %v3225_v43  ;;  %v3212_v63 = vor.u32 %v4218_v29, %v3209_v55  ;;  %v3065_v2 = vld [vmem:[#allocation2 + $0x258] sm:$0xf0] }
  0xd8   :  { %1944 = vmatpush.bf16.msrb.mxu1 %v3416_v53  ;;  %v1725_v45 = vpop.f32.mrf.mxu0  ;;  %v2953_v53 = vld [vmem:[#allocation2 + $0x178] sm:$0xf0]  ;;  %v4110_v24 = vld [vmem:[#allocation2 + $0xc] sm:$0xf] }
  0xd9   :  { %1957 = vmatpush.bf16.msrb.mxu2 %v3544_v54  ;;  %v1726_v51 = vadd.f32 %v1725_v45, %v1713_v4  ;;  %v4186_v54 = vld [vmem:[#allocation2 + $0x26c] sm:$0xf]  ;;  %v2956_v57 = vor.u32 %v4154_v50, %v2953_v53  ;;  %v3193_v6 = vld [vmem:[#allocation2 + $0x358] sm:$0xf0] }
  0xda   :  { %1970 = vmatpush.bf16.msrb.mxu3 %v3672_v34  ;;  %1932 = vmatmul.bf16.vlgmr.msrb.gmra.mxu0 %v4727_v17  ;;  %v3084_v58 = vor.u32 %v4186_v54, %v3081_v28  ;;  %v2793_v13 = vld [vmem:[#allocation2 + $0x38] sm:$0xf0]  ;;  %v3196_v15 = vor.u32 %v4214_v5, %v3193_v6  ;;  %v4142_v35 = vld [vmem:[#allocation2 + $0x10c] sm:$0xf] }
  0xdb   :  { %1976 = vmatpush.bf16.msra.mxu0 %v2892_v56  ;;  %1945 = vmatmul.bf16.vlgmr.msrb.gmra.mxu1 %v4733_v22  ;;  %v1738_v27 = vpop.f32.mrf.mxu1  ;;  %v2828_v56 = vor.u32 %v4122_v48, %v2825_v49  ;;  %v2921_v38 = vld [vmem:[#allocation2 + $0x138] sm:$0xf0]  ;;  %v4206_v42 = vld [vmem:[#allocation2 + $0x30c] sm:$0xf] }
  0xdc   :  { %1989 = vmatpush.bf16.msra.mxu1 %v3020_v59  ;;  %1958 = vmatmul.bf16.vlgmr.msrb.gmra.mxu2 %v4724_v31  ;;  %v1739_v34 = vadd.f32 %v1738_v27, %v1726_v51  ;;  %v4118_v59 = vld [vmem:[#allocation2 + $0x4c] sm:$0xf]  ;;  %v3049_v19 = vld [vmem:[#allocation2 + $0x238] sm:$0xf0] }
  0xdd   :  { %2002 = vmatpush.bf16.msra.mxu2 %v3148_v60  ;;  %1971 = vmatmul.bf16.vlgmr.msrb.gmra.mxu3 %v4730_v18  ;;  %v2809_v60 = vld [vmem:[#allocation2 + $0x58] sm:$0xf0]  ;;  %v3052_v33 = vor.u32 %v4178_v16, %v3049_v19  ;;  %v4266_v45 = vld [vmem:[#allocation2 + $0x4ec] sm:$0xf]  ;;  %v4463_v16 = vld [vmem:[#allocation1 + $0x9] sm:$0xff] }
  0xde   :  { %2015 = vmatpush.bf16.msra.mxu3 %v3276_v0  ;;  %v2937_v0 = vld [vmem:[#allocation2 + $0x158] sm:$0xf0]  ;;  %v2812_v7 = vor.u32 %v4118_v59, %v2809_v60  ;;  %v4330_v50 = vld [vmem:[#allocation2 + $0x6ec] sm:$0xf] }
  0xdf   :  { %1977 = vmatpush.bf16.msra.mxu0 %v2876_v9  ;;  %v1751_v62 = vpop.f32.mrf.mxu2  ;;  %v3177_v21 = vld [vmem:[#allocation2 + $0x338] sm:$0xf0]  ;;  %v4362_v53 = vld [vmem:[#allocation2 + $0x7ec] sm:$0xf] }
  0xe0   :  { %1990 = vmatpush.bf16.msra.mxu1 %v3004_v25  ;;  %v1752_v3 = vadd.f32 %v1751_v62, %v1739_v34  ;;  %v1764_v4 = vpop.f32.mrf.mxu3  ;;  %v1727_v9 = vpop.f32.mrf.mxu0  ;;  %v2940_v25 = vor.u32 %v4150_v61, %v2937_v0  ;;  %v2905_v36 = vld [vmem:[#allocation2 + $0x118] sm:$0xf0]  ;;  %v3180_v40 = vor.u32 %v4210_v20, %v3177_v21  ;;  %v4326_v61 = vld [vmem:[#allocation2 + $0x6cc] sm:$0xf] }
  0xe1   :  { %2003 = vmatpush.bf16.msra.mxu2 %v3132_v11  ;;  %v3068_v11 = vor.u32 %v4182_v1, %v3065_v2  ;;  %v3033_v41 = vld [vmem:[#allocation2 + $0x218] sm:$0xf0]  ;;  %v2908_v27 = vor.u32 %v4142_v35, %v2905_v36  ;;  %v4290_v6 = vld [vmem:[#allocation2 + $0x5ac] sm:$0xf] }
  0xe2   :  { %2016 = vmatpush.bf16.msra.mxu3 %v3260_v32  ;;  %v4736_v8 = vadd.f32 %v1764_v4, %v1752_v3  ;;  %v3161_v43 = vld [vmem:[#allocation2 + $0x318] sm:$0xf0]  ;;  %v4258_v4 = vld [vmem:[#allocation2 + $0x4ac] sm:$0xf] }
  0xe3   :  { %1978 = vmatpush.bf16.msra.mxu0 %v2860_v23  ;;  %v1740_v32 = vpop.f32.mrf.mxu1  ;;  %v2796_v23 = vor.u32 %v4114_v12, %v2793_v13  ;;  %v3529_v49 = vld [vmem:[#allocation2 + $0x5f8] sm:$0xf0]  ;;  %v3164_v28 = vor.u32 %v4206_v42, %v3161_v43  ;;  %v4460_v9 = vld [vmem:[#allocation1 + $0x12] sm:$0xff] }
  0xe4   :  { %1991 = vmatpush.bf16.msra.mxu1 %v2988_v26  ;;  %v2777_v26 = vld [vmem:[#allocation2 + $0x18] sm:$0xf0]  ;;  %v4354_v13 = vld [vmem:[#allocation2 + $0x7ac] sm:$0xf] }
  0xe5   :  { %2004 = vmatpush.bf16.msra.mxu2 %v3116_v30  ;;  %v2924_v30 = vor.u32 %v4146_v14, %v2921_v38  ;;  %v2780_v48 = vor.u32 %v4110_v24, %v2777_v26  ;;  %v3657_v51 = vld [vmem:[#allocation2 + $0x6f8] sm:$0xf0]  ;;  %v4254_v21 = vld [vmem:[#allocation2 + $0x48c] sm:$0xf] }
  0xe6   :  { %2017 = vmatpush.bf16.msra.mxu3 %v3244_v37  ;;  %v4174_v37 = vld [vmem:[#allocation2 + $0x20c] sm:$0xf]  ;;  %v3785_v54 = vld [vmem:[#allocation2 + $0x7f8] sm:$0xf0]  ;;  %v3660_v34 = vor.u32 %v4330_v50, %v3657_v51 }
  0xe7   :  { %1979 = vmatpush.bf16.msra.mxu0 %v2844_v44  ;;  %v1753_v39 = vpop.f32.mrf.mxu2  ;;  %v3788_v59 = vor.u32 %v4362_v53, %v3785_v54  ;;  %v3513_v60 = vld [vmem:[#allocation2 + $0x5d8] sm:$0xf0]  ;;  %v4286_v24 = vld [vmem:[#allocation2 + $0x58c] sm:$0xf] }
  0xe8   :  { %1992 = vmatpush.bf16.msra.mxu1 %v2972_v46  ;;  %v1766_v44 = vpop.f32.mrf.mxu3  ;;  %v3401_v46 = vld [vmem:[#allocation2 + $0x4f8] sm:$0xf0]  ;;  %v4350_v36 = vld [vmem:[#allocation2 + $0x78c] sm:$0xf] }
  0xe9   :  { %2005 = vmatpush.bf16.msra.mxu2 %v3100_v47  ;;  %v4298_v47 = vld [vmem:[#allocation2 + $0x5ec] sm:$0xf]  ;;  %v3404_v29 = vor.u32 %v4266_v45, %v3401_v46  ;;  %v3641_v62 = vld [vmem:[#allocation2 + $0x6d8] sm:$0xf0] }
  0xea   :  { %2018 = vmatpush.bf16.msra.mxu3 %v3228_v52  ;;  %v3036_v52 = vor.u32 %v4174_v37, %v3033_v41  ;;  %v3532_v55 = vor.u32 %v4298_v47, %v3529_v49  ;;  %v3769_v0 = vld [vmem:[#allocation2 + $0x7d8] sm:$0xf0]  ;;  %v3644_v3 = vor.u32 %v4326_v61, %v3641_v62  ;;  %v4250_v43 = vld [vmem:[#allocation2 + $0x46c] sm:$0xf] }
  0xeb   :  { %1980 = vmatpush.bf16.msra.mxu0 %v2828_v56  ;;  %v4262_v56 = vld [vmem:[#allocation2 + $0x4cc] sm:$0xf]  ;;  %v3369_v5 = vld [vmem:[#allocation2 + $0x4b8] sm:$0xf0] }
  0xec   :  { %1993 = vmatpush.bf16.msra.mxu1 %v2956_v57  ;;  %v3385_v57 = vld [vmem:[#allocation2 + $0x4d8] sm:$0xf0]  ;;  %v3372_v38 = vor.u32 %v4258_v4, %v3369_v5  ;;  %v4282_v45 = vld [vmem:[#allocation2 + $0x56c] sm:$0xf] }
  0xed   :  { %2006 = vmatpush.bf16.msra.mxu2 %v3084_v58  ;;  %v4294_v58 = vld [vmem:[#allocation2 + $0x5cc] sm:$0xf]  ;;  %v3388_v1 = vor.u32 %v4262_v56, %v3385_v57  ;;  %v3625_v12 = vld [vmem:[#allocation2 + $0x6b8] sm:$0xf0] }
  0xee   :  { %2019 = vmatpush.bf16.msra.mxu3 %v3212_v63  ;;  %v4358_v63 = vld [vmem:[#allocation2 + $0x7cc] sm:$0xf]  ;;  %v3516_v2 = vor.u32 %v4294_v58, %v3513_v60  ;;  %v3753_v14 = vld [vmem:[#allocation2 + $0x7b8] sm:$0xf0] }
  0xef   :  { %1981 = vmatpush.bf16.msra.mxu0 %v2812_v7  ;;  %v3772_v7 = vor.u32 %v4358_v63, %v3769_v0  ;;  %v4461_v32 = vld [vmem:[#allocation1] sm:$0xff]  ;;  %v3756_v26 = vor.u32 %v4354_v13, %v3753_v14  ;;  %v4314_v49 = vld [vmem:[#allocation2 + $0x66c] sm:$0xf]  ;;  %v359_v14 = vperm.slane %v4721_v10, 1 }
  0xf0   :  { %1994 = vmatpush.bf16.msra.mxu1 %v2940_v25  ;;  %v3497_v25 = vld [vmem:[#allocation2 + $0x5b8] sm:$0xf0]  ;;  %v4346_v51 = vld [vmem:[#allocation2 + $0x76c] sm:$0xf] }
  0xf1   :  { %2007 = vmatpush.bf16.msra.mxu2 %v3068_v11  ;;  %v4322_v11 = vld [vmem:[#allocation2 + $0x6ac] sm:$0xf]  ;;  %v3500_v19 = vor.u32 %v4290_v6, %v3497_v25  ;;  %v3609_v35 = vld [vmem:[#allocation2 + $0x698] sm:$0xf0] }
  0xf2   :  { %2020 = vmatpush.bf16.msra.mxu3 %v3196_v15  ;;  %v4462_v15 = vld [vmem:[#allocation1 + $0x1b] sm:$0xff]  ;;  %v3628_v20 = vor.u32 %v4322_v11, %v3625_v12  ;;  %v3737_v37 = vld [vmem:[#allocation2 + $0x798] sm:$0xf0]  ;;  %v4310_v58 = vld [vmem:[#allocation2 + $0x64c] sm:$0xf] }
  0xf3   :  { %1982 = vmatpush.bf16.msra.mxu0 %v2796_v23  ;;  %v3353_v23 = vld [vmem:[#allocation2 + $0x498] sm:$0xf0]  ;;  %v3740_v47 = vor.u32 %v4350_v36, %v3737_v37  ;;  %v4342_v61 = vld [vmem:[#allocation2 + $0x74c] sm:$0xf]  ;;  %v3847_v37 = vld [vmem:[#allocation7 + $0x70] sm:$0xf] }
  0xf4   :  { %1995 = vmatpush.bf16.msra.mxu1 %v2924_v30  ;;  %v3481_v30 = vld [vmem:[#allocation2 + $0x598] sm:$0xf0]  ;;  %v3356_v39 = vor.u32 %v4254_v21, %v3353_v23  ;;  %v4274_v5 = vld [vmem:[#allocation2 + $0x52c] sm:$0xf] }
  0xf5   :  { %2008 = vmatpush.bf16.msra.mxu2 %v3052_v33  ;;  %v4318_v33 = vld [vmem:[#allocation2 + $0x68c] sm:$0xf]  ;;  %v3484_v41 = vor.u32 %v4286_v24, %v3481_v30  ;;  %v3337_v44 = vld [vmem:[#allocation2 + $0x478] sm:$0xf0] }
  0xf6   :  { %2021 = vmatpush.bf16.msra.mxu3 %v3180_v40  ;;  %v3612_v42 = vor.u32 %v4318_v33, %v3609_v35  ;;  %v3593_v50 = vld [vmem:[#allocation2 + $0x678] sm:$0xf0]  ;;  %v4306_v25 = vld [vmem:[#allocation2 + $0x62c] sm:$0xf] }
  0xf7   :  { %1983 = vmatpush.bf16.msra.mxu0 %v2780_v48  ;;  %v4738_v40 = vpop.f32.mrf.mxu0  ;;  %v3465_v48 = vld [vmem:[#allocation2 + $0x578] sm:$0xf0]  ;;  %v3596_v54 = vor.u32 %v4314_v49, %v3593_v50  ;;  %v4338_v12 = vld [vmem:[#allocation2 + $0x72c] sm:$0xf] }
  0xf8   :  { %1996 = vmatpush.bf16.msra.mxu1 %v2908_v27  ;;  %v4740_v46 = vpop.f32.mrf.mxu1  ;;  %v3721_v27 = vld [vmem:[#allocation2 + $0x778] sm:$0xf0]  ;;  %v3468_v53 = vor.u32 %v4282_v45, %v3465_v48  ;;  %v4334_v33 = vld [vmem:[#allocation2 + $0x70c] sm:$0xf] }
  0xf9   :  { %2009 = vmatpush.bf16.msra.mxu2 %v3036_v52  ;;  %v3340_v52 = vor.u32 %v4250_v43, %v3337_v44  ;;  %v3724_v56 = vor.u32 %v4346_v51, %v3721_v27  ;;  %v3449_v57 = vld [vmem:[#allocation2 + $0x558] sm:$0xf0]  ;;  %v3839_v51 = vld [vmem:[#allocation7 + $0x60] sm:$0xf]  ;;  %v4378_v27 = vld [vmem:[#allocation7 + $0x64] sm:$0xf0] }
  0xfa   :  { %2022 = vmatpush.bf16.msra.mxu3 %v3164_v28  ;;  %1984 = vmatmul.bf16.vlgmr.msra.gmra.mxu0 %v4461_v32  ;;  %v4246_v28 = vld [vmem:[#allocation2 + $0x44c] sm:$0xf]  ;;  %v3705_v62 = vld [vmem:[#allocation2 + $0x758] sm:$0xf0] }
  0xfb   :  { %2028 = vmatpush.bf16.msrb.mxu0 %v3404_v29  ;;  %1997 = vmatmul.bf16.vlgmr.msra.gmra.mxu1 %v4463_v16  ;;  %v3321_v29 = vld [vmem:[#allocation2 + $0x458] sm:$0xf0] }
  0xfc   :  { %2041 = vmatpush.bf16.msrb.mxu1 %v3532_v55  ;;  %2010 = vmatmul.bf16.vlgmr.msra.gmra.mxu2 %v4460_v9  ;;  %v4278_v55 = vld [vmem:[#allocation2 + $0x54c] sm:$0xf]  ;;  %v3324_v63 = vor.u32 %v4246_v28, %v3321_v29  ;;  %v3305_v4 = vld [vmem:[#allocation2 + $0x438] sm:$0xf0]  ;;  %v3831_v29 = vld [vmem:[#allocation7 + $0x50] sm:$0xf] }
  0xfd   :  { %2054 = vmatpush.bf16.msrb.mxu2 %v3660_v34  ;;  %2023 = vmatmul.bf16.vlgmr.msra.gmra.mxu3 %v4462_v15  ;;  %v3433_v9 = vld [vmem:[#allocation2 + $0x538] sm:$0xf0]  ;;  %v4238_v15 = vld [vmem:[#allocation2 + $0x40c] sm:$0xf] }
  0xfe   :  { %2067 = vmatpush.bf16.msrb.mxu3 %v3788_v59  ;;  %v3577_v59 = vld [vmem:[#allocation2 + $0x658] sm:$0xf0] }
  0xff   :  { %2029 = vmatpush.bf16.msrb.mxu0 %v3388_v1  ;;  %v4742_v34 = vpop.f32.mrf.mxu2  ;;  %v1779_v0 = vpop.f32.mrf.mxu0  ;;  %v3452_v1 = vor.u32 %v4278_v55, %v3449_v57  ;;  %v3561_v11 = vld [vmem:[#allocation2 + $0x638] sm:$0xf0] }
 0x100   :  { %2042 = vmatpush.bf16.msrb.mxu1 %v3516_v2  ;;  %v4744_v60 = vpop.f32.mrf.mxu3  ;;  %v3580_v2 = vor.u32 %v4310_v58, %v3577_v59  ;;  %v1792_v6 = vpop.f32.mrf.mxu1  ;;  %v3689_v13 = vld [vmem:[#allocation2 + $0x738] sm:$0xf0]  ;;  %v3564_v16 = vor.u32 %v4306_v25, %v3561_v11 }
 0x101   :  { %2055 = vmatpush.bf16.msrb.mxu2 %v3644_v3  ;;  %v4242_v3 = vld [vmem:[#allocation2 + $0x42c] sm:$0xf]  ;;  %v3417_v21 = vld [vmem:[#allocation2 + $0x518] sm:$0xf0]  ;;  %v3692_v24 = vor.u32 %v4338_v12, %v3689_v13 }
 0x102   :  { %2068 = vmatpush.bf16.msrb.mxu3 %v3772_v7  ;;  %v3708_v7 = vor.u32 %v4342_v61, %v3705_v62  ;;  %v3308_v32 = vor.u32 %v4242_v3, %v3305_v4  ;;  %v3545_v30 = vld [vmem:[#allocation2 + $0x618] sm:$0xf0]  ;;  %v4374_v61 = vld [vmem:[#allocation7 + $0x44] sm:$0xf0]  ;;  %v3887_v62 = vld [vmem:[#allocation7 + $0xc0] sm:$0xf] }
 0x103   :  { %2030 = vmatpush.bf16.msrb.mxu0 %v3372_v38  ;;  %v3436_v38 = vor.u32 %v4274_v5, %v3433_v9  ;;  %v3673_v36 = vld [vmem:[#allocation2 + $0x718] sm:$0xf0]  ;;  %v3815_v3 = vld [vmem:[#allocation7 + $0x30] sm:$0xf]  ;;  %v4410_v9 = vld [vmem:[#allocation7 + $0x164] sm:$0xf0] }
 0x104   :  { %2043 = vmatpush.bf16.msrb.mxu1 %v3500_v19  ;;  %v3289_v19 = vld [vmem:[#allocation2 + $0x418] sm:$0xf0]  ;;  %v3879_v4 = vld [vmem:[#allocation7 + $0xb0] sm:$0xf] }
 0x105   :  { %2056 = vmatpush.bf16.msrb.mxu2 %v3628_v20  ;;  %v4270_v20 = vld [vmem:[#allocation2 + $0x50c] sm:$0xf]  ;;  %v4380_v10 = vld [vmem:[#allocation7 + $0x74] sm:$0xf0] }
 0x106   :  { %2069 = vmatpush.bf16.msrb.mxu3 %v3756_v26  ;;  %v4302_v26 = vld [vmem:[#allocation2 + $0x60c] sm:$0xf]  ;;  %v4396_v43 = vld [vmem:[#allocation7 + $0xf4] sm:$0xf0]  ;;  %v3420_v44 = vor.u32 %v4270_v20, %v3417_v21  ;;  %v3848_v48 = vor.u32 %v4380_v10, %v3847_v37  ;;  %v3959_v20 = vld [vmem:[#allocation7 + $0x150] sm:$0xf] }
 0x107   :  { %2031 = vmatpush.bf16.msrb.mxu0 %v3356_v39  ;;  %v1805_v23 = vpop.f32.mrf.mxu2  ;;  %v1778_v39 = vadd.f32 %v4738_v40, %v359_v14  ;;  %v3548_v45 = vor.u32 %v4302_v26, %v3545_v30  ;;  %v3840_v40 = vor.u32 %v4378_v27, %v3839_v51  ;;  %v4376_v55 = vld [vmem:[#allocation7 + $0x54] sm:$0xf0]  ;;  %v3807_v14 = vld [vmem:[#allocation7 + $0x20] sm:$0xf]  ;;  %v3863_v37 = vld [vmem:[#allocation7 + $0x90] sm:$0xf] }
 0x108   :  { %2044 = vmatpush.bf16.msrb.mxu1 %v3484_v41  ;;  %v1818_v35 = vpop.f32.mrf.mxu3  ;;  %v3292_v41 = vor.u32 %v4238_v15, %v3289_v19  ;;  %v3832_v57 = vor.u32 %v4376_v55, %v3831_v29  ;;  %v4412_v0 = vld [vmem:[#allocation7 + $0x174] sm:$0xf0]  ;;  %v3871_v15 = vld [vmem:[#allocation7 + $0xa0] sm:$0xf]  ;;  %v4382_v51 = vld [vmem:[#allocation7 + $0x84] sm:$0xf0] }
 0x109   :  { %2057 = vmatpush.bf16.msrb.mxu2 %v3612_v42  ;;  %v3911_v42 = vld [vmem:[#allocation7 + $0xf0] sm:$0xf]  ;;  %v1791_v50 = vadd.f32 %v4740_v46, %v1778_v39  ;;  %v4408_v21 = vld [vmem:[#allocation7 + $0x154] sm:$0xf0]  ;;  %v4379_v27 = vld [vmem:[#allocation7 + $0x74] sm:$0xf] }
 0x10a   :  { %2070 = vmatpush.bf16.msrb.mxu3 %v3740_v47  ;;  %v3676_v47 = vor.u32 %v4334_v33, %v3673_v36  ;;  %v3912_v49 = vor.u32 %v4396_v43, %v3911_v42  ;;  %v3895_v46 = vld [vmem:[#allocation7 + $0xd0] sm:$0xf]  ;;  %v3960_v23 = vor.u32 %v4408_v21, %v3959_v20  ;;  %v4368_v36 = vld [vmem:[#allocation7 + $0x14] sm:$0xf0]  ;;  %v4406_v42 = vld [vmem:[#allocation7 + $0x144] sm:$0xf0] }
 0x10b   :  { %2032 = vmatpush.bf16.msrb.mxu0 %v3340_v52  ;;  %v3903_v52 = vld [vmem:[#allocation7 + $0xe0] sm:$0xf]  ;;  %v1804_v28 = vadd.f32 %v4742_v34, %v1791_v50  ;;  %v4390_v34 = vld [vmem:[#allocation7 + $0xc4] sm:$0xf0]  ;;  %v3799_v35 = vld [vmem:[#allocation7 + $0x10] sm:$0xf] }
 0x10c   :  { %2045 = vmatpush.bf16.msrb.mxu1 %v3468_v53  ;;  %v4394_v53 = vld [vmem:[#allocation7 + $0xe4] sm:$0xf0]  ;;  %v4384_v39 = vld [vmem:[#allocation7 + $0x94] sm:$0xf0]  ;;  %v3855_v50 = vld [vmem:[#allocation7 + $0x80] sm:$0xf] }
 0x10d   :  { %2058 = vmatpush.bf16.msrb.mxu2 %v3596_v54  ;;  %v3904_v54 = vor.u32 %v4394_v53, %v3903_v52  ;;  %v1817_v58 = vadd.f32 %v4744_v60, %v1804_v28  ;;  %v4388_v60 = vld [vmem:[#allocation7 + $0xb4] sm:$0xf0]  ;;  %v3849_v53 = vld [vmem:[#allocation7 + $0x78] sm:$0xf0]  ;;  %v4395_v29 = vld [vmem:[#allocation7 + $0xf4] sm:$0xf] }
 0x10e   :  { %2071 = vmatpush.bf16.msrb.mxu3 %v3724_v56  ;;  %v4392_v56 = vld [vmem:[#allocation7 + $0xd4] sm:$0xf0]  ;;  %v3880_v13 = vor.u32 %v4388_v60, %v3879_v4  ;;  %v3913_v55 = vld [vmem:[#allocation7 + $0xf8] sm:$0xf0]  ;;  %v4389_v20 = vld [vmem:[#allocation7 + $0xc4] sm:$0xf] }
 0x10f   :  { %2033 = vmatpush.bf16.msrb.mxu0 %v3324_v63  ;;  %v3896_v59 = vor.u32 %v4392_v56, %v3895_v46  ;;  %v3975_v63 = vld [vmem:[#allocation7 + $0x170] sm:$0xf]  ;;  %v4404_v28 = vld [vmem:[#allocation7 + $0x134] sm:$0xf0]  ;;  %v3833_v60 = vld [vmem:[#allocation7 + $0x58] sm:$0xf0] }
 0x110   :  { %2046 = vmatpush.bf16.msrb.mxu1 %v3452_v1  ;;  %v3976_v1 = vor.u32 %v4412_v0, %v3975_v63  ;;  %v3935_v63 = vld [vmem:[#allocation7 + $0x120] sm:$0xf]  ;;  %v4402_v0 = vld [vmem:[#allocation7 + $0x124] sm:$0xf0]  ;;  %v4400_v4 = vld [vmem:[#allocation7 + $0x114] sm:$0xf0] }
 0x111   :  { %2059 = vmatpush.bf16.msrb.mxu2 %v3580_v2  ;;  %v3888_v2 = vor.u32 %v4390_v34, %v3887_v62  ;;  %v3916_v62 = vor.u32 %v4395_v29, %v3913_v55  ;;  %v3841_v34 = vld [vmem:[#allocation7 + $0x68] sm:$0xf0]  ;;  %v3801_v29 = vld [vmem:[#allocation7 + $0x18] sm:$0xf0]  ;;  %v4383_v55 = vld [vmem:[#allocation7 + $0x94] sm:$0xf] }
 0x112   :  { %2072 = vmatpush.bf16.msrb.mxu3 %v3708_v7  ;;  %v3967_v7 = vld [vmem:[#allocation7 + $0x160] sm:$0xf]  ;;  %v3889_v21 = vld [vmem:[#allocation7 + $0xc8] sm:$0xf0] }
 0x113   :  { %2034 = vmatpush.bf16.msrb.mxu0 %v3308_v32  ;;  %v3968_v25 = vor.u32 %v4410_v9, %v3967_v7  ;;  %v4370_v32 = vld [vmem:[#allocation7 + $0x24] sm:$0xf0]  ;;  %v4391_v7 = vld [vmem:[#allocation7 + $0xd4] sm:$0xf] }
 0x114   :  { %2047 = vmatpush.bf16.msrb.mxu1 %v3436_v38 }
 0x115   :  { %2060 = vmatpush.bf16.msrb.mxu2 %v3564_v16  ;;  %v4386_v16 = vld [vmem:[#allocation7 + $0xa4] sm:$0xf0] }
 0x116   :  { %2073 = vmatpush.bf16.msrb.mxu3 %v3692_v24  ;;  %v3808_v24 = vor.u32 %v4370_v32, %v3807_v14  ;;  %v3872_v33 = vor.u32 %v4386_v16, %v3871_v15  ;;  %v3977_v14 = vld [vmem:[#allocation7 + $0x178] sm:$0xf0]  ;;  %v3825_v16 = vld [vmem:[#allocation7 + $0x48] sm:$0xf0] }
 0x117   :  { %2035 = vmatpush.bf16.msrb.mxu0 %v3292_v41  ;;  %v3951_v41 = vld [vmem:[#allocation7 + $0x140] sm:$0xf] }
 0x118   :  { %2048 = vmatpush.bf16.msrb.mxu1 %v3420_v44  ;;  %v1842_v6 = vpop.f32.mrf.mxu1  ;;  %v3952_v43 = vor.u32 %v4406_v42, %v3951_v41  ;;  %v3969_v41 = vld [vmem:[#allocation7 + $0x168] sm:$0xf0] }
 0x119   :  { %2061 = vmatpush.bf16.msrb.mxu2 %v3548_v45  ;;  %v3800_v45 = vor.u32 %v4368_v36, %v3799_v35  ;;  %v4387_v35 = vld [vmem:[#allocation7 + $0xb4] sm:$0xf] }
 0x11a   :  { %2074 = vmatpush.bf16.msrb.mxu3 %v3676_v47  ;;  %2036 = vmatmul.bf16.vlgmr.msrb.gmra.mxu0 %v4727_v17  ;;  %v3823_v17 = vld [vmem:[#allocation7 + $0x40] sm:$0xf] }
 0x11b   :  { %2478 = vmatpush.bf16.msra.mxu0 %v3848_v48  ;;  %2049 = vmatmul.bf16.vlgmr.msrb.gmra.mxu1 %v4733_v22  ;;  %v3824_v22 = vor.u32 %v4374_v61, %v3823_v17  ;;  %v3791_v47 = vld [vmem:[#allocation7] sm:$0xf]  ;;  %v4366_v48 = vld [vmem:[#allocation7 + $0x4] sm:$0xf0]  ;;  %v3852_v17 = vor.u32 %v4379_v27, %v3849_v53  ;;  %v4377_v61 = vld [vmem:[#allocation7 + $0x64] sm:$0xf] }
 0x11c   :  { %2491 = vmatpush.bf16.msra.mxu1 %v3912_v49  ;;  %2062 = vmatmul.bf16.vlgmr.msrb.gmra.mxu2 %v4724_v31  ;;  %v1829_v31 = vpop.f32.mrf.mxu0  ;;  %v3864_v49 = vor.u32 %v4384_v39, %v3863_v37  ;;  %v3881_v37 = vld [vmem:[#allocation7 + $0xb8] sm:$0xf0]  ;;  %v4409_v39 = vld [vmem:[#allocation7 + $0x164] sm:$0xf] }
 0x11d   :  { %2075 = vmatmul.bf16.vlgmr.msrb.gmra.mxu3 %v4730_v18  ;;  %v4372_v18 = vld [vmem:[#allocation7 + $0x34] sm:$0xf0]  ;;  %v1830_v5 = vadd.f32 %v1829_v31, %v1817_v58  ;;  %2504 = vmatpush.bf16.msra.mxu2 %v3976_v1  ;;  %v2080_v58 = vmax.f32 %v4736_v8, 0.0  ;;  %v4393_v1 = vld [vmem:[#allocation7 + $0xe4] sm:$0xf]  ;;  %v3936_v31 = vor.u32 %v4402_v0, %v3935_v63  ;;  %v3844_v8 = vor.u32 %v4377_v61, %v3841_v34 }
 0x11e   :  { %v3816_v11 = vor.u32 %v4372_v18, %v3815_v3  ;;  %v3927_v18 = vld [vmem:[#allocation7 + $0x110] sm:$0xf]  ;;  %v3972_v42 = vor.u32 %v4409_v39, %v3969_v41  ;;  %v3961_v27 = vld [vmem:[#allocation7 + $0x158] sm:$0xf0]  ;;  %v4365_v63 = vld [vmem:[#allocation7 + $0x4] sm:$0xf] }
 0x11f   :  { %2479 = vmatpush.bf16.msra.mxu0 %v3840_v40  ;;  %v1843_v12 = vadd.f32 %v1842_v6, %v1830_v5  ;;  %v1855_v38 = vpop.f32.mrf.mxu2  ;;  %v4758_v3 = vpack.c.bf16 %v2080_v58, %v2080_v58  ;;  %v4375_v6 = vld [vmem:[#allocation7 + $0x54] sm:$0xf]  ;;  %v3928_v9 = vor.u32 %v4400_v4, %v3927_v18  ;;  %v4405_v58 = vld [vmem:[#allocation7 + $0x144] sm:$0xf]  ;;  %v3857_v18 = vld [vmem:[#allocation7 + $0x88] sm:$0xf0] }
 0x120   :  { %2492 = vmatpush.bf16.msra.mxu1 %v3904_v54  ;;  %v1868_v19 = vpop.f32.mrf.mxu3  ;;  %v1844_v10 = vpop.f32.mrf.mxu1  ;;  %v3943_v54 = vld [vmem:[#allocation7 + $0x130] sm:$0xf]  ;;  %v3836_v32 = vor.u32 %v4375_v6, %v3833_v60  ;;  %v4401_v60 = vld [vmem:[#allocation7 + $0x124] sm:$0xf] }
 0x121   :  { %2505 = vmatpush.bf16.msra.mxu2 %v3968_v25  ;;  %v1856_v26 = vadd.f32 %v1855_v38, %v1843_v12  ;;  %v3944_v46 = vor.u32 %v4404_v28, %v3943_v54  ;;  %v3897_v25 = vld [vmem:[#allocation7 + $0xd8] sm:$0xf0]  ;;  %v4398_v12 = vld [vmem:[#allocation7 + $0x104] sm:$0xf0]  ;;  %v4373_v38 = vld [vmem:[#allocation7 + $0x44] sm:$0xf] }
 0x122   :  { %v3900_v15 = vor.u32 %v4391_v7, %v3897_v25  ;;  %v4367_v28 = vld [vmem:[#allocation7 + $0x14] sm:$0xf]  ;;  %v3937_v7 = vld [vmem:[#allocation7 + $0x128] sm:$0xf0] }
 0x123   :  { %2480 = vmatpush.bf16.msra.mxu0 %v3832_v57  ;;  %v1869_v44 = vadd.f32 %v1868_v19, %v1856_v26  ;;  %v3792_v57 = vor.u32 %v4366_v48, %v3791_v47  ;;  %v3892_v26 = vor.u32 %v4389_v20, %v3889_v21  ;;  %v3809_v47 = vld [vmem:[#allocation7 + $0x28] sm:$0xf0]  ;;  %v4385_v48 = vld [vmem:[#allocation7 + $0xa4] sm:$0xf]  ;;  %v3804_v61 = vor.u32 %v4367_v28, %v3801_v29  ;;  %v4418_v28 = vld [vmem:[#allocation7 + $0x1a4] sm:$0xf0] }
 0x124   :  { %2493 = vmatpush.bf16.msra.mxu1 %v3896_v59  ;;  %v1831_v30 = vpop.f32.mrf.mxu0  ;;  %v3856_v59 = vor.u32 %v4382_v51, %v3855_v50  ;;  %v4407_v51 = vld [vmem:[#allocation7 + $0x154] sm:$0xf]  ;;  %v4397_v20 = vld [vmem:[#allocation7 + $0x104] sm:$0xf]  ;;  %v3921_v21 = vld [vmem:[#allocation7 + $0x108] sm:$0xf0] }
 0x125   :  { %2506 = vmatpush.bf16.msra.mxu2 %v3960_v23  ;;  %v2081_v56 = vmax.f32 %v1869_v44, 0.0  ;;  %v4371_v30 = vld [vmem:[#allocation7 + $0x34] sm:$0xf]  ;;  %v3884_v44 = vor.u32 %v4387_v35, %v3881_v37  ;;  %v3964_v53 = vor.u32 %v4407_v51, %v3961_v27  ;;  %v4424_v37 = vld [vmem:[#allocation7 + $0x1d4] sm:$0xf0] }
 0x127   :  { %2481 = vmatpush.bf16.msra.mxu0 %v3824_v22  ;;  %v1857_v52 = vpop.f32.mrf.mxu2  ;;  %v3905_v22 = vld [vmem:[#allocation7 + $0xe8] sm:$0xf0] }
 0x128   :  { %2494 = vmatpush.bf16.msra.mxu1 %v3888_v2  ;;  %v1870_v40 = vpop.f32.mrf.mxu3  ;;  %v4756_v2 = vpack.c.bf16 %v2081_v56, %v2081_v56  ;;  %v3908_v5 = vor.u32 %v4393_v1, %v3905_v22  ;;  %v3865_v56 = vld [vmem:[#allocation7 + $0x98] sm:$0xf0]  ;;  %v3793_v1 = vld [vmem:[#allocation7 + $0x8] sm:$0xf0]  ;;  %v4403_v22 = vld [vmem:[#allocation7 + $0x134] sm:$0xf] }
 0x129   :  { %2507 = vmatpush.bf16.msra.mxu2 %v3952_v43  ;;  %v3868_v0 = vor.u32 %v4383_v55, %v3865_v56 }
 0x12b   :  { %2482 = vmatpush.bf16.msra.mxu0 %v3816_v11  ;;  %v3919_v11 = vld [vmem:[#allocation7 + $0x100] sm:$0xf] }
 0x12c   :  { %2495 = vmatpush.bf16.msra.mxu1 %v3880_v13  ;;  %v4411_v13 = vld [vmem:[#allocation7 + $0x174] sm:$0xf]  ;;  %v3920_v19 = vor.u32 %v4398_v12, %v3919_v11  ;;  %v3796_v11 = vor.u32 %v4365_v63, %v3793_v1  ;;  %v4428_v12 = vld [vmem:[#allocation7 + $0x1f4] sm:$0xf0] }
 0x12d   :  { %2508 = vmatpush.bf16.msra.mxu2 %v3944_v46  ;;  %v3980_v23 = vor.u32 %v4411_v13, %v3977_v14  ;;  %v4427_v63 = vld [vmem:[#allocation7 + $0x1f4] sm:$0xf] }
 0x12f   :  { %2483 = vmatpush.bf16.msra.mxu0 %v3808_v24  ;;  %v3828_v24 = vor.u32 %v4373_v38, %v3825_v16  ;;  %v3929_v38 = vld [vmem:[#allocation7 + $0x118] sm:$0xf0] }
 0x130   :  { %2496 = vmatpush.bf16.msra.mxu1 %v3872_v33  ;;  %v3817_v33 = vld [vmem:[#allocation7 + $0x38] sm:$0xf0] }
 0x131   :  { %2509 = vmatpush.bf16.msra.mxu2 %v3936_v31  ;;  %v3820_v43 = vor.u32 %v4371_v30, %v3817_v33  ;;  %v3945_v31 = vld [vmem:[#allocation7 + $0x138] sm:$0xf0]  ;;  %v4031_v30 = vld [vmem:[#allocation7 + $0x1e0] sm:$0xf]  ;;  %v4426_v33 = vld [vmem:[#allocation7 + $0x1e4] sm:$0xf0] }
 0x132   :  { %v4032_v35 = vor.u32 %v4426_v33, %v4031_v30  ;;  %v3993_v30 = vld [vmem:[#allocation7 + $0x198] sm:$0xf0] }
 0x133   :  { %2484 = vmatpush.bf16.msra.mxu0 %v3800_v45  ;;  %v4369_v45 = vld [vmem:[#allocation7 + $0x24] sm:$0xf] }
 0x134   :  { %2497 = vmatpush.bf16.msra.mxu1 %v3864_v49  ;;  %v3873_v49 = vld [vmem:[#allocation7 + $0xa8] sm:$0xf0]  ;;  %v3812_v40 = vor.u32 %v4369_v45, %v3809_v47 }
 0x135   :  { %2510 = vmatpush.bf16.msra.mxu2 %v3928_v9  ;;  %v3876_v54 = vor.u32 %v4385_v48, %v3873_v49  ;;  %v4039_v9 = vld [vmem:[#allocation7 + $0x1f0] sm:$0xf] }
 0x136   :  { %v4040_v14 = vor.u32 %v4428_v12, %v4039_v9  ;;  %v4007_v49 = vld [vmem:[#allocation7 + $0x1b0] sm:$0xf] }
 0x137   :  { %2485 = vmatpush.bf16.msra.mxu0 %v3792_v57  ;;  %v1881_v36 = vpop.f32.mrf.mxu0 }
 0x138   :  { %2498 = vmatpush.bf16.msra.mxu1 %v3856_v59  ;;  %v4762_v10 = vpop.f32.mrf.mxu1  ;;  %v3953_v59 = vld [vmem:[#allocation7 + $0x148] sm:$0xf0]  ;;  %2517 = vmatpush.bf16.msra.mxu3 %v4040_v14 }
 0x139   :  { %2511 = vmatpush.bf16.msra.mxu2 %v3920_v19 }
 0x13a   :  { %2486 = vmatmul.bf16.vlgmr.msra.gmra.mxu0 %v4758_v3 }
 0x13b   :  { %2530 = vmatpush.bf16.msrb.mxu0 %v3852_v17  ;;  %2499 = vmatmul.bf16.vlgmr.msra.gmra.mxu1 %v4756_v2  ;;  %v3956_v17 = vor.u32 %v4405_v58, %v3953_v59  ;;  %v4416_v58 = vld [vmem:[#allocation7 + $0x194] sm:$0xf0] }
 0x13c   :  { %2543 = vmatpush.bf16.msrb.mxu1 %v3916_v62  ;;  %v4764_v62 = vld [vmem:[#allocation5] sm:$0xf]  ;;  %2518 = vmatpush.bf16.msra.mxu3 %v4032_v35 }
 0x13d   :  { %2556 = vmatpush.bf16.msrb.mxu2 %v3980_v23  ;;  %v360_v34 = vperm.slane %v4764_v62, 2 }
 0x13f   :  { %2531 = vmatpush.bf16.msrb.mxu0 %v3844_v8  ;;  %v1907_v50 = vpop.f32.mrf.mxu2  ;;  %v1883_v46 = vpop.f32.mrf.mxu0  ;;  %v4381_v8 = vld [vmem:[#allocation7 + $0x84] sm:$0xf]  ;;  %v1882_v25 = vadd.f32 %v1881_v36, %v360_v34  ;;  %v4023_v36 = vld [vmem:[#allocation7 + $0x1d0] sm:$0xf] }
 0x140   :  { %2544 = vmatpush.bf16.msrb.mxu1 %v3908_v5  ;;  %v1920_v52 = vpop.f32.mrf.mxu3  ;;  %v1896_v57 = vpop.f32.mrf.mxu1  ;;  %v3948_v5 = vor.u32 %v4403_v22, %v3945_v31  ;;  %v3860_v13 = vor.u32 %v4381_v8, %v3857_v18  ;;  %v4425_v22 = vld [vmem:[#allocation7 + $0x1e4] sm:$0xf]  ;;  %v4033_v31 = vld [vmem:[#allocation7 + $0x1e8] sm:$0xf0] }
 0x141   :  { %2557 = vmatpush.bf16.msrb.mxu2 %v3972_v42  ;;  %v1895_v16 = vadd.f32 %v4762_v10, %v1882_v25  ;;  %v4024_v42 = vor.u32 %v4424_v37, %v4023_v36  ;;  %v3991_v57 = vld [vmem:[#allocation7 + $0x190] sm:$0xf]  ;;  %v4036_v18 = vor.u32 %v4425_v22, %v4033_v31  ;;  %v4421_v25 = vld [vmem:[#allocation7 + $0x1c4] sm:$0xf]  ;;  %v3985_v37 = vld [vmem:[#allocation7 + $0x188] sm:$0xf0] }
 0x142   :  { %v3992_v59 = vor.u32 %v4416_v58, %v3991_v57  ;;  %v4413_v36 = vld [vmem:[#allocation7 + $0x184] sm:$0xf]  ;;  %v4444_v22 = vld [vmem:[%s4827_s5 + $0x78] sm:$0xff] }
 0x143   :  { %2532 = vmatpush.bf16.msrb.mxu0 %v3836_v32  ;;  %v3940_v32 = vor.u32 %v4401_v60, %v3937_v7  ;;  %v1908_v23 = vadd.f32 %v1907_v50, %v1895_v16  ;;  %2519 = vmatpush.bf16.msra.mxu3 %v4024_v42  ;;  %v4420_v50 = vld [vmem:[#allocation7 + $0x1b4] sm:$0xf0]  ;;  %v4435_v31 = vld [vmem:[%s4827_s5 + $0x30] sm:$0xff] }
 0x144   :  { %2545 = vmatpush.bf16.msrb.mxu1 %v3900_v15  ;;  %v4399_v15 = vld [vmem:[#allocation7 + $0x114] sm:$0xf] }
 0x145   :  { %2558 = vmatpush.bf16.msrb.mxu2 %v3964_v53  ;;  %v3932_v19 = vor.u32 %v4399_v15, %v3929_v38  ;;  %v4008_v53 = vor.u32 %v4420_v50, %v4007_v49  ;;  %v4009_v15 = vld [vmem:[#allocation7 + $0x1b8] sm:$0xf0]  ;;  %v361_v38 = vperm.slane %v4764_v62, 3 }
 0x147   :  { %2533 = vmatpush.bf16.msrb.mxu0 %v3828_v24  ;;  %v1909_v4 = vpop.f32.mrf.mxu2  ;;  %v3924_v24 = vor.u32 %v4397_v20, %v3921_v21  ;;  %v4001_v20 = vld [vmem:[#allocation7 + $0x1a8] sm:$0xf0] }
 0x148   :  { %2546 = vmatpush.bf16.msrb.mxu1 %v3892_v26  ;;  %v1922_v6 = vpop.f32.mrf.mxu3  ;;  %v1921_v26 = vadd.f32 %v1920_v52, %v1908_v23 }
 0x149   :  { %2559 = vmatpush.bf16.msrb.mxu2 %v3956_v17  ;;  %v3983_v17 = vld [vmem:[#allocation7 + $0x180] sm:$0xf]  ;;  %v4025_v6 = vld [vmem:[#allocation7 + $0x1d8] sm:$0xf0] }
 0x14b   :  { %2534 = vmatpush.bf16.msrb.mxu0 %v3820_v43  ;;  %v4015_v43 = vld [vmem:[#allocation7 + $0x1c0] sm:$0xf] }
 0x14c   :  { %2547 = vmatpush.bf16.msrb.mxu1 %v3884_v44  ;;  %v4422_v44 = vld [vmem:[#allocation7 + $0x1c4] sm:$0xf0] }
 0x14d   :  { %2560 = vmatpush.bf16.msrb.mxu2 %v3948_v5  ;;  %v4423_v5 = vld [vmem:[#allocation7 + $0x1d4] sm:$0xf] }
 0x14e   :  { %v4028_v60 = vor.u32 %v4423_v5, %v4025_v6  ;;  %v4433_v5 = vld [vmem:[%s4827_s5 + $0x20] sm:$0xff]  ;;  %v4432_v6 = vld [vmem:[%s4827_s5 + $0x18] sm:$0xff] }
 0x14f   :  { %2535 = vmatpush.bf16.msrb.mxu0 %v3812_v40 }
 0x150   :  { %2548 = vmatpush.bf16.msrb.mxu1 %v3876_v54  ;;  %v3999_v54 = vld [vmem:[#allocation7 + $0x1a0] sm:$0xf] }
 0x151   :  { %2561 = vmatpush.bf16.msrb.mxu2 %v3940_v32  ;;  %v4000_v46 = vor.u32 %v4418_v28, %v3999_v54  ;;  %v4419_v32 = vld [vmem:[#allocation7 + $0x1b4] sm:$0xf] }
 0x152   :  { %v4012_v16 = vor.u32 %v4419_v32, %v4009_v15  ;;  %v4440_v32 = vld [vmem:[%s4827_s5 + $0x58] sm:$0xff]  ;;  %v4439_v15 = vld [vmem:[%s4827_s5 + $0x50] sm:$0xff] }
 0x153   :  { %2536 = vmatpush.bf16.msrb.mxu0 %v3804_v61  ;;  %v4414_v61 = vld [vmem:[#allocation7 + $0x184] sm:$0xf0] }
 0x154   :  { %2549 = vmatpush.bf16.msrb.mxu1 %v3868_v0  ;;  %v3984_v34 = vor.u32 %v4414_v61, %v3983_v17  ;;  %v4041_v0 = vld [vmem:[#allocation7 + $0x1f8] sm:$0xf0] }
 0x155   :  { %2562 = vmatpush.bf16.msrb.mxu2 %v3932_v19  ;;  %v4044_v1 = vor.u32 %v4427_v63, %v4041_v0  ;;  %v4417_v19 = vld [vmem:[#allocation7 + $0x1a4] sm:$0xf] }
 0x157   :  { %2537 = vmatpush.bf16.msrb.mxu0 %v3796_v11  ;;  %v1933_v10 = vpop.f32.mrf.mxu0  ;;  %v4017_v11 = vld [vmem:[#allocation7 + $0x1c8] sm:$0xf0] }
 0x158   :  { %2550 = vmatpush.bf16.msrb.mxu1 %v3860_v13  ;;  %v1934_v39 = vadd.f32 %v1933_v10, %v1921_v26  ;;  %v1946_v41 = vpop.f32.mrf.mxu1  ;;  %v4020_v13 = vor.u32 %v4421_v25, %v4017_v11  ;;  %v4415_v26 = vld [vmem:[#allocation7 + $0x194] sm:$0xf]  ;;  %v4430_v11 = vld [vmem:[%s4827_s5 + $0x8] sm:$0xff] }
 0x159   :  { %2563 = vmatpush.bf16.msrb.mxu2 %v3924_v24  ;;  %v4004_v24 = vor.u32 %v4417_v19, %v4001_v20  ;;  %v3996_v35 = vor.u32 %v4415_v26, %v3993_v30 }
 0x15a   :  { %2538 = vmatmul.bf16.vlgmr.msrb.gmra.mxu0 %v4758_v3  ;;  %v1947_v3 = vadd.f32 %v1946_v41, %v1934_v39  ;;  %v3988_v39 = vor.u32 %v4413_v36, %v3985_v37 }
 0x15b   :  { %2551 = vmatmul.bf16.vlgmr.msrb.gmra.mxu1 %v4756_v2  ;;  %v4016_v2 = vor.u32 %v4422_v44, %v4015_v43 }
 0x15c   :  { %2731 = vmatpush.bf16.msra.mxu1 %v4444_v22 }
 0x15d   :  { %2520 = vmatpush.bf16.msra.mxu3 %v4016_v2 }
 0x15f   :  { %v1959_v45 = vpop.f32.mrf.mxu2  ;;  %v1935_v27 = vpop.f32.mrf.mxu0 }
 0x160   :  { %v1960_v47 = vadd.f32 %v1959_v45, %v1947_v3  ;;  %v1972_v48 = vpop.f32.mrf.mxu3  ;;  %v1948_v52 = vpop.f32.mrf.mxu1 }
 0x161   :  { %2521 = vmatpush.bf16.msra.mxu3 %v4008_v53 }
 0x162   :  { %v1973_v51 = vadd.f32 %v1972_v48, %v1960_v47 }
 0x164   :  { %v2082_v40 = vmax.f32 %v1973_v51, 0.0 }
 0x165   :  { %2522 = vmatpush.bf16.msra.mxu3 %v4000_v46 }
 0x166   :  { %v2086_v29 = vpack.c.bf16 %v2082_v40, %v2082_v40  ;;  %v2152_v40 = vld [vmem:[#allocation8] sm:$0x3] }
 0x167   :  { %v1961_v55 = vpop.f32.mrf.mxu2  ;;  %v2154_v54 = vperm.slane %v2152_v40, 0  ;;  %v2155_v58 = vperm.slane %v2152_v40, 1 }
 0x168   :  { %2512 = vmatmul.bf16.vlgmr.msra.gmra.mxu2 %v2086_v29  ;;  %v1974_v56 = vpop.f32.mrf.mxu3 }
 0x169   :  { %2523 = vmatpush.bf16.msra.mxu3 %v3992_v59 }
 0x16d   :  { %2524 = vmatpush.bf16.msra.mxu3 %v3984_v34 }
 0x171   :  { %2569 = vmatpush.bf16.msrb.mxu3 %v4044_v1  ;;  %v4436_v1 = vld [vmem:[%s4827_s5 + $0x38] sm:$0xff] }
 0x172   :  { %2718 = vmatpush.bf16.msra.mxu0 %v4436_v1 }
 0x175   :  { %2570 = vmatpush.bf16.msrb.mxu3 %v4036_v18  ;;  %v4434_v18 = vld [vmem:[%s4827_s5 + $0x28] sm:$0xff] }
 0x176   :  { %2719 = vmatpush.bf16.msra.mxu0 %v4435_v31 }
 0x177   :  { %v1985_v8 = vpop.f32.mrf.mxu0 }
 0x178   :  { %2564 = vmatmul.bf16.vlgmr.msrb.gmra.mxu2 %v2086_v29  ;;  %v1998_v4 = vpop.f32.mrf.mxu1  ;;  %v1986_v33 = vadd.f32 %v1985_v8, %v361_v38  ;;  %v4443_v8 = vld [vmem:[%s4827_s5 + $0x70] sm:$0xff]  ;;  %v4438_v38 = vld [vmem:[%s4827_s5 + $0x48] sm:$0xff] }
 0x179   :  { %2571 = vmatpush.bf16.msrb.mxu3 %v4028_v60  ;;  %2732 = vmatpush.bf16.msra.mxu1 %v4443_v8 }
 0x17a   :  { %v1999_v10 = vadd.f32 %v1998_v4, %v1986_v33  ;;  %2720 = vmatpush.bf16.msra.mxu0 %v4434_v18 }
 0x17d   :  { %2572 = vmatpush.bf16.msrb.mxu3 %v4020_v13  ;;  %v4429_v13 = vld [vmem:[%s4827_s5] sm:$0xff] }
 0x17e   :  { %2721 = vmatpush.bf16.msra.mxu0 %v4433_v5 }
 0x17f   :  { %v2011_v7 = vpop.f32.mrf.mxu2  ;;  %v1987_v12 = vpop.f32.mrf.mxu0 }
 0x180   :  { %v2024_v9 = vpop.f32.mrf.mxu3  ;;  %v2000_v14 = vpop.f32.mrf.mxu1  ;;  %v2012_v41 = vadd.f32 %v2011_v7, %v1999_v10  ;;  %v4431_v7 = vld [vmem:[%s4827_s5 + $0x10] sm:$0xff]  ;;  %v4442_v12 = vld [vmem:[%s4827_s5 + $0x68] sm:$0xff] }
 0x181   :  { %2573 = vmatpush.bf16.msrb.mxu3 %v4012_v16  ;;  %2733 = vmatpush.bf16.msra.mxu1 %v4442_v12  ;;  %v4441_v14 = vld [vmem:[%s4827_s5 + $0x60] sm:$0xff] }
 0x182   :  { %v2025_v62 = vadd.f32 %v2024_v9, %v2012_v41  ;;  %2722 = vmatpush.bf16.msra.mxu0 %v4432_v6  ;;  %v4437_v16 = vld [vmem:[%s4827_s5 + $0x40] sm:$0xff]  ;;  %s2751_s5 = sshll.u32 %s4626_s29, 4  ;;  %s2752_s5 = int_to_ptr.vmem [resolvable:$true] %s2751_s5 }
 0x185   :  { %2574 = vmatpush.bf16.msrb.mxu3 %v4004_v24  ;;  %2734 = vmatpush.bf16.msra.mxu1 %v4441_v14 }
 0x186   :  { %2723 = vmatpush.bf16.msra.mxu0 %v4431_v7 }
 0x187   :  { %v2013_v21 = vpop.f32.mrf.mxu2 }
 0x188   :  { %v2026_v23 = vpop.f32.mrf.mxu3 }
 0x189   :  { %2575 = vmatpush.bf16.msrb.mxu3 %v3996_v35  ;;  %2735 = vmatpush.bf16.msra.mxu1 %v4440_v32 }
 0x18a   :  { %2724 = vmatpush.bf16.msra.mxu0 %v4430_v11 }
 0x18d   :  { %2576 = vmatpush.bf16.msrb.mxu3 %v3988_v39  ;;  %2736 = vmatpush.bf16.msra.mxu1 %v4439_v15 }
 0x18e   :  { %2725 = vmatpush.bf16.msra.mxu0 %v4429_v13 }
 0x191   :  { %2737 = vmatpush.bf16.msra.mxu1 %v4438_v38 }
 0x195   :  { %2738 = vmatpush.bf16.msra.mxu1 %v4437_v16 }
 0x197   :  { %v2037_v42 = vpop.f32.mrf.mxu0 }
 0x198   :  { %v2050_v3 = vpop.f32.mrf.mxu1  ;;  %v2038_v43 = vadd.f32 %v2037_v42, %v2025_v62  ;;  %v4455_v62 = vld [vmem:[#allocation10] ss:$0 sm:$0xff] }
 0x19a   :  { %v2051_v44 = vadd.f32 %v2050_v3, %v2038_v43 }
 0x19f   :  { %v2063_v45 = vpop.f32.mrf.mxu2  ;;  %v2039_v48 = vpop.f32.mrf.mxu0 }
 0x1a0   :  { %v2064_v2 = vadd.f32 %v2063_v45, %v2051_v44  ;;  %v2076_v47 = vpop.f32.mrf.mxu3  ;;  %v2052_v49 = vpop.f32.mrf.mxu1 }
 0x1a2   :  { %v2077_v50 = vadd.f32 %v2076_v47, %v2064_v2 }
 0x1a4   :  { %v2083_v51 = vmax.f32 %v2077_v50, 0.0 }
 0x1a6   :  { %v2087_v27 = vpack.c.bf16 %v2083_v51, %v2083_v51 }
 0x1a7   :  { %v2065_v52 = vpop.f32.mrf.mxu2 }
 0x1a8   :  { %v2078_v53 = vpop.f32.mrf.mxu3  ;;  %2525 = vmatmul.bf16.vlgmr.msra.gmra.mxu3 %v2087_v27 }
 0x1b7   :  { %v2487_v28 = vpop.f32.mrf.mxu0 }
 0x1b8   :  { %v2488_v29 = vadd.f32 %v2487_v28, %v2154_v54  ;;  %v2500_v55 = vpop.f32.mrf.mxu1  ;;  %2577 = vmatmul.bf16.vlgmr.msrb.gmra.mxu3 %v2087_v27 }
 0x1ba   :  { %v2501_v46 = vadd.f32 %v2500_v55, %v2488_v29 }
 0x1bf   :  { %v2489_v56 = vpop.f32.mrf.mxu0 }
 0x1c0   :  { %v2502_v57 = vpop.f32.mrf.mxu1 }
 0x1d7   :  { %v2539_v59 = vpop.f32.mrf.mxu0 }
 0x1d8   :  { %v2540_v17 = vadd.f32 %v2539_v59, %v2155_v58  ;;  %v2552_v61 = vpop.f32.mrf.mxu1 }
 0x1da   :  { %v2553_v34 = vadd.f32 %v2552_v61, %v2540_v17 }
 0x1df   :  { %v2541_v63 = vpop.f32.mrf.mxu0 }
 0x1e0   :  { %v2554_v0 = vpop.f32.mrf.mxu1 }
 0x1eb   :  { %v2513_v4 = vpop.f32.mrf.mxu2 }
 0x1ec   :  { %v2514_v19 = vadd.f32 %v2513_v4, %v2501_v46 }
 0x1f3   :  { %v2515_v60 = vpop.f32.mrf.mxu2 }
 0x1fb   :  { %v2565_v9 = vpop.f32.mrf.mxu2 }
 0x1fc   :  { %v2566_v30 = vadd.f32 %v2565_v9, %v2553_v34 }
 0x203   :  { %v2567_v25 = vpop.f32.mrf.mxu2 }
 0x22b   :  { %v2526_v20 = vpop.f32.mrf.mxu3 }
 0x22c   :  { %v2527_v21 = vadd.f32 %v2526_v20, %v2514_v19 }
 0x22e   :  { %v2582_v23 = vmax.f32 %v2527_v21, 0.0 }
 0x230   :  { %v2584_v24 = vpack.c.bf16 %v2582_v23, %v2582_v23 }
 0x232   :  { %2726 = vmatmul.bf16.vlgmr.msra.gmra.mxu0 %v2584_v24 }
 0x233   :  { %v2528_v26 = vpop.f32.mrf.mxu3 }
 0x23b   :  { %v2578_v33 = vpop.f32.mrf.mxu3 }
 0x23c   :  { %v2579_v35 = vadd.f32 %v2578_v33, %v2566_v30 }
 0x23e   :  { %v2583_v36 = vmax.f32 %v2579_v35, 0.0 }
 0x240   :  { %v2585_v37 = vpack.c.bf16 %v2583_v36, %v2583_v36 }
 0x242   :  { %2739 = vmatmul.bf16.vlgmr.msra.gmra.mxu1 %v2585_v37 }
 0x243   :  { %v2580_v10 = vpop.f32.mrf.mxu3 }
 0x2af   :  { %v2727_v39 = vpop.f32.mrf.mxu0 }
 0x2b0   :  { %v2728_v42 = vadd.f32 %v4455_v62, %v2727_v39 }
 0x2b7   :  { %v2729_v41 = vpop.f32.mrf.mxu0 }
 0x2bf   :  { %v2740_v3 = vpop.f32.mrf.mxu1 }
 0x2c0   :  { %v2741_v43 = vadd.f32 %v2740_v3, %v2728_v42 }
 0x2c2   :  { %2745 = vst.msk [vmem:[#allocation11] sm:$0x3] %vm2744_vm0, %v2741_v43 }
 0x2c3   :  { %2756 = dma.vmem_to_hbm [thread:$0]  %s2752_s5, 32, %s2754_s9, [#allocation4]  }
 0x2c7   :  { %v2742_v44 = vpop.f32.mrf.mxu1 }
 0x2c8   :  { %4615 = dma.done.wait [#allocation4], 32  }
 0x2c9   :  { %4616 = vsyncadd [#allocation4], 4294967264 }
 0x2ca   :  { %2761 = vsyncpa [#allocation3], 1 }
 0x2cb   :  { %2762 = vsyncpa [#allocation6], 1 }
 0x2cc   :  { %2763 = vsyncpa [#allocation9], 1 }
 0x2cd   :  { %2764 = vsyncpa [#allocation4], 1 }

// kernel: feature_net_forward.4
= control target key start
LH: loop header
LB: loop body
LE: loop exit
PB: predicated region body
PF: predicated region fallthrough
CT: control target
= control target key end

     0   :  { %8 = vsyncpa [#allocation3], 0  ;;  %s9755_s0 = inlined_call_operand.vmem [shape: bf16[2,2,6,384], index: 0, kind: input, shape index: {}]   ;;  %s9756_s1 = inlined_call_operand.hbm [shape: bf16[2,5,384,256], index: 1, kind: input, shape index: {}]   ;;  %s9757_s2 = inlined_call_operand.hbm [shape: f32[1,256], index: 2, kind: input, shape index: {}]   ;;  %s9758_s3 = inlined_call_operand.vmem [shape: bf16[2,4,256], index: 3, kind: output, shape index: {}]  }
   0x1   :  { %9 = vsyncpa [#allocation5], 0  ;;  %s7470_s12 = smov 0  }
   0x2 LB: > { %s125_s15 = sshll.u32 %s9756_s1, 4  ;;  %s7479_s16 = sadd.s32 4294967295, %s7444_s12   ;;  %s7444_s12 = sphi %s7470_s12, %s15_s12   ;;  %s126_s15 = int_to_ptr.hbm [resolvable:$true] %s125_s15 }
   0x3   : > { %p4919_p0 = scmp.ge.s32.totalorder %s7444_s12, 1  ;;  %p114_p1 = scmp.lt.s32.totalorder %s7444_s12, 3 }
   0x4   : > { %p7354_p2 = scmp.eq.s32.totalorder %s7479_s16, 0  ;;  %s7446_s18 = smov [#allocation2]  }
   0x5   : > { %p7484_p3 = pnand %p4919_p0, %p114_p1  ;;  %s127_s19 = sshll.u32 %s7446_s18, 4  ;;  %s128_s19 = int_to_ptr.vmem [resolvable:$true] %s127_s19 }
   0x6   : > { %s140_s22 = sshll.u32 %s9757_s2, 4  ;;  %s7447_s23 = smov [#allocation4]   ;;  %s141_s22 = int_to_ptr.hbm [resolvable:$true] %s140_s22 }
   0x7   : > { %p7347_p4 = pneg %p7484_p3  ;;  %s142_s24 = sshll.u32 %s7447_s23, 4  ;;  %s143_s24 = int_to_ptr.vmem [resolvable:$true] %s142_s24 }
   0x8   : > { %s7448_s25 = smov 128   ;;  %s7449_s26 = smov 8  }
   0x9   : > { %p7348_p5 = pnand %p7354_p2, %p7347_p4  ;;  %163 = sbr.rel (%p7484_p3) target bundleno = 1131 (0x46b), region = 32 }
   0xb   : > { %7350 = dma.hbm_to_vmem [thread:$0]  (!%p7348_p5), %s126_s15, 61440, %s128_s19, [#allocation3], %s7448_s25, %s7448_s25, %s7449_s26  }
   0xc   : > { %7353 = dma.hbm_to_vmem [thread:$0]  (!%p7348_p5), %s141_s22, 32, %s143_s24, [#allocation5]  }
   0xe   : > { %7435 = dma.done.wait (%p7354_p2), [#allocation3], 61440  }
   0xf   : > { %7437 = vsyncadd (%p7354_p2), [#allocation3], 4294905856 }
  0x10   : > { %7439 = dma.done.wait (%p7354_p2), [#allocation5], 32  }
  0x11   : > { %7441 = vsyncadd (%p7354_p2), [#allocation5], 4294967264  ;;  %v4989_v0 = vld [vmem:[#allocation2 + $0x1f0] sm:$0xf]  ;;  %v6969_v1 = vld [vmem:[#allocation2 + $0x1f4] sm:$0xf0] }
  0x12   : > { %v5053_v2 = vld [vmem:[#allocation2 + $0x270] sm:$0xf]  ;;  %v7505_v3 = vor.u32 %v6969_v1, %v4989_v0  ;;  %v6985_v4 = vld [vmem:[#allocation2 + $0x274] sm:$0xf0]  ;;  %v6968_v9 = vld [vmem:[#allocation2 + $0x1f4] sm:$0xf] }
  0x13   : > { %v5117_v5 = vld [vmem:[#allocation2 + $0x2f0] sm:$0xf]  ;;  %v7001_v6 = vld [vmem:[#allocation2 + $0x2f4] sm:$0xf0]  ;;  %v7507_v7 = vor.u32 %v6985_v4, %v5053_v2  ;;  %v4991_v10 = vld [vmem:[#allocation2 + $0x1f8] sm:$0xf0] }
  0x14   : > { %v7509_v8 = vor.u32 %v7001_v6, %v5117_v5  ;;  %v4981_v11 = vld [vmem:[#allocation2 + $0x1e0] sm:$0xf]  ;;  %605 = vmatpush.bf16.msra.mxu0 %v7505_v3  ;;  %v7512_v12 = vor.u32 %v6968_v9, %v4991_v10  ;;  %v6967_v13 = vld [vmem:[#allocation2 + $0x1e4] sm:$0xf0]  ;;  %v6966_v20 = vld [vmem:[#allocation2 + $0x1e4] sm:$0xf] }
  0x15   : > { %v5045_v14 = vld [vmem:[#allocation2 + $0x260] sm:$0xf]  ;;  %v6983_v15 = vld [vmem:[#allocation2 + $0x264] sm:$0xf0]  ;;  %618 = vmatpush.bf16.msra.mxu1 %v7507_v7  ;;  %v7516_v16 = vor.u32 %v6967_v13, %v4981_v11  ;;  %v4983_v22 = vld [vmem:[#allocation2 + $0x1e8] sm:$0xf0] }
  0x16   : > { %631 = vmatpush.bf16.msra.mxu2 %v7509_v8  ;;  %v7518_v17 = vor.u32 %v6983_v15, %v5045_v14  ;;  %v5109_v18 = vld [vmem:[#allocation2 + $0x2e0] sm:$0xf]  ;;  %v6999_v19 = vld [vmem:[#allocation2 + $0x2e4] sm:$0xf0]  ;;  %644 = vmatpush.bf16.msra.mxu3 %v7512_v12  ;;  %v4973_v23 = vld [vmem:[#allocation2 + $0x1d0] sm:$0xf]  ;;  %v7523_v25 = vor.u32 %v6966_v20, %v4983_v22 }
  0x17   : > { %v7521_v21 = vor.u32 %v6999_v19, %v5109_v18  ;;  %v6965_v24 = vld [vmem:[#allocation2 + $0x1d4] sm:$0xf0]  ;;  %v5037_v26 = vld [vmem:[#allocation2 + $0x250] sm:$0xf]  ;;  %v6964_v31 = vld [vmem:[#allocation2 + $0x1d4] sm:$0xf] }
  0x18   : > { %v6981_v27 = vld [vmem:[#allocation2 + $0x254] sm:$0xf0]  ;;  %v5101_v28 = vld [vmem:[#allocation2 + $0x2d0] sm:$0xf]  ;;  %606 = vmatpush.bf16.msra.mxu0 %v7516_v16  ;;  %v7526_v29 = vor.u32 %v6965_v24, %v4973_v23  ;;  %v4975_v32 = vld [vmem:[#allocation2 + $0x1d8] sm:$0xf0] }
  0x19   : > { %v6997_v30 = vld [vmem:[#allocation2 + $0x2d4] sm:$0xf0]  ;;  %619 = vmatpush.bf16.msra.mxu1 %v7518_v17  ;;  %v7530_v33 = vor.u32 %v6981_v27, %v5037_v26  ;;  %v4965_v35 = vld [vmem:[#allocation2 + $0x1c0] sm:$0xf]  ;;  %v6963_v36 = vld [vmem:[#allocation2 + $0x1c4] sm:$0xf0]  ;;  %v7535_v38 = vor.u32 %v6964_v31, %v4975_v32 }
  0x1a   : > { %632 = vmatpush.bf16.msra.mxu2 %v7521_v21  ;;  %v7532_v34 = vor.u32 %v6997_v30, %v5101_v28  ;;  %v5029_v37 = vld [vmem:[#allocation2 + $0x240] sm:$0xf]  ;;  %645 = vmatpush.bf16.msra.mxu3 %v7523_v25  ;;  %v6979_v39 = vld [vmem:[#allocation2 + $0x244] sm:$0xf0]  ;;  %v6962_v42 = vld [vmem:[#allocation2 + $0x1c4] sm:$0xf]  ;;  %v7538_v44 = vor.u32 %v6963_v36, %v4965_v35 }
  0x1b   : > { %v5093_v40 = vld [vmem:[#allocation2 + $0x2c0] sm:$0xf]  ;;  %v6995_v41 = vld [vmem:[#allocation2 + $0x2c4] sm:$0xf0]  ;;  %v4967_v43 = vld [vmem:[#allocation2 + $0x1c8] sm:$0xf0]  ;;  %v7542_v45 = vor.u32 %v6979_v39, %v5029_v37 }
  0x1c   : > { %607 = vmatpush.bf16.msra.mxu0 %v7526_v29  ;;  %v7544_v46 = vor.u32 %v6995_v41, %v5093_v40  ;;  %v4957_v47 = vld [vmem:[#allocation2 + $0x1b0] sm:$0xf]  ;;  %v6961_v48 = vld [vmem:[#allocation2 + $0x1b4] sm:$0xf0]  ;;  %v7547_v50 = vor.u32 %v6962_v42, %v4967_v43  ;;  %v6960_v54 = vld [vmem:[#allocation2 + $0x1b4] sm:$0xf] }
  0x1d   : > { %620 = vmatpush.bf16.msra.mxu1 %v7530_v33  ;;  %v5021_v49 = vld [vmem:[#allocation2 + $0x230] sm:$0xf]  ;;  %v6977_v51 = vld [vmem:[#allocation2 + $0x234] sm:$0xf0]  ;;  %v4959_v55 = vld [vmem:[#allocation2 + $0x1b8] sm:$0xf0]  ;;  %v7550_v56 = vor.u32 %v6961_v48, %v4957_v47 }
  0x1e   : > { %633 = vmatpush.bf16.msra.mxu2 %v7532_v34  ;;  %646 = vmatpush.bf16.msra.mxu3 %v7535_v38  ;;  %v5085_v52 = vld [vmem:[#allocation2 + $0x2b0] sm:$0xf]  ;;  %v6993_v53 = vld [vmem:[#allocation2 + $0x2b4] sm:$0xf0]  ;;  %p193_p6 = scmp.lt.s32.totalorder %s7479_s16, 1  ;;  %v7555_v57 = vor.u32 %v6977_v51, %v5021_v49  ;;  %v7560_v62 = vor.u32 %v6960_v54, %v4959_v55  ;;  %vm4834_vm0 = vcmask 1041408  }
  0x1f   : > { %v7557_v58 = vor.u32 %v6993_v53, %v5085_v52  ;;  %v4949_v59 = vld [vmem:[#allocation2 + $0x1a0] sm:$0xf]  ;;  %v6959_v60 = vld [vmem:[#allocation2 + $0x1a4] sm:$0xf0]  ;;  %v6958_v2 = vld [vmem:[#allocation2 + $0x1a4] sm:$0xf] }
  0x20   : > { %608 = vmatpush.bf16.msra.mxu0 %v7538_v44  ;;  %v5013_v61 = vld [vmem:[#allocation2 + $0x220] sm:$0xf]  ;;  %v6975_v63 = vld [vmem:[#allocation2 + $0x224] sm:$0xf0]  ;;  %v4951_v4 = vld [vmem:[#allocation2 + $0x1a8] sm:$0xf0]  ;;  %v7563_v5 = vor.u32 %v6959_v60, %v4949_v59 }
  0x21   : > { %621 = vmatpush.bf16.msra.mxu1 %v7542_v45  ;;  %v5077_v0 = vld [vmem:[#allocation2 + $0x2a0] sm:$0xf]  ;;  %v6991_v1 = vld [vmem:[#allocation2 + $0x2a4] sm:$0xf0]  ;;  %s11103_s16 = smov (!%p193_p6, %s7479_s16), 1  ;;  %v7572_v6 = vor.u32 %v6975_v63, %v5013_v61  ;;  %v7577_v14 = vor.u32 %v6958_v2, %v4951_v4 }
  0x22   : > { %634 = vmatpush.bf16.msra.mxu2 %v7544_v46  ;;  %647 = vmatpush.bf16.msra.mxu3 %v7547_v50  ;;  %v7574_v9 = vor.u32 %v6991_v1, %v5077_v0  ;;  %v4941_v10 = vld [vmem:[#allocation2 + $0x190] sm:$0xf]  ;;  %v6957_v11 = vld [vmem:[#allocation2 + $0x194] sm:$0xf0]  ;;  %v6956_v20 = vld [vmem:[#allocation2 + $0x194] sm:$0xf] }
  0x23   : > { %v5005_v13 = vld [vmem:[#allocation2 + $0x210] sm:$0xf]  ;;  %v6973_v15 = vld [vmem:[#allocation2 + $0x214] sm:$0xf0]  ;;  %v4943_v22 = vld [vmem:[#allocation2 + $0x198] sm:$0xf0]  ;;  %v7580_v23 = vor.u32 %v6957_v11, %v4941_v10 }
  0x24   : > { %609 = vmatpush.bf16.msra.mxu0 %v7550_v56  ;;  %v5069_v18 = vld [vmem:[#allocation2 + $0x290] sm:$0xf]  ;;  %v6989_v19 = vld [vmem:[#allocation2 + $0x294] sm:$0xf0]  ;;  %v4933_v24 = vld [vmem:[#allocation2 + $0x180] sm:$0xf]  ;;  %v7585_v27 = vor.u32 %v6973_v15, %v5005_v13  ;;  %v7590_v35 = vor.u32 %v6956_v20, %v4943_v22 }
  0x25   : > { %622 = vmatpush.bf16.msra.mxu1 %v7555_v57  ;;  %v6955_v26 = vld [vmem:[#allocation2 + $0x184] sm:$0xf0]  ;;  %s7338_s27 = smul.u32 24, %s11103_s16  ;;  %v7587_v28 = vor.u32 %v6989_v19, %v5069_v18  ;;  %v4997_v30 = vld [vmem:[#allocation2 + $0x200] sm:$0xf]  ;;  %s6857_s4 = sshll.u32 %s11103_s16, 2 }
  0x26   : > { %635 = vmatpush.bf16.msra.mxu2 %v7557_v58  ;;  %648 = vmatpush.bf16.msra.mxu3 %v7560_v62  ;;  %v6971_v31 = vld [vmem:[#allocation2 + $0x204] sm:$0xf0]  ;;  %v5061_v32 = vld [vmem:[#allocation2 + $0x280] sm:$0xf]  ;;  %v6954_v37 = vld [vmem:[#allocation2 + $0x184] sm:$0xf]  ;;  %v7593_v43 = vor.u32 %v6955_v26, %v4933_v24  ;;  %s202_s7 = scalar_lea.vmem %s9758_s3, %s6857_s4 }
  0x27   : > { %v6987_v36 = vld [vmem:[#allocation2 + $0x284] sm:$0xf0]  ;;  %v4935_v39 = vld [vmem:[#allocation2 + $0x188] sm:$0xf0]  ;;  %v6984_v40 = vld [vmem:[#allocation2 + $0x274] sm:$0xf]  ;;  %v7597_v51 = vor.u32 %v6971_v31, %v4997_v30  ;;  %s7611_s30 = scalar_lea.vmem %s9755_s0, %s7338_s27 }
  0x28   : > { %610 = vmatpush.bf16.msra.mxu0 %v7563_v5  ;;  %v5055_v41 = vld [vmem:[#allocation2 + $0x278] sm:$0xf0]  ;;  %v7000_v42 = vld [vmem:[#allocation2 + $0x2f4] sm:$0xf]  ;;  %10212 = vst [vmem:[#allocation8_spill] sm:$0xff] %v7593_v43  ;;  %v7599_v52 = vor.u32 %v6987_v36, %v5061_v32  ;;  %v7602_v55 = vor.u32 %v6954_v37, %v4935_v39 }
  0x29   : > { %623 = vmatpush.bf16.msra.mxu1 %v7572_v6  ;;  %v5119_v47 = vld [vmem:[#allocation2 + $0x2f8] sm:$0xf0]  ;;  %v5181_v48 = vld [vmem:[#allocation2 + $0x70] sm:$0xf]  ;;  %v6873_v49 = vld [vmem:[#allocation2 + $0x74] sm:$0xf0]  ;;  %v7604_v59 = vor.u32 %v6984_v40, %v5055_v41 }
  0x2a   : > { %636 = vmatpush.bf16.msra.mxu2 %v7574_v9  ;;  %649 = vmatpush.bf16.msra.mxu3 %v7577_v14  ;;  %10213 = vst [vmem:[#allocation9_spill] sm:$0xff] %v7597_v51  ;;  %v5245_v53 = vld [vmem:[#allocation2 + $0xf0] sm:$0xf]  ;;  %v6889_v54 = vld [vmem:[#allocation2 + $0xf4] sm:$0xf0]  ;;  %v7613_v60 = vor.u32 %v7000_v42, %v5119_v47  ;;  %v7615_v61 = vor.u32 %v6873_v49, %v5181_v48 }
  0x2b   : > { %10214 = vst [vmem:[#allocation10_spill] sm:$0xff] %v7599_v52  ;;  %v6982_v63 = vld [vmem:[#allocation2 + $0x264] sm:$0xf]  ;;  %v5047_v0 = vld [vmem:[#allocation2 + $0x268] sm:$0xf0]  ;;  %v7618_v2 = vor.u32 %v6889_v54, %v5245_v53 }
  0x2c   : > { %611 = vmatpush.bf16.msra.mxu0 %v7580_v23  ;;  %10215 = vst [vmem:[#allocation11_spill] sm:$0xff] %v7602_v55  ;;  %v6998_v1 = vld [vmem:[#allocation2 + $0x2e4] sm:$0xf]  ;;  %v5111_v4 = vld [vmem:[#allocation2 + $0x2e8] sm:$0xf0]  ;;  %v7625_v19 = vor.u32 %v6982_v63, %v5047_v0 }
  0x2d   : > { %624 = vmatpush.bf16.msra.mxu1 %v7585_v27  ;;  %10216 = vst [vmem:[#allocation12_spill] sm:$0xff] %v7604_v59  ;;  %v5173_v10 = vld [vmem:[#allocation2 + $0x60] sm:$0xf]  ;;  %v6871_v11 = vld [vmem:[#allocation2 + $0x64] sm:$0xf0]  ;;  %v7629_v24 = vor.u32 %v6998_v1, %v5111_v4 }
  0x2e   : > { %637 = vmatpush.bf16.msra.mxu2 %v7587_v28  ;;  %650 = vmatpush.bf16.msra.mxu3 %v7590_v35  ;;  %10217 = vst [vmem:[#allocation13_spill] sm:$0xff] %v7613_v60  ;;  %v5237_v13 = vld [vmem:[#allocation2 + $0xe0] sm:$0xf]  ;;  %v6887_v15 = vld [vmem:[#allocation2 + $0xe4] sm:$0xf0]  ;;  %v7631_v26 = vor.u32 %v6871_v11, %v5173_v10 }
  0x2f   : > { %10218 = vst [vmem:[#allocation14_spill] sm:$0xff] %v7615_v61  ;;  %v4930_v18 = vld [vmem:[%s7611_s30 + $0x14] sm:$0x3]  ;;  %v5039_v30 = vld [vmem:[#allocation2 + $0x258] sm:$0xf0]  ;;  %v7634_v36 = vor.u32 %v6887_v15, %v5237_v13 }
  0x30   : > { %612 = vmatpush.bf16.msra.mxu0 %v7593_v43  ;;  %10219 = vst [vmem:[#allocation15_spill] sm:$0xff] %v7618_v2  ;;  %v6980_v20 = vld [vmem:[#allocation2 + $0x254] sm:$0xf]  ;;  %v358_v22 = vunpack.c.l.b16 %v4930_v18  ;;  %v5103_v32 = vld [vmem:[#allocation2 + $0x2d8] sm:$0xf0] }
  0x31   : > { %625 = vmatpush.bf16.msra.mxu1 %v7597_v51  ;;  %10220 = vst [vmem:[#allocation16_spill] sm:$0xff] %v7625_v19  ;;  %v6996_v31 = vld [vmem:[#allocation2 + $0x2d4] sm:$0xf]  ;;  %v5165_v37 = vld [vmem:[#allocation2 + $0x50] sm:$0xf]  ;;  %v7640_v53 = vor.u32 %v6980_v20, %v5039_v30 }
  0x32   : > { %638 = vmatpush.bf16.msra.mxu2 %v7599_v52  ;;  %651 = vmatpush.bf16.msra.mxu3 %v7602_v55  ;;  %10221 = vst [vmem:[#allocation17_spill] sm:$0xff] %v7629_v24  ;;  %v6869_v39 = vld [vmem:[#allocation2 + $0x54] sm:$0xf0]  ;;  %v7636_v40 = vpack.c.b16 %v358_v22, %v358_v22  ;;  %v4929_v41 = vld [vmem:[%s7611_s30 + $0xc] sm:$0x33]  ;;  %v7645_v54 = vor.u32 %v6996_v31, %v5103_v32 }
  0x33   : > { %10222 = vst [vmem:[#allocation18_spill] sm:$0xff] %v7631_v26  ;;  %v5229_v42 = vld [vmem:[#allocation2 + $0xd0] sm:$0xf]  ;;  %v6885_v47 = vld [vmem:[#allocation2 + $0xd4] sm:$0xf0]  ;;  %v356_v48 = vunpack.c.l.b16 %v4929_v41  ;;  %v357_v49 = vunpack.c.h.b16 %v4929_v41  ;;  %v7647_v63 = vor.u32 %v6869_v39, %v5165_v37 }
  0x34   : > { %657 = vmatpush.bf16.msrb.mxu0 %v7604_v59  ;;  %10223 = vst [vmem:[#allocation19_spill] sm:$0xff] %v7634_v36  ;;  %v6978_v0 = vld [vmem:[#allocation2 + $0x244] sm:$0xf]  ;;  %v5031_v1 = vld [vmem:[#allocation2 + $0x248] sm:$0xf0]  ;;  %v7652_v11 = vor.u32 %v6885_v47, %v5229_v42 }
  0x35   : > { %670 = vmatpush.bf16.msrb.mxu1 %v7613_v60  ;;  %10224 = vst [vmem:[#allocation20_spill] sm:$0xff] %v7636_v40  ;;  %639 = vmatmul.bf16.vlgmr.msra.gmra.mxu2 %v7636_v40  ;;  %v6994_v4 = vld [vmem:[#allocation2 + $0x2c4] sm:$0xf]  ;;  %v7649_v10 = vpack.c.b16 %v356_v48, %v356_v48  ;;  %v5095_v13 = vld [vmem:[#allocation2 + $0x2c8] sm:$0xf0]  ;;  %v7654_v20 = vpack.c.b16 %v357_v49, %v357_v49 }
  0x36   : > { %934 = vmatpush.bf16.msrb.mxu2 %v7615_v61  ;;  %947 = vmatpush.bf16.msrb.mxu3 %v7618_v2  ;;  %10225 = vst [vmem:[#allocation21_spill] sm:$0xff] %v7640_v53  ;;  %v5157_v15 = vld [vmem:[#allocation2 + $0x40] sm:$0xf]  ;;  %v6867_v18 = vld [vmem:[#allocation2 + $0x44] sm:$0xf0]  ;;  %v7659_v31 = vor.u32 %v6978_v0, %v5031_v1  ;;  %v7664_v32 = vor.u32 %v6994_v4, %v5095_v13 }
  0x37   : > { %10226 = vst [vmem:[#allocation22_spill] sm:$0xff] %v7645_v54  ;;  %v5221_v22 = vld [vmem:[#allocation2 + $0xc0] sm:$0xf]  ;;  %v6883_v30 = vld [vmem:[#allocation2 + $0xc4] sm:$0xf0]  ;;  %652 = vmatmul.bf16.vlgmr.msra.gmra.mxu3 %v7649_v10  ;;  %613 = vmatmul.bf16.vlgmr.msra.gmra.mxu0 %v7649_v10  ;;  %v7666_v37 = vor.u32 %v6867_v18, %v5157_v15 }
  0x38   : > { %658 = vmatpush.bf16.msrb.mxu0 %v7625_v19  ;;  %10227 = vst [vmem:[#allocation23_spill] sm:$0xff] %v7647_v63  ;;  %626 = vmatmul.bf16.vlgmr.msra.gmra.mxu1 %v7654_v20  ;;  %v6976_v39 = vld [vmem:[#allocation2 + $0x234] sm:$0xf]  ;;  %v5023_v41 = vld [vmem:[#allocation2 + $0x238] sm:$0xf0]  ;;  %v7669_v47 = vor.u32 %v6883_v30, %v5221_v22 }
  0x39   : > { %671 = vmatpush.bf16.msrb.mxu1 %v7629_v24  ;;  %10228 = vst [vmem:[#allocation24_spill] sm:$0xff] %v7649_v10  ;;  %v6992_v42 = vld [vmem:[#allocation2 + $0x2b4] sm:$0xf]  ;;  %v5087_v48 = vld [vmem:[#allocation2 + $0x2b8] sm:$0xf0] }
  0x3a   : > { %935 = vmatpush.bf16.msrb.mxu2 %v7631_v26  ;;  %948 = vmatpush.bf16.msrb.mxu3 %v7634_v36  ;;  %10229 = vst [vmem:[#allocation25_spill] sm:$0xff] %v7652_v11  ;;  %v5149_v49 = vld [vmem:[#allocation2 + $0x30] sm:$0xf]  ;;  %v6865_v0 = vld [vmem:[#allocation2 + $0x34] sm:$0xf0]  ;;  %v7676_v4 = vor.u32 %v6992_v42, %v5087_v48 }
  0x3b   : > { %10230 = vst [vmem:[#allocation26_spill] sm:$0xff] %v7654_v20  ;;  %v5213_v1 = vld [vmem:[#allocation2 + $0xb0] sm:$0xf]  ;;  %v7678_v13 = vor.u32 %v6865_v0, %v5149_v49  ;;  %v6974_v15 = vld [vmem:[#allocation2 + $0x224] sm:$0xf] }
  0x3c   : > { %659 = vmatpush.bf16.msrb.mxu0 %v7640_v53  ;;  %10231 = vst [vmem:[#allocation27_spill] sm:$0xff] %v7659_v31  ;;  %v6881_v53 = vld [vmem:[#allocation2 + $0xb4] sm:$0xf0]  ;;  %v5015_v18 = vld [vmem:[#allocation2 + $0x228] sm:$0xf0] }
  0x3d   : > { %672 = vmatpush.bf16.msrb.mxu1 %v7645_v54  ;;  %10232 = vst [vmem:[#allocation28_spill] sm:$0xff] %v7664_v32  ;;  %v7672_v54 = vor.u32 %v6976_v39, %v5023_v41  ;;  %v6990_v22 = vld [vmem:[#allocation2 + $0x2a4] sm:$0xf]  ;;  %v7681_v30 = vor.u32 %v6881_v53, %v5213_v1  ;;  %v5205_v39 = vld [vmem:[#allocation2 + $0xa0] sm:$0xf] }
  0x3e   : > { %936 = vmatpush.bf16.msrb.mxu2 %v7647_v63  ;;  %10233 = vst [vmem:[#allocation29_spill] sm:$0xff] %v7666_v37  ;;  %949 = vmatpush.bf16.msrb.mxu3 %v7652_v11  ;;  %v5079_v11 = vld [vmem:[#allocation2 + $0x2a8] sm:$0xf0]  ;;  %v5141_v63 = vld [vmem:[#allocation2 + $0x20] sm:$0xf] }
  0x3f   : > { %10234 = vst [vmem:[#allocation30_spill] sm:$0xff] %v7669_v47  ;;  %v6879_v41 = vld [vmem:[#allocation2 + $0xa4] sm:$0xf0]  ;;  %v7688_v42 = vor.u32 %v6990_v22, %v5079_v11  ;;  %v6972_v49 = vld [vmem:[#allocation2 + $0x214] sm:$0xf] }
  0x40   : > { %660 = vmatpush.bf16.msrb.mxu0 %v7659_v31  ;;  %10235 = vst [vmem:[#allocation31_spill] sm:$0xff] %v7672_v54  ;;  %v6863_v31 = vld [vmem:[#allocation2 + $0x24] sm:$0xf0]  ;;  %v5007_v53 = vld [vmem:[#allocation2 + $0x218] sm:$0xf0]  ;;  %v7693_v1 = vor.u32 %v6879_v41, %v5205_v39 }
  0x41   : > { %673 = vmatpush.bf16.msrb.mxu1 %v7664_v32  ;;  %10236 = vst [vmem:[#allocation32_spill] sm:$0xff] %v7676_v4  ;;  %v7684_v32 = vor.u32 %v6974_v15, %v5015_v18  ;;  %v7690_v48 = vor.u32 %v6863_v31, %v5141_v63  ;;  %v6988_v0 = vld [vmem:[#allocation2 + $0x294] sm:$0xf]  ;;  %v6861_v15 = vld [vmem:[#allocation2 + $0x14] sm:$0xf0] }
  0x42   : > { %937 = vmatpush.bf16.msrb.mxu2 %v7666_v37  ;;  %10237 = vst [vmem:[#allocation33_spill] sm:$0xff] %v7678_v13  ;;  %950 = vmatpush.bf16.msrb.mxu3 %v7669_v47  ;;  %v5071_v47 = vld [vmem:[#allocation2 + $0x298] sm:$0xf0]  ;;  %v5197_v18 = vld [vmem:[#allocation2 + $0x90] sm:$0xf] }
  0x43   : > { %10238 = vst [vmem:[#allocation34_spill] sm:$0xff] %v7681_v30  ;;  %v6877_v37 = vld [vmem:[#allocation2 + $0x94] sm:$0xf0]  ;;  %v6970_v11 = vld [vmem:[#allocation2 + $0x204] sm:$0xf]  ;;  %v7700_v22 = vor.u32 %v6988_v0, %v5071_v47 }
  0x44   : > { %661 = vmatpush.bf16.msrb.mxu0 %v7672_v54  ;;  %10239 = vst [vmem:[#allocation35_spill] sm:$0xff] %v7684_v32  ;;  %v5133_v54 = vld [vmem:[#allocation2 + $0x10] sm:$0xf]  ;;  %v4999_v63 = vld [vmem:[#allocation2 + $0x208] sm:$0xf0]  ;;  %v7706_v36 = vor.u32 %v6877_v37, %v5197_v18 }
  0x45   : > { %674 = vmatpush.bf16.msrb.mxu1 %v7676_v4  ;;  %10240 = vst [vmem:[#allocation36_spill] sm:$0xff] %v7688_v42  ;;  %v6986_v31 = vld [vmem:[#allocation2 + $0x284] sm:$0xf]  ;;  %v7702_v39 = vor.u32 %v6861_v15, %v5133_v54  ;;  %v5063_v41 = vld [vmem:[#allocation2 + $0x288] sm:$0xf0] }
  0x46   : > { %938 = vmatpush.bf16.msrb.mxu2 %v7678_v13  ;;  %10241 = vst [vmem:[#allocation37_spill] sm:$0xff] %v7690_v48  ;;  %951 = vmatpush.bf16.msrb.mxu3 %v7681_v30  ;;  %v7696_v13 = vor.u32 %v6972_v49, %v5007_v53  ;;  %v5125_v30 = vld [vmem:[#allocation2] sm:$0xf]  ;;  %v6859_v49 = vld [vmem:[#allocation2 + $0x4] sm:$0xf0]  ;;  %v7713_v37 = vor.u32 %v6986_v31, %v5063_v41 }
  0x47   : > { %10242 = vst [vmem:[#allocation38_spill] sm:$0xff] %v7693_v1  ;;  %v203_v4 = vld [vmem:[%s7611_s30] sm:$0x33]  ;;  %v5309_v26 = vld [vmem:[#allocation2 + $0x170] sm:$0xf]  ;;  %v7715_v18 = vor.u32 %v6859_v49, %v5125_v30 }
  0x48   : > { %662 = vmatpush.bf16.msrb.mxu0 %v7684_v32  ;;  %10243 = vst [vmem:[#allocation39_spill] sm:$0xff] %v7696_v13  ;;  %v5189_v53 = vld [vmem:[#allocation2 + $0x80] sm:$0xf]  ;;  %v6875_v32 = vld [vmem:[#allocation2 + $0x84] sm:$0xf0]  ;;  %v685_v15 = vunpack.c.l.b16 %v203_v4  ;;  %v686_v2 = vunpack.c.h.b16 %v203_v4 }
  0x49   : > { %675 = vmatpush.bf16.msrb.mxu1 %v7688_v42  ;;  %10244 = vst [vmem:[#allocation40_spill] sm:$0xff] %v7700_v22  ;;  %v6905_v24 = vld [vmem:[#allocation2 + $0x174] sm:$0xf0]  ;;  %v6872_v19 = vld [vmem:[#allocation2 + $0x74] sm:$0xf] }
  0x4a   : > { %939 = vmatpush.bf16.msrb.mxu2 %v7690_v48  ;;  %10245 = vst [vmem:[#allocation41_spill] sm:$0xff] %v7702_v39  ;;  %952 = vmatpush.bf16.msrb.mxu3 %v7693_v1  ;;  %v7709_v48 = vor.u32 %v6970_v11, %v4999_v63  ;;  %v5183_v47 = vld [vmem:[#allocation2 + $0x78] sm:$0xf0]  ;;  %v6888_v54 = vld [vmem:[#allocation2 + $0xf4] sm:$0xf]  ;;  %v7720_v11 = vor.u32 %v6905_v24, %v5309_v26 }
  0x4b   : > { %10246 = vst [vmem:[#allocation42_spill] sm:$0xff] %v7706_v36  ;;  %v5247_v0 = vld [vmem:[#allocation2 + $0xf8] sm:$0xf0]  ;;  %v6904_v1 = vld [vmem:[#allocation2 + $0x174] sm:$0xf]  ;;  %v7722_v63 = vor.u32 %v6872_v19, %v5183_v47  ;;  %v7729_v31 = vpack.c.b16 %v685_v15, %v685_v15  ;;  %v7733_v19 = vpack.c.b16 %v686_v2, %v686_v2 }
  0x4c   : > { %663 = vmatpush.bf16.msrb.mxu0 %v7696_v13  ;;  %10247 = vst [vmem:[#allocation43_spill] sm:$0xff] %v7709_v48  ;;  %v5311_v42 = vld [vmem:[#allocation2 + $0x178] sm:$0xf0]  ;;  %v7718_v13 = vor.u32 %v6875_v32, %v5189_v53  ;;  %v7724_v61 = vor.u32 %v6888_v54, %v5247_v0  ;;  %v6903_v60 = vld [vmem:[#allocation2 + $0x164] sm:$0xf0] }
  0x4d   : > { %676 = vmatpush.bf16.msrb.mxu1 %v7700_v22  ;;  %10248 = vst [vmem:[#allocation44_spill] sm:$0xff] %v7713_v37  ;;  %v5301_v22 = vld [vmem:[#allocation2 + $0x160] sm:$0xf]  ;;  %v7727_v30 = vor.u32 %v6904_v1, %v5311_v42  ;;  %v5175_v4 = vld [vmem:[#allocation2 + $0x68] sm:$0xf0] }
  0x4e   : > { %940 = vmatpush.bf16.msrb.mxu2 %v7702_v39  ;;  %10249 = vst [vmem:[#allocation45_spill] sm:$0xff] %v7715_v18  ;;  %953 = vmatpush.bf16.msrb.mxu3 %v7706_v36  ;;  %v6870_v39 = vld [vmem:[#allocation2 + $0x64] sm:$0xf]  ;;  %v5239_v49 = vld [vmem:[#allocation2 + $0xe8] sm:$0xf0]  ;;  %v7737_v32 = vor.u32 %v6903_v60, %v5301_v22 }
  0x4f   : > { %10250 = vst [vmem:[#allocation46_spill] sm:$0xff] %v7718_v13  ;;  %v6886_v41 = vld [vmem:[#allocation2 + $0xe4] sm:$0xf]  ;;  %v5303_v26 = vld [vmem:[#allocation2 + $0x168] sm:$0xf0]  ;;  %v7741_v42 = vor.u32 %v6870_v39, %v5175_v4 }
  0x50   : > { %10251 = vst [vmem:[#allocation47_spill] sm:$0xff] %v7720_v11  ;;  %664 = vmatpush.bf16.msrb.mxu0 %v7709_v48  ;;  %v6902_v24 = vld [vmem:[#allocation2 + $0x164] sm:$0xf]  ;;  %v7743_v1 = vor.u32 %v6886_v41, %v5239_v49  ;;  %v5293_v53 = vld [vmem:[#allocation2 + $0x150] sm:$0xf] }
  0x51   : > { %10252 = vst [vmem:[#allocation48_spill] sm:$0xff] %v7722_v63  ;;  %677 = vmatpush.bf16.msrb.mxu1 %v7713_v37  ;;  %v6901_v47 = vld [vmem:[#allocation2 + $0x154] sm:$0xf0]  ;;  %v6868_v2 = vld [vmem:[#allocation2 + $0x54] sm:$0xf]  ;;  %v7747_v54 = vor.u32 %v6902_v24, %v5303_v26 }
  0x52   : > { %10253 = vst [vmem:[#allocation49_spill] sm:$0xff] %v7724_v61  ;;  %941 = vmatpush.bf16.msrb.mxu2 %v7715_v18  ;;  %954 = vmatpush.bf16.msrb.mxu3 %v7718_v13  ;;  %v5167_v0 = vld [vmem:[#allocation2 + $0x58] sm:$0xf0]  ;;  %v6884_v60 = vld [vmem:[#allocation2 + $0xd4] sm:$0xf]  ;;  %v7752_v4 = vor.u32 %v6901_v47, %v5293_v53 }
  0x53   : > { %10254 = vst [vmem:[#allocation50_spill] sm:$0xff] %v7727_v30  ;;  %v5231_v22 = vld [vmem:[#allocation2 + $0xd8] sm:$0xf0]  ;;  %665 = vmatmul.bf16.vlgmr.msrb.gmra.mxu0 %v7654_v20  ;;  %v6900_v39 = vld [vmem:[#allocation2 + $0x154] sm:$0xf]  ;;  %v7757_v41 = vor.u32 %v6868_v2, %v5167_v0 }
  0x54   : > { %960 = vmatpush.bf16.msra.mxu0 %v7720_v11  ;;  %10255 = vst [vmem:[#allocation51_spill] sm:$0xff] %v7737_v32  ;;  %v5295_v15 = vld [vmem:[#allocation2 + $0x158] sm:$0xf0]  ;;  %678 = vmatmul.bf16.vlgmr.msrb.gmra.mxu1 %v7636_v40  ;;  %v7759_v49 = vor.u32 %v6884_v60, %v5231_v22  ;;  %v5285_v24 = vld [vmem:[#allocation2 + $0x140] sm:$0xf] }
  0x55   : > { %973 = vmatpush.bf16.msra.mxu1 %v7722_v63  ;;  %10256 = vst [vmem:[#allocation52_spill] sm:$0xff] %v7741_v42  ;;  %942 = vmatmul.bf16.vlgmr.msrb.gmra.mxu2 %v7729_v31  ;;  %v6899_v26 = vld [vmem:[#allocation2 + $0x144] sm:$0xf0]  ;;  %v6882_v53 = vld [vmem:[#allocation2 + $0xc4] sm:$0xf] }
  0x56   : > { %986 = vmatpush.bf16.msra.mxu2 %v7724_v61  ;;  %10257 = vst [vmem:[#allocation53_spill] sm:$0xff] %v7743_v1  ;;  %999 = vmatpush.bf16.msra.mxu3 %v7727_v30  ;;  %v6866_v30 = vld [vmem:[#allocation2 + $0x44] sm:$0xf]  ;;  %v7762_v61 = vor.u32 %v6900_v39, %v5295_v15  ;;  %v5223_v47 = vld [vmem:[#allocation2 + $0xc8] sm:$0xf0] }
  0x57   : > { %10258 = vst [vmem:[#allocation54_spill] sm:$0xff] %v7747_v54  ;;  %955 = vmatmul.bf16.vlgmr.msrb.gmra.mxu3 %v7733_v19  ;;  %v6898_v63 = vld [vmem:[#allocation2 + $0x144] sm:$0xf]  ;;  %v5287_v11 = vld [vmem:[#allocation2 + $0x148] sm:$0xf0]  ;;  %v7771_v0 = vor.u32 %v6882_v53, %v5223_v47 }
  0x58   : > { %961 = vmatpush.bf16.msra.mxu0 %v7737_v32  ;;  %10259 = vst [vmem:[#allocation55_spill] sm:$0xff] %v7752_v4  ;;  %v5159_v32 = vld [vmem:[#allocation2 + $0x48] sm:$0xf0]  ;;  %v5277_v60 = vld [vmem:[#allocation2 + $0x130] sm:$0xf]  ;;  %v7774_v15 = vor.u32 %v6898_v63, %v5287_v11 }
  0x59   : > { %974 = vmatpush.bf16.msra.mxu1 %v7741_v42  ;;  %10260 = vst [vmem:[#allocation56_spill] sm:$0xff] %v7757_v41  ;;  %v7765_v42 = vor.u32 %v6899_v26, %v5285_v24  ;;  %v7769_v2 = vor.u32 %v6866_v30, %v5159_v32  ;;  %v6897_v22 = vld [vmem:[#allocation2 + $0x134] sm:$0xf0]  ;;  %v6864_v39 = vld [vmem:[#allocation2 + $0x34] sm:$0xf] }
  0x5a   : > { %987 = vmatpush.bf16.msra.mxu2 %v7743_v1  ;;  %10261 = vst [vmem:[#allocation57_spill] sm:$0xff] %v7759_v49  ;;  %1000 = vmatpush.bf16.msra.mxu3 %v7747_v54  ;;  %v5151_v54 = vld [vmem:[#allocation2 + $0x38] sm:$0xf0]  ;;  %v6880_v1 = vld [vmem:[#allocation2 + $0xb4] sm:$0xf] }
  0x5b   : > { %10262 = vst [vmem:[#allocation58_spill] sm:$0xff] %v7762_v61  ;;  %v6896_v24 = vld [vmem:[#allocation2 + $0x134] sm:$0xf]  ;;  %v5279_v26 = vld [vmem:[#allocation2 + $0x138] sm:$0xf0]  ;;  %v7781_v30 = vor.u32 %v6864_v39, %v5151_v54 }
  0x5c   : > { %962 = vmatpush.bf16.msra.mxu0 %v7752_v4  ;;  %10263 = vst [vmem:[#allocation59_spill] sm:$0xff] %v7765_v42  ;;  %v5215_v4 = vld [vmem:[#allocation2 + $0xb8] sm:$0xf0]  ;;  %v5269_v53 = vld [vmem:[#allocation2 + $0x120] sm:$0xf]  ;;  %v7786_v47 = vor.u32 %v6896_v24, %v5279_v26 }
  0x5d   : > { %975 = vmatpush.bf16.msra.mxu1 %v7757_v41  ;;  %10264 = vst [vmem:[#allocation60_spill] sm:$0xff] %v7769_v2  ;;  %v7777_v41 = vor.u32 %v6897_v22, %v5277_v60  ;;  %v7783_v32 = vor.u32 %v6880_v1, %v5215_v4  ;;  %v6895_v11 = vld [vmem:[#allocation2 + $0x124] sm:$0xf0]  ;;  %v6862_v63 = vld [vmem:[#allocation2 + $0x24] sm:$0xf] }
  0x5e   : > { %988 = vmatpush.bf16.msra.mxu2 %v7759_v49  ;;  %10265 = vst [vmem:[#allocation61_spill] sm:$0xff] %v7771_v0  ;;  %1001 = vmatpush.bf16.msra.mxu3 %v7762_v61  ;;  %v5143_v61 = vld [vmem:[#allocation2 + $0x28] sm:$0xf0]  ;;  %v6878_v49 = vld [vmem:[#allocation2 + $0xa4] sm:$0xf] }
  0x5f   : > { %10266 = vst [vmem:[#allocation62_spill] sm:$0xff] %v7774_v15  ;;  %v6894_v60 = vld [vmem:[#allocation2 + $0x124] sm:$0xf]  ;;  %v5271_v22 = vld [vmem:[#allocation2 + $0x128] sm:$0xf0]  ;;  %v7793_v1 = vor.u32 %v6862_v63, %v5143_v61 }
  0x60   : > { %963 = vmatpush.bf16.msra.mxu0 %v7765_v42  ;;  %10267 = vst [vmem:[#allocation63_spill] sm:$0xff] %v7777_v41  ;;  %v5207_v42 = vld [vmem:[#allocation2 + $0xa8] sm:$0xf0]  ;;  %v5261_v4 = vld [vmem:[#allocation2 + $0x110] sm:$0xf]  ;;  %v7798_v26 = vor.u32 %v6894_v60, %v5271_v22 }
  0x61   : > { %976 = vmatpush.bf16.msra.mxu1 %v7769_v2  ;;  %10268 = vst [vmem:[#allocation64_spill] sm:$0xff] %v7781_v30  ;;  %v7789_v2 = vor.u32 %v6895_v11, %v5269_v53  ;;  %v7795_v54 = vor.u32 %v6878_v49, %v5207_v42  ;;  %v6893_v39 = vld [vmem:[#allocation2 + $0x114] sm:$0xf0]  ;;  %v6860_v24 = vld [vmem:[#allocation2 + $0x14] sm:$0xf] }
  0x62   : > { %989 = vmatpush.bf16.msra.mxu2 %v7771_v0  ;;  %10269 = vst [vmem:[#allocation65_spill] sm:$0xff] %v7783_v32  ;;  %1002 = vmatpush.bf16.msra.mxu3 %v7774_v15  ;;  %v5135_v15 = vld [vmem:[#allocation2 + $0x18] sm:$0xf0]  ;;  %v6892_v11 = vld [vmem:[#allocation2 + $0x114] sm:$0xf] }
  0x63   : > { %10270 = vst [vmem:[#allocation66_spill] sm:$0xff] %v7786_v47  ;;  %v5199_v53 = vld [vmem:[#allocation2 + $0x98] sm:$0xf0]  ;;  %v5253_v61 = vld [vmem:[#allocation2 + $0x100] sm:$0xf]  ;;  %v7805_v63 = vor.u32 %v6860_v24, %v5135_v15 }
  0x64   : > { %964 = vmatpush.bf16.msra.mxu0 %v7777_v41  ;;  %10271 = vst [vmem:[#allocation67_spill] sm:$0xff] %v7789_v2  ;;  %v6876_v41 = vld [vmem:[#allocation2 + $0x94] sm:$0xf]  ;;  %v5263_v0 = vld [vmem:[#allocation2 + $0x118] sm:$0xf0] }
  0x65   : > { %977 = vmatpush.bf16.msra.mxu1 %v7781_v30  ;;  %10272 = vst [vmem:[#allocation68_spill] sm:$0xff] %v7793_v1  ;;  %v6891_v42 = vld [vmem:[#allocation2 + $0x104] sm:$0xf0]  ;;  %v6858_v49 = vld [vmem:[#allocation2 + $0x4] sm:$0xf]  ;;  %v7807_v60 = vor.u32 %v6876_v41, %v5199_v53  ;;  %v7811_v13 = vor.u32 %v6892_v11, %v5263_v0 }
  0x66   : > { %990 = vmatpush.bf16.msra.mxu2 %v7783_v32  ;;  %10273 = vst [vmem:[#allocation69_spill] sm:$0xff] %v7795_v54  ;;  %1003 = vmatpush.bf16.msra.mxu3 %v7786_v47  ;;  %v7801_v32 = vor.u32 %v6893_v39, %v5261_v4  ;;  %v5127_v22 = vld [vmem:[#allocation2 + $0x8] sm:$0xf0]  ;;  %v6874_v47 = vld [vmem:[#allocation2 + $0x84] sm:$0xf] }
  0x67   : > { %10274 = vst [vmem:[#allocation70_spill] sm:$0xff] %v7798_v26  ;;  %v204_v30 = vld [vmem:[%s7611_s30 + $0x8] sm:$0x3]  ;;  %v5191_v4 = vld [vmem:[#allocation2 + $0x88] sm:$0xf0]  ;;  %v7818_v0 = vor.u32 %v6858_v49, %v5127_v22 }
  0x68   : > { %965 = vmatpush.bf16.msra.mxu0 %v7789_v2  ;;  %10275 = vst [vmem:[#allocation71_spill] sm:$0xff] %v7801_v32  ;;  %v6890_v39 = vld [vmem:[#allocation2 + $0x104] sm:$0xf]  ;;  %v5255_v2 = vld [vmem:[#allocation2 + $0x108] sm:$0xf0]  ;;  %v687_v53 = vunpack.c.l.b16 %v204_v30  ;;  %v7820_v11 = vor.u32 %v6874_v47, %v5191_v4 }
  0x69   : > { %978 = vmatpush.bf16.msra.mxu1 %v7793_v1  ;;  %10276 = vst [vmem:[#allocation72_spill] sm:$0xff] %v7805_v63  ;;  %v5373_v18 = vld [vmem:[#allocation2 + $0x970] sm:$0xf]  ;;  %v7017_v37 = vld [vmem:[#allocation2 + $0x974] sm:$0xf0]  ;;  %v7823_v36 = vor.u32 %v6890_v39, %v5255_v2 }
  0x6a   : > { %991 = vmatpush.bf16.msra.mxu2 %v7795_v54  ;;  %10277 = vst [vmem:[#allocation73_spill] sm:$0xff] %v7807_v60  ;;  %1004 = vmatpush.bf16.msra.mxu3 %v7798_v26  ;;  %v5437_v48 = vld [vmem:[#allocation2 + $0x9f0] sm:$0xf]  ;;  %v7814_v54 = vor.u32 %v6891_v42, %v5253_v61  ;;  %v7033_v15 = vld [vmem:[#allocation2 + $0x9f4] sm:$0xf0]  ;;  %v7825_v61 = vor.u32 %v7017_v37, %v5373_v18 }
  0x6b   : > { %10278 = vst [vmem:[#allocation74_spill] sm:$0xff] %v7811_v13  ;;  %v5501_v41 = vld [vmem:[#allocation2 + $0xa70] sm:$0xf]  ;;  %v7049_v24 = vld [vmem:[#allocation2 + $0xa74] sm:$0xf0]  ;;  %v7827_v42 = vor.u32 %v7033_v15, %v5437_v48  ;;  %v7834_v47 = vpack.c.b16 %v687_v53, %v687_v53 }
  0x6c   : > { %966 = vmatpush.bf16.msra.mxu0 %v7801_v32  ;;  %10279 = vst [vmem:[#allocation75_spill] sm:$0xff] %v7814_v54  ;;  %v7016_v26 = vld [vmem:[#allocation2 + $0x974] sm:$0xf]  ;;  %v5375_v1 = vld [vmem:[#allocation2 + $0x978] sm:$0xf0]  ;;  %v7829_v32 = vor.u32 %v7049_v24, %v5501_v41 }
  0x6d   : > { %979 = vmatpush.bf16.msra.mxu1 %v7805_v63  ;;  %10280 = vst [vmem:[#allocation76_spill] sm:$0xff] %v7818_v0  ;;  %v5365_v30 = vld [vmem:[#allocation2 + $0x960] sm:$0xf]  ;;  %v7015_v63 = vld [vmem:[#allocation2 + $0x964] sm:$0xf0]  ;;  %v7832_v49 = vor.u32 %v7016_v26, %v5375_v1 }
  0x6e   : > { %992 = vmatpush.bf16.msra.mxu2 %v7807_v60  ;;  %10281 = vst [vmem:[#allocation77_spill] sm:$0xff] %v7820_v11  ;;  %1005 = vmatpush.bf16.msra.mxu3 %v7811_v13  ;;  %v5429_v59 = vld [vmem:[#allocation2 + $0x9e0] sm:$0xf]  ;;  %v7031_v22 = vld [vmem:[#allocation2 + $0x9e4] sm:$0xf0]  ;;  %v7840_v18 = vor.u32 %v7015_v63, %v5365_v30 }
  0x6f   : > { %10282 = vst [vmem:[#allocation78_spill] sm:$0xff] %v7823_v36  ;;  %v5493_v4 = vld [vmem:[#allocation2 + $0xa60] sm:$0xf]  ;;  %v7047_v13 = vld [vmem:[#allocation2 + $0xa64] sm:$0xf0]  ;;  %v7844_v2 = vor.u32 %v7031_v22, %v5429_v59 }
  0x70   : > { %10283 = vst [vmem:[#allocation79_spill] sm:$0xff] %v7825_v61  ;;  %967 = vmatpush.bf16.msra.mxu0 %v7814_v54  ;;  %v7014_v48 = vld [vmem:[#allocation2 + $0x964] sm:$0xf]  ;;  %v5367_v37 = vld [vmem:[#allocation2 + $0x968] sm:$0xf0]  ;;  %v7846_v1 = vor.u32 %v7047_v13, %v5493_v4 }
  0x71   : > { %10284 = vst [vmem:[#allocation80_spill] sm:$0xff] %v7827_v42  ;;  %980 = vmatpush.bf16.msra.mxu1 %v7818_v0  ;;  %v5357_v26 = vld [vmem:[#allocation2 + $0x950] sm:$0xf]  ;;  %v7013_v39 = vld [vmem:[#allocation2 + $0x954] sm:$0xf0]  ;;  %v7850_v41 = vor.u32 %v7014_v48, %v5367_v37 }
  0x72   : > { %10285 = vst [vmem:[#allocation81_spill] sm:$0xff] %v7829_v32  ;;  %993 = vmatpush.bf16.msra.mxu2 %v7820_v11  ;;  %1006 = vmatpush.bf16.msra.mxu3 %v7823_v36  ;;  %v5421_v15 = vld [vmem:[#allocation2 + $0x9d0] sm:$0xf]  ;;  %v7029_v24 = vld [vmem:[#allocation2 + $0x9d4] sm:$0xf0]  ;;  %v7856_v13 = vor.u32 %v7013_v39, %v5357_v26 }
  0x73   : > { %10286 = vst [vmem:[#allocation82_spill] sm:$0xff] %v7832_v49  ;;  %968 = vmatmul.bf16.vlgmr.msra.gmra.mxu0 %v7834_v47  ;;  %v5485_v63 = vld [vmem:[#allocation2 + $0xa50] sm:$0xf]  ;;  %v7045_v53 = vld [vmem:[#allocation2 + $0xa54] sm:$0xf0]  ;;  %v7860_v22 = vor.u32 %v7029_v24, %v5421_v15 }
  0x74   : > { %1301 = vmatpush.bf16.msrb.mxu0 %v7825_v61  ;;  %10287 = vst [vmem:[#allocation83_spill] sm:$0xff] %v7840_v18  ;;  %981 = vmatmul.bf16.vlgmr.msra.gmra.mxu1 %v7729_v31  ;;  %v7012_v59 = vld [vmem:[#allocation2 + $0x954] sm:$0xf]  ;;  %v5359_v30 = vld [vmem:[#allocation2 + $0x958] sm:$0xf0]  ;;  %v7862_v4 = vor.u32 %v7045_v53, %v5485_v63 }
  0x75   : > { %1314 = vmatpush.bf16.msrb.mxu1 %v7827_v42  ;;  %10288 = vst [vmem:[#allocation84_spill] sm:$0xff] %v7844_v2  ;;  %994 = vmatmul.bf16.vlgmr.msra.gmra.mxu2 %v7733_v19  ;;  %v5349_v48 = vld [vmem:[#allocation2 + $0x940] sm:$0xf]  ;;  %v7011_v37 = vld [vmem:[#allocation2 + $0x944] sm:$0xf0] }
  0x76   : > { %1327 = vmatpush.bf16.msrb.mxu2 %v7829_v32  ;;  %10289 = vst [vmem:[#allocation85_spill] sm:$0xff] %v7846_v1  ;;  %1340 = vmatpush.bf16.msrb.mxu3 %v7832_v49  ;;  %v5413_v49 = vld [vmem:[#allocation2 + $0x9c0] sm:$0xf]  ;;  %v7865_v32 = vor.u32 %v7012_v59, %v5359_v30  ;;  %v7027_v42 = vld [vmem:[#allocation2 + $0x9c4] sm:$0xf0] }
  0x77   : > { %10290 = vst [vmem:[#allocation86_spill] sm:$0xff] %v7850_v41  ;;  %1007 = vmatmul.bf16.vlgmr.msra.gmra.mxu3 %v7834_v47  ;;  %v5477_v61 = vld [vmem:[#allocation2 + $0xa40] sm:$0xf]  ;;  %v7010_v26 = vld [vmem:[#allocation2 + $0x944] sm:$0xf]  ;;  %v7872_v15 = vor.u32 %v7027_v42, %v5413_v49 }
  0x78   : > { %1302 = vmatpush.bf16.msrb.mxu0 %v7840_v18  ;;  %10291 = vst [vmem:[#allocation87_spill] sm:$0xff] %v7856_v13  ;;  %v7043_v18 = vld [vmem:[#allocation2 + $0xa44] sm:$0xf0]  ;;  %v5351_v39 = vld [vmem:[#allocation2 + $0x948] sm:$0xf0] }
  0x79   : > { %1315 = vmatpush.bf16.msrb.mxu1 %v7844_v2  ;;  %10292 = vst [vmem:[#allocation88_spill] sm:$0xff] %v7860_v22  ;;  %v7868_v2 = vor.u32 %v7011_v37, %v5349_v48  ;;  %v7874_v24 = vor.u32 %v7043_v18, %v5477_v61  ;;  %v5341_v63 = vld [vmem:[#allocation2 + $0x930] sm:$0xf]  ;;  %v7009_v53 = vld [vmem:[#allocation2 + $0x934] sm:$0xf0]  ;;  %v7877_v30 = vor.u32 %v7010_v26, %v5351_v39 }
  0x7a   : > { %1328 = vmatpush.bf16.msrb.mxu2 %v7846_v1  ;;  %10293 = vst [vmem:[#allocation89_spill] sm:$0xff] %v7862_v4  ;;  %1341 = vmatpush.bf16.msrb.mxu3 %v7850_v41  ;;  %v5405_v59 = vld [vmem:[#allocation2 + $0x9b0] sm:$0xf]  ;;  %v7025_v41 = vld [vmem:[#allocation2 + $0x9b4] sm:$0xf0] }
  0x7b   : > { %10294 = vst [vmem:[#allocation90_spill] sm:$0xff] %v7865_v32  ;;  %v5469_v1 = vld [vmem:[#allocation2 + $0xa30] sm:$0xf]  ;;  %v7008_v48 = vld [vmem:[#allocation2 + $0x934] sm:$0xf]  ;;  %v7884_v61 = vor.u32 %v7025_v41, %v5405_v59 }
  0x7c   : > { %1303 = vmatpush.bf16.msrb.mxu0 %v7856_v13  ;;  %10295 = vst [vmem:[#allocation91_spill] sm:$0xff] %v7868_v2  ;;  %v7041_v13 = vld [vmem:[#allocation2 + $0xa34] sm:$0xf0]  ;;  %v5343_v37 = vld [vmem:[#allocation2 + $0x938] sm:$0xf0] }
  0x7d   : > { %1316 = vmatpush.bf16.msrb.mxu1 %v7860_v22  ;;  %10296 = vst [vmem:[#allocation92_spill] sm:$0xff] %v7872_v15  ;;  %v7880_v22 = vor.u32 %v7009_v53, %v5341_v63  ;;  %v7886_v42 = vor.u32 %v7041_v13, %v5469_v1  ;;  %v5333_v49 = vld [vmem:[#allocation2 + $0x920] sm:$0xf]  ;;  %v7007_v18 = vld [vmem:[#allocation2 + $0x924] sm:$0xf0]  ;;  %v7889_v39 = vor.u32 %v7008_v48, %v5343_v37 }
  0x7e   : > { %1329 = vmatpush.bf16.msrb.mxu2 %v7862_v4  ;;  %10297 = vst [vmem:[#allocation93_spill] sm:$0xff] %v7874_v24  ;;  %1342 = vmatpush.bf16.msrb.mxu3 %v7865_v32  ;;  %v5397_v26 = vld [vmem:[#allocation2 + $0x9a0] sm:$0xf]  ;;  %v7023_v32 = vld [vmem:[#allocation2 + $0x9a4] sm:$0xf0] }
  0x7f   : > { %10298 = vst [vmem:[#allocation94_spill] sm:$0xff] %v7877_v30  ;;  %v5461_v4 = vld [vmem:[#allocation2 + $0xa20] sm:$0xf]  ;;  %v7006_v63 = vld [vmem:[#allocation2 + $0x924] sm:$0xf]  ;;  %v7896_v1 = vor.u32 %v7023_v32, %v5397_v26 }
  0x80   : > { %1304 = vmatpush.bf16.msrb.mxu0 %v7868_v2  ;;  %10299 = vst [vmem:[#allocation95_spill] sm:$0xff] %v7880_v22  ;;  %v7039_v2 = vld [vmem:[#allocation2 + $0xa24] sm:$0xf0]  ;;  %v5335_v53 = vld [vmem:[#allocation2 + $0x928] sm:$0xf0] }
  0x81   : > { %1317 = vmatpush.bf16.msrb.mxu1 %v7872_v15  ;;  %10300 = vst [vmem:[#allocation96_spill] sm:$0xff] %v7884_v61  ;;  %v7892_v15 = vor.u32 %v7007_v18, %v5333_v49  ;;  %v7898_v41 = vor.u32 %v7039_v2, %v5461_v4  ;;  %v5325_v13 = vld [vmem:[#allocation2 + $0x910] sm:$0xf]  ;;  %v7005_v59 = vld [vmem:[#allocation2 + $0x914] sm:$0xf0]  ;;  %v7901_v37 = vor.u32 %v7006_v63, %v5335_v53 }
  0x82   : > { %1330 = vmatpush.bf16.msrb.mxu2 %v7874_v24  ;;  %10301 = vst [vmem:[#allocation97_spill] sm:$0xff] %v7886_v42  ;;  %1343 = vmatpush.bf16.msrb.mxu3 %v7877_v30  ;;  %v5389_v48 = vld [vmem:[#allocation2 + $0x990] sm:$0xf]  ;;  %v7021_v30 = vld [vmem:[#allocation2 + $0x994] sm:$0xf0] }
  0x83   : > { %10302 = vst [vmem:[#allocation98_spill] sm:$0xff] %v7889_v39  ;;  %v5453_v24 = vld [vmem:[#allocation2 + $0xa10] sm:$0xf]  ;;  %v7004_v49 = vld [vmem:[#allocation2 + $0x914] sm:$0xf]  ;;  %v7908_v2 = vor.u32 %v7021_v30, %v5389_v48 }
  0x84   : > { %1305 = vmatpush.bf16.msrb.mxu0 %v7880_v22  ;;  %10303 = vst [vmem:[#allocation99_spill] sm:$0xff] %v7892_v15  ;;  %v7037_v22 = vld [vmem:[#allocation2 + $0xa14] sm:$0xf0]  ;;  %v5327_v18 = vld [vmem:[#allocation2 + $0x918] sm:$0xf0] }
  0x85   : > { %1318 = vmatpush.bf16.msrb.mxu1 %v7884_v61  ;;  %10304 = vst [vmem:[#allocation100_spill] sm:$0xff] %v7896_v1  ;;  %v7904_v61 = vor.u32 %v7005_v59, %v5325_v13  ;;  %v5317_v32 = vld [vmem:[#allocation2 + $0x900] sm:$0xf]  ;;  %v7003_v26 = vld [vmem:[#allocation2 + $0x904] sm:$0xf0]  ;;  %v7910_v4 = vor.u32 %v7037_v22, %v5453_v24 }
  0x86   : > { %1331 = vmatpush.bf16.msrb.mxu2 %v7886_v42  ;;  %10305 = vst [vmem:[#allocation101_spill] sm:$0xff] %v7898_v41  ;;  %1344 = vmatpush.bf16.msrb.mxu3 %v7889_v39  ;;  %v5381_v63 = vld [vmem:[#allocation2 + $0x980] sm:$0xf]  ;;  %v7019_v53 = vld [vmem:[#allocation2 + $0x984] sm:$0xf0]  ;;  %v7913_v42 = vor.u32 %v7004_v49, %v5327_v18 }
  0x87   : > { %10306 = vst [vmem:[#allocation102_spill] sm:$0xff] %v7901_v37  ;;  %v5445_v39 = vld [vmem:[#allocation2 + $0xa00] sm:$0xf]  ;;  %v7002_v13 = vld [vmem:[#allocation2 + $0x904] sm:$0xf]  ;;  %v7920_v48 = vor.u32 %v7019_v53, %v5381_v63 }
  0x88   : > { %1306 = vmatpush.bf16.msrb.mxu0 %v7892_v15  ;;  %10307 = vst [vmem:[#allocation103_spill] sm:$0xff] %v7904_v61  ;;  %v7035_v15 = vld [vmem:[#allocation2 + $0xa04] sm:$0xf0]  ;;  %v5319_v59 = vld [vmem:[#allocation2 + $0x908] sm:$0xf0] }
  0x89   : > { %1319 = vmatpush.bf16.msrb.mxu1 %v7896_v1  ;;  %10308 = vst [vmem:[#allocation104_spill] sm:$0xff] %v7908_v2  ;;  %v7032_v36 = vld [vmem:[#allocation2 + $0x9f4] sm:$0xf]  ;;  %v5439_v11 = vld [vmem:[#allocation2 + $0x9f8] sm:$0xf0]  ;;  %v7922_v49 = vor.u32 %v7035_v15, %v5445_v39  ;;  %v7925_v1 = vor.u32 %v7002_v13, %v5319_v59 }
  0x8a   : > { %1332 = vmatpush.bf16.msrb.mxu2 %v7898_v41  ;;  %10309 = vst [vmem:[#allocation105_spill] sm:$0xff] %v7910_v4  ;;  %1345 = vmatpush.bf16.msrb.mxu3 %v7901_v37  ;;  %v7048_v0 = vld [vmem:[#allocation2 + $0xa74] sm:$0xf]  ;;  %v7916_v41 = vor.u32 %v7003_v26, %v5317_v32  ;;  %v5503_v30 = vld [vmem:[#allocation2 + $0xa78] sm:$0xf0] }
  0x8b   : > { %10310 = vst [vmem:[#allocation106_spill] sm:$0xff] %v7913_v42  ;;  %v5565_v22 = vld [vmem:[#allocation2 + $0x7f0] sm:$0xf]  ;;  %v6921_v24 = vld [vmem:[#allocation2 + $0x7f4] sm:$0xf0]  ;;  %v7929_v32 = vor.u32 %v7048_v0, %v5503_v30 }
  0x8c   : > { %1307 = vmatpush.bf16.msrb.mxu0 %v7904_v61  ;;  %10311 = vst [vmem:[#allocation107_spill] sm:$0xff] %v7916_v41  ;;  %v5629_v18 = vld [vmem:[#allocation2 + $0x870] sm:$0xf]  ;;  %v6937_v37 = vld [vmem:[#allocation2 + $0x874] sm:$0xf0]  ;;  %v7927_v61 = vor.u32 %v7032_v36, %v5439_v11  ;;  %v7931_v26 = vor.u32 %v6921_v24, %v5565_v22 }
  0x8d   : > { %1320 = vmatpush.bf16.msrb.mxu1 %v7908_v2  ;;  %10312 = vst [vmem:[#allocation108_spill] sm:$0xff] %v7920_v48  ;;  %v7030_v54 = vld [vmem:[#allocation2 + $0x9e4] sm:$0xf]  ;;  %v5431_v2 = vld [vmem:[#allocation2 + $0x9e8] sm:$0xf0]  ;;  %v7934_v63 = vor.u32 %v6937_v37, %v5629_v18 }
  0x8e   : > { %1333 = vmatpush.bf16.msrb.mxu2 %v7910_v4  ;;  %10313 = vst [vmem:[#allocation109_spill] sm:$0xff] %v7922_v49  ;;  %1346 = vmatpush.bf16.msrb.mxu3 %v7913_v42  ;;  %v7046_v60 = vld [vmem:[#allocation2 + $0xa64] sm:$0xf]  ;;  %v5495_v15 = vld [vmem:[#allocation2 + $0xa68] sm:$0xf0]  ;;  %v7940_v0 = vor.u32 %v7030_v54, %v5431_v2 }
  0x8f   : > { %10314 = vst [vmem:[#allocation110_spill] sm:$0xff] %v7925_v1  ;;  %v5557_v39 = vld [vmem:[#allocation2 + $0x7e0] sm:$0xf]  ;;  %v6919_v53 = vld [vmem:[#allocation2 + $0x7e4] sm:$0xf0]  ;;  %v7944_v37 = vor.u32 %v7046_v60, %v5495_v15 }
  0x90   : > { %10315 = vst [vmem:[#allocation111_spill] sm:$0xff] %v7927_v61  ;;  %1308 = vmatpush.bf16.msrb.mxu0 %v7916_v41  ;;  %v5621_v36 = vld [vmem:[#allocation2 + $0x860] sm:$0xf]  ;;  %v6935_v11 = vld [vmem:[#allocation2 + $0x864] sm:$0xf0]  ;;  %v7946_v13 = vor.u32 %v6919_v53, %v5557_v39 }
  0x91   : > { %10316 = vst [vmem:[#allocation112_spill] sm:$0xff] %v7929_v32  ;;  %1321 = vmatpush.bf16.msrb.mxu1 %v7920_v48  ;;  %v7028_v59 = vld [vmem:[#allocation2 + $0x9d4] sm:$0xf]  ;;  %v5423_v30 = vld [vmem:[#allocation2 + $0x9d8] sm:$0xf0]  ;;  %v7949_v24 = vor.u32 %v6935_v11, %v5621_v36 }
  0x92   : > { %10317 = vst [vmem:[#allocation113_spill] sm:$0xff] %v7931_v26  ;;  %1334 = vmatpush.bf16.msrb.mxu2 %v7922_v49  ;;  %1347 = vmatpush.bf16.msrb.mxu3 %v7925_v1  ;;  %v7044_v22 = vld [vmem:[#allocation2 + $0xa54] sm:$0xf]  ;;  %v5487_v18 = vld [vmem:[#allocation2 + $0xa58] sm:$0xf0]  ;;  %v7955_v60 = vor.u32 %v7028_v59, %v5423_v30 }
  0x93   : > { %10318 = vst [vmem:[#allocation114_spill] sm:$0xff] %v7934_v63  ;;  %v5549_v1 = vld [vmem:[#allocation2 + $0x7d0] sm:$0xf]  ;;  %v6933_v2 = vld [vmem:[#allocation2 + $0x854] sm:$0xf0]  ;;  %1309 = vmatmul.bf16.vlgmr.msrb.gmra.mxu0 %v7649_v10  ;;  %v7960_v15 = vor.u32 %v7044_v22, %v5487_v18 }
  0x94   : > { %1353 = vmatpush.bf16.msra.mxu0 %v7927_v61  ;;  %10319 = vst [vmem:[#allocation115_spill] sm:$0xff] %v7940_v0  ;;  %v6917_v61 = vld [vmem:[#allocation2 + $0x7d4] sm:$0xf0]  ;;  %v5613_v54 = vld [vmem:[#allocation2 + $0x850] sm:$0xf]  ;;  %1322 = vmatmul.bf16.vlgmr.msrb.gmra.mxu1 %v7654_v20 }
  0x95   : > { %1366 = vmatpush.bf16.msra.mxu1 %v7929_v32  ;;  %10320 = vst [vmem:[#allocation116_spill] sm:$0xff] %v7944_v37  ;;  %1335 = vmatmul.bf16.vlgmr.msrb.gmra.mxu2 %v7636_v40  ;;  %v7962_v39 = vor.u32 %v6917_v61, %v5549_v1  ;;  %v7026_v53 = vld [vmem:[#allocation2 + $0x9c4] sm:$0xf]  ;;  %v5415_v36 = vld [vmem:[#allocation2 + $0x9c8] sm:$0xf0] }
  0x96   : > { %1619 = vmatpush.bf16.msra.mxu2 %v7931_v26  ;;  %10321 = vst [vmem:[#allocation117_spill] sm:$0xff] %v7946_v13  ;;  %1632 = vmatpush.bf16.msra.mxu3 %v7934_v63  ;;  %v7042_v11 = vld [vmem:[#allocation2 + $0xa44] sm:$0xf]  ;;  %v7965_v63 = vor.u32 %v6933_v2, %v5613_v54  ;;  %v5541_v59 = vld [vmem:[#allocation2 + $0x7c0] sm:$0xf] }
  0x97   : > { %10322 = vst [vmem:[#allocation118_spill] sm:$0xff] %v7949_v24  ;;  %1348 = vmatmul.bf16.vlgmr.msrb.gmra.mxu3 %v7649_v10  ;;  %v6915_v30 = vld [vmem:[#allocation2 + $0x7c4] sm:$0xf0]  ;;  %v5605_v26 = vld [vmem:[#allocation2 + $0x840] sm:$0xf] }
  0x98   : > { %1354 = vmatpush.bf16.msra.mxu0 %v7940_v0  ;;  %10323 = vst [vmem:[#allocation119_spill] sm:$0xff] %v7955_v60  ;;  %v5479_v0 = vld [vmem:[#allocation2 + $0xa48] sm:$0xf0]  ;;  %v6931_v32 = vld [vmem:[#allocation2 + $0x844] sm:$0xf0]  ;;  %v7974_v1 = vor.u32 %v6915_v30, %v5541_v59 }
  0x99   : > { %1367 = vmatpush.bf16.msra.mxu1 %v7944_v37  ;;  %10324 = vst [vmem:[#allocation120_spill] sm:$0xff] %v7960_v15  ;;  %v7968_v37 = vor.u32 %v7026_v53, %v5415_v36  ;;  %v7972_v61 = vor.u32 %v7042_v11, %v5479_v0  ;;  %v7024_v22 = vld [vmem:[#allocation2 + $0x9b4] sm:$0xf]  ;;  %v5407_v18 = vld [vmem:[#allocation2 + $0x9b8] sm:$0xf0]  ;;  %v7977_v2 = vor.u32 %v6931_v32, %v5605_v26 }
  0x9a   : > { %1620 = vmatpush.bf16.msra.mxu2 %v7946_v13  ;;  %10325 = vst [vmem:[#allocation121_spill] sm:$0xff] %v7962_v39  ;;  %1633 = vmatpush.bf16.msra.mxu3 %v7949_v24  ;;  %v7040_v54 = vld [vmem:[#allocation2 + $0xa34] sm:$0xf]  ;;  %v5471_v24 = vld [vmem:[#allocation2 + $0xa38] sm:$0xf0] }
  0x9b   : > { %10326 = vst [vmem:[#allocation122_spill] sm:$0xff] %v7965_v63  ;;  %v5533_v13 = vld [vmem:[#allocation2 + $0x7b0] sm:$0xf]  ;;  %v6929_v36 = vld [vmem:[#allocation2 + $0x834] sm:$0xf0]  ;;  %v7984_v0 = vor.u32 %v7040_v54, %v5471_v24 }
  0x9c   : > { %1355 = vmatpush.bf16.msra.mxu0 %v7955_v60  ;;  %10327 = vst [vmem:[#allocation123_spill] sm:$0xff] %v7968_v37  ;;  %v6913_v60 = vld [vmem:[#allocation2 + $0x7b4] sm:$0xf0]  ;;  %v5597_v53 = vld [vmem:[#allocation2 + $0x830] sm:$0xf] }
  0x9d   : > { %1368 = vmatpush.bf16.msra.mxu1 %v7960_v15  ;;  %10328 = vst [vmem:[#allocation124_spill] sm:$0xff] %v7972_v61  ;;  %v7980_v15 = vor.u32 %v7024_v22, %v5407_v18  ;;  %v7986_v11 = vor.u32 %v6913_v60, %v5533_v13  ;;  %v7022_v59 = vld [vmem:[#allocation2 + $0x9a4] sm:$0xf]  ;;  %v5399_v32 = vld [vmem:[#allocation2 + $0x9a8] sm:$0xf0]  ;;  %v7989_v30 = vor.u32 %v6929_v36, %v5597_v53 }
  0x9e   : > { %1621 = vmatpush.bf16.msra.mxu2 %v7962_v39  ;;  %10329 = vst [vmem:[#allocation125_spill] sm:$0xff] %v7974_v1  ;;  %1634 = vmatpush.bf16.msra.mxu3 %v7965_v63  ;;  %v7038_v26 = vld [vmem:[#allocation2 + $0xa24] sm:$0xf]  ;;  %v5463_v63 = vld [vmem:[#allocation2 + $0xa28] sm:$0xf0] }
  0x9f   : > { %10330 = vst [vmem:[#allocation126_spill] sm:$0xff] %v7977_v2  ;;  %v5525_v39 = vld [vmem:[#allocation2 + $0x7a0] sm:$0xf]  ;;  %v6927_v18 = vld [vmem:[#allocation2 + $0x824] sm:$0xf0]  ;;  %v7996_v13 = vor.u32 %v7038_v26, %v5463_v63 }
  0xa0   : > { %1356 = vmatpush.bf16.msra.mxu0 %v7968_v37  ;;  %10331 = vst [vmem:[#allocation127_spill] sm:$0xff] %v7980_v15  ;;  %v6911_v37 = vld [vmem:[#allocation2 + $0x7a4] sm:$0xf0]  ;;  %v5589_v22 = vld [vmem:[#allocation2 + $0x820] sm:$0xf] }
  0xa1   : > { %1369 = vmatpush.bf16.msra.mxu1 %v7972_v61  ;;  %10332 = vst [vmem:[#allocation128_spill] sm:$0xff] %v7984_v0  ;;  %v7992_v61 = vor.u32 %v7022_v59, %v5399_v32  ;;  %v7998_v24 = vor.u32 %v6911_v37, %v5525_v39  ;;  %v7020_v60 = vld [vmem:[#allocation2 + $0x994] sm:$0xf]  ;;  %v5391_v54 = vld [vmem:[#allocation2 + $0x998] sm:$0xf0]  ;;  %v8001_v36 = vor.u32 %v6927_v18, %v5589_v22 }
  0xa2   : > { %1622 = vmatpush.bf16.msra.mxu2 %v7974_v1  ;;  %10333 = vst [vmem:[#allocation129_spill] sm:$0xff] %v7986_v11  ;;  %1635 = vmatpush.bf16.msra.mxu3 %v7977_v2  ;;  %v7036_v53 = vld [vmem:[#allocation2 + $0xa14] sm:$0xf]  ;;  %v5455_v2 = vld [vmem:[#allocation2 + $0xa18] sm:$0xf0] }
  0xa3   : > { %10334 = vst [vmem:[#allocation130_spill] sm:$0xff] %v7989_v30  ;;  %v5517_v1 = vld [vmem:[#allocation2 + $0x790] sm:$0xf]  ;;  %v6925_v32 = vld [vmem:[#allocation2 + $0x814] sm:$0xf0]  ;;  %v8008_v37 = vor.u32 %v7036_v53, %v5455_v2 }
  0xa4   : > { %1357 = vmatpush.bf16.msra.mxu0 %v7980_v15  ;;  %10335 = vst [vmem:[#allocation131_spill] sm:$0xff] %v7992_v61  ;;  %v6909_v15 = vld [vmem:[#allocation2 + $0x794] sm:$0xf0]  ;;  %v5581_v59 = vld [vmem:[#allocation2 + $0x810] sm:$0xf] }
  0xa5   : > { %1370 = vmatpush.bf16.msra.mxu1 %v7984_v0  ;;  %10336 = vst [vmem:[#allocation132_spill] sm:$0xff] %v7996_v13  ;;  %v8004_v0 = vor.u32 %v7020_v60, %v5391_v54  ;;  %v7018_v63 = vld [vmem:[#allocation2 + $0x984] sm:$0xf]  ;;  %v5383_v26 = vld [vmem:[#allocation2 + $0x988] sm:$0xf0]  ;;  %v8010_v39 = vor.u32 %v6909_v15, %v5517_v1 }
  0xa6   : > { %1623 = vmatpush.bf16.msra.mxu2 %v7986_v11  ;;  %10337 = vst [vmem:[#allocation133_spill] sm:$0xff] %v7998_v24  ;;  %1636 = vmatpush.bf16.msra.mxu3 %v7989_v30  ;;  %v7034_v22 = vld [vmem:[#allocation2 + $0xa04] sm:$0xf]  ;;  %v5447_v18 = vld [vmem:[#allocation2 + $0xa08] sm:$0xf0]  ;;  %v8013_v11 = vor.u32 %v6925_v32, %v5581_v59 }
  0xa7   : > { %10338 = vst [vmem:[#allocation134_spill] sm:$0xff] %v8001_v36  ;;  %v5509_v30 = vld [vmem:[#allocation2 + $0x780] sm:$0xf]  ;;  %v6923_v54 = vld [vmem:[#allocation2 + $0x804] sm:$0xf0]  ;;  %v8020_v53 = vor.u32 %v7034_v22, %v5447_v18 }
  0xa8   : > { %1358 = vmatpush.bf16.msra.mxu0 %v7992_v61  ;;  %10339 = vst [vmem:[#allocation135_spill] sm:$0xff] %v8004_v0  ;;  %v6907_v61 = vld [vmem:[#allocation2 + $0x784] sm:$0xf0]  ;;  %v5573_v60 = vld [vmem:[#allocation2 + $0x800] sm:$0xf] }
  0xa9   : > { %1371 = vmatpush.bf16.msra.mxu1 %v7996_v13  ;;  %10340 = vst [vmem:[#allocation136_spill] sm:$0xff] %v8008_v37  ;;  %v5693_v49 = vld [vmem:[#allocation2 + $0x8f0] sm:$0xf]  ;;  %v6953_v48 = vld [vmem:[#allocation2 + $0x8f4] sm:$0xf0]  ;;  %v8022_v59 = vor.u32 %v6907_v61, %v5509_v30  ;;  %v8025_v13 = vor.u32 %v6923_v54, %v5573_v60 }
  0xaa   : > { %1624 = vmatpush.bf16.msra.mxu2 %v7998_v24  ;;  %10341 = vst [vmem:[#allocation137_spill] sm:$0xff] %v8010_v39  ;;  %1637 = vmatpush.bf16.msra.mxu3 %v8001_v36  ;;  %v6920_v41 = vld [vmem:[#allocation2 + $0x7f4] sm:$0xf]  ;;  %v8016_v24 = vor.u32 %v7018_v63, %v5383_v26  ;;  %v5567_v2 = vld [vmem:[#allocation2 + $0x7f8] sm:$0xf0] }
  0xab   : > { %10342 = vst [vmem:[#allocation138_spill] sm:$0xff] %v8013_v11  ;;  %v6936_v15 = vld [vmem:[#allocation2 + $0x874] sm:$0xf]  ;;  %v5631_v1 = vld [vmem:[#allocation2 + $0x878] sm:$0xf0]  ;;  %v8029_v63 = vor.u32 %v6920_v41, %v5567_v2 }
  0xac   : > { %1359 = vmatpush.bf16.msra.mxu0 %v8004_v0  ;;  %10343 = vst [vmem:[#allocation139_spill] sm:$0xff] %v8016_v24  ;;  %v6952_v32 = vld [vmem:[#allocation2 + $0x8f4] sm:$0xf]  ;;  %v5695_v36 = vld [vmem:[#allocation2 + $0x8f8] sm:$0xf0]  ;;  %v8027_v0 = vor.u32 %v6953_v48, %v5693_v49  ;;  %v8031_v26 = vor.u32 %v6936_v15, %v5631_v1 }
  0xad   : > { %1372 = vmatpush.bf16.msra.mxu1 %v8008_v37  ;;  %10344 = vst [vmem:[#allocation140_spill] sm:$0xff] %v8020_v53  ;;  %v5685_v42 = vld [vmem:[#allocation2 + $0x8e0] sm:$0xf]  ;;  %v6951_v37 = vld [vmem:[#allocation2 + $0x8e4] sm:$0xf0]  ;;  %v8034_v22 = vor.u32 %v6952_v32, %v5695_v36 }
  0xae   : > { %1625 = vmatpush.bf16.msra.mxu2 %v8010_v39  ;;  %10345 = vst [vmem:[#allocation141_spill] sm:$0xff] %v8022_v59  ;;  %1638 = vmatpush.bf16.msra.mxu3 %v8013_v11  ;;  %v6918_v4 = vld [vmem:[#allocation2 + $0x7e4] sm:$0xf]  ;;  %v5559_v61 = vld [vmem:[#allocation2 + $0x7e8] sm:$0xf0]  ;;  %v8040_v41 = vor.u32 %v6951_v37, %v5685_v42 }
  0xaf   : > { %10346 = vst [vmem:[#allocation142_spill] sm:$0xff] %v8025_v13  ;;  %v6934_v30 = vld [vmem:[#allocation2 + $0x864] sm:$0xf]  ;;  %v5623_v18 = vld [vmem:[#allocation2 + $0x868] sm:$0xf0]  ;;  %v8044_v36 = vor.u32 %v6918_v4, %v5559_v61 }
  0xb0   : > { %10347 = vst [vmem:[#allocation143_spill] sm:$0xff] %v8027_v0  ;;  %1360 = vmatpush.bf16.msra.mxu0 %v8016_v24  ;;  %v6950_v48 = vld [vmem:[#allocation2 + $0x8e4] sm:$0xf]  ;;  %v5687_v49 = vld [vmem:[#allocation2 + $0x8e8] sm:$0xf0]  ;;  %v8046_v60 = vor.u32 %v6934_v30, %v5623_v18 }
  0xb1   : > { %10348 = vst [vmem:[#allocation144_spill] sm:$0xff] %v8029_v63  ;;  %1373 = vmatpush.bf16.msra.mxu1 %v8020_v53  ;;  %v5677_v54 = vld [vmem:[#allocation2 + $0x8d0] sm:$0xf]  ;;  %v6949_v2 = vld [vmem:[#allocation2 + $0x8d4] sm:$0xf0]  ;;  %v8050_v1 = vor.u32 %v6950_v48, %v5687_v49 }
  0xb2   : > { %10349 = vst [vmem:[#allocation145_spill] sm:$0xff] %v8031_v26  ;;  %1626 = vmatpush.bf16.msra.mxu2 %v8022_v59  ;;  %1639 = vmatpush.bf16.msra.mxu3 %v8025_v13  ;;  %v6916_v15 = vld [vmem:[#allocation2 + $0x7d4] sm:$0xf]  ;;  %v5551_v32 = vld [vmem:[#allocation2 + $0x7d8] sm:$0xf0]  ;;  %v8055_v30 = vor.u32 %v6949_v2, %v5677_v54 }
  0xb3   : > { %10350 = vst [vmem:[#allocation146_spill] sm:$0xff] %v8034_v22  ;;  %v6932_v42 = vld [vmem:[#allocation2 + $0x854] sm:$0xf]  ;;  %v5615_v37 = vld [vmem:[#allocation2 + $0x858] sm:$0xf0]  ;;  %1361 = vmatmul.bf16.vlgmr.msra.gmra.mxu0 %v7654_v20  ;;  %v8060_v18 = vor.u32 %v6916_v15, %v5551_v32 }
  0xb4   : > { %1645 = vmatpush.bf16.msrb.mxu0 %v8027_v0  ;;  %10351 = vst [vmem:[#allocation147_spill] sm:$0xff] %v8040_v41  ;;  %v6948_v4 = vld [vmem:[#allocation2 + $0x8d4] sm:$0xf]  ;;  %v5679_v61 = vld [vmem:[#allocation2 + $0x8d8] sm:$0xf0]  ;;  %1374 = vmatmul.bf16.vlgmr.msra.gmra.mxu1 %v7636_v40  ;;  %v8062_v48 = vor.u32 %v6932_v42, %v5615_v37 }
  0xb5   : > { %1658 = vmatpush.bf16.msrb.mxu1 %v8029_v63  ;;  %10352 = vst [vmem:[#allocation148_spill] sm:$0xff] %v8044_v36  ;;  %1627 = vmatmul.bf16.vlgmr.msra.gmra.mxu2 %v7729_v31  ;;  %v5669_v49 = vld [vmem:[#allocation2 + $0x8c0] sm:$0xf]  ;;  %v8065_v63 = vor.u32 %v6948_v4, %v5679_v61  ;;  %v6930_v54 = vld [vmem:[#allocation2 + $0x844] sm:$0xf] }
  0xb6   : > { %1671 = vmatpush.bf16.msrb.mxu2 %v8031_v26  ;;  %10353 = vst [vmem:[#allocation149_spill] sm:$0xff] %v8046_v60  ;;  %1684 = vmatpush.bf16.msrb.mxu3 %v8034_v22  ;;  %v6947_v22 = vld [vmem:[#allocation2 + $0x8c4] sm:$0xf0]  ;;  %v6914_v26 = vld [vmem:[#allocation2 + $0x7c4] sm:$0xf] }
  0xb7   : > { %10354 = vst [vmem:[#allocation150_spill] sm:$0xff] %v8050_v1  ;;  %1640 = vmatmul.bf16.vlgmr.msra.gmra.mxu3 %v7733_v19  ;;  %v5607_v2 = vld [vmem:[#allocation2 + $0x848] sm:$0xf0]  ;;  %v6946_v0 = vld [vmem:[#allocation2 + $0x8c4] sm:$0xf] }
  0xb8   : > { %1646 = vmatpush.bf16.msrb.mxu0 %v8040_v41  ;;  %10355 = vst [vmem:[#allocation151_spill] sm:$0xff] %v8055_v30  ;;  %v5543_v41 = vld [vmem:[#allocation2 + $0x7c8] sm:$0xf0]  ;;  %v8074_v32 = vor.u32 %v6930_v54, %v5607_v2  ;;  %v5661_v42 = vld [vmem:[#allocation2 + $0x8b0] sm:$0xf]  ;;  %v640_v24 = vpop.f32.mrf.mxu2 }
  0xb9   : > { %1659 = vmatpush.bf16.msrb.mxu1 %v8044_v36  ;;  %10356 = vst [vmem:[#allocation152_spill] sm:$0xff] %v8060_v18  ;;  %v5671_v13 = vld [vmem:[#allocation2 + $0x8c8] sm:$0xf0]  ;;  %v8068_v36 = vor.u32 %v6947_v22, %v5669_v49  ;;  %v8072_v15 = vor.u32 %v6914_v26, %v5543_v41  ;;  %v6945_v37 = vld [vmem:[#allocation2 + $0x8b4] sm:$0xf0]  ;;  %v614_v26 = vpop.f32.mrf.mxu0 }
  0xba   : > { %1672 = vmatpush.bf16.msrb.mxu2 %v8046_v60  ;;  %10357 = vst [vmem:[#allocation153_spill] sm:$0xff] %v8062_v48  ;;  %1685 = vmatpush.bf16.msrb.mxu3 %v8050_v1  ;;  %v6912_v4 = vld [vmem:[#allocation2 + $0x7b4] sm:$0xf]  ;;  %v8077_v61 = vor.u32 %v6946_v0, %v5671_v13  ;;  %v5535_v1 = vld [vmem:[#allocation2 + $0x7b8] sm:$0xf0] }
  0xbb   : > { %10358 = vst [vmem:[#allocation154_spill] sm:$0xff] %v8065_v63  ;;  %v6928_v60 = vld [vmem:[#allocation2 + $0x834] sm:$0xf]  ;;  %v5663_v49 = vld [vmem:[#allocation2 + $0x8b8] sm:$0xf0]  ;;  %v8084_v41 = vor.u32 %v6912_v4, %v5535_v1 }
  0xbc   : > { %1647 = vmatpush.bf16.msrb.mxu0 %v8055_v30  ;;  %10359 = vst [vmem:[#allocation155_spill] sm:$0xff] %v8068_v36  ;;  %v5599_v30 = vld [vmem:[#allocation2 + $0x838] sm:$0xf0]  ;;  %v6944_v22 = vld [vmem:[#allocation2 + $0x8b4] sm:$0xf] }
  0xbd   : > { %1660 = vmatpush.bf16.msrb.mxu1 %v8060_v18  ;;  %10360 = vst [vmem:[#allocation156_spill] sm:$0xff] %v8072_v15  ;;  %v8080_v18 = vor.u32 %v6945_v37, %v5661_v42  ;;  %v8086_v54 = vor.u32 %v6928_v60, %v5599_v30  ;;  %v5653_v0 = vld [vmem:[#allocation2 + $0x8a0] sm:$0xf]  ;;  %v6943_v13 = vld [vmem:[#allocation2 + $0x8a4] sm:$0xf0] }
  0xbe   : > { %1673 = vmatpush.bf16.msrb.mxu2 %v8062_v48  ;;  %10361 = vst [vmem:[#allocation157_spill] sm:$0xff] %v8074_v32  ;;  %1686 = vmatpush.bf16.msrb.mxu3 %v8065_v63  ;;  %v6910_v2 = vld [vmem:[#allocation2 + $0x7a4] sm:$0xf]  ;;  %v627_v63 = vpop.f32.mrf.mxu1  ;;  %v8089_v48 = vor.u32 %v6944_v22, %v5663_v49  ;;  %v5591_v37 = vld [vmem:[#allocation2 + $0x828] sm:$0xf0]  ;;  %v8092_v1 = vor.u32 %v6943_v13, %v5653_v0 }
  0xbf   : > { %10362 = vst [vmem:[#allocation158_spill] sm:$0xff] %v8077_v61  ;;  %v6926_v42 = vld [vmem:[#allocation2 + $0x824] sm:$0xf]  ;;  %v628_v59 = vadd.f32 %v627_v63, %v614_v26  ;;  %v5645_v22 = vld [vmem:[#allocation2 + $0x890] sm:$0xf] }
  0xc0   : > { %1648 = vmatpush.bf16.msrb.mxu0 %v8068_v36  ;;  %10363 = vst [vmem:[#allocation159_spill] sm:$0xff] %v8080_v18  ;;  %v5527_v36 = vld [vmem:[#allocation2 + $0x7a8] sm:$0xf0]  ;;  %v6942_v53 = vld [vmem:[#allocation2 + $0x8a4] sm:$0xf]  ;;  %v8100_v4 = vor.u32 %v6926_v42, %v5591_v37  ;;  %v642_v40 = vpop.f32.mrf.mxu2 }
  0xc1   : > { %1661 = vmatpush.bf16.msrb.mxu1 %v8072_v15  ;;  %10364 = vst [vmem:[#allocation160_spill] sm:$0xff] %v8084_v41  ;;  %v5655_v15 = vld [vmem:[#allocation2 + $0x8a8] sm:$0xf0]  ;;  %v8094_v60 = vadd.f32 %v640_v24, %v628_v59  ;;  %v8098_v30 = vor.u32 %v6910_v2, %v5527_v36  ;;  %v6941_v49 = vld [vmem:[#allocation2 + $0x894] sm:$0xf0]  ;;  %v8105_v24 = vpop.f32.mrf.mxu3  ;;  %v616_v37 = vpop.f32.mrf.mxu0 }
  0xc2   : > { %1674 = vmatpush.bf16.msrb.mxu2 %v8074_v32  ;;  %10365 = vst [vmem:[#allocation161_spill] sm:$0xff] %v8086_v54  ;;  %1687 = vmatpush.bf16.msrb.mxu3 %v8077_v61  ;;  %v6908_v63 = vld [vmem:[#allocation2 + $0x794] sm:$0xf]  ;;  %v8103_v26 = vor.u32 %v6942_v53, %v5655_v15  ;;  %v5583_v13 = vld [vmem:[#allocation2 + $0x818] sm:$0xf0]  ;;  %v8108_v36 = vor.u32 %v6941_v49, %v5645_v22 }
  0xc3   : > { %10366 = vst [vmem:[#allocation162_spill] sm:$0xff] %v8089_v48  ;;  %v6924_v0 = vld [vmem:[#allocation2 + $0x814] sm:$0xf]  ;;  %v5637_v2 = vld [vmem:[#allocation2 + $0x880] sm:$0xf] }
  0xc4   : > { %1649 = vmatpush.bf16.msrb.mxu0 %v8080_v18  ;;  %10367 = vst [vmem:[#allocation163_spill] sm:$0xff] %v8092_v1  ;;  %v5519_v18 = vld [vmem:[#allocation2 + $0x798] sm:$0xf0]  ;;  %v6940_v59 = vld [vmem:[#allocation2 + $0x894] sm:$0xf]  ;;  %v8114_v15 = vor.u32 %v6924_v0, %v5583_v13 }
  0xc5   : > { %1662 = vmatpush.bf16.msrb.mxu1 %v8084_v41  ;;  %10368 = vst [vmem:[#allocation164_spill] sm:$0xff] %v8098_v30  ;;  %v5647_v41 = vld [vmem:[#allocation2 + $0x898] sm:$0xf0]  ;;  %v6939_v42 = vld [vmem:[#allocation2 + $0x884] sm:$0xf0]  ;;  %v8112_v53 = vor.u32 %v6908_v63, %v5519_v18 }
  0xc6   : > { %1675 = vmatpush.bf16.msrb.mxu2 %v8086_v54  ;;  %10369 = vst [vmem:[#allocation165_spill] sm:$0xff] %v8100_v4  ;;  %1688 = vmatpush.bf16.msrb.mxu3 %v8089_v48  ;;  %v6906_v48 = vld [vmem:[#allocation2 + $0x784] sm:$0xf]  ;;  %v5511_v54 = vld [vmem:[#allocation2 + $0x788] sm:$0xf0]  ;;  %v629_v32 = vpop.f32.mrf.mxu1  ;;  %v8120_v18 = vor.u32 %v6939_v42, %v5637_v2 }
  0xc7   : > { %10370 = vst [vmem:[#allocation166_spill] sm:$0xff] %v8103_v26  ;;  %v6922_v61 = vld [vmem:[#allocation2 + $0x804] sm:$0xf]  ;;  %v5575_v22 = vld [vmem:[#allocation2 + $0x808] sm:$0xf0]  ;;  %v8124_v32 = vor.u32 %v6906_v48, %v5511_v54 }
  0xc8   : > { %1650 = vmatpush.bf16.msrb.mxu0 %v8092_v1  ;;  %10371 = vst [vmem:[#allocation167_spill] sm:$0xff] %v8108_v36  ;;  %v8117_v1 = vor.u32 %v6940_v59, %v5647_v41  ;;  %v6938_v49 = vld [vmem:[#allocation2 + $0x884] sm:$0xf]  ;;  %v5639_v11 = vld [vmem:[#allocation2 + $0x888] sm:$0xf0]  ;;  %v8126_v41 = vor.u32 %v6922_v61, %v5575_v22 }
  0xc9   : > { %1663 = vmatpush.bf16.msrb.mxu1 %v8098_v30  ;;  %10372 = vst [vmem:[#allocation168_spill] sm:$0xff] %v8112_v53  ;;  %v5757_v37 = vld [vmem:[#allocation2 + $0x370] sm:$0xf]  ;;  %v7065_v39 = vld [vmem:[#allocation2 + $0x374] sm:$0xf0]  ;;  %v8129_v40 = vor.u32 %v6938_v49, %v5639_v11  ;;  %v655_v2 = vpop.f32.mrf.mxu3 }
  0xca   : > { %1676 = vmatpush.bf16.msrb.mxu2 %v8100_v4  ;;  %10373 = vst [vmem:[#allocation169_spill] sm:$0xff] %v8114_v15  ;;  %1689 = vmatpush.bf16.msrb.mxu3 %v8103_v26  ;;  %v5821_v30 = vld [vmem:[#allocation2 + $0x3f0] sm:$0xf]  ;;  %v7081_v63 = vld [vmem:[#allocation2 + $0x3f4] sm:$0xf0] }
  0xcb   : > { %10374 = vst [vmem:[#allocation170_spill] sm:$0xff] %v8117_v1  ;;  %v5885_v0 = vld [vmem:[#allocation2 + $0x470] sm:$0xf]  ;;  %v7097_v13 = vld [vmem:[#allocation2 + $0x474] sm:$0xf0]  ;;  %v8133_v42 = vor.u32 %v7081_v63, %v5821_v30 }
  0xcc   : > { %1651 = vmatpush.bf16.msrb.mxu0 %v8108_v36  ;;  %10375 = vst [vmem:[#allocation171_spill] sm:$0xff] %v8120_v18  ;;  %v7064_v59 = vld [vmem:[#allocation2 + $0x374] sm:$0xf]  ;;  %v5759_v26 = vld [vmem:[#allocation2 + $0x378] sm:$0xf0]  ;;  %v8131_v36 = vor.u32 %v7065_v39, %v5757_v37  ;;  %v8135_v4 = vor.u32 %v7097_v13, %v5885_v0 }
  0xcd   : > { %1664 = vmatpush.bf16.msrb.mxu1 %v8112_v53  ;;  %10376 = vst [vmem:[#allocation172_spill] sm:$0xff] %v8124_v32  ;;  %v5749_v53 = vld [vmem:[#allocation2 + $0x360] sm:$0xf]  ;;  %v7063_v20 = vld [vmem:[#allocation2 + $0x364] sm:$0xf0]  ;;  %v8138_v48 = vor.u32 %v7064_v59, %v5759_v26 }
  0xce   : > { %1677 = vmatpush.bf16.msrb.mxu2 %v8114_v15  ;;  %10377 = vst [vmem:[#allocation173_spill] sm:$0xff] %v8126_v41  ;;  %1690 = vmatpush.bf16.msrb.mxu3 %v8117_v1  ;;  %v5813_v15 = vld [vmem:[#allocation2 + $0x3e0] sm:$0xf]  ;;  %v7079_v61 = vld [vmem:[#allocation2 + $0x3e4] sm:$0xf0]  ;;  %v8144_v30 = vor.u32 %v7063_v20, %v5749_v53 }
  0xcf   : > { %10378 = vst [vmem:[#allocation174_spill] sm:$0xff] %v8129_v40  ;;  %v5877_v54 = vld [vmem:[#allocation2 + $0x460] sm:$0xf]  ;;  %v7095_v22 = vld [vmem:[#allocation2 + $0x464] sm:$0xf0]  ;;  %v8148_v26 = vor.u32 %v7079_v61, %v5813_v15 }
  0xd0   : > { %10379 = vst [vmem:[#allocation175_spill] sm:$0xff] %v8131_v36  ;;  %1652 = vmatpush.bf16.msrb.mxu0 %v8120_v18  ;;  %v7062_v11 = vld [vmem:[#allocation2 + $0x364] sm:$0xf]  ;;  %v5751_v39 = vld [vmem:[#allocation2 + $0x368] sm:$0xf0]  ;;  %v8150_v49 = vor.u32 %v7095_v22, %v5877_v54 }
  0xd1   : > { %10380 = vst [vmem:[#allocation176_spill] sm:$0xff] %v8133_v42  ;;  %1665 = vmatpush.bf16.msrb.mxu1 %v8124_v32  ;;  %v5741_v37 = vld [vmem:[#allocation2 + $0x350] sm:$0xf]  ;;  %v7061_v63 = vld [vmem:[#allocation2 + $0x354] sm:$0xf0]  ;;  %v8154_v13 = vor.u32 %v7062_v11, %v5751_v39 }
  0xd2   : > { %10381 = vst [vmem:[#allocation177_spill] sm:$0xff] %v8135_v4  ;;  %1678 = vmatpush.bf16.msrb.mxu2 %v8126_v41  ;;  %1691 = vmatpush.bf16.msrb.mxu3 %v8129_v40  ;;  %v5805_v0 = vld [vmem:[#allocation2 + $0x3d0] sm:$0xf]  ;;  %v7077_v59 = vld [vmem:[#allocation2 + $0x3d4] sm:$0xf0]  ;;  %v8160_v61 = vor.u32 %v7061_v63, %v5741_v37 }
  0xd3   : > { %10382 = vst [vmem:[#allocation178_spill] sm:$0xff] %v8138_v48  ;;  %1653 = vmatmul.bf16.vlgmr.msrb.gmra.mxu0 %v7834_v47  ;;  %v5869_v20 = vld [vmem:[#allocation2 + $0x450] sm:$0xf]  ;;  %v7093_v53 = vld [vmem:[#allocation2 + $0x454] sm:$0xf0]  ;;  %v8164_v54 = vor.u32 %v7077_v59, %v5805_v0 }
  0xd4   : > { %2020 = vmatpush.bf16.msra.mxu0 %v8131_v36  ;;  %10383 = vst [vmem:[#allocation179_spill] sm:$0xff] %v8144_v30  ;;  %1666 = vmatmul.bf16.vlgmr.msrb.gmra.mxu1 %v7729_v31  ;;  %v7060_v15 = vld [vmem:[#allocation2 + $0x354] sm:$0xf]  ;;  %v5743_v2 = vld [vmem:[#allocation2 + $0x358] sm:$0xf0]  ;;  %v8166_v22 = vor.u32 %v7093_v53, %v5869_v20  ;;  %v666_v20 = vpop.f32.mrf.mxu0 }
  0xd5   : > { %2033 = vmatpush.bf16.msra.mxu1 %v8133_v42  ;;  %10384 = vst [vmem:[#allocation180_spill] sm:$0xff] %v8148_v26  ;;  %1679 = vmatmul.bf16.vlgmr.msrb.gmra.mxu2 %v7733_v19  ;;  %v5733_v11 = vld [vmem:[#allocation2 + $0x340] sm:$0xf]  ;;  %v7059_v31 = vld [vmem:[#allocation2 + $0x344] sm:$0xf0]  ;;  %v8169_v19 = vor.u32 %v7060_v15, %v5743_v2 }
  0xd6   : > { %2046 = vmatpush.bf16.msra.mxu2 %v8135_v4  ;;  %10385 = vst [vmem:[#allocation181_spill] sm:$0xff] %v8150_v49  ;;  %2059 = vmatpush.bf16.msra.mxu3 %v8138_v48  ;;  %v5797_v39 = vld [vmem:[#allocation2 + $0x3c0] sm:$0xf]  ;;  %v7058_v37 = vld [vmem:[#allocation2 + $0x344] sm:$0xf]  ;;  %v679_v4 = vpop.f32.mrf.mxu1 }
  0xd7   : > { %10386 = vst [vmem:[#allocation182_spill] sm:$0xff] %v8154_v13  ;;  %1692 = vmatmul.bf16.vlgmr.msrb.gmra.mxu3 %v7834_v47  ;;  %v7075_v47 = vld [vmem:[#allocation2 + $0x3c4] sm:$0xf0]  ;;  %v5861_v48 = vld [vmem:[#allocation2 + $0x440] sm:$0xf] }
  0xd8   : > { %2021 = vmatpush.bf16.msra.mxu0 %v8144_v30  ;;  %10387 = vst [vmem:[#allocation183_spill] sm:$0xff] %v8160_v61  ;;  %v7091_v30 = vld [vmem:[#allocation2 + $0x444] sm:$0xf0]  ;;  %v5735_v63 = vld [vmem:[#allocation2 + $0x348] sm:$0xf0]  ;;  %v8176_v53 = vor.u32 %v7075_v47, %v5797_v39 }
  0xd9   : > { %2034 = vmatpush.bf16.msra.mxu1 %v8148_v26  ;;  %10388 = vst [vmem:[#allocation184_spill] sm:$0xff] %v8164_v54  ;;  %v5725_v0 = vld [vmem:[#allocation2 + $0x330] sm:$0xf]  ;;  %v7057_v59 = vld [vmem:[#allocation2 + $0x334] sm:$0xf0]  ;;  %v8178_v15 = vor.u32 %v7091_v30, %v5861_v48  ;;  %v667_v26 = vadd.f32 %v666_v20, %v8105_v24 }
  0xda   : > { %2047 = vmatpush.bf16.msra.mxu2 %v8150_v49  ;;  %10389 = vst [vmem:[#allocation185_spill] sm:$0xff] %v8166_v22  ;;  %2060 = vmatpush.bf16.msra.mxu3 %v8154_v13  ;;  %v8172_v49 = vor.u32 %v7059_v31, %v5733_v11  ;;  %v5789_v2 = vld [vmem:[#allocation2 + $0x3b0] sm:$0xf]  ;;  %v7073_v13 = vld [vmem:[#allocation2 + $0x3b4] sm:$0xf0]  ;;  %v8183_v11 = vor.u32 %v7058_v37, %v5735_v63  ;;  %v943_v37 = vpop.f32.mrf.mxu2 }
  0xdb   : > { %10390 = vst [vmem:[#allocation186_spill] sm:$0xff] %v8169_v19  ;;  %v5853_v31 = vld [vmem:[#allocation2 + $0x430] sm:$0xf]  ;;  %v7089_v42 = vld [vmem:[#allocation2 + $0x434] sm:$0xf0]  ;;  %v8189_v48 = vor.u32 %v7057_v59, %v5725_v0  ;;  %v8193_v24 = vor.u32 %v7073_v13, %v5789_v2  ;;  %v956_v59 = vpop.f32.mrf.mxu3 }
  0xdc   : > { %2022 = vmatpush.bf16.msra.mxu0 %v8160_v61  ;;  %10391 = vst [vmem:[#allocation187_spill] sm:$0xff] %v8172_v49  ;;  %v1698_v61 = vld [vmem:[%s7611_s30 + $0x8] sm:$0x7]  ;;  %v1697_v36 = vld [vmem:[%s7611_s30] sm:$0x77]  ;;  %v8195_v47 = vor.u32 %v7089_v42, %v5853_v31 }
  0xdd   : > { %2035 = vmatpush.bf16.msra.mxu1 %v8164_v54  ;;  %10392 = vst [vmem:[#allocation188_spill] sm:$0xff] %v8176_v53  ;;  %v7056_v54 = vld [vmem:[#allocation2 + $0x334] sm:$0xf]  ;;  %v5727_v40 = vld [vmem:[#allocation2 + $0x338] sm:$0xf0]  ;;  %v1752_v39 = vunpack.c.l.b16 %v1698_v61  ;;  %v944_v61 = vadd.f32 %v943_v37, %v8094_v60 }
  0xde   : > { %2048 = vmatpush.bf16.msra.mxu2 %v8166_v22  ;;  %10393 = vst [vmem:[#allocation189_spill] sm:$0xff] %v8178_v15  ;;  %2061 = vmatpush.bf16.msra.mxu3 %v8169_v19  ;;  %v8186_v22 = vadd.f32 %v679_v4, %v667_v26  ;;  %v5717_v30 = vld [vmem:[#allocation2 + $0x320] sm:$0xf]  ;;  %v7055_v63 = vld [vmem:[#allocation2 + $0x324] sm:$0xf0]  ;;  %v1750_v4 = vunpack.c.l.b16 %v1697_v36  ;;  %v1751_v26 = vunpack.c.h.b16 %v1697_v36  ;;  %v8198_v0 = vor.u32 %v7056_v54, %v5727_v40  ;;  %v668_v40 = vpop.f32.mrf.mxu0 }
  0xdf   : > { %10394 = vst [vmem:[#allocation190_spill] sm:$0xff] %v8183_v11  ;;  %v5781_v20 = vld [vmem:[#allocation2 + $0x3a0] sm:$0xf]  ;;  %v7071_v19 = vld [vmem:[#allocation2 + $0x3a4] sm:$0xf0]  ;;  %v8202_v42 = vadd.f32 %v956_v59, %v944_v61  ;;  %v8204_v2 = vor.u32 %v7055_v63, %v5717_v30  ;;  %v681_v61 = vpop.f32.mrf.mxu1 }
  0xe0   : > { %2023 = vmatpush.bf16.msra.mxu0 %v8172_v49  ;;  %10395 = vst [vmem:[#allocation191_spill] sm:$0xff] %v8189_v48  ;;  %v7087_v49 = vld [vmem:[#allocation2 + $0x424] sm:$0xf0]  ;;  %v5719_v13 = vld [vmem:[#allocation2 + $0x328] sm:$0xf0]  ;;  %v8206_v31 = vor.u32 %v7071_v19, %v5781_v20  ;;  %v8214_v59 = vpack.c.b16 %v1750_v4, %v1750_v4  ;;  %v8216_v30 = vpack.c.b16 %v1751_v26, %v1751_v26 }
  0xe1   : > { %2036 = vmatpush.bf16.msra.mxu1 %v8176_v53  ;;  %10396 = vst [vmem:[#allocation192_spill] sm:$0xff] %v8193_v24  ;;  %v5845_v53 = vld [vmem:[#allocation2 + $0x420] sm:$0xf]  ;;  %v5709_v36 = vld [vmem:[#allocation2 + $0x310] sm:$0xf] }
  0xe2   : > { %2049 = vmatpush.bf16.msra.mxu2 %v8178_v15  ;;  %10397 = vst [vmem:[#allocation193_spill] sm:$0xff] %v8195_v47  ;;  %2062 = vmatpush.bf16.msra.mxu3 %v8183_v11  ;;  %v7054_v15 = vld [vmem:[#allocation2 + $0x324] sm:$0xf]  ;;  %v7053_v41 = vld [vmem:[#allocation2 + $0x314] sm:$0xf0]  ;;  %v8208_v11 = vpack.c.b16 %v1752_v39, %v1752_v39  ;;  %v8212_v60 = vor.u32 %v7087_v49, %v5845_v53  ;;  %v1759_v32 = vshll.u32 %v8214_v59, 16 }
  0xe3   : > { %10398 = vst [vmem:[#allocation194_spill] sm:$0xff] %v8198_v0  ;;  %v5773_v54 = vld [vmem:[#allocation2 + $0x390] sm:$0xf]  ;;  %v7069_v37 = vld [vmem:[#allocation2 + $0x394] sm:$0xf0]  ;;  %v8219_v19 = vor.u32 %v7054_v15, %v5719_v13  ;;  %v8222_v49 = vor.u32 %v7053_v41, %v5709_v36  ;;  %v945_v41 = vpop.f32.mrf.mxu2  ;;  %v958_v10 = vpop.f32.mrf.mxu3 }
  0xe4   : > { %2024 = vmatpush.bf16.msra.mxu0 %v8189_v48  ;;  %10399 = vst [vmem:[#allocation195_spill] sm:$0xff] %v8204_v2  ;;  %v5837_v48 = vld [vmem:[#allocation2 + $0x410] sm:$0xf]  ;;  %v7085_v39 = vld [vmem:[#allocation2 + $0x414] sm:$0xf0]  ;;  %v1773_v4 = vshll.u32 %v8208_v11, 16  ;;  %v8227_v15 = vor.u32 %v7069_v37, %v5773_v54 }
  0xe5   : > { %10400 = vst [vmem:[#allocation196_spill] sm:$0xff] %v8206_v31  ;;  %2037 = vmatpush.bf16.msra.mxu1 %v8193_v24  ;;  %v7052_v63 = vld [vmem:[#allocation2 + $0x314] sm:$0xf]  ;;  %v5711_v20 = vld [vmem:[#allocation2 + $0x318] sm:$0xf0]  ;;  %v8229_v26 = vor.u32 %v7085_v39, %v5837_v48 }
  0xe6   : > { %2050 = vmatpush.bf16.msra.mxu2 %v8195_v47  ;;  %10401 = vst [vmem:[#allocation197_spill] sm:$0xff] %v8212_v60  ;;  %2063 = vmatpush.bf16.msra.mxu3 %v8198_v0  ;;  %v5701_v40 = vld [vmem:[#allocation2 + $0x300] sm:$0xf]  ;;  %v7051_v24 = vld [vmem:[#allocation2 + $0x304] sm:$0xf0]  ;;  %v8234_v36 = vor.u32 %v7052_v63, %v5711_v20  ;;  %v1771_v63 = vshrl.u32 %v8208_v11, 16 }
  0xe7   : > { %10402 = vst [vmem:[#allocation198_spill] sm:$0xff] %v8219_v19  ;;  %v5765_v47 = vld [vmem:[#allocation2 + $0x380] sm:$0xf]  ;;  %v7067_v53 = vld [vmem:[#allocation2 + $0x384] sm:$0xf0]  ;;  %v1775_v20 = vrot.slane %v1773_v4, 1 }
  0xe8   : > { %2025 = vmatpush.bf16.msra.mxu0 %v8204_v2  ;;  %10403 = vst [vmem:[#allocation199_spill] sm:$0xff] %v8222_v49  ;;  %v5829_v61 = vld [vmem:[#allocation2 + $0x400] sm:$0xf]  ;;  %v7083_v13 = vld [vmem:[#allocation2 + $0x404] sm:$0xf0]  ;;  %v1766_v2 = vshll.u32 %v8216_v30, 16  ;;  %v8239_v39 = vor.u32 %v7067_v53, %v5765_v47 }
  0xe9   : > { %2038 = vmatpush.bf16.msra.mxu1 %v8206_v31  ;;  %10404 = vst [vmem:[#allocation200_spill] sm:$0xff] %v8227_v15  ;;  %v7050_v0 = vld [vmem:[#allocation2 + $0x304] sm:$0xf]  ;;  %v5703_v18 = vld [vmem:[#allocation2 + $0x308] sm:$0xf0]  ;;  %v8241_v55 = vor.u32 %v7083_v13, %v5829_v61 }
  0xea   : > { %2051 = vmatpush.bf16.msra.mxu2 %v8212_v60  ;;  %10405 = vst [vmem:[#allocation201_spill] sm:$0xff] %v8229_v26  ;;  %2064 = vmatpush.bf16.msra.mxu3 %v8219_v19  ;;  %v7080_v1 = vld [vmem:[#allocation2 + $0x3f4] sm:$0xf]  ;;  %v5823_v31 = vld [vmem:[#allocation2 + $0x3f8] sm:$0xf0]  ;;  %v8236_v60 = vor.u32 %v7051_v24, %v5701_v40  ;;  %v1757_v24 = vshrl.u32 %v8214_v59, 16  ;;  %v8249_v47 = vor.u32 %v7050_v0, %v5703_v18 }
  0xeb   : > { %10406 = vst [vmem:[#allocation202_spill] sm:$0xff] %v8234_v36  ;;  %v7096_v54 = vld [vmem:[#allocation2 + $0x474] sm:$0xf]  ;;  %v5887_v48 = vld [vmem:[#allocation2 + $0x478] sm:$0xf0]  ;;  %v1761_v40 = vrot.slane %v1759_v32, 1  ;;  %v8251_v53 = vor.u32 %v7080_v1, %v5823_v31  ;;  %v8260_v32 = vor.u32 %v1775_v20, %v1771_v63 }
  0xec   : > { %10407 = vst [vmem:[#allocation203_spill] sm:$0xff] %v8236_v60  ;;  %v5949_v37 = vld [vmem:[#allocation2 + $0xaf0] sm:$0xf]  ;;  %2026 = vmatpush.bf16.msra.mxu0 %v8222_v49  ;;  %v7113_v41 = vld [vmem:[#allocation2 + $0xaf4] sm:$0xf0]  ;;  %v1764_v19 = vshrl.u32 %v8216_v30, 16  ;;  %v8253_v61 = vor.u32 %v7096_v54, %v5887_v48 }
  0xed   : > { %10408 = vst [vmem:[#allocation204_spill] sm:$0xff] %v8239_v39  ;;  %v6013_v52 = vld [vmem:[#allocation2 + $0xb70] sm:$0xf]  ;;  %2039 = vmatpush.bf16.msra.mxu1 %v8227_v15  ;;  %v7129_v10 = vld [vmem:[#allocation2 + $0xb74] sm:$0xf0]  ;;  %v1768_v49 = vrot.slane %v1766_v2, 1  ;;  %v8255_v11 = vor.u32 %v7113_v41, %v5949_v37  ;;  %v8264_v0 = vor.u32 %v1761_v40, %v1757_v24 }
  0xee   : > { %10409 = vst [vmem:[#allocation205_spill] sm:$0xff] %v8241_v55  ;;  %2052 = vmatpush.bf16.msra.mxu2 %v8229_v26  ;;  %2065 = vmatpush.bf16.msra.mxu3 %v8234_v36  ;;  %v7078_v4 = vld [vmem:[#allocation2 + $0x3e4] sm:$0xf]  ;;  %v5815_v13 = vld [vmem:[#allocation2 + $0x3e8] sm:$0xf0]  ;;  %v8258_v59 = vor.u32 %v7129_v10, %v6013_v52 }
  0xef   : > { %10410 = vst [vmem:[#allocation206_spill] sm:$0xff] %v8249_v47  ;;  %v7094_v26 = vld [vmem:[#allocation2 + $0x464] sm:$0xf]  ;;  %v5879_v2 = vld [vmem:[#allocation2 + $0x468] sm:$0xf0]  ;;  %v8266_v31 = vor.u32 %v1768_v49, %v1764_v19  ;;  %v8270_v52 = vor.u32 %v7078_v4, %v5815_v13 }
  0xf0   : > { %10411 = vst [vmem:[#allocation207_spill] sm:$0xff] %v8251_v53  ;;  %2027 = vmatpush.bf16.msra.mxu0 %v8236_v60  ;;  %v5941_v30 = vld [vmem:[#allocation2 + $0xae0] sm:$0xf]  ;;  %v7111_v36 = vld [vmem:[#allocation2 + $0xae4] sm:$0xf0]  ;;  %v8274_v54 = vor.u32 %v7094_v26, %v5879_v2 }
  0xf1   : > { %10412 = vst [vmem:[#allocation208_spill] sm:$0xff] %v8253_v61  ;;  %2040 = vmatpush.bf16.msra.mxu1 %v8239_v39  ;;  %v6005_v1 = vld [vmem:[#allocation2 + $0xb60] sm:$0xf]  ;;  %v7127_v18 = vld [vmem:[#allocation2 + $0xb64] sm:$0xf0]  ;;  %v8276_v48 = vor.u32 %v7111_v36, %v5941_v30 }
  0xf2   : > { %10413 = vst [vmem:[#allocation209_spill] sm:$0xff] %v8255_v11  ;;  %2053 = vmatpush.bf16.msra.mxu2 %v8241_v55  ;;  %2066 = vmatpush.bf16.msra.mxu3 %v8249_v47  ;;  %v7076_v37 = vld [vmem:[#allocation2 + $0x3d4] sm:$0xf]  ;;  %v5807_v41 = vld [vmem:[#allocation2 + $0x3d8] sm:$0xf0]  ;;  %v8280_v19 = vor.u32 %v7127_v18, %v6005_v1 }
  0xf3   : > { %10414 = vst [vmem:[#allocation210_spill] sm:$0xff] %v8258_v59  ;;  %v7092_v63 = vld [vmem:[#allocation2 + $0x454] sm:$0xf]  ;;  %v5871_v49 = vld [vmem:[#allocation2 + $0x458] sm:$0xf0]  ;;  %2028 = vmatmul.bf16.vlgmr.msra.gmra.mxu0 %v8264_v0  ;;  %v8285_v36 = vor.u32 %v7076_v37, %v5807_v41 }
  0xf4   : > { %10415 = vst [vmem:[#allocation211_spill] sm:$0xff] %v8260_v32  ;;  %2072 = vmatpush.bf16.msrb.mxu0 %v8251_v53  ;;  %v5933_v20 = vld [vmem:[#allocation2 + $0xad0] sm:$0xf]  ;;  %v7109_v10 = vld [vmem:[#allocation2 + $0xad4] sm:$0xf0]  ;;  %2041 = vmatmul.bf16.vlgmr.msra.gmra.mxu1 %v8266_v31  ;;  %v8290_v40 = vor.u32 %v7092_v63, %v5871_v49  ;;  %v982_v49 = vpop.f32.mrf.mxu1 }
  0xf5   : > { %10416 = vst [vmem:[#allocation212_spill] sm:$0xff] %v8264_v0  ;;  %2085 = vmatpush.bf16.msrb.mxu1 %v8253_v61  ;;  %2054 = vmatmul.bf16.vlgmr.msra.gmra.mxu2 %v8260_v32  ;;  %v5997_v26 = vld [vmem:[#allocation2 + $0xb50] sm:$0xf]  ;;  %v7125_v24 = vld [vmem:[#allocation2 + $0xb54] sm:$0xf0]  ;;  %v8292_v4 = vor.u32 %v7109_v10, %v5933_v20  ;;  %v983_v10 = vadd.f32 %v982_v49, %v8186_v22 }
  0xf6   : > { %10417 = vst [vmem:[#allocation213_spill] sm:$0xff] %v8266_v31  ;;  %2389 = vmatpush.bf16.msrb.mxu2 %v8255_v11  ;;  %2402 = vmatpush.bf16.msrb.mxu3 %v8258_v59  ;;  %v7074_v13 = vld [vmem:[#allocation2 + $0x3c4] sm:$0xf]  ;;  %v5799_v2 = vld [vmem:[#allocation2 + $0x3c8] sm:$0xf0]  ;;  %v8295_v1 = vor.u32 %v7125_v24, %v5997_v26 }
  0xf7   : > { %10418 = vst [vmem:[#allocation214_spill] sm:$0xff] %v8270_v52  ;;  %2067 = vmatmul.bf16.vlgmr.msra.gmra.mxu3 %v8264_v0  ;;  %v7090_v30 = vld [vmem:[#allocation2 + $0x444] sm:$0xf]  ;;  %v5863_v18 = vld [vmem:[#allocation2 + $0x448] sm:$0xf0]  ;;  %v8301_v20 = vor.u32 %v7074_v13, %v5799_v2 }
  0xf8   : > { %10419 = vst [vmem:[#allocation215_spill] sm:$0xff] %v8274_v54  ;;  %2073 = vmatpush.bf16.msrb.mxu0 %v8270_v52  ;;  %v5925_v37 = vld [vmem:[#allocation2 + $0xac0] sm:$0xf]  ;;  %v7107_v41 = vld [vmem:[#allocation2 + $0xac4] sm:$0xf0]  ;;  %v969_v52 = vpop.f32.mrf.mxu0  ;;  %v8306_v26 = vor.u32 %v7090_v30, %v5863_v18 }
  0xf9   : > { %10420 = vst [vmem:[#allocation216_spill] sm:$0xff] %v8276_v48  ;;  %2086 = vmatpush.bf16.msrb.mxu1 %v8274_v54  ;;  %v5989_v59 = vld [vmem:[#allocation2 + $0xb40] sm:$0xf]  ;;  %v7123_v11 = vld [vmem:[#allocation2 + $0xb44] sm:$0xf0]  ;;  %v8299_v63 = vadd.f32 %v969_v52, %v8202_v42  ;;  %v8308_v24 = vor.u32 %v7107_v41, %v5925_v37  ;;  %v995_v41 = vpop.f32.mrf.mxu2 }
  0xfa   : > { %10421 = vst [vmem:[#allocation217_spill] sm:$0xff] %v8280_v19  ;;  %2390 = vmatpush.bf16.msrb.mxu2 %v8276_v48  ;;  %2403 = vmatpush.bf16.msrb.mxu3 %v8280_v19  ;;  %v7072_v19 = vld [vmem:[#allocation2 + $0x3b4] sm:$0xf]  ;;  %v5791_v48 = vld [vmem:[#allocation2 + $0x3b8] sm:$0xf0]  ;;  %v8311_v42 = vor.u32 %v7123_v11, %v5989_v59 }
  0xfb   : > { %10422 = vst [vmem:[#allocation218_spill] sm:$0xff] %v8285_v36  ;;  %v7088_v54 = vld [vmem:[#allocation2 + $0x434] sm:$0xf]  ;;  %v5855_v52 = vld [vmem:[#allocation2 + $0x438] sm:$0xf0] }
  0xfc   : > { %10423 = vst [vmem:[#allocation219_spill] sm:$0xff] %v8290_v40  ;;  %2074 = vmatpush.bf16.msrb.mxu0 %v8285_v36  ;;  %v5917_v13 = vld [vmem:[#allocation2 + $0xab0] sm:$0xf]  ;;  %v7105_v2 = vld [vmem:[#allocation2 + $0xab4] sm:$0xf0]  ;;  %v8318_v22 = vor.u32 %v7088_v54, %v5855_v52  ;;  %v984_v52 = vpop.f32.mrf.mxu1 }
  0xfd   : > { %10424 = vst [vmem:[#allocation220_spill] sm:$0xff] %v8292_v4  ;;  %2087 = vmatpush.bf16.msrb.mxu1 %v8290_v40  ;;  %v5981_v36 = vld [vmem:[#allocation2 + $0xb30] sm:$0xf]  ;;  %v7121_v40 = vld [vmem:[#allocation2 + $0xb34] sm:$0xf0]  ;;  %v8320_v30 = vor.u32 %v7105_v2, %v5917_v13 }
  0xfe   : > { %10425 = vst [vmem:[#allocation221_spill] sm:$0xff] %v8295_v1  ;;  %2391 = vmatpush.bf16.msrb.mxu2 %v8292_v4  ;;  %2404 = vmatpush.bf16.msrb.mxu3 %v8295_v1  ;;  %v8314_v4 = vor.u32 %v7072_v19, %v5791_v48  ;;  %v7070_v18 = vld [vmem:[#allocation2 + $0x3a4] sm:$0xf]  ;;  %v5783_v11 = vld [vmem:[#allocation2 + $0x3a8] sm:$0xf0]  ;;  %v8323_v37 = vor.u32 %v7121_v40, %v5981_v36  ;;  %v1008_v1 = vpop.f32.mrf.mxu3 }
  0xff   : > { %10426 = vst [vmem:[#allocation222_spill] sm:$0xff] %v8301_v20  ;;  %v7086_v59 = vld [vmem:[#allocation2 + $0x424] sm:$0xf]  ;;  %v5847_v49 = vld [vmem:[#allocation2 + $0x428] sm:$0xf0]  ;;  %v996_v19 = vadd.f32 %v995_v41, %v983_v10  ;;  %v8326_v54 = vor.u32 %v7070_v18, %v5783_v11 }
 0x100   : > { %10427 = vst [vmem:[#allocation223_spill] sm:$0xff] %v8306_v26  ;;  %2075 = vmatpush.bf16.msrb.mxu0 %v8301_v20  ;;  %v5909_v20 = vld [vmem:[#allocation2 + $0xaa0] sm:$0xf]  ;;  %v7103_v48 = vld [vmem:[#allocation2 + $0xaa4] sm:$0xf0]  ;;  %v8332_v40 = vor.u32 %v7086_v59, %v5847_v49 }
 0x101   : > { %10428 = vst [vmem:[#allocation224_spill] sm:$0xff] %v8308_v24  ;;  %2088 = vmatpush.bf16.msrb.mxu1 %v8306_v26  ;;  %v5973_v26 = vld [vmem:[#allocation2 + $0xb20] sm:$0xf]  ;;  %v7119_v61 = vld [vmem:[#allocation2 + $0xb24] sm:$0xf0]  ;;  %v8330_v36 = vadd.f32 %v1008_v1, %v996_v19  ;;  %v8334_v13 = vor.u32 %v7103_v48, %v5909_v20 }
 0x102   : > { %10429 = vst [vmem:[#allocation225_spill] sm:$0xff] %v8311_v42  ;;  %2392 = vmatpush.bf16.msrb.mxu2 %v8308_v24  ;;  %2405 = vmatpush.bf16.msrb.mxu3 %v8311_v42  ;;  %v971_v24 = vpop.f32.mrf.mxu0  ;;  %v7068_v10 = vld [vmem:[#allocation2 + $0x394] sm:$0xf]  ;;  %v5775_v2 = vld [vmem:[#allocation2 + $0x398] sm:$0xf0] }
 0x103   : > { %10430 = vst [vmem:[#allocation226_spill] sm:$0xff] %v8314_v4  ;;  %v7084_v41 = vld [vmem:[#allocation2 + $0x414] sm:$0xf]  ;;  %v8337_v24 = vor.u32 %v7119_v61, %v5973_v26  ;;  %v5839_v18 = vld [vmem:[#allocation2 + $0x418] sm:$0xf0]  ;;  %v8340_v1 = vor.u32 %v7068_v10, %v5775_v2 }
 0x104   : > { %10431 = vst [vmem:[#allocation227_spill] sm:$0xff] %v8318_v22  ;;  %2076 = vmatpush.bf16.msrb.mxu0 %v8314_v4  ;;  %v5901_v11 = vld [vmem:[#allocation2 + $0xa90] sm:$0xf]  ;;  %v7101_v52 = vld [vmem:[#allocation2 + $0xa94] sm:$0xf0]  ;;  %v8344_v20 = vor.u32 %v7084_v41, %v5839_v18 }
 0x105   : > { %10432 = vst [vmem:[#allocation228_spill] sm:$0xff] %v8320_v30  ;;  %2089 = vmatpush.bf16.msrb.mxu1 %v8318_v22  ;;  %v5965_v4 = vld [vmem:[#allocation2 + $0xb10] sm:$0xf]  ;;  %v7117_v22 = vld [vmem:[#allocation2 + $0xb14] sm:$0xf0]  ;;  %v8346_v48 = vor.u32 %v7101_v52, %v5901_v11 }
 0x106   : > { %10433 = vst [vmem:[#allocation229_spill] sm:$0xff] %v8323_v37  ;;  %2393 = vmatpush.bf16.msrb.mxu2 %v8320_v30  ;;  %2406 = vmatpush.bf16.msrb.mxu3 %v8323_v37  ;;  %v7066_v59 = vld [vmem:[#allocation2 + $0x384] sm:$0xf]  ;;  %v5767_v49 = vld [vmem:[#allocation2 + $0x388] sm:$0xf0]  ;;  %v8349_v37 = vor.u32 %v7117_v22, %v5965_v4  ;;  %v997_v30 = vpop.f32.mrf.mxu2  ;;  %v1010_v47 = vpop.f32.mrf.mxu3 }
 0x107   : > { %10434 = vst [vmem:[#allocation230_spill] sm:$0xff] %v8326_v54  ;;  %v7082_v61 = vld [vmem:[#allocation2 + $0x404] sm:$0xf]  ;;  %v5831_v26 = vld [vmem:[#allocation2 + $0x408] sm:$0xf0]  ;;  %v8352_v41 = vor.u32 %v7066_v59, %v5767_v49 }
 0x108   : > { %10435 = vst [vmem:[#allocation231_spill] sm:$0xff] %v8332_v40  ;;  %2077 = vmatpush.bf16.msrb.mxu0 %v8326_v54  ;;  %v5893_v19 = vld [vmem:[#allocation2 + $0xa80] sm:$0xf]  ;;  %v7099_v54 = vld [vmem:[#allocation2 + $0xa84] sm:$0xf0]  ;;  %v8356_v4 = vor.u32 %v7082_v61, %v5831_v26 }
 0x109   : > { %10436 = vst [vmem:[#allocation232_spill] sm:$0xff] %v8334_v13  ;;  %2090 = vmatpush.bf16.msrb.mxu1 %v8332_v40  ;;  %v5957_v10 = vld [vmem:[#allocation2 + $0xb00] sm:$0xf]  ;;  %v7115_v2 = vld [vmem:[#allocation2 + $0xb04] sm:$0xf0]  ;;  %v8358_v22 = vor.u32 %v7099_v54, %v5893_v19 }
 0x10a   : > { %10437 = vst [vmem:[#allocation233_spill] sm:$0xff] %v8337_v24  ;;  %2394 = vmatpush.bf16.msrb.mxu2 %v8334_v13  ;;  %2407 = vmatpush.bf16.msrb.mxu3 %v8337_v24  ;;  %v6077_v42 = vld [vmem:[#allocation2 + $0xbf0] sm:$0xf]  ;;  %v7145_v53 = vld [vmem:[#allocation2 + $0xbf4] sm:$0xf0]  ;;  %v8361_v47 = vor.u32 %v7115_v2, %v5957_v10 }
 0x10b   : > { %10438 = vst [vmem:[#allocation234_spill] sm:$0xff] %v8340_v1  ;;  %v7112_v40 = vld [vmem:[#allocation2 + $0xaf4] sm:$0xf]  ;;  %v5951_v18 = vld [vmem:[#allocation2 + $0xaf8] sm:$0xf0] }
 0x10c   : > { %10439 = vst [vmem:[#allocation235_spill] sm:$0xff] %v8344_v20  ;;  %2078 = vmatpush.bf16.msrb.mxu0 %v8340_v1  ;;  %v7128_v11 = vld [vmem:[#allocation2 + $0xb74] sm:$0xf]  ;;  %v6015_v52 = vld [vmem:[#allocation2 + $0xb78] sm:$0xf0]  ;;  %v8363_v1 = vor.u32 %v7145_v53, %v6077_v42  ;;  %v8365_v59 = vor.u32 %v7112_v40, %v5951_v18 }
 0x10d   : > { %10440 = vst [vmem:[#allocation236_spill] sm:$0xff] %v8346_v48  ;;  %2091 = vmatpush.bf16.msrb.mxu1 %v8344_v20  ;;  %v7144_v30 = vld [vmem:[#allocation2 + $0xbf4] sm:$0xf]  ;;  %v6079_v24 = vld [vmem:[#allocation2 + $0xbf8] sm:$0xf0]  ;;  %v8367_v49 = vor.u32 %v7128_v11, %v6015_v52 }
 0x10e   : > { %10441 = vst [vmem:[#allocation237_spill] sm:$0xff] %v8349_v37  ;;  %2395 = vmatpush.bf16.msrb.mxu2 %v8346_v48  ;;  %2408 = vmatpush.bf16.msrb.mxu3 %v8349_v37  ;;  %v6069_v13 = vld [vmem:[#allocation2 + $0xbe0] sm:$0xf]  ;;  %v7143_v20 = vld [vmem:[#allocation2 + $0xbe4] sm:$0xf0]  ;;  %v8370_v61 = vor.u32 %v7144_v30, %v6079_v24 }
 0x10f   : > { %10442 = vst [vmem:[#allocation238_spill] sm:$0xff] %v8352_v41  ;;  %v7110_v55 = vld [vmem:[#allocation2 + $0xae4] sm:$0xf]  ;;  %v5943_v54 = vld [vmem:[#allocation2 + $0xae8] sm:$0xf0]  ;;  %v8376_v40 = vor.u32 %v7143_v20, %v6069_v13 }
 0x110   : > { %10443 = vst [vmem:[#allocation239_spill] sm:$0xff] %v8356_v4  ;;  %2079 = vmatpush.bf16.msrb.mxu0 %v8352_v41  ;;  %v7126_v26 = vld [vmem:[#allocation2 + $0xb64] sm:$0xf]  ;;  %v6007_v19 = vld [vmem:[#allocation2 + $0xb68] sm:$0xf0]  ;;  %v8380_v24 = vor.u32 %v7110_v55, %v5943_v54 }
 0x111   : > { %10444 = vst [vmem:[#allocation240_spill] sm:$0xff] %v8358_v22  ;;  %2092 = vmatpush.bf16.msrb.mxu1 %v8356_v4  ;;  %v7142_v53 = vld [vmem:[#allocation2 + $0xbe4] sm:$0xf]  ;;  %v6071_v42 = vld [vmem:[#allocation2 + $0xbe8] sm:$0xf0]  ;;  %v8382_v10 = vor.u32 %v7126_v26, %v6007_v19 }
 0x112   : > { %10445 = vst [vmem:[#allocation241_spill] sm:$0xff] %v8361_v47  ;;  %2396 = vmatpush.bf16.msrb.mxu2 %v8358_v22  ;;  %2409 = vmatpush.bf16.msrb.mxu3 %v8361_v47  ;;  %v6061_v2 = vld [vmem:[#allocation2 + $0xbd0] sm:$0xf]  ;;  %v7141_v18 = vld [vmem:[#allocation2 + $0xbd4] sm:$0xf0]  ;;  %v8386_v52 = vor.u32 %v7142_v53, %v6071_v42 }
 0x113   : > { %10446 = vst [vmem:[#allocation242_spill] sm:$0xff] %v8363_v1  ;;  %v7108_v11 = vld [vmem:[#allocation2 + $0xad4] sm:$0xf]  ;;  %2080 = vmatmul.bf16.vlgmr.msrb.gmra.mxu0 %v8266_v31  ;;  %v5935_v30 = vld [vmem:[#allocation2 + $0xad8] sm:$0xf0]  ;;  %v8391_v55 = vor.u32 %v7141_v18, %v6061_v2 }
 0x114   : > { %10447 = vst [vmem:[#allocation243_spill] sm:$0xff] %v8365_v59  ;;  %2415 = vmatpush.bf16.msra.mxu0 %v8363_v1  ;;  %v7124_v13 = vld [vmem:[#allocation2 + $0xb54] sm:$0xf]  ;;  %v5999_v20 = vld [vmem:[#allocation2 + $0xb58] sm:$0xf0]  ;;  %2093 = vmatmul.bf16.vlgmr.msrb.gmra.mxu1 %v8260_v32  ;;  %v8396_v54 = vor.u32 %v7108_v11, %v5935_v30  ;;  %v1310_v11 = vpop.f32.mrf.mxu0 }
 0x115   : > { %10448 = vst [vmem:[#allocation244_spill] sm:$0xff] %v8367_v49  ;;  %2428 = vmatpush.bf16.msra.mxu1 %v8365_v59  ;;  %v7140_v59 = vld [vmem:[#allocation2 + $0xbd4] sm:$0xf]  ;;  %2397 = vmatmul.bf16.vlgmr.msrb.gmra.mxu2 %v8264_v0  ;;  %v8398_v26 = vor.u32 %v7124_v13, %v5999_v20  ;;  %v6053_v19 = vld [vmem:[#allocation2 + $0xbc0] sm:$0xf] }
 0x116   : > { %10449 = vst [vmem:[#allocation245_spill] sm:$0xff] %v8370_v61  ;;  %2441 = vmatpush.bf16.msra.mxu2 %v8367_v49  ;;  %2454 = vmatpush.bf16.msra.mxu3 %v8370_v61  ;;  %v6063_v49 = vld [vmem:[#allocation2 + $0xbd8] sm:$0xf0]  ;;  %v7139_v53 = vld [vmem:[#allocation2 + $0xbc4] sm:$0xf0] }
 0x117   : > { %10450 = vst [vmem:[#allocation246_spill] sm:$0xff] %v8376_v40  ;;  %2410 = vmatmul.bf16.vlgmr.msrb.gmra.mxu3 %v8266_v31  ;;  %v7106_v42 = vld [vmem:[#allocation2 + $0xac4] sm:$0xf]  ;;  %v8401_v61 = vor.u32 %v7140_v59, %v6063_v49  ;;  %v5991_v18 = vld [vmem:[#allocation2 + $0xb48] sm:$0xf0] }
 0x118   : > { %10451 = vst [vmem:[#allocation247_spill] sm:$0xff] %v8380_v24  ;;  %2416 = vmatpush.bf16.msra.mxu0 %v8376_v40  ;;  %v5927_v40 = vld [vmem:[#allocation2 + $0xac8] sm:$0xf0]  ;;  %v7122_v2 = vld [vmem:[#allocation2 + $0xb44] sm:$0xf] }
 0x119   : > { %10452 = vst [vmem:[#allocation248_spill] sm:$0xff] %v8382_v10  ;;  %2429 = vmatpush.bf16.msra.mxu1 %v8380_v24  ;;  %v7138_v1 = vld [vmem:[#allocation2 + $0xbc4] sm:$0xf]  ;;  %v6055_v47 = vld [vmem:[#allocation2 + $0xbc8] sm:$0xf0]  ;;  %v8404_v24 = vor.u32 %v7139_v53, %v6053_v19  ;;  %v8408_v30 = vor.u32 %v7106_v42, %v5927_v40  ;;  %v8410_v13 = vor.u32 %v7122_v2, %v5991_v18 }
 0x11a   : > { %10453 = vst [vmem:[#allocation249_spill] sm:$0xff] %v8386_v52  ;;  %2442 = vmatpush.bf16.msra.mxu2 %v8382_v10  ;;  %2455 = vmatpush.bf16.msra.mxu3 %v8386_v52  ;;  %v6045_v59 = vld [vmem:[#allocation2 + $0xbb0] sm:$0xf]  ;;  %v7137_v49 = vld [vmem:[#allocation2 + $0xbb4] sm:$0xf0]  ;;  %v1323_v52 = vpop.f32.mrf.mxu1  ;;  %v8413_v10 = vor.u32 %v7138_v1, %v6055_v47 }
 0x11b   : > { %10454 = vst [vmem:[#allocation250_spill] sm:$0xff] %v8391_v55  ;;  %v7104_v20 = vld [vmem:[#allocation2 + $0xab4] sm:$0xf]  ;;  %v5983_v53 = vld [vmem:[#allocation2 + $0xb38] sm:$0xf0]  ;;  %v1324_v22 = vadd.f32 %v1323_v52, %v1310_v11  ;;  %v8416_v40 = vor.u32 %v7137_v49, %v6045_v59  ;;  %v8427_v49 = vpop.f32.mrf.mxu3 }
 0x11c   : > { %10455 = vst [vmem:[#allocation251_spill] sm:$0xff] %v8396_v54  ;;  %2417 = vmatpush.bf16.msra.mxu0 %v8391_v55  ;;  %v5919_v55 = vld [vmem:[#allocation2 + $0xab8] sm:$0xf0]  ;;  %v7120_v19 = vld [vmem:[#allocation2 + $0xb34] sm:$0xf] }
 0x11d   : > { %10456 = vst [vmem:[#allocation252_spill] sm:$0xff] %v8398_v26  ;;  %2430 = vmatpush.bf16.msra.mxu1 %v8396_v54  ;;  %v7136_v4 = vld [vmem:[#allocation2 + $0xbb4] sm:$0xf]  ;;  %v6047_v54 = vld [vmem:[#allocation2 + $0xbb8] sm:$0xf0]  ;;  %v8420_v42 = vor.u32 %v7104_v20, %v5919_v55  ;;  %v8422_v2 = vor.u32 %v7120_v19, %v5983_v53  ;;  %v1312_v20 = vpop.f32.mrf.mxu0 }
 0x11e   : > { %10457 = vst [vmem:[#allocation253_spill] sm:$0xff] %v8401_v61  ;;  %2443 = vmatpush.bf16.msra.mxu2 %v8398_v26  ;;  %2456 = vmatpush.bf16.msra.mxu3 %v8401_v61  ;;  %v6037_v1 = vld [vmem:[#allocation2 + $0xba0] sm:$0xf]  ;;  %v7135_v47 = vld [vmem:[#allocation2 + $0xba4] sm:$0xf0]  ;;  %v1336_v61 = vpop.f32.mrf.mxu2  ;;  %v8425_v52 = vor.u32 %v7136_v4, %v6047_v54 }
 0x11f   : > { %10458 = vst [vmem:[#allocation254_spill] sm:$0xff] %v8404_v24  ;;  %v7102_v18 = vld [vmem:[#allocation2 + $0xaa4] sm:$0xf]  ;;  %v5911_v11 = vld [vmem:[#allocation2 + $0xaa8] sm:$0xf0]  ;;  %v8430_v55 = vor.u32 %v7135_v47, %v6037_v1  ;;  %v8432_v19 = vadd.f32 %v1336_v61, %v1324_v22 }
 0x120   : > { %10459 = vst [vmem:[#allocation255_spill] sm:$0xff] %v8408_v30  ;;  %2418 = vmatpush.bf16.msra.mxu0 %v8404_v24  ;;  %v7118_v24 = vld [vmem:[#allocation2 + $0xb24] sm:$0xf]  ;;  %v5975_v59 = vld [vmem:[#allocation2 + $0xb28] sm:$0xf0]  ;;  %v8436_v4 = vor.u32 %v7102_v18, %v5911_v11 }
 0x121   : > { %10460 = vst [vmem:[#allocation256_spill] sm:$0xff] %v8410_v13  ;;  %2431 = vmatpush.bf16.msra.mxu1 %v8408_v30  ;;  %v7134_v30 = vld [vmem:[#allocation2 + $0xba4] sm:$0xf]  ;;  %v6039_v26 = vld [vmem:[#allocation2 + $0xba8] sm:$0xf0]  ;;  %v8438_v54 = vor.u32 %v7118_v24, %v5975_v59 }
 0x122   : > { %10461 = vst [vmem:[#allocation257_spill] sm:$0xff] %v8413_v10  ;;  %2444 = vmatpush.bf16.msra.mxu2 %v8410_v13  ;;  %2457 = vmatpush.bf16.msra.mxu3 %v8413_v10  ;;  %v6029_v53 = vld [vmem:[#allocation2 + $0xb90] sm:$0xf]  ;;  %v7133_v10 = vld [vmem:[#allocation2 + $0xb94] sm:$0xf0]  ;;  %v1325_v41 = vpop.f32.mrf.mxu1 }
 0x123   : > { %10462 = vst [vmem:[#allocation258_spill] sm:$0xff] %v8416_v40  ;;  %v7100_v13 = vld [vmem:[#allocation2 + $0xa94] sm:$0xf]  ;;  %v5903_v1 = vld [vmem:[#allocation2 + $0xa98] sm:$0xf0]  ;;  %v1351_v37 = vpop.f32.mrf.mxu3 }
 0x124   : > { %10463 = vst [vmem:[#allocation259_spill] sm:$0xff] %v8420_v42  ;;  %2419 = vmatpush.bf16.msra.mxu0 %v8416_v40  ;;  %v8441_v40 = vor.u32 %v7134_v30, %v6039_v26  ;;  %v7116_v47 = vld [vmem:[#allocation2 + $0xb14] sm:$0xf]  ;;  %v5967_v22 = vld [vmem:[#allocation2 + $0xb18] sm:$0xf0]  ;;  %v8448_v41 = vor.u32 %v7100_v13, %v5903_v1 }
 0x125   : > { %10464 = vst [vmem:[#allocation260_spill] sm:$0xff] %v8422_v2  ;;  %2432 = vmatpush.bf16.msra.mxu1 %v8420_v42  ;;  %v7132_v61 = vld [vmem:[#allocation2 + $0xb94] sm:$0xf]  ;;  %v6031_v20 = vld [vmem:[#allocation2 + $0xb98] sm:$0xf0]  ;;  %v8450_v11 = vor.u32 %v7116_v47, %v5967_v22 }
 0x126   : > { %10465 = vst [vmem:[#allocation261_spill] sm:$0xff] %v8425_v52  ;;  %2445 = vmatpush.bf16.msra.mxu2 %v8422_v2  ;;  %2458 = vmatpush.bf16.msra.mxu3 %v8425_v52  ;;  %v8444_v2 = vor.u32 %v7133_v10, %v6029_v53  ;;  %v6021_v18 = vld [vmem:[#allocation2 + $0xb80] sm:$0xf]  ;;  %v7131_v24 = vld [vmem:[#allocation2 + $0xb84] sm:$0xf0]  ;;  %v1338_v52 = vpop.f32.mrf.mxu2  ;;  %v8453_v42 = vor.u32 %v7132_v61, %v6031_v20 }
 0x127   : > { %10466 = vst [vmem:[#allocation262_spill] sm:$0xff] %v8430_v55  ;;  %v7098_v26 = vld [vmem:[#allocation2 + $0xa84] sm:$0xf]  ;;  %v5895_v30 = vld [vmem:[#allocation2 + $0xa88] sm:$0xf0]  ;;  %v8456_v13 = vor.u32 %v7131_v24, %v6021_v18 }
 0x128   : > { %10467 = vst [vmem:[#allocation263_spill] sm:$0xff] %v8436_v4  ;;  %2420 = vmatpush.bf16.msra.mxu0 %v8430_v55  ;;  %v7114_v59 = vld [vmem:[#allocation2 + $0xb04] sm:$0xf]  ;;  %v5959_v10 = vld [vmem:[#allocation2 + $0xb08] sm:$0xf0]  ;;  %v8460_v52 = vor.u32 %v7098_v26, %v5895_v30 }
 0x129   : > { %10468 = vst [vmem:[#allocation264_spill] sm:$0xff] %v8438_v54  ;;  %2433 = vmatpush.bf16.msra.mxu1 %v8436_v4  ;;  %v7130_v53 = vld [vmem:[#allocation2 + $0xb84] sm:$0xf]  ;;  %v6023_v55 = vld [vmem:[#allocation2 + $0xb88] sm:$0xf0]  ;;  %v8462_v61 = vor.u32 %v7114_v59, %v5959_v10 }
 0x12a   : > { %10469 = vst [vmem:[#allocation265_spill] sm:$0xff] %v8441_v40  ;;  %2446 = vmatpush.bf16.msra.mxu2 %v8438_v54  ;;  %2459 = vmatpush.bf16.msra.mxu3 %v8441_v40  ;;  %v6143_v48 = vld [vmem:[#allocation2 + $0x4f0] sm:$0xf]  ;;  %v7161_v4 = vld [vmem:[#allocation2 + $0x4f4] sm:$0xf0]  ;;  %v8465_v40 = vor.u32 %v7130_v53, %v6023_v55 }
 0x12b   : > { %10470 = vst [vmem:[#allocation266_spill] sm:$0xff] %v8444_v2  ;;  %v6207_v39 = vld [vmem:[#allocation2 + $0x570] sm:$0xf]  ;;  %v7177_v1 = vld [vmem:[#allocation2 + $0x574] sm:$0xf0] }
 0x12c   : > { %10471 = vst [vmem:[#allocation267_spill] sm:$0xff] %v8448_v41  ;;  %2421 = vmatpush.bf16.msra.mxu0 %v8444_v2  ;;  %v6271_v47 = vld [vmem:[#allocation2 + $0x5f0] sm:$0xf]  ;;  %v7193_v22 = vld [vmem:[#allocation2 + $0x5f4] sm:$0xf0]  ;;  %v8467_v2 = vor.u32 %v7161_v4, %v6143_v48  ;;  %v8469_v18 = vor.u32 %v7177_v1, %v6207_v39 }
 0x12d   : > { %10472 = vst [vmem:[#allocation268_spill] sm:$0xff] %v8450_v11  ;;  %2434 = vmatpush.bf16.msra.mxu1 %v8448_v41  ;;  %v7160_v20 = vld [vmem:[#allocation2 + $0x4f4] sm:$0xf]  ;;  %v6145_v37 = vld [vmem:[#allocation2 + $0x4f8] sm:$0xf0]  ;;  %v8471_v24 = vor.u32 %v7193_v22, %v6271_v47 }
 0x12e   : > { %10473 = vst [vmem:[#allocation269_spill] sm:$0xff] %v8453_v42  ;;  %2447 = vmatpush.bf16.msra.mxu2 %v8450_v11  ;;  %2460 = vmatpush.bf16.msra.mxu3 %v8453_v42  ;;  %v6135_v54 = vld [vmem:[#allocation2 + $0x4e0] sm:$0xf]  ;;  %v7159_v41 = vld [vmem:[#allocation2 + $0x4e4] sm:$0xf0]  ;;  %v8474_v26 = vor.u32 %v7160_v20, %v6145_v37 }
 0x12f   : > { %10474 = vst [vmem:[#allocation270_spill] sm:$0xff] %v8456_v13  ;;  %v6199_v60 = vld [vmem:[#allocation2 + $0x560] sm:$0xf]  ;;  %v7175_v30 = vld [vmem:[#allocation2 + $0x564] sm:$0xf0]  ;;  %v8480_v39 = vor.u32 %v7159_v41, %v6135_v54 }
 0x130   : > { %10475 = vst [vmem:[#allocation271_spill] sm:$0xff] %v8460_v52  ;;  %2422 = vmatpush.bf16.msra.mxu0 %v8456_v13  ;;  %v6263_v59 = vld [vmem:[#allocation2 + $0x5e0] sm:$0xf]  ;;  %v7191_v10 = vld [vmem:[#allocation2 + $0x5e4] sm:$0xf0]  ;;  %v8484_v4 = vor.u32 %v7175_v30, %v6199_v60 }
 0x131   : > { %10476 = vst [vmem:[#allocation272_spill] sm:$0xff] %v8462_v61  ;;  %2435 = vmatpush.bf16.msra.mxu1 %v8460_v52  ;;  %v7158_v48 = vld [vmem:[#allocation2 + $0x4e4] sm:$0xf]  ;;  %v6137_v55 = vld [vmem:[#allocation2 + $0x4e8] sm:$0xf0]  ;;  %v8486_v53 = vor.u32 %v7191_v10, %v6263_v59 }
 0x132   : > { %10477 = vst [vmem:[#allocation273_spill] sm:$0xff] %v8465_v40  ;;  %2448 = vmatpush.bf16.msra.mxu2 %v8462_v61  ;;  %2461 = vmatpush.bf16.msra.mxu3 %v8465_v40  ;;  %v6127_v1 = vld [vmem:[#allocation2 + $0x4d0] sm:$0xf]  ;;  %v7157_v47 = vld [vmem:[#allocation2 + $0x4d4] sm:$0xf0]  ;;  %v8490_v20 = vor.u32 %v7158_v48, %v6137_v55  ;;  %v1375_v61 = vpop.f32.mrf.mxu1 }
 0x133   : > { %10478 = vst [vmem:[#allocation274_spill] sm:$0xff] %v8467_v2  ;;  %v6191_v22 = vld [vmem:[#allocation2 + $0x550] sm:$0xf]  ;;  %2423 = vmatmul.bf16.vlgmr.msra.gmra.mxu0 %v8260_v32  ;;  %v7173_v37 = vld [vmem:[#allocation2 + $0x554] sm:$0xf0]  ;;  %v8496_v59 = vor.u32 %v7157_v47, %v6127_v1 }
 0x134   : > { %10479 = vst [vmem:[#allocation275_spill] sm:$0xff] %v8469_v18  ;;  %2792 = vmatpush.bf16.msrb.mxu0 %v8467_v2  ;;  %v6255_v54 = vld [vmem:[#allocation2 + $0x5d0] sm:$0xf]  ;;  %v7189_v41 = vld [vmem:[#allocation2 + $0x5d4] sm:$0xf0]  ;;  %2436 = vmatmul.bf16.vlgmr.msra.gmra.mxu1 %v8264_v0  ;;  %v8500_v10 = vor.u32 %v7173_v37, %v6191_v22 }
 0x135   : > { %10480 = vst [vmem:[#allocation276_spill] sm:$0xff] %v8471_v24  ;;  %2805 = vmatpush.bf16.msrb.mxu1 %v8469_v18  ;;  %2449 = vmatmul.bf16.vlgmr.msra.gmra.mxu2 %v8266_v31  ;;  %v7156_v60 = vld [vmem:[#allocation2 + $0x4d4] sm:$0xf]  ;;  %v6129_v30 = vld [vmem:[#allocation2 + $0x4d8] sm:$0xf0]  ;;  %v8502_v48 = vor.u32 %v7189_v41, %v6255_v54  ;;  %v1362_v54 = vpop.f32.mrf.mxu0 }
 0x136   : > { %10481 = vst [vmem:[#allocation277_spill] sm:$0xff] %v8474_v26  ;;  %2818 = vmatpush.bf16.msrb.mxu2 %v8471_v24  ;;  %2831 = vmatpush.bf16.msrb.mxu3 %v8474_v26  ;;  %v6119_v55 = vld [vmem:[#allocation2 + $0x4c0] sm:$0xf]  ;;  %v7155_v26 = vld [vmem:[#allocation2 + $0x4c4] sm:$0xf0]  ;;  %v8505_v18 = vor.u32 %v7156_v60, %v6129_v30 }
 0x137   : > { %10482 = vst [vmem:[#allocation278_spill] sm:$0xff] %v8480_v39  ;;  %2462 = vmatmul.bf16.vlgmr.msra.gmra.mxu3 %v8260_v32  ;;  %v6183_v24 = vld [vmem:[#allocation2 + $0x540] sm:$0xf]  ;;  %v7187_v40 = vld [vmem:[#allocation2 + $0x5c4] sm:$0xf0] }
 0x138   : > { %10483 = vst [vmem:[#allocation279_spill] sm:$0xff] %v8484_v4  ;;  %2793 = vmatpush.bf16.msrb.mxu0 %v8480_v39  ;;  %v7171_v39 = vld [vmem:[#allocation2 + $0x544] sm:$0xf0]  ;;  %v6247_v2 = vld [vmem:[#allocation2 + $0x5c0] sm:$0xf] }
 0x139   : > { %10484 = vst [vmem:[#allocation280_spill] sm:$0xff] %v8486_v53  ;;  %2806 = vmatpush.bf16.msrb.mxu1 %v8484_v4  ;;  %v7154_v1 = vld [vmem:[#allocation2 + $0x4c4] sm:$0xf]  ;;  %v6121_v47 = vld [vmem:[#allocation2 + $0x4c8] sm:$0xf0]  ;;  %v8512_v41 = vor.u32 %v7171_v39, %v6183_v24  ;;  %v8514_v60 = vor.u32 %v7187_v40, %v6247_v2  ;;  %v1363_v4 = vadd.f32 %v1362_v54, %v8427_v49 }
 0x13a   : > { %10485 = vst [vmem:[#allocation281_spill] sm:$0xff] %v8490_v20  ;;  %2819 = vmatpush.bf16.msrb.mxu2 %v8486_v53  ;;  %2832 = vmatpush.bf16.msrb.mxu3 %v8490_v20  ;;  %v8508_v53 = vor.u32 %v7155_v26, %v6119_v55  ;;  %v6111_v22 = vld [vmem:[#allocation2 + $0x4b0] sm:$0xf]  ;;  %v7153_v37 = vld [vmem:[#allocation2 + $0x4b4] sm:$0xf0]  ;;  %v8519_v26 = vor.u32 %v7154_v1, %v6121_v47  ;;  %v1628_v1 = vpop.f32.mrf.mxu2 }
 0x13b   : > { %10486 = vst [vmem:[#allocation282_spill] sm:$0xff] %v8496_v59  ;;  %v6175_v30 = vld [vmem:[#allocation2 + $0x530] sm:$0xf]  ;;  %v7169_v20 = vld [vmem:[#allocation2 + $0x534] sm:$0xf0]  ;;  %v8525_v40 = vor.u32 %v7153_v37, %v6111_v22  ;;  %v1641_v37 = vpop.f32.mrf.mxu3 }
 0x13c   : > { %10487 = vst [vmem:[#allocation283_spill] sm:$0xff] %v8500_v10  ;;  %2794 = vmatpush.bf16.msrb.mxu0 %v8496_v59  ;;  %v6084_v59 = vld [vmem:[%s7611_s30 + $0x14] sm:$0x7]  ;;  %v6239_v55 = vld [vmem:[#allocation2 + $0x5b0] sm:$0xf]  ;;  %v8529_v49 = vor.u32 %v7169_v20, %v6175_v30 }
 0x13d   : > { %10488 = vst [vmem:[#allocation284_spill] sm:$0xff] %v8502_v48  ;;  %2807 = vmatpush.bf16.msrb.mxu1 %v8500_v10  ;;  %v7185_v52 = vld [vmem:[#allocation2 + $0x5b4] sm:$0xf0]  ;;  %v6083_v13 = vld [vmem:[%s7611_s30 + $0xc] sm:$0x77]  ;;  %v2524_v24 = vunpack.c.l.b16 %v6084_v59  ;;  %v1629_v59 = vadd.f32 %v1628_v1, %v8432_v19 }
 0x13e   : > { %10489 = vst [vmem:[#allocation285_spill] sm:$0xff] %v8505_v18  ;;  %2820 = vmatpush.bf16.msrb.mxu2 %v8502_v48  ;;  %2833 = vmatpush.bf16.msrb.mxu3 %v8505_v18  ;;  %v7152_v10 = vld [vmem:[#allocation2 + $0x4b4] sm:$0xf]  ;;  %v6113_v42 = vld [vmem:[#allocation2 + $0x4b8] sm:$0xf0]  ;;  %v8522_v48 = vadd.f32 %v1375_v61, %v1363_v4  ;;  %v8531_v39 = vor.u32 %v7185_v52, %v6239_v55  ;;  %v2522_v61 = vunpack.c.l.b16 %v6083_v13  ;;  %v2523_v4 = vunpack.c.h.b16 %v6083_v13 }
 0x13f   : > { %10490 = vst [vmem:[#allocation286_spill] sm:$0xff] %v8508_v53  ;;  %v6103_v2 = vld [vmem:[#allocation2 + $0x4a0] sm:$0xf]  ;;  %v7151_v47 = vld [vmem:[#allocation2 + $0x4a4] sm:$0xf0]  ;;  %v8534_v22 = vor.u32 %v7152_v10, %v6113_v42  ;;  %v8538_v52 = vadd.f32 %v1641_v37, %v1629_v59  ;;  %v1364_v42 = vpop.f32.mrf.mxu0  ;;  %v1377_v59 = vpop.f32.mrf.mxu1 }
 0x140   : > { %10491 = vst [vmem:[#allocation287_spill] sm:$0xff] %v8512_v41  ;;  %2795 = vmatpush.bf16.msrb.mxu0 %v8508_v53  ;;  %v6167_v54 = vld [vmem:[#allocation2 + $0x520] sm:$0xf]  ;;  %v7167_v18 = vld [vmem:[#allocation2 + $0x524] sm:$0xf0]  ;;  %v8540_v30 = vor.u32 %v7151_v47, %v6103_v2  ;;  %v8550_v37 = vpack.c.b16 %v2522_v61, %v2522_v61  ;;  %v8552_v2 = vpack.c.b16 %v2523_v4, %v2523_v4 }
 0x141   : > { %10492 = vst [vmem:[#allocation288_spill] sm:$0xff] %v8514_v60  ;;  %2808 = vmatpush.bf16.msrb.mxu1 %v8512_v41  ;;  %v6231_v41 = vld [vmem:[#allocation2 + $0x5a0] sm:$0xf]  ;;  %v7183_v53 = vld [vmem:[#allocation2 + $0x5a4] sm:$0xf0]  ;;  %v8542_v55 = vor.u32 %v7167_v18, %v6167_v54 }
 0x142   : > { %10493 = vst [vmem:[#allocation289_spill] sm:$0xff] %v8519_v26  ;;  %2821 = vmatpush.bf16.msrb.mxu2 %v8514_v60  ;;  %2834 = vmatpush.bf16.msrb.mxu3 %v8519_v26  ;;  %v7150_v60 = vld [vmem:[#allocation2 + $0x4a4] sm:$0xf]  ;;  %v6105_v20 = vld [vmem:[#allocation2 + $0x4a8] sm:$0xf0]  ;;  %v8544_v26 = vpack.c.b16 %v2524_v24, %v2524_v24  ;;  %v8548_v19 = vor.u32 %v7183_v53, %v6231_v41  ;;  %v2531_v15 = vshll.u32 %v8550_v37, 16 }
 0x143   : > { %10494 = vst [vmem:[#allocation290_spill] sm:$0xff] %v8525_v40  ;;  %v6095_v13 = vld [vmem:[#allocation2 + $0x490] sm:$0xf]  ;;  %v7149_v11 = vld [vmem:[#allocation2 + $0x494] sm:$0xf0]  ;;  %v8555_v18 = vor.u32 %v7150_v60, %v6105_v20  ;;  %v1643_v32 = vpop.f32.mrf.mxu3 }
 0x144   : > { %10495 = vst [vmem:[#allocation291_spill] sm:$0xff] %v8529_v49  ;;  %2796 = vmatpush.bf16.msrb.mxu0 %v8525_v40  ;;  %v6159_v10 = vld [vmem:[#allocation2 + $0x510] sm:$0xf]  ;;  %v7165_v1 = vld [vmem:[#allocation2 + $0x514] sm:$0xf0]  ;;  %v8558_v53 = vor.u32 %v7149_v11, %v6095_v13  ;;  %v2545_v61 = vshll.u32 %v8544_v26, 16  ;;  %v1630_v11 = vpop.f32.mrf.mxu2 }
 0x145   : > { %10496 = vst [vmem:[#allocation292_spill] sm:$0xff] %v8531_v39  ;;  %2809 = vmatpush.bf16.msrb.mxu1 %v8529_v49  ;;  %v6223_v40 = vld [vmem:[#allocation2 + $0x590] sm:$0xf]  ;;  %v7181_v24 = vld [vmem:[#allocation2 + $0x594] sm:$0xf0]  ;;  %v8563_v60 = vor.u32 %v7165_v1, %v6159_v10 }
 0x146   : > { %10497 = vst [vmem:[#allocation293_spill] sm:$0xff] %v8534_v22  ;;  %2822 = vmatpush.bf16.msrb.mxu2 %v8531_v39  ;;  %2835 = vmatpush.bf16.msrb.mxu3 %v8534_v22  ;;  %v7148_v47 = vld [vmem:[#allocation2 + $0x494] sm:$0xf]  ;;  %v6097_v54 = vld [vmem:[#allocation2 + $0x498] sm:$0xf0]  ;;  %v8565_v4 = vor.u32 %v7181_v24, %v6223_v40 }
 0x147   : > { %10498 = vst [vmem:[#allocation294_spill] sm:$0xff] %v8540_v30  ;;  %v6087_v42 = vld [vmem:[#allocation2 + $0x480] sm:$0xf]  ;;  %v7147_v49 = vld [vmem:[#allocation2 + $0x484] sm:$0xf0]  ;;  %v8570_v13 = vor.u32 %v7148_v47, %v6097_v54  ;;  %v2543_v47 = vshrl.u32 %v8544_v26, 16 }
 0x148   : > { %10499 = vst [vmem:[#allocation295_spill] sm:$0xff] %v8542_v55  ;;  %v6151_v39 = vld [vmem:[#allocation2 + $0x500] sm:$0xf]  ;;  %2797 = vmatpush.bf16.msrb.mxu0 %v8540_v30  ;;  %v7163_v41 = vld [vmem:[#allocation2 + $0x504] sm:$0xf0]  ;;  %v2538_v30 = vshll.u32 %v8552_v2, 16 }
 0x149   : > { %10500 = vst [vmem:[#allocation296_spill] sm:$0xff] %v8548_v19  ;;  %v6215_v59 = vld [vmem:[#allocation2 + $0x580] sm:$0xf]  ;;  %2810 = vmatpush.bf16.msrb.mxu1 %v8542_v55  ;;  %v7179_v20 = vld [vmem:[#allocation2 + $0x584] sm:$0xf0]  ;;  %v8575_v24 = vor.u32 %v7163_v41, %v6151_v39  ;;  %v2547_v54 = vrot.slane %v2545_v61, 1 }
 0x14a   : > { %10501 = vst [vmem:[#allocation297_spill] sm:$0xff] %v8555_v18  ;;  %2823 = vmatpush.bf16.msrb.mxu2 %v8548_v19  ;;  %v7146_v22 = vld [vmem:[#allocation2 + $0x484] sm:$0xf]  ;;  %2836 = vmatpush.bf16.msrb.mxu3 %v8555_v18  ;;  %v6089_v31 = vld [vmem:[#allocation2 + $0x488] sm:$0xf0]  ;;  %v8572_v19 = vor.u32 %v7147_v49, %v6087_v42  ;;  %v8577_v51 = vor.u32 %v7179_v20, %v6215_v59  ;;  %v2529_v49 = vshrl.u32 %v8550_v37, 16 }
 0x14b   : > { %10502 = vst [vmem:[#allocation298_spill] sm:$0xff] %v8558_v53  ;;  %v7176_v0 = vld [vmem:[#allocation2 + $0x574] sm:$0xf]  ;;  %v6209_v55 = vld [vmem:[#allocation2 + $0x578] sm:$0xf0]  ;;  %v2533_v42 = vrot.slane %v2531_v15, 1  ;;  %v8585_v39 = vor.u32 %v7146_v22, %v6089_v31  ;;  %v8596_v15 = vor.u32 %v2547_v54, %v2543_v47 }
 0x14c   : > { %10503 = vst [vmem:[#allocation299_spill] sm:$0xff] %v8563_v60  ;;  %v7192_v10 = vld [vmem:[#allocation2 + $0x5f4] sm:$0xf]  ;;  %v6273_v40 = vld [vmem:[#allocation2 + $0x5f8] sm:$0xf0]  ;;  %2798 = vmatpush.bf16.msrb.mxu0 %v8558_v53  ;;  %v2536_v18 = vshrl.u32 %v8552_v2, 16  ;;  %v8587_v41 = vor.u32 %v7176_v0, %v6209_v55 }
 0x14d   : > { %10504 = vst [vmem:[#allocation300_spill] sm:$0xff] %v8565_v4  ;;  %v6335_v1 = vld [vmem:[#allocation2 + $0xc70] sm:$0xf]  ;;  %v7209_v11 = vld [vmem:[#allocation2 + $0xc74] sm:$0xf0]  ;;  %2811 = vmatpush.bf16.msrb.mxu1 %v8563_v60  ;;  %v2540_v53 = vrot.slane %v2538_v30, 1  ;;  %v8589_v59 = vor.u32 %v7192_v10, %v6273_v40  ;;  %v8600_v22 = vor.u32 %v2533_v42, %v2529_v49 }
 0x14e   : > { %10505 = vst [vmem:[#allocation301_spill] sm:$0xff] %v8570_v13  ;;  %v6399_v43 = vld [vmem:[#allocation2 + $0xcf0] sm:$0xf]  ;;  %2824 = vmatpush.bf16.msrb.mxu2 %v8565_v4  ;;  %v7225_v32 = vld [vmem:[#allocation2 + $0xcf4] sm:$0xf0]  ;;  %2837 = vmatpush.bf16.msrb.mxu3 %v8570_v13  ;;  %v8591_v26 = vor.u32 %v7209_v11, %v6335_v1 }
 0x14f   : > { %10506 = vst [vmem:[#allocation302_spill] sm:$0xff] %v8572_v19  ;;  %v7174_v61 = vld [vmem:[#allocation2 + $0x564] sm:$0xf]  ;;  %v6201_v20 = vld [vmem:[#allocation2 + $0x568] sm:$0xf0]  ;;  %v8594_v37 = vor.u32 %v7225_v32, %v6399_v43  ;;  %v8602_v55 = vor.u32 %v2540_v53, %v2536_v18 }
 0x150   : > { %10507 = vst [vmem:[#allocation303_spill] sm:$0xff] %v8575_v24  ;;  %v7190_v4 = vld [vmem:[#allocation2 + $0x5e4] sm:$0xf]  ;;  %2799 = vmatpush.bf16.msrb.mxu0 %v8572_v19  ;;  %v6265_v30 = vld [vmem:[#allocation2 + $0x5e8] sm:$0xf0]  ;;  %v8606_v43 = vor.u32 %v7174_v61, %v6201_v20 }
 0x151   : > { %10508 = vst [vmem:[#allocation304_spill] sm:$0xff] %v8577_v51  ;;  %v6327_v2 = vld [vmem:[#allocation2 + $0xc60] sm:$0xf]  ;;  %v7207_v13 = vld [vmem:[#allocation2 + $0xc64] sm:$0xf0]  ;;  %2812 = vmatpush.bf16.msrb.mxu1 %v8575_v24  ;;  %v8610_v10 = vor.u32 %v7190_v4, %v6265_v30 }
 0x152   : > { %10509 = vst [vmem:[#allocation305_spill] sm:$0xff] %v8585_v39  ;;  %2825 = vmatpush.bf16.msrb.mxu2 %v8577_v51  ;;  %v6391_v0 = vld [vmem:[#allocation2 + $0xce0] sm:$0xf]  ;;  %v7223_v31 = vld [vmem:[#allocation2 + $0xce4] sm:$0xf0]  ;;  %2838 = vmatpush.bf16.msrb.mxu3 %v8585_v39  ;;  %v8612_v40 = vor.u32 %v7207_v13, %v6327_v2 }
 0x153   : > { %10510 = vst [vmem:[#allocation306_spill] sm:$0xff] %v8587_v41  ;;  %v7172_v1 = vld [vmem:[#allocation2 + $0x554] sm:$0xf]  ;;  %v6193_v11 = vld [vmem:[#allocation2 + $0x558] sm:$0xf0]  ;;  %v8616_v18 = vor.u32 %v7223_v31, %v6391_v0  ;;  %2800 = vmatmul.bf16.vlgmr.msrb.gmra.mxu0 %v8600_v22 }
 0x154   : > { %10511 = vst [vmem:[#allocation307_spill] sm:$0xff] %v8589_v59  ;;  %2844 = vmatpush.bf16.msra.mxu0 %v8587_v41  ;;  %v7188_v47 = vld [vmem:[#allocation2 + $0x5d4] sm:$0xf]  ;;  %v6257_v53 = vld [vmem:[#allocation2 + $0x5d8] sm:$0xf0]  ;;  %2813 = vmatmul.bf16.vlgmr.msrb.gmra.mxu1 %v8602_v55  ;;  %v8621_v13 = vor.u32 %v7172_v1, %v6193_v11 }
 0x155   : > { %10512 = vst [vmem:[#allocation308_spill] sm:$0xff] %v8591_v26  ;;  %2857 = vmatpush.bf16.msra.mxu1 %v8589_v59  ;;  %2826 = vmatmul.bf16.vlgmr.msrb.gmra.mxu2 %v8596_v15  ;;  %v6319_v54 = vld [vmem:[#allocation2 + $0xc50] sm:$0xf]  ;;  %v7205_v32 = vld [vmem:[#allocation2 + $0xc54] sm:$0xf0]  ;;  %v8626_v42 = vor.u32 %v7188_v47, %v6257_v53  ;;  %v1667_v53 = vpop.f32.mrf.mxu1 }
 0x156   : > { %10513 = vst [vmem:[#allocation309_spill] sm:$0xff] %v8594_v37  ;;  %3161 = vmatpush.bf16.msra.mxu2 %v8591_v26  ;;  %3174 = vmatpush.bf16.msra.mxu3 %v8594_v37  ;;  %v6383_v4 = vld [vmem:[#allocation2 + $0xcd0] sm:$0xf]  ;;  %v7221_v49 = vld [vmem:[#allocation2 + $0xcd4] sm:$0xf0]  ;;  %v8628_v61 = vor.u32 %v7205_v32, %v6319_v54  ;;  %v1668_v32 = vadd.f32 %v1667_v53, %v8522_v48 }
 0x157   : > { %10514 = vst [vmem:[#allocation310_spill] sm:$0xff] %v8602_v55  ;;  %2839 = vmatmul.bf16.vlgmr.msrb.gmra.mxu3 %v8600_v22  ;;  %v7170_v20 = vld [vmem:[#allocation2 + $0x544] sm:$0xf]  ;;  %v6185_v30 = vld [vmem:[#allocation2 + $0x548] sm:$0xf0]  ;;  %v8631_v0 = vor.u32 %v7221_v49, %v6383_v4 }
 0x158   : > { %10515 = vst [vmem:[#allocation311_spill] sm:$0xff] %v8606_v43  ;;  %2845 = vmatpush.bf16.msra.mxu0 %v8606_v43  ;;  %v7186_v2 = vld [vmem:[#allocation2 + $0x5c4] sm:$0xf]  ;;  %v6249_v31 = vld [vmem:[#allocation2 + $0x5c8] sm:$0xf0]  ;;  %v1654_v43 = vpop.f32.mrf.mxu0  ;;  %v8637_v54 = vor.u32 %v7170_v20, %v6185_v30 }
 0x159   : > { %10516 = vst [vmem:[#allocation312_spill] sm:$0xff] %v8610_v10  ;;  %2858 = vmatpush.bf16.msra.mxu1 %v8610_v10  ;;  %v6311_v1 = vld [vmem:[#allocation2 + $0xc40] sm:$0xf]  ;;  %v7203_v11 = vld [vmem:[#allocation2 + $0xc44] sm:$0xf0]  ;;  %v8635_v47 = vadd.f32 %v1654_v43, %v8538_v52  ;;  %v8642_v4 = vor.u32 %v7186_v2, %v6249_v31 }
 0x15a   : > { %10517 = vst [vmem:[#allocation313_spill] sm:$0xff] %v8612_v40  ;;  %3162 = vmatpush.bf16.msra.mxu2 %v8612_v40  ;;  %3175 = vmatpush.bf16.msra.mxu3 %v8616_v18  ;;  %v6375_v37 = vld [vmem:[#allocation2 + $0xcc0] sm:$0xf]  ;;  %v7219_v26 = vld [vmem:[#allocation2 + $0xcc4] sm:$0xf0]  ;;  %v8644_v49 = vor.u32 %v7203_v11, %v6311_v1  ;;  %v1680_v11 = vpop.f32.mrf.mxu2 }
 0x15b   : > { %10518 = vst [vmem:[#allocation314_spill] sm:$0xff] %v8616_v18  ;;  %v7168_v18 = vld [vmem:[#allocation2 + $0x534] sm:$0xf]  ;;  %v6177_v40 = vld [vmem:[#allocation2 + $0x538] sm:$0xf0]  ;;  %v8647_v52 = vor.u32 %v7219_v26, %v6375_v37 }
 0x15c   : > { %10519 = vst [vmem:[#allocation315_spill] sm:$0xff] %v8621_v13  ;;  %2846 = vmatpush.bf16.msra.mxu0 %v8621_v13  ;;  %v7184_v10 = vld [vmem:[#allocation2 + $0x5b4] sm:$0xf]  ;;  %v6241_v43 = vld [vmem:[#allocation2 + $0x5b8] sm:$0xf0] }
 0x15d   : > { %10520 = vst [vmem:[#allocation316_spill] sm:$0xff] %v8626_v42  ;;  %2859 = vmatpush.bf16.msra.mxu1 %v8626_v42  ;;  %v6303_v20 = vld [vmem:[#allocation2 + $0xc30] sm:$0xf]  ;;  %v7201_v30 = vld [vmem:[#allocation2 + $0xc34] sm:$0xf0]  ;;  %v8654_v48 = vor.u32 %v7184_v10, %v6241_v43  ;;  %v1669_v43 = vpop.f32.mrf.mxu1 }
 0x15e   : > { %10521 = vst [vmem:[#allocation317_spill] sm:$0xff] %v8628_v61  ;;  %3163 = vmatpush.bf16.msra.mxu2 %v8628_v61  ;;  %3176 = vmatpush.bf16.msra.mxu3 %v8631_v0  ;;  %v6367_v13 = vld [vmem:[#allocation2 + $0xcb0] sm:$0xf]  ;;  %v7217_v42 = vld [vmem:[#allocation2 + $0xcb4] sm:$0xf0]  ;;  %v8650_v61 = vor.u32 %v7168_v18, %v6177_v40  ;;  %v8656_v2 = vor.u32 %v7201_v30, %v6303_v20 }
 0x15f   : > { %10522 = vst [vmem:[#allocation318_spill] sm:$0xff] %v8631_v0  ;;  %v7166_v31 = vld [vmem:[#allocation2 + $0x524] sm:$0xf]  ;;  %v6169_v26 = vld [vmem:[#allocation2 + $0x528] sm:$0xf0]  ;;  %v8659_v1 = vor.u32 %v7217_v42, %v6367_v13  ;;  %v1681_v18 = vadd.f32 %v1680_v11, %v1668_v32  ;;  %v1693_v0 = vpop.f32.mrf.mxu3 }
 0x160   : > { %10523 = vst [vmem:[#allocation319_spill] sm:$0xff] %v8637_v54  ;;  %2847 = vmatpush.bf16.msra.mxu0 %v8637_v54  ;;  %v7182_v37 = vld [vmem:[#allocation2 + $0x5a4] sm:$0xf]  ;;  %v6233_v53 = vld [vmem:[#allocation2 + $0x5a8] sm:$0xf0]  ;;  %v8662_v10 = vor.u32 %v7166_v31, %v6169_v26 }
 0x161   : > { %10524 = vst [vmem:[#allocation320_spill] sm:$0xff] %v8642_v4  ;;  %2860 = vmatpush.bf16.msra.mxu1 %v8642_v4  ;;  %v6295_v54 = vld [vmem:[#allocation2 + $0xc20] sm:$0xf]  ;;  %v7199_v40 = vld [vmem:[#allocation2 + $0xc24] sm:$0xf0]  ;;  %v8666_v13 = vadd.f32 %v1693_v0, %v1681_v18  ;;  %v8668_v42 = vor.u32 %v7182_v37, %v6233_v53 }
 0x162   : > { %10525 = vst [vmem:[#allocation321_spill] sm:$0xff] %v8644_v49  ;;  %3164 = vmatpush.bf16.msra.mxu2 %v8644_v49  ;;  %3177 = vmatpush.bf16.msra.mxu3 %v8647_v52  ;;  %v6359_v4 = vld [vmem:[#allocation2 + $0xca0] sm:$0xf]  ;;  %v7215_v59 = vld [vmem:[#allocation2 + $0xca4] sm:$0xf0]  ;;  %v1656_v49 = vpop.f32.mrf.mxu0  ;;  %v8670_v20 = vor.u32 %v7199_v40, %v6295_v54 }
 0x163   : > { %10526 = vst [vmem:[#allocation322_spill] sm:$0xff] %v8647_v52  ;;  %v7164_v32 = vld [vmem:[#allocation2 + $0x514] sm:$0xf]  ;;  %v6161_v30 = vld [vmem:[#allocation2 + $0x518] sm:$0xf0]  ;;  %v8673_v49 = vor.u32 %v7215_v59, %v6359_v4 }
 0x164   : > { %10527 = vst [vmem:[#allocation323_spill] sm:$0xff] %v8650_v61  ;;  %2848 = vmatpush.bf16.msra.mxu0 %v8650_v61  ;;  %v7180_v11 = vld [vmem:[#allocation2 + $0x594] sm:$0xf]  ;;  %v6225_v31 = vld [vmem:[#allocation2 + $0x598] sm:$0xf0]  ;;  %v8676_v0 = vor.u32 %v7164_v32, %v6161_v30 }
 0x165   : > { %10528 = vst [vmem:[#allocation324_spill] sm:$0xff] %v8654_v48  ;;  %2861 = vmatpush.bf16.msra.mxu1 %v8654_v48  ;;  %v6287_v26 = vld [vmem:[#allocation2 + $0xc10] sm:$0xf]  ;;  %v7197_v43 = vld [vmem:[#allocation2 + $0xc14] sm:$0xf0]  ;;  %v8680_v54 = vor.u32 %v7180_v11, %v6225_v31 }
 0x166   : > { %10529 = vst [vmem:[#allocation325_spill] sm:$0xff] %v8656_v2  ;;  %3165 = vmatpush.bf16.msra.mxu2 %v8656_v2  ;;  %3178 = vmatpush.bf16.msra.mxu3 %v8659_v1  ;;  %v6351_v61 = vld [vmem:[#allocation2 + $0xc90] sm:$0xf]  ;;  %v7213_v48 = vld [vmem:[#allocation2 + $0xc94] sm:$0xf0]  ;;  %v8682_v40 = vor.u32 %v7197_v43, %v6287_v26  ;;  %v1682_v2 = vpop.f32.mrf.mxu2 }
 0x167   : > { %10530 = vst [vmem:[#allocation326_spill] sm:$0xff] %v8659_v1  ;;  %v7162_v37 = vld [vmem:[#allocation2 + $0x504] sm:$0xf]  ;;  %v6153_v53 = vld [vmem:[#allocation2 + $0x508] sm:$0xf0]  ;;  %v8685_v1 = vor.u32 %v7213_v48, %v6351_v61  ;;  %v1695_v39 = vpop.f32.mrf.mxu3 }
 0x168   : > { %10531 = vst [vmem:[#allocation327_spill] sm:$0xff] %v8662_v10  ;;  %2849 = vmatpush.bf16.msra.mxu0 %v8662_v10  ;;  %v7178_v59 = vld [vmem:[#allocation2 + $0x584] sm:$0xf]  ;;  %v6217_v4 = vld [vmem:[#allocation2 + $0x588] sm:$0xf0]  ;;  %v8688_v11 = vor.u32 %v7162_v37, %v6153_v53 }
 0x169   : > { %10532 = vst [vmem:[#allocation328_spill] sm:$0xff] %v8668_v42  ;;  %2862 = vmatpush.bf16.msra.mxu1 %v8668_v42  ;;  %v6279_v18 = vld [vmem:[#allocation2 + $0xc00] sm:$0xf]  ;;  %v7195_v10 = vld [vmem:[#allocation2 + $0xc04] sm:$0xf0]  ;;  %v8692_v61 = vor.u32 %v7178_v59, %v6217_v4 }
 0x16a   : > { %10533 = vst [vmem:[#allocation329_spill] sm:$0xff] %v8670_v20  ;;  %3166 = vmatpush.bf16.msra.mxu2 %v8670_v20  ;;  %3179 = vmatpush.bf16.msra.mxu3 %v8673_v49  ;;  %v6343_v32 = vld [vmem:[#allocation2 + $0xc80] sm:$0xf]  ;;  %v7211_v30 = vld [vmem:[#allocation2 + $0xc84] sm:$0xf0]  ;;  %v8694_v48 = vor.u32 %v7195_v10, %v6279_v18 }
 0x16b   : > { %10534 = vst [vmem:[#allocation330_spill] sm:$0xff] %v8673_v49  ;;  %v6463_v52 = vld [vmem:[#allocation2 + $0xd70] sm:$0xf]  ;;  %v7241_v41 = vld [vmem:[#allocation2 + $0xd74] sm:$0xf0]  ;;  %v8697_v39 = vor.u32 %v7211_v30, %v6343_v32 }
 0x16c   : > { %10535 = vst [vmem:[#allocation331_spill] sm:$0xff] %v8676_v0  ;;  %v7208_v42 = vld [vmem:[#allocation2 + $0xc74] sm:$0xf]  ;;  %2850 = vmatpush.bf16.msra.mxu0 %v8676_v0  ;;  %v6337_v31 = vld [vmem:[#allocation2 + $0xc78] sm:$0xf0]  ;;  %v8699_v0 = vor.u32 %v7241_v41, %v6463_v52 }
 0x16d   : > { %10536 = vst [vmem:[#allocation332_spill] sm:$0xff] %v8680_v54  ;;  %v7224_v26 = vld [vmem:[#allocation2 + $0xcf4] sm:$0xf]  ;;  %v6401_v43 = vld [vmem:[#allocation2 + $0xcf8] sm:$0xf0]  ;;  %2863 = vmatpush.bf16.msra.mxu1 %v8680_v54  ;;  %v8701_v37 = vor.u32 %v7208_v42, %v6337_v31 }
 0x16e   : > { %10537 = vst [vmem:[#allocation333_spill] sm:$0xff] %v8682_v40  ;;  %3167 = vmatpush.bf16.msra.mxu2 %v8682_v40  ;;  %v7240_v2 = vld [vmem:[#allocation2 + $0xd74] sm:$0xf]  ;;  %v6465_v49 = vld [vmem:[#allocation2 + $0xd78] sm:$0xf0]  ;;  %3180 = vmatpush.bf16.msra.mxu3 %v8685_v1  ;;  %v8703_v53 = vor.u32 %v7224_v26, %v6401_v43 }
 0x16f   : > { %10538 = vst [vmem:[#allocation334_spill] sm:$0xff] %v8685_v1  ;;  %v6455_v20 = vld [vmem:[#allocation2 + $0xd60] sm:$0xf]  ;;  %v7239_v54 = vld [vmem:[#allocation2 + $0xd64] sm:$0xf0]  ;;  %v8706_v59 = vor.u32 %v7240_v2, %v6465_v49 }
 0x170   : > { %10539 = vst [vmem:[#allocation335_spill] sm:$0xff] %v8688_v11  ;;  %v7206_v51 = vld [vmem:[#allocation2 + $0xc64] sm:$0xf]  ;;  %2851 = vmatpush.bf16.msra.mxu0 %v8688_v11  ;;  %v6329_v10 = vld [vmem:[#allocation2 + $0xc68] sm:$0xf0]  ;;  %v8712_v42 = vor.u32 %v7239_v54, %v6455_v20 }
 0x171   : > { %10540 = vst [vmem:[#allocation336_spill] sm:$0xff] %v8692_v61  ;;  %v7222_v4 = vld [vmem:[#allocation2 + $0xce4] sm:$0xf]  ;;  %v6393_v18 = vld [vmem:[#allocation2 + $0xce8] sm:$0xf0]  ;;  %2864 = vmatpush.bf16.msra.mxu1 %v8692_v61  ;;  %v8716_v49 = vor.u32 %v7206_v51, %v6329_v10 }
 0x172   : > { %10541 = vst [vmem:[#allocation337_spill] sm:$0xff] %v8694_v48  ;;  %3168 = vmatpush.bf16.msra.mxu2 %v8694_v48  ;;  %v7238_v41 = vld [vmem:[#allocation2 + $0xd64] sm:$0xf]  ;;  %v6457_v52 = vld [vmem:[#allocation2 + $0xd68] sm:$0xf0]  ;;  %3181 = vmatpush.bf16.msra.mxu3 %v8697_v39  ;;  %v8718_v32 = vor.u32 %v7222_v4, %v6393_v18 }
 0x173   : > { %10542 = vst [vmem:[#allocation338_spill] sm:$0xff] %v8697_v39  ;;  %v6447_v30 = vld [vmem:[#allocation2 + $0xd50] sm:$0xf]  ;;  %v7237_v31 = vld [vmem:[#allocation2 + $0xd54] sm:$0xf0]  ;;  %2852 = vmatmul.bf16.vlgmr.msra.gmra.mxu0 %v8602_v55  ;;  %v8722_v43 = vor.u32 %v7238_v41, %v6457_v52 }
 0x174   : > { %10543 = vst [vmem:[#allocation339_spill] sm:$0xff] %v8699_v0  ;;  %3187 = vmatpush.bf16.msrb.mxu0 %v8699_v0  ;;  %v7204_v26 = vld [vmem:[#allocation2 + $0xc54] sm:$0xf]  ;;  %v6321_v2 = vld [vmem:[#allocation2 + $0xc58] sm:$0xf0]  ;;  %2865 = vmatmul.bf16.vlgmr.msra.gmra.mxu1 %v8596_v15  ;;  %v8727_v51 = vor.u32 %v7237_v31, %v6447_v30 }
 0x175   : > { %10544 = vst [vmem:[#allocation340_spill] sm:$0xff] %v8701_v37  ;;  %3200 = vmatpush.bf16.msrb.mxu1 %v8701_v37  ;;  %v7220_v20 = vld [vmem:[#allocation2 + $0xcd4] sm:$0xf]  ;;  %v6385_v54 = vld [vmem:[#allocation2 + $0xcd8] sm:$0xf0]  ;;  %3169 = vmatmul.bf16.vlgmr.msra.gmra.mxu2 %v8600_v22  ;;  %v8732_v10 = vor.u32 %v7204_v26, %v6321_v2  ;;  %v2029_v26 = vpop.f32.mrf.mxu0  ;;  %v2042_v2 = vpop.f32.mrf.mxu1 }
 0x176   : > { %10545 = vst [vmem:[#allocation341_spill] sm:$0xff] %v8703_v53  ;;  %3213 = vmatpush.bf16.msrb.mxu2 %v8703_v53  ;;  %3226 = vmatpush.bf16.msrb.mxu3 %v8706_v59  ;;  %v7236_v37 = vld [vmem:[#allocation2 + $0xd54] sm:$0xf]  ;;  %v6449_v53 = vld [vmem:[#allocation2 + $0xd58] sm:$0xf0]  ;;  %v8734_v4 = vor.u32 %v7220_v20, %v6385_v54 }
 0x177   : > { %10546 = vst [vmem:[#allocation342_spill] sm:$0xff] %v8706_v59  ;;  %3182 = vmatmul.bf16.vlgmr.msra.gmra.mxu3 %v8602_v55  ;;  %v6439_v18 = vld [vmem:[#allocation2 + $0xd40] sm:$0xf]  ;;  %v7235_v41 = vld [vmem:[#allocation2 + $0xd44] sm:$0xf0]  ;;  %v8737_v59 = vor.u32 %v7236_v37, %v6449_v53  ;;  %v2043_v37 = vadd.f32 %v2042_v2, %v2029_v26 }
 0x178   : > { %10547 = vst [vmem:[#allocation343_spill] sm:$0xff] %v8712_v42  ;;  %3188 = vmatpush.bf16.msrb.mxu0 %v8712_v42  ;;  %v7202_v52 = vld [vmem:[#allocation2 + $0xc44] sm:$0xf]  ;;  %v6313_v42 = vld [vmem:[#allocation2 + $0xc48] sm:$0xf0] }
 0x179   : > { %10548 = vst [vmem:[#allocation344_spill] sm:$0xff] %v8716_v49  ;;  %3201 = vmatpush.bf16.msrb.mxu1 %v8716_v49  ;;  %v7218_v30 = vld [vmem:[#allocation2 + $0xcc4] sm:$0xf]  ;;  %v6377_v31 = vld [vmem:[#allocation2 + $0xcc8] sm:$0xf0]  ;;  %v8740_v49 = vor.u32 %v7235_v41, %v6439_v18  ;;  %v8744_v20 = vor.u32 %v7202_v52, %v6313_v42 }
 0x17a   : > { %10549 = vst [vmem:[#allocation345_spill] sm:$0xff] %v8718_v32  ;;  %3214 = vmatpush.bf16.msrb.mxu2 %v8718_v32  ;;  %3227 = vmatpush.bf16.msrb.mxu3 %v8722_v43  ;;  %v7234_v0 = vld [vmem:[#allocation2 + $0xd44] sm:$0xf]  ;;  %v6441_v39 = vld [vmem:[#allocation2 + $0xd48] sm:$0xf0]  ;;  %v8746_v54 = vor.u32 %v7218_v30, %v6377_v31  ;;  %v2055_v30 = vpop.f32.mrf.mxu2 }
 0x17b   : > { %10550 = vst [vmem:[#allocation346_spill] sm:$0xff] %v8722_v43  ;;  %v6431_v53 = vld [vmem:[#allocation2 + $0xd30] sm:$0xf]  ;;  %v7233_v43 = vld [vmem:[#allocation2 + $0xd34] sm:$0xf0]  ;;  %v8749_v48 = vor.u32 %v7234_v0, %v6441_v39  ;;  %v2056_v2 = vadd.f32 %v2055_v30, %v2043_v37 }
 0x17c   : > { %10551 = vst [vmem:[#allocation347_spill] sm:$0xff] %v8727_v51  ;;  %3189 = vmatpush.bf16.msrb.mxu0 %v8727_v51  ;;  %v7200_v32 = vld [vmem:[#allocation2 + $0xc34] sm:$0xf]  ;;  %v6305_v18 = vld [vmem:[#allocation2 + $0xc38] sm:$0xf0] }
 0x17d   : > { %10552 = vst [vmem:[#allocation348_spill] sm:$0xff] %v8732_v10  ;;  %3202 = vmatpush.bf16.msrb.mxu1 %v8732_v10  ;;  %v7216_v41 = vld [vmem:[#allocation2 + $0xcb4] sm:$0xf]  ;;  %v6369_v51 = vld [vmem:[#allocation2 + $0xcb8] sm:$0xf0]  ;;  %v8756_v42 = vor.u32 %v7200_v32, %v6305_v18  ;;  %v8763_v10 = vpop.f32.mrf.mxu3  ;;  %v8767_v32 = vadd.f32 %v2056_v2, %v8299_v63  ;;  %v2031_v18 = vpop.f32.mrf.mxu0 }
 0x17e   : > { %10553 = vst [vmem:[#allocation349_spill] sm:$0xff] %v8734_v4  ;;  %3215 = vmatpush.bf16.msrb.mxu2 %v8734_v4  ;;  %3228 = vmatpush.bf16.msrb.mxu3 %v8737_v59  ;;  %v7232_v61 = vld [vmem:[#allocation2 + $0xd34] sm:$0xf]  ;;  %v6433_v11 = vld [vmem:[#allocation2 + $0xd38] sm:$0xf0]  ;;  %v8752_v4 = vor.u32 %v7233_v43, %v6431_v53  ;;  %v8758_v52 = vor.u32 %v7216_v41, %v6369_v51  ;;  %v2044_v41 = vpop.f32.mrf.mxu1 }
 0x17f   : > { %10554 = vst [vmem:[#allocation350_spill] sm:$0xff] %v8737_v59  ;;  %v6423_v0 = vld [vmem:[#allocation2 + $0xd20] sm:$0xf]  ;;  %v7231_v39 = vld [vmem:[#allocation2 + $0xd24] sm:$0xf0]  ;;  %v8761_v26 = vor.u32 %v7232_v61, %v6433_v11 }
 0x180   : > { %10555 = vst [vmem:[#allocation351_spill] sm:$0xff] %v8740_v49  ;;  %3190 = vmatpush.bf16.msrb.mxu0 %v8740_v49  ;;  %v7198_v31 = vld [vmem:[#allocation2 + $0xc24] sm:$0xf]  ;;  %v6297_v49 = vld [vmem:[#allocation2 + $0xc28] sm:$0xf0]  ;;  %v8769_v51 = vor.u32 %v7231_v39, %v6423_v0 }
 0x181   : > { %10556 = vst [vmem:[#allocation352_spill] sm:$0xff] %v8744_v20  ;;  %3203 = vmatpush.bf16.msrb.mxu1 %v8744_v20  ;;  %v7214_v43 = vld [vmem:[#allocation2 + $0xca4] sm:$0xf]  ;;  %v6361_v53 = vld [vmem:[#allocation2 + $0xca8] sm:$0xf0]  ;;  %v8773_v11 = vor.u32 %v7198_v31, %v6297_v49 }
 0x182   : > { %10557 = vst [vmem:[#allocation353_spill] sm:$0xff] %v8746_v54  ;;  %3216 = vmatpush.bf16.msrb.mxu2 %v8746_v54  ;;  %3229 = vmatpush.bf16.msrb.mxu3 %v8749_v48  ;;  %v7230_v59 = vld [vmem:[#allocation2 + $0xd24] sm:$0xf]  ;;  %v6425_v20 = vld [vmem:[#allocation2 + $0xd28] sm:$0xf0]  ;;  %v8775_v61 = vor.u32 %v7214_v43, %v6361_v53 }
 0x183   : > { %10558 = vst [vmem:[#allocation354_spill] sm:$0xff] %v8749_v48  ;;  %v6415_v37 = vld [vmem:[#allocation2 + $0xd10] sm:$0xf]  ;;  %v7229_v30 = vld [vmem:[#allocation2 + $0xd14] sm:$0xf0] }
 0x184   : > { %10559 = vst [vmem:[#allocation355_spill] sm:$0xff] %v8752_v4  ;;  %3191 = vmatpush.bf16.msrb.mxu0 %v8752_v4  ;;  %v7196_v48 = vld [vmem:[#allocation2 + $0xc14] sm:$0xf]  ;;  %v8778_v4 = vor.u32 %v7230_v59, %v6425_v20  ;;  %v6289_v63 = vld [vmem:[#allocation2 + $0xc18] sm:$0xf0]  ;;  %v8781_v41 = vor.u32 %v7229_v30, %v6415_v37 }
 0x185   : > { %10560 = vst [vmem:[#allocation356_spill] sm:$0xff] %v8756_v42  ;;  %3204 = vmatpush.bf16.msrb.mxu1 %v8756_v42  ;;  %v7212_v0 = vld [vmem:[#allocation2 + $0xc94] sm:$0xf]  ;;  %v6353_v39 = vld [vmem:[#allocation2 + $0xc98] sm:$0xf0]  ;;  %v8785_v43 = vor.u32 %v7196_v48, %v6289_v63  ;;  %v2070_v40 = vpop.f32.mrf.mxu3 }
 0x186   : > { %10561 = vst [vmem:[#allocation357_spill] sm:$0xff] %v8758_v52  ;;  %3217 = vmatpush.bf16.msrb.mxu2 %v8758_v52  ;;  %3230 = vmatpush.bf16.msrb.mxu3 %v8761_v26  ;;  %v7228_v2 = vld [vmem:[#allocation2 + $0xd14] sm:$0xf]  ;;  %v6417_v18 = vld [vmem:[#allocation2 + $0xd18] sm:$0xf0]  ;;  %v8787_v53 = vor.u32 %v7212_v0, %v6353_v39  ;;  %v2057_v52 = vpop.f32.mrf.mxu2 }
 0x187   : > { %10562 = vst [vmem:[#allocation358_spill] sm:$0xff] %v8761_v26  ;;  %v6407_v49 = vld [vmem:[#allocation2 + $0xd00] sm:$0xf]  ;;  %v7227_v31 = vld [vmem:[#allocation2 + $0xd04] sm:$0xf0]  ;;  %v8790_v42 = vor.u32 %v7228_v2, %v6417_v18 }
 0x188   : > { %10563 = vst [vmem:[#allocation359_spill] sm:$0xff] %v8769_v51  ;;  %3192 = vmatpush.bf16.msrb.mxu0 %v8769_v51  ;;  %v7194_v59 = vld [vmem:[#allocation2 + $0xc04] sm:$0xf]  ;;  %v6281_v20 = vld [vmem:[#allocation2 + $0xc08] sm:$0xf0]  ;;  %v8793_v48 = vor.u32 %v7227_v31, %v6407_v49 }
 0x189   : > { %10564 = vst [vmem:[#allocation360_spill] sm:$0xff] %v8773_v11  ;;  %3205 = vmatpush.bf16.msrb.mxu1 %v8773_v11  ;;  %v7210_v26 = vld [vmem:[#allocation2 + $0xc84] sm:$0xf]  ;;  %v6345_v37 = vld [vmem:[#allocation2 + $0xc88] sm:$0xf0]  ;;  %v8797_v52 = vor.u32 %v7194_v59, %v6281_v20 }
 0x18a   : > { %10565 = vst [vmem:[#allocation361_spill] sm:$0xff] %v8775_v61  ;;  %3218 = vmatpush.bf16.msrb.mxu2 %v8775_v61  ;;  %3231 = vmatpush.bf16.msrb.mxu3 %v8778_v4  ;;  %v7226_v30 = vld [vmem:[#allocation2 + $0xd04] sm:$0xf]  ;;  %v6409_v51 = vld [vmem:[#allocation2 + $0xd08] sm:$0xf0]  ;;  %v8799_v2 = vor.u32 %v7210_v26, %v6345_v37 }
 0x18b   : > { %10566 = vst [vmem:[#allocation362_spill] sm:$0xff] %v8778_v4  ;;  %v6527_v54 = vld [vmem:[#allocation2 + $0x670] sm:$0xf]  ;;  %v7257_v1 = vld [vmem:[#allocation2 + $0x674] sm:$0xf0]  ;;  %v8802_v40 = vor.u32 %v7226_v30, %v6409_v51 }
 0x18c   : > { %10567 = vst [vmem:[#allocation363_spill] sm:$0xff] %v8781_v41  ;;  %v6591_v11 = vld [vmem:[#allocation2 + $0x6f0] sm:$0xf]  ;;  %3193 = vmatpush.bf16.msrb.mxu0 %v8781_v41  ;;  %v7273_v63 = vld [vmem:[#allocation2 + $0x6f4] sm:$0xf0]  ;;  %v8804_v41 = vor.u32 %v7257_v1, %v6527_v54 }
 0x18d   : > { %10568 = vst [vmem:[#allocation364_spill] sm:$0xff] %v8785_v43  ;;  %v6655_v0 = vld [vmem:[#allocation2 + $0x770] sm:$0xf]  ;;  %v7289_v39 = vld [vmem:[#allocation2 + $0x774] sm:$0xf0]  ;;  %3206 = vmatpush.bf16.msrb.mxu1 %v8785_v43  ;;  %v8806_v49 = vor.u32 %v7273_v63, %v6591_v11 }
 0x18e   : > { %10569 = vst [vmem:[#allocation365_spill] sm:$0xff] %v8787_v53  ;;  %3219 = vmatpush.bf16.msrb.mxu2 %v8787_v53  ;;  %v7256_v18 = vld [vmem:[#allocation2 + $0x674] sm:$0xf]  ;;  %v6529_v4 = vld [vmem:[#allocation2 + $0x678] sm:$0xf0]  ;;  %3232 = vmatpush.bf16.msrb.mxu3 %v8790_v42  ;;  %v8808_v31 = vor.u32 %v7289_v39, %v6655_v0 }
 0x18f   : > { %10570 = vst [vmem:[#allocation366_spill] sm:$0xff] %v8790_v42  ;;  %v6519_v61 = vld [vmem:[#allocation2 + $0x660] sm:$0xf]  ;;  %v7255_v43 = vld [vmem:[#allocation2 + $0x664] sm:$0xf0]  ;;  %v8811_v59 = vor.u32 %v7256_v18, %v6529_v4 }
 0x190   : > { %10571 = vst [vmem:[#allocation367_spill] sm:$0xff] %v8793_v48  ;;  %v6583_v24 = vld [vmem:[#allocation2 + $0x6e0] sm:$0xf]  ;;  %3194 = vmatpush.bf16.msrb.mxu0 %v8793_v48  ;;  %v7271_v26 = vld [vmem:[#allocation2 + $0x6e4] sm:$0xf0]  ;;  %v8817_v51 = vor.u32 %v7255_v43, %v6519_v61 }
 0x191   : > { %10572 = vst [vmem:[#allocation368_spill] sm:$0xff] %v8797_v52  ;;  %v6647_v20 = vld [vmem:[#allocation2 + $0x760] sm:$0xf]  ;;  %v7287_v37 = vld [vmem:[#allocation2 + $0x764] sm:$0xf0]  ;;  %3207 = vmatpush.bf16.msrb.mxu1 %v8797_v52  ;;  %v8821_v4 = vor.u32 %v7271_v26, %v6583_v24 }
 0x192   : > { %10573 = vst [vmem:[#allocation369_spill] sm:$0xff] %v8799_v2  ;;  %3220 = vmatpush.bf16.msrb.mxu2 %v8799_v2  ;;  %v7254_v1 = vld [vmem:[#allocation2 + $0x664] sm:$0xf]  ;;  %v6521_v54 = vld [vmem:[#allocation2 + $0x668] sm:$0xf0]  ;;  %3233 = vmatpush.bf16.msrb.mxu3 %v8802_v40  ;;  %v8823_v11 = vor.u32 %v7287_v37, %v6647_v20 }
 0x193   : > { %10574 = vst [vmem:[#allocation370_spill] sm:$0xff] %v8802_v40  ;;  %v6511_v30 = vld [vmem:[#allocation2 + $0x650] sm:$0xf]  ;;  %v7253_v63 = vld [vmem:[#allocation2 + $0x654] sm:$0xf0]  ;;  %3195 = vmatmul.bf16.vlgmr.msrb.gmra.mxu0 %v8596_v15  ;;  %v8827_v39 = vor.u32 %v7254_v1, %v6521_v54 }
 0x194   : > { %10575 = vst [vmem:[#allocation371_spill] sm:$0xff] %v8804_v41  ;;  %3546 = vmatpush.bf16.msra.mxu0 %v8804_v41  ;;  %v6575_v0 = vld [vmem:[#allocation2 + $0x6d0] sm:$0xf]  ;;  %v7269_v18 = vld [vmem:[#allocation2 + $0x6d4] sm:$0xf0]  ;;  %3208 = vmatmul.bf16.vlgmr.msrb.gmra.mxu1 %v8600_v22  ;;  %v8833_v20 = vor.u32 %v7253_v63, %v6511_v30  ;;  %v2081_v30 = vpop.f32.mrf.mxu0 }
 0x195   : > { %10576 = vst [vmem:[#allocation372_spill] sm:$0xff] %v8806_v49  ;;  %3559 = vmatpush.bf16.msra.mxu1 %v8806_v49  ;;  %v6639_v61 = vld [vmem:[#allocation2 + $0x750] sm:$0xf]  ;;  %v7285_v43 = vld [vmem:[#allocation2 + $0x754] sm:$0xf0]  ;;  %3221 = vmatmul.bf16.vlgmr.msrb.gmra.mxu2 %v8602_v55  ;;  %v8837_v37 = vor.u32 %v7269_v18, %v6575_v0  ;;  %v2082_v0 = vadd.f32 %v2081_v30, %v8763_v10 }
 0x196   : > { %10577 = vst [vmem:[#allocation373_spill] sm:$0xff] %v8808_v31  ;;  %3572 = vmatpush.bf16.msra.mxu2 %v8808_v31  ;;  %3585 = vmatpush.bf16.msra.mxu3 %v8811_v59  ;;  %v7252_v24 = vld [vmem:[#allocation2 + $0x654] sm:$0xf]  ;;  %v6513_v26 = vld [vmem:[#allocation2 + $0x658] sm:$0xf0]  ;;  %v8839_v1 = vor.u32 %v7285_v43, %v6639_v61  ;;  %v2094_v61 = vpop.f32.mrf.mxu1 }
 0x197   : > { %10578 = vst [vmem:[#allocation374_spill] sm:$0xff] %v8811_v59  ;;  %3234 = vmatmul.bf16.vlgmr.msrb.gmra.mxu3 %v8596_v15  ;;  %v6503_v54 = vld [vmem:[#allocation2 + $0x640] sm:$0xf]  ;;  %v7251_v59 = vld [vmem:[#allocation2 + $0x644] sm:$0xf0]  ;;  %v8842_v49 = vor.u32 %v7252_v24, %v6513_v26 }
 0x198   : > { %10579 = vst [vmem:[#allocation375_spill] sm:$0xff] %v8817_v51  ;;  %3547 = vmatpush.bf16.msra.mxu0 %v8817_v51  ;;  %v6567_v31 = vld [vmem:[#allocation2 + $0x6c0] sm:$0xf]  ;;  %v7267_v51 = vld [vmem:[#allocation2 + $0x6c4] sm:$0xf0]  ;;  %v8846_v18 = vor.u32 %v7251_v59, %v6503_v54 }
 0x199   : > { %10580 = vst [vmem:[#allocation376_spill] sm:$0xff] %v8821_v4  ;;  %3560 = vmatpush.bf16.msra.mxu1 %v8821_v4  ;;  %v6631_v41 = vld [vmem:[#allocation2 + $0x740] sm:$0xf]  ;;  %v7283_v40 = vld [vmem:[#allocation2 + $0x744] sm:$0xf0]  ;;  %v8850_v43 = vor.u32 %v7267_v51, %v6567_v31 }
 0x19a   : > { %10581 = vst [vmem:[#allocation377_spill] sm:$0xff] %v8823_v11  ;;  %3573 = vmatpush.bf16.msra.mxu2 %v8823_v11  ;;  %3586 = vmatpush.bf16.msra.mxu3 %v8827_v39  ;;  %v7250_v63 = vld [vmem:[#allocation2 + $0x644] sm:$0xf]  ;;  %v6505_v2 = vld [vmem:[#allocation2 + $0x648] sm:$0xf0]  ;;  %v8852_v24 = vor.u32 %v7283_v40, %v6631_v41 }
 0x19b   : > { %10582 = vst [vmem:[#allocation378_spill] sm:$0xff] %v8827_v39  ;;  %v6495_v26 = vld [vmem:[#allocation2 + $0x630] sm:$0xf]  ;;  %v7249_v39 = vld [vmem:[#allocation2 + $0x634] sm:$0xf0]  ;;  %v8855_v4 = vor.u32 %v7250_v63, %v6505_v2 }
 0x19c   : > { %10583 = vst [vmem:[#allocation379_spill] sm:$0xff] %v8833_v20  ;;  %3548 = vmatpush.bf16.msra.mxu0 %v8833_v20  ;;  %v6559_v11 = vld [vmem:[#allocation2 + $0x6b0] sm:$0xf]  ;;  %v2095_v20 = vadd.f32 %v2094_v61, %v2082_v0  ;;  %v7265_v10 = vld [vmem:[#allocation2 + $0x6b4] sm:$0xf0]  ;;  %v8861_v41 = vor.u32 %v7249_v39, %v6495_v26  ;;  %v2398_v39 = vpop.f32.mrf.mxu2 }
 0x19d   : > { %10584 = vst [vmem:[#allocation380_spill] sm:$0xff] %v8837_v37  ;;  %3561 = vmatpush.bf16.msra.mxu1 %v8837_v37  ;;  %v6623_v59 = vld [vmem:[#allocation2 + $0x730] sm:$0xf]  ;;  %v7281_v54 = vld [vmem:[#allocation2 + $0x734] sm:$0xf0]  ;;  %v8865_v40 = vor.u32 %v7265_v10, %v6559_v11 }
 0x19e   : > { %10585 = vst [vmem:[#allocation381_spill] sm:$0xff] %v8839_v1  ;;  %3574 = vmatpush.bf16.msra.mxu2 %v8839_v1  ;;  %3587 = vmatpush.bf16.msra.mxu3 %v8842_v49  ;;  %v7248_v30 = vld [vmem:[#allocation2 + $0x634] sm:$0xf]  ;;  %v6497_v52 = vld [vmem:[#allocation2 + $0x638] sm:$0xf0]  ;;  %v8859_v31 = vadd.f32 %v2095_v20, %v8330_v36  ;;  %v8867_v2 = vor.u32 %v7281_v54, %v6623_v59 }
 0x19f   : > { %10586 = vst [vmem:[#allocation382_spill] sm:$0xff] %v8842_v49  ;;  %v6487_v51 = vld [vmem:[#allocation2 + $0x620] sm:$0xf]  ;;  %v7247_v63 = vld [vmem:[#allocation2 + $0x624] sm:$0xf0]  ;;  %v8870_v61 = vor.u32 %v7248_v30, %v6497_v52  ;;  %v2083_v49 = vpop.f32.mrf.mxu0  ;;  %v2096_v52 = vpop.f32.mrf.mxu1 }
 0x1a0   : > { %10587 = vst [vmem:[#allocation383_spill] sm:$0xff] %v8846_v18  ;;  %3549 = vmatpush.bf16.msra.mxu0 %v8846_v18  ;;  %v6551_v0 = vld [vmem:[#allocation2 + $0x6a0] sm:$0xf]  ;;  %v7263_v18 = vld [vmem:[#allocation2 + $0x6a4] sm:$0xf0]  ;;  %v8873_v11 = vor.u32 %v7247_v63, %v6487_v51 }
 0x1a1   : > { %10588 = vst [vmem:[#allocation384_spill] sm:$0xff] %v8850_v43  ;;  %3562 = vmatpush.bf16.msra.mxu1 %v8850_v43  ;;  %v6615_v36 = vld [vmem:[#allocation2 + $0x720] sm:$0xf]  ;;  %v7279_v20 = vld [vmem:[#allocation2 + $0x724] sm:$0xf0]  ;;  %v8879_v30 = vor.u32 %v7263_v18, %v6551_v0 }
 0x1a2   : > { %10589 = vst [vmem:[#allocation385_spill] sm:$0xff] %v8852_v24  ;;  %3575 = vmatpush.bf16.msra.mxu2 %v8852_v24  ;;  %3588 = vmatpush.bf16.msra.mxu3 %v8855_v4  ;;  %v7246_v26 = vld [vmem:[#allocation2 + $0x624] sm:$0xf]  ;;  %v6489_v43 = vld [vmem:[#allocation2 + $0x628] sm:$0xf0]  ;;  %v2411_v24 = vpop.f32.mrf.mxu3 }
 0x1a3   : > { %10590 = vst [vmem:[#allocation386_spill] sm:$0xff] %v8855_v4  ;;  %v6479_v10 = vld [vmem:[#allocation2 + $0x610] sm:$0xf]  ;;  %v7245_v59 = vld [vmem:[#allocation2 + $0x614] sm:$0xf0]  ;;  %v8875_v54 = vadd.f32 %v2411_v24, %v2398_v39  ;;  %v8881_v4 = vor.u32 %v7279_v20, %v6615_v36  ;;  %v8885_v51 = vor.u32 %v7246_v26, %v6489_v43 }
 0x1a4   : > { %10591 = vst [vmem:[#allocation387_spill] sm:$0xff] %v8861_v41  ;;  %3550 = vmatpush.bf16.msra.mxu0 %v8861_v41  ;;  %v6543_v49 = vld [vmem:[#allocation2 + $0x690] sm:$0xf]  ;;  %v7261_v1 = vld [vmem:[#allocation2 + $0x694] sm:$0xf0]  ;;  %v2400_v53 = vpop.f32.mrf.mxu2 }
 0x1a5   : > { %10592 = vst [vmem:[#allocation388_spill] sm:$0xff] %v8865_v40  ;;  %3563 = vmatpush.bf16.msra.mxu1 %v8865_v40  ;;  %v3242_v37 = vld [vmem:[%s7611_s30 + $0x8] sm:$0x6]  ;;  %v6607_v63 = vld [vmem:[#allocation2 + $0x710] sm:$0xf]  ;;  %v8889_v40 = vor.u32 %v7245_v59, %v6479_v10  ;;  %v8893_v20 = vor.u32 %v7261_v1, %v6543_v49 }
 0x1a6   : > { %10593 = vst [vmem:[#allocation389_spill] sm:$0xff] %v8867_v2  ;;  %3576 = vmatpush.bf16.msra.mxu2 %v8867_v2  ;;  %3589 = vmatpush.bf16.msra.mxu3 %v8870_v61  ;;  %v7277_v41 = vld [vmem:[#allocation2 + $0x714] sm:$0xf0]  ;;  %v3241_v24 = vld [vmem:[%s7611_s30] sm:$0x66]  ;;  %v3296_v36 = vunpack.c.l.b16 %v3242_v37 }
 0x1a7   : > { %10594 = vst [vmem:[#allocation390_spill] sm:$0xff] %v8870_v61  ;;  %v7244_v39 = vld [vmem:[#allocation2 + $0x614] sm:$0xf]  ;;  %v6481_v52 = vld [vmem:[#allocation2 + $0x618] sm:$0xf0]  ;;  %v8895_v43 = vor.u32 %v7277_v41, %v6607_v63  ;;  %v3294_v48 = vunpack.c.l.b16 %v3241_v24  ;;  %v3295_v42 = vunpack.c.h.b16 %v3241_v24 }
 0x1a8   : > { %10595 = vst [vmem:[#allocation391_spill] sm:$0xff] %v8873_v11  ;;  %3551 = vmatpush.bf16.msra.mxu0 %v8873_v11  ;;  %v6471_v18 = vld [vmem:[#allocation2 + $0x600] sm:$0xf]  ;;  %v7243_v0 = vld [vmem:[#allocation2 + $0x604] sm:$0xf0]  ;;  %v8898_v10 = vor.u32 %v7244_v39, %v6481_v52 }
 0x1a9   : > { %10596 = vst [vmem:[#allocation392_spill] sm:$0xff] %v8879_v30  ;;  %3564 = vmatpush.bf16.msra.mxu1 %v8879_v30  ;;  %v6535_v26 = vld [vmem:[#allocation2 + $0x680] sm:$0xf]  ;;  %v7259_v61 = vld [vmem:[#allocation2 + $0x684] sm:$0xf0]  ;;  %v8901_v41 = vor.u32 %v7243_v0, %v6471_v18  ;;  %v3297_v55 = vpack.c.b16 %v3294_v48, %v3294_v48 }
 0x1aa   : > { %10597 = vst [vmem:[#allocation393_spill] sm:$0xff] %v8881_v4  ;;  %3577 = vmatpush.bf16.msra.mxu2 %v8881_v4  ;;  %v6599_v2 = vld [vmem:[#allocation2 + $0x700] sm:$0xf]  ;;  %3590 = vmatpush.bf16.msra.mxu3 %v8885_v51  ;;  %v7275_v59 = vld [vmem:[#allocation2 + $0x704] sm:$0xf0]  ;;  %v2413_v1 = vpop.f32.mrf.mxu3  ;;  %v8903_v49 = vor.u32 %v7259_v61, %v6535_v26 }
 0x1ab   : > { %10598 = vst [vmem:[#allocation394_spill] sm:$0xff] %v8885_v51  ;;  %v7242_v11 = vld [vmem:[#allocation2 + $0x604] sm:$0xf]  ;;  %v6473_v37 = vld [vmem:[#allocation2 + $0x608] sm:$0xf0]  ;;  %v3299_v51 = vpack.c.b16 %v3296_v36, %v3296_v36  ;;  %v8907_v39 = vor.u32 %v7275_v59, %v6599_v2  ;;  %v3298_v1 = vpack.c.b16 %v3295_v42, %v3295_v42 }
 0x1ac   : > { %10599 = vst [vmem:[#allocation395_spill] sm:$0xff] %v8889_v40  ;;  %v7272_v30 = vld [vmem:[#allocation2 + $0x6f4] sm:$0xf]  ;;  %v6593_v19 = vld [vmem:[#allocation2 + $0x6f8] sm:$0xf0]  ;;  %3552 = vmatpush.bf16.msra.mxu0 %v8889_v40  ;;  %v8910_v18 = vor.u32 %v7242_v11, %v6473_v37  ;;  %v8925_v11 = vrot.slane %v3297_v55, 1 }
 0x1ad   : > { %10600 = vst [vmem:[#allocation396_spill] sm:$0xff] %v8893_v20  ;;  %v7288_v4 = vld [vmem:[#allocation2 + $0x774] sm:$0xf]  ;;  %v6657_v63 = vld [vmem:[#allocation2 + $0x778] sm:$0xf0]  ;;  %3565 = vmatpush.bf16.msra.mxu1 %v8893_v20  ;;  %v8912_v61 = vor.u32 %v7272_v30, %v6593_v19  ;;  %v8921_v48 = vrot.slane %v3299_v51, 1 }
 0x1ae   : > { %10601 = vst [vmem:[#allocation397_spill] sm:$0xff] %v8895_v43  ;;  %v6719_v24 = vld [vmem:[#allocation2 + $0xdf0] sm:$0xf]  ;;  %v7305_v60 = vld [vmem:[#allocation2 + $0xdf4] sm:$0xf0]  ;;  %3578 = vmatpush.bf16.msra.mxu2 %v8895_v43  ;;  %3591 = vmatpush.bf16.msra.mxu3 %v8898_v10  ;;  %v8914_v26 = vor.u32 %v7288_v4, %v6657_v63 }
 0x1af   : > { %10602 = vst [vmem:[#allocation398_spill] sm:$0xff] %v8901_v41  ;;  %v6783_v53 = vld [vmem:[#allocation2 + $0xe70] sm:$0xf]  ;;  %v7321_v52 = vld [vmem:[#allocation2 + $0xe74] sm:$0xf0]  ;;  %v8916_v36 = vor.u32 %v7305_v60, %v6719_v24  ;;  %v8927_v60 = vrot.slane %v3298_v1, 1 }
 0x1b0   : > { %10603 = vst [vmem:[#allocation399_spill] sm:$0xff] %v8903_v49  ;;  %v7270_v0 = vld [vmem:[#allocation2 + $0x6e4] sm:$0xf]  ;;  %v6585_v20 = vld [vmem:[#allocation2 + $0x6e8] sm:$0xf0]  ;;  %3553 = vmatpush.bf16.msra.mxu0 %v8901_v41  ;;  %v8919_v2 = vor.u32 %v7321_v52, %v6783_v53 }
 0x1b1   : > { %10604 = vst [vmem:[#allocation400_spill] sm:$0xff] %v8907_v39  ;;  %v7286_v40 = vld [vmem:[#allocation2 + $0x764] sm:$0xf]  ;;  %v6649_v43 = vld [vmem:[#allocation2 + $0x768] sm:$0xf0]  ;;  %3566 = vmatpush.bf16.msra.mxu1 %v8903_v49  ;;  %v8931_v30 = vor.u32 %v7270_v0, %v6585_v20 }
 0x1b2   : > { %10605 = vst [vmem:[#allocation401_spill] sm:$0xff] %v8910_v18  ;;  %v6711_v42 = vld [vmem:[#allocation2 + $0xde0] sm:$0xf]  ;;  %v7303_v59 = vld [vmem:[#allocation2 + $0xde4] sm:$0xf0]  ;;  %3579 = vmatpush.bf16.msra.mxu2 %v8907_v39  ;;  %3592 = vmatpush.bf16.msra.mxu3 %v8910_v18  ;;  %v8935_v51 = vor.u32 %v7286_v40, %v6649_v43 }
 0x1b3   : > { %10606 = vst [vmem:[#allocation402_spill] sm:$0xff] %v8912_v61  ;;  %v6775_v19 = vld [vmem:[#allocation2 + $0xe60] sm:$0xf]  ;;  %v7319_v4 = vld [vmem:[#allocation2 + $0xe64] sm:$0xf0]  ;;  %v8937_v37 = vor.u32 %v7303_v59, %v6711_v42  ;;  %3554 = vmatmul.bf16.vlgmr.msra.gmra.mxu0 %v8925_v11 }
 0x1b4   : > { %10607 = vst [vmem:[#allocation403_spill] sm:$0xff] %v8914_v26  ;;  %3598 = vmatpush.bf16.msrb.mxu0 %v8912_v61  ;;  %v7268_v63 = vld [vmem:[#allocation2 + $0x6d4] sm:$0xf]  ;;  %v6577_v24 = vld [vmem:[#allocation2 + $0x6d8] sm:$0xf0]  ;;  %v8941_v53 = vor.u32 %v7319_v4, %v6775_v19  ;;  %3567 = vmatmul.bf16.vlgmr.msra.gmra.mxu1 %v8927_v60 }
 0x1b5   : > { %10608 = vst [vmem:[#allocation404_spill] sm:$0xff] %v8916_v36  ;;  %3611 = vmatpush.bf16.msrb.mxu1 %v8914_v26  ;;  %v7284_v55 = vld [vmem:[#allocation2 + $0x754] sm:$0xf]  ;;  %3580 = vmatmul.bf16.vlgmr.msra.gmra.mxu2 %v8921_v48  ;;  %v6641_v52 = vld [vmem:[#allocation2 + $0x758] sm:$0xf0]  ;;  %v8946_v0 = vor.u32 %v7268_v63, %v6577_v24  ;;  %v2424_v26 = vpop.f32.mrf.mxu0 }
 0x1b6   : > { %10609 = vst [vmem:[#allocation405_spill] sm:$0xff] %v8919_v2  ;;  %3915 = vmatpush.bf16.msrb.mxu2 %v8916_v36  ;;  %3928 = vmatpush.bf16.msrb.mxu3 %v8919_v2  ;;  %v6703_v20 = vld [vmem:[#allocation2 + $0xdd0] sm:$0xf]  ;;  %v7301_v1 = vld [vmem:[#allocation2 + $0xdd4] sm:$0xf0]  ;;  %v8951_v42 = vor.u32 %v7284_v55, %v6641_v52  ;;  %v2425_v55 = vadd.f32 %v2424_v26, %v8875_v54 }
 0x1b7   : > { %10610 = vst [vmem:[#allocation406_spill] sm:$0xff] %v8931_v30  ;;  %v6767_v40 = vld [vmem:[#allocation2 + $0xe50] sm:$0xf]  ;;  %v7317_v43 = vld [vmem:[#allocation2 + $0xe54] sm:$0xf0]  ;;  %3593 = vmatmul.bf16.vlgmr.msra.gmra.mxu3 %v8925_v11  ;;  %v8953_v59 = vor.u32 %v7301_v1, %v6703_v20 }
 0x1b8   : > { %10611 = vst [vmem:[#allocation407_spill] sm:$0xff] %v8935_v51  ;;  %3599 = vmatpush.bf16.msrb.mxu0 %v8931_v30  ;;  %v7266_v19 = vld [vmem:[#allocation2 + $0x6c4] sm:$0xf]  ;;  %v6569_v4 = vld [vmem:[#allocation2 + $0x6c8] sm:$0xf0]  ;;  %v8956_v36 = vor.u32 %v7317_v43, %v6767_v40 }
 0x1b9   : > { %10612 = vst [vmem:[#allocation408_spill] sm:$0xff] %v8937_v37  ;;  %3612 = vmatpush.bf16.msrb.mxu1 %v8935_v51  ;;  %v7282_v2 = vld [vmem:[#allocation2 + $0x744] sm:$0xf]  ;;  %v6633_v30 = vld [vmem:[#allocation2 + $0x748] sm:$0xf0]  ;;  %v8960_v52 = vor.u32 %v7266_v19, %v6569_v4 }
 0x1ba   : > { %10613 = vst [vmem:[#allocation409_spill] sm:$0xff] %v8941_v53  ;;  %3916 = vmatpush.bf16.msrb.mxu2 %v8937_v37  ;;  %3929 = vmatpush.bf16.msrb.mxu3 %v8941_v53  ;;  %v6695_v63 = vld [vmem:[#allocation2 + $0xdc0] sm:$0xf]  ;;  %v7299_v24 = vld [vmem:[#allocation2 + $0xdc4] sm:$0xf0]  ;;  %v8964_v20 = vor.u32 %v7282_v2, %v6633_v30  ;;  %v2437_v37 = vpop.f32.mrf.mxu1 }
 0x1bb   : > { %10614 = vst [vmem:[#allocation410_spill] sm:$0xff] %v8946_v0  ;;  %v6759_v61 = vld [vmem:[#allocation2 + $0xe40] sm:$0xf]  ;;  %v7315_v18 = vld [vmem:[#allocation2 + $0xe44] sm:$0xf0]  ;;  %v8966_v1 = vor.u32 %v7299_v24, %v6695_v63 }
 0x1bc   : > { %10615 = vst [vmem:[#allocation411_spill] sm:$0xff] %v8951_v42  ;;  %3600 = vmatpush.bf16.msrb.mxu0 %v8946_v0  ;;  %v7264_v40 = vld [vmem:[#allocation2 + $0x6b4] sm:$0xf]  ;;  %v6561_v43 = vld [vmem:[#allocation2 + $0x6b8] sm:$0xf0]  ;;  %v8970_v0 = vadd.f32 %v2425_v55, %v8635_v47  ;;  %v8972_v54 = vor.u32 %v7315_v18, %v6759_v61  ;;  %v2450_v55 = vpop.f32.mrf.mxu2 }
 0x1bd   : > { %10616 = vst [vmem:[#allocation412_spill] sm:$0xff] %v8953_v59  ;;  %3613 = vmatpush.bf16.msrb.mxu1 %v8951_v42  ;;  %v7280_v53 = vld [vmem:[#allocation2 + $0x734] sm:$0xf]  ;;  %v6625_v26 = vld [vmem:[#allocation2 + $0x738] sm:$0xf0]  ;;  %v8975_v2 = vor.u32 %v7264_v40, %v6561_v43  ;;  %v2451_v51 = vadd.f32 %v2450_v55, %v2437_v37 }
 0x1be   : > { %10617 = vst [vmem:[#allocation413_spill] sm:$0xff] %v8956_v36  ;;  %3917 = vmatpush.bf16.msrb.mxu2 %v8953_v59  ;;  %3930 = vmatpush.bf16.msrb.mxu3 %v8956_v36  ;;  %v6687_v19 = vld [vmem:[#allocation2 + $0xdb0] sm:$0xf]  ;;  %v7297_v4 = vld [vmem:[#allocation2 + $0xdb4] sm:$0xf0]  ;;  %v8979_v30 = vor.u32 %v7280_v53, %v6625_v26  ;;  %v2463_v36 = vpop.f32.mrf.mxu3 }
 0x1bf   : > { %10618 = vst [vmem:[#allocation414_spill] sm:$0xff] %v8960_v52  ;;  %v6751_v42 = vld [vmem:[#allocation2 + $0xe30] sm:$0xf]  ;;  %v7313_v59 = vld [vmem:[#allocation2 + $0xe34] sm:$0xf0]  ;;  %v8981_v63 = vor.u32 %v7297_v4, %v6687_v19  ;;  %v2464_v26 = vadd.f32 %v2463_v36, %v2451_v51 }
 0x1c0   : > { %10619 = vst [vmem:[#allocation415_spill] sm:$0xff] %v8964_v20  ;;  %3601 = vmatpush.bf16.msrb.mxu0 %v8960_v52  ;;  %v7262_v47 = vld [vmem:[#allocation2 + $0x6a4] sm:$0xf]  ;;  %v6553_v18 = vld [vmem:[#allocation2 + $0x6a8] sm:$0xf0]  ;;  %v8984_v24 = vor.u32 %v7313_v59, %v6751_v42 }
 0x1c1   : > { %10620 = vst [vmem:[#allocation416_spill] sm:$0xff] %v8966_v1  ;;  %3614 = vmatpush.bf16.msrb.mxu1 %v8964_v20  ;;  %v7278_v61 = vld [vmem:[#allocation2 + $0x724] sm:$0xf]  ;;  %v6617_v52 = vld [vmem:[#allocation2 + $0x728] sm:$0xf0]  ;;  %v8987_v53 = vor.u32 %v7262_v47, %v6553_v18 }
 0x1c2   : > { %10621 = vst [vmem:[#allocation417_spill] sm:$0xff] %v8972_v54  ;;  %3918 = vmatpush.bf16.msrb.mxu2 %v8966_v1  ;;  %3931 = vmatpush.bf16.msrb.mxu3 %v8972_v54  ;;  %v6679_v40 = vld [vmem:[#allocation2 + $0xda0] sm:$0xf]  ;;  %v7295_v43 = vld [vmem:[#allocation2 + $0xda4] sm:$0xf0]  ;;  %v2426_v1 = vpop.f32.mrf.mxu0  ;;  %v8991_v42 = vor.u32 %v7278_v61, %v6617_v52  ;;  %v2439_v37 = vpop.f32.mrf.mxu1 }
 0x1c3   : > { %10622 = vst [vmem:[#allocation418_spill] sm:$0xff] %v8975_v2  ;;  %v6743_v20 = vld [vmem:[#allocation2 + $0xe20] sm:$0xf]  ;;  %v7311_v39 = vld [vmem:[#allocation2 + $0xe24] sm:$0xf0]  ;;  %v8993_v59 = vor.u32 %v7295_v43, %v6679_v40 }
 0x1c4   : > { %10623 = vst [vmem:[#allocation419_spill] sm:$0xff] %v8979_v30  ;;  %3602 = vmatpush.bf16.msrb.mxu0 %v8975_v2  ;;  %v7260_v19 = vld [vmem:[#allocation2 + $0x694] sm:$0xf]  ;;  %v6545_v4 = vld [vmem:[#allocation2 + $0x698] sm:$0xf0]  ;;  %v8996_v1 = vor.u32 %v7311_v39, %v6743_v20 }
 0x1c5   : > { %10624 = vst [vmem:[#allocation420_spill] sm:$0xff] %v8981_v63  ;;  %3615 = vmatpush.bf16.msrb.mxu1 %v8979_v30  ;;  %v7276_v54 = vld [vmem:[#allocation2 + $0x714] sm:$0xf]  ;;  %v6609_v55 = vld [vmem:[#allocation2 + $0x718] sm:$0xf0]  ;;  %v8999_v30 = vadd.f32 %v2464_v26, %v8666_v13  ;;  %v9002_v51 = vor.u32 %v7260_v19, %v6545_v4 }
 0x1c6   : > { %10625 = vst [vmem:[#allocation421_spill] sm:$0xff] %v8984_v24  ;;  %3919 = vmatpush.bf16.msrb.mxu2 %v8981_v63  ;;  %3932 = vmatpush.bf16.msrb.mxu3 %v8984_v24  ;;  %v6671_v47 = vld [vmem:[#allocation2 + $0xd90] sm:$0xf]  ;;  %v7293_v18 = vld [vmem:[#allocation2 + $0xd94] sm:$0xf0]  ;;  %v9006_v39 = vor.u32 %v7276_v54, %v6609_v55  ;;  %v2465_v24 = vpop.f32.mrf.mxu3 }
 0x1c7   : > { %10626 = vst [vmem:[#allocation422_spill] sm:$0xff] %v8987_v53  ;;  %v6735_v63 = vld [vmem:[#allocation2 + $0xe10] sm:$0xf]  ;;  %v7309_v36 = vld [vmem:[#allocation2 + $0xe14] sm:$0xf0]  ;;  %v9008_v20 = vor.u32 %v7293_v18, %v6671_v47 }
 0x1c8   : > { %10627 = vst [vmem:[#allocation423_spill] sm:$0xff] %v8991_v42  ;;  %3603 = vmatpush.bf16.msrb.mxu0 %v8987_v53  ;;  %v7258_v52 = vld [vmem:[#allocation2 + $0x684] sm:$0xf]  ;;  %v6537_v61 = vld [vmem:[#allocation2 + $0x688] sm:$0xf0]  ;;  %v9011_v26 = vor.u32 %v7309_v36, %v6735_v63  ;;  %v2452_v53 = vpop.f32.mrf.mxu2 }
 0x1c9   : > { %10628 = vst [vmem:[#allocation424_spill] sm:$0xff] %v8993_v59  ;;  %3616 = vmatpush.bf16.msrb.mxu1 %v8991_v42  ;;  %v7274_v40 = vld [vmem:[#allocation2 + $0x704] sm:$0xf]  ;;  %v6601_v43 = vld [vmem:[#allocation2 + $0x708] sm:$0xf0]  ;;  %v9014_v54 = vor.u32 %v7258_v52, %v6537_v61 }
 0x1ca   : > { %10629 = vst [vmem:[#allocation425_spill] sm:$0xff] %v8996_v1  ;;  %3920 = vmatpush.bf16.msrb.mxu2 %v8993_v59  ;;  %v6663_v13 = vld [vmem:[#allocation2 + $0xd80] sm:$0xf]  ;;  %3933 = vmatpush.bf16.msrb.mxu3 %v8996_v1  ;;  %v7291_v37 = vld [vmem:[#allocation2 + $0xd84] sm:$0xf0]  ;;  %v9018_v63 = vor.u32 %v7274_v40, %v6601_v43 }
 0x1cb   : > { %10630 = vst [vmem:[#allocation426_spill] sm:$0xff] %v9002_v51  ;;  %v6727_v19 = vld [vmem:[#allocation2 + $0xe00] sm:$0xf]  ;;  %v7307_v4 = vld [vmem:[#allocation2 + $0xe04] sm:$0xf0]  ;;  %v9020_v36 = vor.u32 %v7291_v37, %v6663_v13 }
 0x1cc   : > { %10631 = vst [vmem:[#allocation427_spill] sm:$0xff] %v9006_v39  ;;  %v6847_v2 = vld [vmem:[#allocation2 + $0xef0] sm:$0xf]  ;;  %v7337_v42 = vld [vmem:[#allocation2 + $0xef4] sm:$0xf0]  ;;  %3604 = vmatpush.bf16.msrb.mxu0 %v9002_v51  ;;  %v9023_v1 = vor.u32 %v7307_v4, %v6727_v19 }
 0x1cd   : > { %v7304_v49 = vld [vmem:[#allocation2 + $0xdf4] sm:$0xf]  ;;  %10632 = vst [vmem:[#allocation428_spill] sm:$0xff] %v9014_v54  ;;  %v6721_v55 = vld [vmem:[#allocation2 + $0xdf8] sm:$0xf0]  ;;  %3617 = vmatpush.bf16.msrb.mxu1 %v9006_v39  ;;  %v9025_v51 = vor.u32 %v7337_v42, %v6847_v2 }
 0x1ce   : > { %v7320_v47 = vld [vmem:[#allocation2 + $0xe74] sm:$0xf]  ;;  %v6785_v18 = vld [vmem:[#allocation2 + $0xe78] sm:$0xf0]  ;;  %3921 = vmatpush.bf16.msrb.mxu2 %v9008_v20  ;;  %10633 = vst [vmem:[#allocation429_spill] sm:$0xff] %v9018_v63  ;;  %3934 = vmatpush.bf16.msrb.mxu3 %v9011_v26  ;;  %v9027_v52 = vor.u32 %v7304_v49, %v6721_v55 }
 0x1cf   : > { %10634 = vst [vmem:[#allocation430_spill] sm:$0xff] %v9020_v36  ;;  %v7336_v53 = vld [vmem:[#allocation2 + $0xef4] sm:$0xf]  ;;  %v6849_v24 = vld [vmem:[#allocation2 + $0xef8] sm:$0xf0]  ;;  %v9029_v61 = vor.u32 %v7320_v47, %v6785_v18 }
 0x1d0   : > { %10635 = vst [vmem:[#allocation431_spill] sm:$0xff] %v9023_v1  ;;  %v6839_v59 = vld [vmem:[#allocation2 + $0xee0] sm:$0xf]  ;;  %v7335_v39 = vld [vmem:[#allocation2 + $0xee4] sm:$0xf0]  ;;  %3605 = vmatpush.bf16.msrb.mxu0 %v9014_v54  ;;  %v9032_v40 = vor.u32 %v7336_v53, %v6849_v24 }
 0x1d1   : > { %10636 = vst [vmem:[#allocation432_spill] sm:$0xff] %v9025_v51  ;;  %v7302_v41 = vld [vmem:[#allocation2 + $0xde4] sm:$0xf]  ;;  %v6713_v43 = vld [vmem:[#allocation2 + $0xde8] sm:$0xf0]  ;;  %3618 = vmatpush.bf16.msrb.mxu1 %v9018_v63  ;;  %v9038_v49 = vor.u32 %v7335_v39, %v6839_v59 }
 0x1d2   : > { %10637 = vst [vmem:[#allocation433_spill] sm:$0xff] %v9027_v52  ;;  %v7318_v13 = vld [vmem:[#allocation2 + $0xe64] sm:$0xf]  ;;  %v6777_v37 = vld [vmem:[#allocation2 + $0xe68] sm:$0xf0]  ;;  %3922 = vmatpush.bf16.msrb.mxu2 %v9020_v36  ;;  %3935 = vmatpush.bf16.msrb.mxu3 %v9023_v1  ;;  %v9042_v19 = vor.u32 %v7302_v41, %v6713_v43 }
 0x1d3   : > { %10638 = vst [vmem:[#allocation434_spill] sm:$0xff] %v9029_v61  ;;  %v7334_v2 = vld [vmem:[#allocation2 + $0xee4] sm:$0xf]  ;;  %v6841_v42 = vld [vmem:[#allocation2 + $0xee8] sm:$0xf0]  ;;  %v9044_v4 = vor.u32 %v7318_v13, %v6777_v37  ;;  %3606 = vmatmul.bf16.vlgmr.msrb.gmra.mxu0 %v8927_v60 }
 0x1d4   : > { %10639 = vst [vmem:[#allocation435_spill] sm:$0xff] %v9032_v40  ;;  %3941 = vmatpush.bf16.msra.mxu0 %v9025_v51  ;;  %v6831_v55 = vld [vmem:[#allocation2 + $0xed0] sm:$0xf]  ;;  %v7333_v47 = vld [vmem:[#allocation2 + $0xed4] sm:$0xf0]  ;;  %v9048_v53 = vor.u32 %v7334_v2, %v6841_v42  ;;  %3619 = vmatmul.bf16.vlgmr.msrb.gmra.mxu1 %v8921_v48 }
 0x1d5   : > { %10640 = vst [vmem:[#allocation436_spill] sm:$0xff] %v9038_v49  ;;  %3954 = vmatpush.bf16.msra.mxu1 %v9027_v52  ;;  %v7300_v18 = vld [vmem:[#allocation2 + $0xdd4] sm:$0xf]  ;;  %v6705_v24 = vld [vmem:[#allocation2 + $0xdd8] sm:$0xf0]  ;;  %3923 = vmatmul.bf16.vlgmr.msrb.gmra.mxu2 %v8925_v11  ;;  %v9053_v41 = vor.u32 %v7333_v47, %v6831_v55 }
 0x1d6   : > { %3967 = vmatpush.bf16.msra.mxu2 %v9029_v61  ;;  %10641 = vst [vmem:[#allocation437_spill] sm:$0xff] %v9042_v19  ;;  %3980 = vmatpush.bf16.msra.mxu3 %v9032_v40  ;;  %v7316_v59 = vld [vmem:[#allocation2 + $0xe54] sm:$0xf]  ;;  %v6769_v39 = vld [vmem:[#allocation2 + $0xe58] sm:$0xf0]  ;;  %v9058_v43 = vor.u32 %v7300_v18, %v6705_v24  ;;  %v2801_v18 = vpop.f32.mrf.mxu0  ;;  %v2814_v24 = vpop.f32.mrf.mxu1 }
 0x1d7   : > { %10642 = vst [vmem:[#allocation438_spill] sm:$0xff] %v9044_v4  ;;  %v7332_v52 = vld [vmem:[#allocation2 + $0xed4] sm:$0xf]  ;;  %v6833_v61 = vld [vmem:[#allocation2 + $0xed8] sm:$0xf0]  ;;  %3936 = vmatmul.bf16.vlgmr.msrb.gmra.mxu3 %v8927_v60  ;;  %v9060_v13 = vor.u32 %v7316_v59, %v6769_v39 }
 0x1d8   : > { %10643 = vst [vmem:[#allocation439_spill] sm:$0xff] %v9048_v53  ;;  %3942 = vmatpush.bf16.msra.mxu0 %v9038_v49  ;;  %v6823_v37 = vld [vmem:[#allocation2 + $0xec0] sm:$0xf]  ;;  %v7331_v2 = vld [vmem:[#allocation2 + $0xec4] sm:$0xf0]  ;;  %v9063_v40 = vor.u32 %v7332_v52, %v6833_v61  ;;  %v2815_v52 = vadd.f32 %v2814_v24, %v2801_v18 }
 0x1d9   : > { %10644 = vst [vmem:[#allocation440_spill] sm:$0xff] %v9053_v41  ;;  %3955 = vmatpush.bf16.msra.mxu1 %v9042_v19  ;;  %v7298_v42 = vld [vmem:[#allocation2 + $0xdc4] sm:$0xf]  ;;  %v6697_v49 = vld [vmem:[#allocation2 + $0xdc8] sm:$0xf0]  ;;  %v9066_v19 = vor.u32 %v7331_v2, %v6823_v37 }
 0x1da   : > { %3968 = vmatpush.bf16.msra.mxu2 %v9044_v4  ;;  %10645 = vst [vmem:[#allocation441_spill] sm:$0xff] %v9058_v43  ;;  %3981 = vmatpush.bf16.msra.mxu3 %v9048_v53  ;;  %v7314_v55 = vld [vmem:[#allocation2 + $0xe44] sm:$0xf]  ;;  %v6761_v47 = vld [vmem:[#allocation2 + $0xe48] sm:$0xf0]  ;;  %v9070_v59 = vor.u32 %v7298_v42, %v6697_v49 }
 0x1db   : > { %10646 = vst [vmem:[#allocation442_spill] sm:$0xff] %v9060_v13  ;;  %v7330_v51 = vld [vmem:[#allocation2 + $0xec4] sm:$0xf]  ;;  %v6825_v1 = vld [vmem:[#allocation2 + $0xec8] sm:$0xf0]  ;;  %v9072_v39 = vor.u32 %v7314_v55, %v6761_v47  ;;  %v2827_v55 = vpop.f32.mrf.mxu2 }
 0x1dc   : > { %10647 = vst [vmem:[#allocation443_spill] sm:$0xff] %v9063_v40  ;;  %3943 = vmatpush.bf16.msra.mxu0 %v9053_v41  ;;  %v6815_v61 = vld [vmem:[#allocation2 + $0xeb0] sm:$0xf]  ;;  %v7329_v53 = vld [vmem:[#allocation2 + $0xeb4] sm:$0xf0]  ;;  %v9075_v36 = vor.u32 %v7330_v51, %v6825_v1  ;;  %v2828_v24 = vadd.f32 %v2827_v55, %v2815_v52 }
 0x1dd   : > { %10648 = vst [vmem:[#allocation444_spill] sm:$0xff] %v9066_v19  ;;  %3956 = vmatpush.bf16.msra.mxu1 %v9058_v43  ;;  %v7296_v4 = vld [vmem:[#allocation2 + $0xdb4] sm:$0xf]  ;;  %v6689_v37 = vld [vmem:[#allocation2 + $0xdb8] sm:$0xf0]  ;;  %v9089_v43 = vpop.f32.mrf.mxu3 }
 0x1de   : > { %3969 = vmatpush.bf16.msra.mxu2 %v9060_v13  ;;  %10649 = vst [vmem:[#allocation445_spill] sm:$0xff] %v9070_v59  ;;  %3982 = vmatpush.bf16.msra.mxu3 %v9063_v40  ;;  %v7312_v2 = vld [vmem:[#allocation2 + $0xe34] sm:$0xf]  ;;  %v6753_v41 = vld [vmem:[#allocation2 + $0xe38] sm:$0xf0]  ;;  %v9078_v13 = vor.u32 %v7329_v53, %v6815_v61  ;;  %v9082_v49 = vor.u32 %v7296_v4, %v6689_v37  ;;  %v2803_v37 = vpop.f32.mrf.mxu0 }
 0x1df   : > { %10650 = vst [vmem:[#allocation446_spill] sm:$0xff] %v9075_v36  ;;  %v7328_v63 = vld [vmem:[#allocation2 + $0xeb4] sm:$0xf]  ;;  %v6817_v54 = vld [vmem:[#allocation2 + $0xeb8] sm:$0xf0]  ;;  %v9084_v42 = vor.u32 %v7312_v2, %v6753_v41  ;;  %v9093_v4 = vadd.f32 %v2828_v24, %v8767_v32  ;;  %v2816_v2 = vpop.f32.mrf.mxu1 }
 0x1e0   : > { %3944 = vmatpush.bf16.msra.mxu0 %v9066_v19  ;;  %10651 = vst [vmem:[#allocation447_spill] sm:$0xff] %v9078_v13  ;;  %v6807_v1 = vld [vmem:[#allocation2 + $0xea0] sm:$0xf]  ;;  %v7327_v51 = vld [vmem:[#allocation2 + $0xea4] sm:$0xf0]  ;;  %v9087_v18 = vor.u32 %v7328_v63, %v6817_v54 }
 0x1e1   : > { %3957 = vmatpush.bf16.msra.mxu1 %v9070_v59  ;;  %10652 = vst [vmem:[#allocation448_spill] sm:$0xff] %v9082_v49  ;;  %v7294_v47 = vld [vmem:[#allocation2 + $0xda4] sm:$0xf]  ;;  %v6681_v19 = vld [vmem:[#allocation2 + $0xda8] sm:$0xf0]  ;;  %v9095_v41 = vor.u32 %v7327_v51, %v6807_v1 }
 0x1e2   : > { %3970 = vmatpush.bf16.msra.mxu2 %v9072_v39  ;;  %10653 = vst [vmem:[#allocation449_spill] sm:$0xff] %v9084_v42  ;;  %3983 = vmatpush.bf16.msra.mxu3 %v9075_v36  ;;  %v7310_v53 = vld [vmem:[#allocation2 + $0xe24] sm:$0xf]  ;;  %v6745_v61 = vld [vmem:[#allocation2 + $0xe28] sm:$0xf0]  ;;  %v9099_v54 = vor.u32 %v7294_v47, %v6681_v19 }
 0x1e3   : > { %10654 = vst [vmem:[#allocation450_spill] sm:$0xff] %v9087_v18  ;;  %v7326_v40 = vld [vmem:[#allocation2 + $0xea4] sm:$0xf]  ;;  %v6809_v59 = vld [vmem:[#allocation2 + $0xea8] sm:$0xf0]  ;;  %v9101_v63 = vor.u32 %v7310_v53, %v6745_v61  ;;  %v2829_v61 = vpop.f32.mrf.mxu2 }
 0x1e4   : > { %3945 = vmatpush.bf16.msra.mxu0 %v9078_v13  ;;  %10655 = vst [vmem:[#allocation451_spill] sm:$0xff] %v9095_v41  ;;  %v6799_v52 = vld [vmem:[#allocation2 + $0xe90] sm:$0xf]  ;;  %v7325_v55 = vld [vmem:[#allocation2 + $0xe94] sm:$0xf0]  ;;  %v9104_v13 = vor.u32 %v7326_v40, %v6809_v59 }
 0x1e5   : > { %3958 = vmatpush.bf16.msra.mxu1 %v9082_v49  ;;  %10656 = vst [vmem:[#allocation452_spill] sm:$0xff] %v9099_v54  ;;  %v7292_v36 = vld [vmem:[#allocation2 + $0xd94] sm:$0xf]  ;;  %v6673_v32 = vld [vmem:[#allocation2 + $0xd98] sm:$0xf0]  ;;  %v9107_v2 = vor.u32 %v7325_v55, %v6799_v52 }
 0x1e6   : > { %3971 = vmatpush.bf16.msra.mxu2 %v9084_v42  ;;  %3984 = vmatpush.bf16.msra.mxu3 %v9087_v18  ;;  %v7308_v1 = vld [vmem:[#allocation2 + $0xe14] sm:$0xf]  ;;  %v6737_v51 = vld [vmem:[#allocation2 + $0xe18] sm:$0xf0]  ;;  %v9111_v19 = vor.u32 %v7292_v36, %v6673_v32  ;;  %v6791_v53 = vld [vmem:[#allocation2 + $0xe80] sm:$0xf] }
 0x1e7   : > { %v7324_v24 = vld [vmem:[#allocation2 + $0xe94] sm:$0xf]  ;;  %v6801_v37 = vld [vmem:[#allocation2 + $0xe98] sm:$0xf0]  ;;  %v9113_v47 = vor.u32 %v7308_v1, %v6737_v51  ;;  %v7323_v40 = vld [vmem:[#allocation2 + $0xe84] sm:$0xf0] }
 0x1e8   : > { %3946 = vmatpush.bf16.msra.mxu0 %v9095_v41  ;;  %v7290_v59 = vld [vmem:[#allocation2 + $0xd84] sm:$0xf]  ;;  %v9116_v18 = vor.u32 %v7324_v24, %v6801_v37  ;;  %v6665_v42 = vld [vmem:[#allocation2 + $0xd88] sm:$0xf0]  ;;  %v9119_v36 = vor.u32 %v7323_v40, %v6791_v53  ;;  %v10676_v37 = vld [vmem:[#allocation27_spill] sm:$0xff] }
 0x1e9   : > { %3959 = vmatpush.bf16.msra.mxu1 %v9099_v54  ;;  %v7306_v41 = vld [vmem:[#allocation2 + $0xe04] sm:$0xf]  ;;  %v6729_v52 = vld [vmem:[#allocation2 + $0xe08] sm:$0xf0]  ;;  %v2842_v54 = vpop.f32.mrf.mxu3  ;;  %v9123_v32 = vor.u32 %v7290_v59, %v6665_v42  ;;  %v10674_v42 = vld [vmem:[#allocation23_spill] sm:$0xff] }
 0x1ea   : > { %3972 = vmatpush.bf16.msra.mxu2 %v9101_v63  ;;  %3985 = vmatpush.bf16.msra.mxu3 %v9104_v13  ;;  %v7322_v55 = vld [vmem:[#allocation2 + $0xe84] sm:$0xf]  ;;  %v6793_v49 = vld [vmem:[#allocation2 + $0xe88] sm:$0xf0]  ;;  %v9125_v1 = vor.u32 %v7306_v41, %v6729_v52  ;;  %v10679_v59 = vld [vmem:[#allocation30_spill] sm:$0xff] }
 0x1eb   : > { %v9128_v51 = vor.u32 %v7322_v55, %v6793_v49  ;;  %v10673_v49 = vld [vmem:[#allocation22_spill] sm:$0xff]  ;;  %v10675_v54 = vld [vmem:[#allocation25_spill] sm:$0xff]  ;;  %v10677_v53 = vld [vmem:[#allocation28_spill] sm:$0xff] }
 0x1ec   : > { %3947 = vmatpush.bf16.msra.mxu0 %v9107_v2  ;;  %v10678_v40 = vld [vmem:[#allocation29_spill] sm:$0xff] }
 0x1ed   : > { %3960 = vmatpush.bf16.msra.mxu1 %v9111_v19 }
 0x1ee   : > { %3973 = vmatpush.bf16.msra.mxu2 %v9113_v47  ;;  %3986 = vmatpush.bf16.msra.mxu3 %v9116_v18 }
 0x1f0   : > { %3948 = vmatpush.bf16.msra.mxu0 %v9119_v36 }
 0x1f1   : > { %3961 = vmatpush.bf16.msra.mxu1 %v9123_v32 }
 0x1f2   : > { %3974 = vmatpush.bf16.msra.mxu2 %v9125_v1  ;;  %3987 = vmatpush.bf16.msra.mxu3 %v9128_v51 }
 0x1f3   : > { %3949 = vmatmul.bf16.vlgmr.msra.gmra.mxu0 %v8921_v48 }
 0x1f4   : > { %3995 = vmatpush.bf16.msrb.mxu0 %v7505_v3  ;;  %3962 = vmatmul.bf16.vlgmr.msra.gmra.mxu1 %v8925_v11  ;;  %v2853_v3 = vpop.f32.mrf.mxu0 }
 0x1f5   : > { %4008 = vmatpush.bf16.msrb.mxu1 %v7507_v7  ;;  %3975 = vmatmul.bf16.vlgmr.msra.gmra.mxu2 %v8927_v60  ;;  %v2854_v7 = vadd.f32 %v2853_v3, %v9089_v43 }
 0x1f6   : > { %4021 = vmatpush.bf16.msrb.mxu2 %v7509_v8  ;;  %4034 = vmatpush.bf16.msrb.mxu3 %v7512_v12  ;;  %v2866_v8 = vpop.f32.mrf.mxu1 }
 0x1f7   : > { %3988 = vmatmul.bf16.vlgmr.msra.gmra.mxu3 %v8921_v48  ;;  %v2867_v12 = vadd.f32 %v2866_v8, %v2854_v7  ;;  %v10680_v7 = vld [vmem:[#allocation31_spill] sm:$0xff]  ;;  %v10681_v8 = vld [vmem:[#allocation32_spill] sm:$0xff] }
 0x1f8   : > { %3996 = vmatpush.bf16.msrb.mxu0 %v7516_v16 }
 0x1f9   : > { %4009 = vmatpush.bf16.msrb.mxu1 %v7518_v17  ;;  %v9153_v16 = vadd.f32 %v2867_v12, %v8859_v31  ;;  %v3170_v17 = vpop.f32.mrf.mxu2  ;;  %v10672_v31 = vld [vmem:[#allocation21_spill] sm:$0xff] }
 0x1fa   : > { %4022 = vmatpush.bf16.msrb.mxu2 %v7521_v21  ;;  %4035 = vmatpush.bf16.msrb.mxu3 %v7523_v25  ;;  %v3183_v25 = vpop.f32.mrf.mxu3  ;;  %v10682_v12 = vld [vmem:[#allocation33_spill] sm:$0xff] }
 0x1fc   : > { %3997 = vmatpush.bf16.msrb.mxu0 %v7526_v29  ;;  %v2855_v21 = vpop.f32.mrf.mxu0  ;;  %v3184_v29 = vadd.f32 %v3183_v25, %v3170_v17 }
 0x1fd   : > { %4010 = vmatpush.bf16.msrb.mxu1 %v7530_v33  ;;  %v10683_v21 = vld [vmem:[#allocation34_spill] sm:$0xff] }
 0x1fe   : > { %4023 = vmatpush.bf16.msrb.mxu2 %v7532_v34  ;;  %4036 = vmatpush.bf16.msrb.mxu3 %v7535_v38  ;;  %v2868_v33 = vpop.f32.mrf.mxu1 }
 0x1ff   : > { %v10685_v33 = vld [vmem:[#allocation36_spill] sm:$0xff] }
 0x200   : > { %3998 = vmatpush.bf16.msrb.mxu0 %v7538_v44  ;;  %v10657_v44 = vld [vmem:[#allocation8_spill] sm:$0xff] }
 0x201   : > { %4011 = vmatpush.bf16.msrb.mxu1 %v7542_v45  ;;  %v3172_v34 = vpop.f32.mrf.mxu2  ;;  %v10658_v45 = vld [vmem:[#allocation9_spill] sm:$0xff] }
 0x202   : > { %4024 = vmatpush.bf16.msrb.mxu2 %v7544_v46  ;;  %4037 = vmatpush.bf16.msrb.mxu3 %v7547_v50  ;;  %v3185_v38 = vpop.f32.mrf.mxu3  ;;  %v10659_v46 = vld [vmem:[#allocation10_spill] sm:$0xff]  ;;  %v10660_v50 = vld [vmem:[#allocation11_spill] sm:$0xff]  ;;  %v10686_v34 = vld [vmem:[#allocation37_spill] sm:$0xff] }
 0x203   : > { %v10687_v38 = vld [vmem:[#allocation38_spill] sm:$0xff] }
 0x204   : > { %3999 = vmatpush.bf16.msrb.mxu0 %v7550_v56  ;;  %v10661_v56 = vld [vmem:[#allocation12_spill] sm:$0xff] }
 0x205   : > { %4012 = vmatpush.bf16.msrb.mxu1 %v7555_v57  ;;  %v10662_v57 = vld [vmem:[#allocation13_spill] sm:$0xff] }
 0x206   : > { %4025 = vmatpush.bf16.msrb.mxu2 %v7557_v58  ;;  %4038 = vmatpush.bf16.msrb.mxu3 %v7560_v62  ;;  %v10663_v58 = vld [vmem:[#allocation14_spill] sm:$0xff]  ;;  %v10664_v62 = vld [vmem:[#allocation15_spill] sm:$0xff] }
 0x208   : > { %4000 = vmatpush.bf16.msrb.mxu0 %v7563_v5  ;;  %v10665_v5 = vld [vmem:[#allocation211_spill] sm:$0xff] }
 0x209   : > { %4013 = vmatpush.bf16.msrb.mxu1 %v7572_v6  ;;  %v10666_v6 = vld [vmem:[#allocation212_spill] sm:$0xff] }
 0x20a   : > { %4026 = vmatpush.bf16.msrb.mxu2 %v7574_v9  ;;  %4039 = vmatpush.bf16.msrb.mxu3 %v7577_v14  ;;  %v10667_v9 = vld [vmem:[#allocation16_spill] sm:$0xff]  ;;  %v10668_v14 = vld [vmem:[#allocation213_spill] sm:$0xff] }
 0x20c   : > { %4001 = vmatpush.bf16.msrb.mxu0 %v7580_v23  ;;  %v10669_v23 = vld [vmem:[#allocation17_spill] sm:$0xff] }
 0x20d   : > { %4014 = vmatpush.bf16.msrb.mxu1 %v7585_v27  ;;  %v10670_v27 = vld [vmem:[#allocation18_spill] sm:$0xff] }
 0x20e   : > { %4027 = vmatpush.bf16.msrb.mxu2 %v7587_v28  ;;  %4040 = vmatpush.bf16.msrb.mxu3 %v7590_v35  ;;  %v10671_v28 = vld [vmem:[#allocation19_spill] sm:$0xff] }
 0x210   : > { %4002 = vmatpush.bf16.msrb.mxu0 %v10657_v44  ;;  %v3196_v35 = vpop.f32.mrf.mxu0 }
 0x211   : > { %4015 = vmatpush.bf16.msrb.mxu1 %v10658_v45  ;;  %v3197_v43 = vadd.f32 %v3196_v35, %v3184_v29  ;;  %v3209_v41 = vpop.f32.mrf.mxu1  ;;  %v10684_v29 = vld [vmem:[#allocation35_spill] sm:$0xff]  ;;  %v10699_v35 = vld [vmem:[#allocation50_spill] sm:$0xff] }
 0x212   : > { %4028 = vmatpush.bf16.msrb.mxu2 %v10659_v46  ;;  %4041 = vmatpush.bf16.msrb.mxu3 %v10660_v50  ;;  %v10688_v46 = vld [vmem:[#allocation39_spill] sm:$0xff]  ;;  %v10689_v50 = vld [vmem:[#allocation40_spill] sm:$0xff] }
 0x213   : > { %4003 = vmatmul.bf16.vlgmr.msrb.gmra.mxu0 %v10666_v6  ;;  %v9191_v24 = vadd.f32 %v3197_v43, %v8970_v0  ;;  %v10701_v43 = vld [vmem:[#allocation26_spill] sm:$0xff] }
 0x214   : > { %4047 = vmatpush.bf16.msra.mxu0 %v10661_v56  ;;  %4016 = vmatmul.bf16.vlgmr.msrb.gmra.mxu1 %v10668_v14  ;;  %v10690_v56 = vld [vmem:[#allocation41_spill] sm:$0xff] }
 0x215   : > { %4060 = vmatpush.bf16.msra.mxu1 %v10662_v57  ;;  %4029 = vmatmul.bf16.vlgmr.msrb.gmra.mxu2 %v10665_v5  ;;  %v10691_v57 = vld [vmem:[#allocation42_spill] sm:$0xff] }
 0x216   : > { %4073 = vmatpush.bf16.msra.mxu2 %v10663_v58  ;;  %4086 = vmatpush.bf16.msra.mxu3 %v10664_v62  ;;  %v10693_v58 = vld [vmem:[#allocation44_spill] sm:$0xff]  ;;  %v10694_v62 = vld [vmem:[#allocation45_spill] sm:$0xff] }
 0x217   : > { %4042 = vmatmul.bf16.vlgmr.msrb.gmra.mxu3 %v10666_v6 }
 0x218   : > { %4048 = vmatpush.bf16.msra.mxu0 %v10667_v9  ;;  %v3222_v61 = vpop.f32.mrf.mxu2  ;;  %v3198_v3 = vpop.f32.mrf.mxu0  ;;  %v10695_v9 = vld [vmem:[#allocation46_spill] sm:$0xff] }
 0x219   : > { %4061 = vmatpush.bf16.msra.mxu1 %v10669_v23  ;;  %v3223_v55 = vadd.f32 %v3222_v61, %v3209_v41  ;;  %v3211_v17 = vpop.f32.mrf.mxu1  ;;  %v10696_v23 = vld [vmem:[#allocation47_spill] sm:$0xff]  ;;  %v10704_v41 = vld [vmem:[#allocation53_spill] sm:$0xff] }
 0x21a   : > { %4074 = vmatpush.bf16.msra.mxu2 %v10670_v27  ;;  %4087 = vmatpush.bf16.msra.mxu3 %v10671_v28  ;;  %v3235_v52 = vpop.f32.mrf.mxu3  ;;  %v10697_v27 = vld [vmem:[#allocation48_spill] sm:$0xff]  ;;  %v10698_v28 = vld [vmem:[#allocation49_spill] sm:$0xff]  ;;  %v10710_v3 = vld [vmem:[#allocation59_spill] sm:$0xff] }
 0x21b   : > { %v3236_v0 = vadd.f32 %v3235_v52, %v3223_v55  ;;  %v10708_v61 = vld [vmem:[#allocation57_spill] sm:$0xff]  ;;  %v10709_v55 = vld [vmem:[#allocation58_spill] sm:$0xff] }
 0x21c   : > { %4049 = vmatpush.bf16.msra.mxu0 %v10672_v31  ;;  %v10700_v31 = vld [vmem:[#allocation24_spill] sm:$0xff] }
 0x21d   : > { %4062 = vmatpush.bf16.msra.mxu1 %v10673_v49  ;;  %v9202_v25 = vadd.f32 %v3236_v0, %v8999_v30  ;;  %v10692_v30 = vld [vmem:[#allocation43_spill] sm:$0xff]  ;;  %v10713_v0 = vld [vmem:[#allocation62_spill] sm:$0xff] }
 0x21e   : > { %4075 = vmatpush.bf16.msra.mxu2 %v10674_v42  ;;  %4088 = vmatpush.bf16.msra.mxu3 %v10675_v54  ;;  %v10702_v49 = vld [vmem:[#allocation51_spill] sm:$0xff]  ;;  %v10703_v42 = vld [vmem:[#allocation52_spill] sm:$0xff]  ;;  %v10705_v54 = vld [vmem:[#allocation54_spill] sm:$0xff] }
 0x220   : > { %4050 = vmatpush.bf16.msra.mxu0 %v10676_v37  ;;  %v3224_v44 = vpop.f32.mrf.mxu2  ;;  %v10706_v37 = vld [vmem:[#allocation55_spill] sm:$0xff] }
 0x221   : > { %4063 = vmatpush.bf16.msra.mxu1 %v10677_v53  ;;  %v10715_v44 = vld [vmem:[#allocation64_spill] sm:$0xff] }
 0x222   : > { %4076 = vmatpush.bf16.msra.mxu2 %v10678_v40  ;;  %4089 = vmatpush.bf16.msra.mxu3 %v10679_v59  ;;  %v3237_v45 = vpop.f32.mrf.mxu3  ;;  %v10707_v59 = vld [vmem:[#allocation56_spill] sm:$0xff] }
 0x223   : > { %v10716_v45 = vld [vmem:[#allocation65_spill] sm:$0xff] }
 0x224   : > { %4051 = vmatpush.bf16.msra.mxu0 %v10680_v7  ;;  %v10711_v7 = vld [vmem:[#allocation60_spill] sm:$0xff] }
 0x225   : > { %4064 = vmatpush.bf16.msra.mxu1 %v10681_v8  ;;  %v10712_v8 = vld [vmem:[#allocation61_spill] sm:$0xff] }
 0x226   : > { %4077 = vmatpush.bf16.msra.mxu2 %v10682_v12  ;;  %4090 = vmatpush.bf16.msra.mxu3 %v10683_v21 }
 0x228   : > { %4052 = vmatpush.bf16.msra.mxu0 %v10684_v29  ;;  %v10714_v29 = vld [vmem:[#allocation63_spill] sm:$0xff] }
 0x229   : > { %4065 = vmatpush.bf16.msra.mxu1 %v10685_v33 }
 0x22a   : > { %4078 = vmatpush.bf16.msra.mxu2 %v10686_v34  ;;  %4091 = vmatpush.bf16.msra.mxu3 %v10687_v38 }
 0x22c   : > { %4053 = vmatpush.bf16.msra.mxu0 %v10688_v46  ;;  %v10717_v46 = vld [vmem:[#allocation66_spill] sm:$0xff] }
 0x22d   : > { %4066 = vmatpush.bf16.msra.mxu1 %v10689_v50  ;;  %v10718_v50 = vld [vmem:[#allocation67_spill] sm:$0xff] }
 0x22e   : > { %4079 = vmatpush.bf16.msra.mxu2 %v10690_v56  ;;  %4092 = vmatpush.bf16.msra.mxu3 %v10691_v57  ;;  %v10719_v56 = vld [vmem:[#allocation68_spill] sm:$0xff]  ;;  %v10720_v57 = vld [vmem:[#allocation69_spill] sm:$0xff] }
 0x230   : > { %4054 = vmatpush.bf16.msra.mxu0 %v10692_v30  ;;  %v3555_v53 = vpop.f32.mrf.mxu0 }
 0x231   : > { %4067 = vmatpush.bf16.msra.mxu1 %v10693_v58  ;;  %v3568_v40 = vpop.f32.mrf.mxu1  ;;  %v10721_v58 = vld [vmem:[#allocation70_spill] sm:$0xff] }
 0x232   : > { %4080 = vmatpush.bf16.msra.mxu2 %v10694_v62  ;;  %4093 = vmatpush.bf16.msra.mxu3 %v10695_v9  ;;  %v3569_v52 = vadd.f32 %v3568_v40, %v3555_v53  ;;  %v10723_v9 = vld [vmem:[#allocation72_spill] sm:$0xff]  ;;  %v10733_v53 = vld [vmem:[#allocation82_spill] sm:$0xff] }
 0x233   : > { %4055 = vmatmul.bf16.vlgmr.msra.gmra.mxu0 %v10668_v14  ;;  %v10734_v40 = vld [vmem:[#allocation20_spill] sm:$0xff] }
 0x234   : > { %4099 = vmatpush.bf16.msrb.mxu0 %v10696_v23  ;;  %4068 = vmatmul.bf16.vlgmr.msra.gmra.mxu1 %v10665_v5  ;;  %v10724_v23 = vld [vmem:[#allocation73_spill] sm:$0xff] }
 0x235   : > { %4112 = vmatpush.bf16.msrb.mxu1 %v10697_v27  ;;  %4081 = vmatmul.bf16.vlgmr.msra.gmra.mxu2 %v10700_v31  ;;  %v10725_v27 = vld [vmem:[#allocation74_spill] sm:$0xff] }
 0x236   : > { %4125 = vmatpush.bf16.msrb.mxu2 %v10698_v28  ;;  %4138 = vmatpush.bf16.msrb.mxu3 %v10699_v35  ;;  %v10726_v28 = vld [vmem:[#allocation75_spill] sm:$0xff]  ;;  %v10727_v35 = vld [vmem:[#allocation76_spill] sm:$0xff] }
 0x237   : > { %4094 = vmatmul.bf16.vlgmr.msra.gmra.mxu3 %v10701_v43 }
 0x238   : > { %4100 = vmatpush.bf16.msrb.mxu0 %v10702_v49  ;;  %v3581_v12 = vpop.f32.mrf.mxu2  ;;  %v3557_v34 = vpop.f32.mrf.mxu0  ;;  %v10728_v49 = vld [vmem:[#allocation77_spill] sm:$0xff] }
 0x239   : > { %4113 = vmatpush.bf16.msrb.mxu1 %v10703_v42  ;;  %v3582_v17 = vadd.f32 %v3581_v12, %v3569_v52  ;;  %v3570_v38 = vpop.f32.mrf.mxu1  ;;  %v10729_v42 = vld [vmem:[#allocation78_spill] sm:$0xff]  ;;  %v10737_v52 = vld [vmem:[#allocation85_spill] sm:$0xff] }
 0x23a   : > { %4126 = vmatpush.bf16.msrb.mxu2 %v10704_v41  ;;  %4139 = vmatpush.bf16.msrb.mxu3 %v10705_v54  ;;  %v3594_v21 = vpop.f32.mrf.mxu3  ;;  %v10730_v41 = vld [vmem:[#allocation79_spill] sm:$0xff]  ;;  %v10731_v54 = vld [vmem:[#allocation80_spill] sm:$0xff] }
 0x23b   : > { %v9238_v33 = vadd.f32 %v3582_v17, %v9093_v4  ;;  %v10722_v4 = vld [vmem:[#allocation71_spill] sm:$0xff]  ;;  %v10741_v17 = vld [vmem:[#allocation89_spill] sm:$0xff] }
 0x23c   : > { %4101 = vmatpush.bf16.msrb.mxu0 %v10706_v37  ;;  %v10732_v37 = vld [vmem:[#allocation81_spill] sm:$0xff]  ;;  %v10743_v38 = vld [vmem:[#allocation91_spill] sm:$0xff] }
 0x23d   : > { %4114 = vmatpush.bf16.msrb.mxu1 %v10707_v59  ;;  %v10735_v59 = vld [vmem:[#allocation83_spill] sm:$0xff] }
 0x23e   : > { %4127 = vmatpush.bf16.msrb.mxu2 %v10708_v61  ;;  %4140 = vmatpush.bf16.msrb.mxu3 %v10709_v55  ;;  %v10736_v61 = vld [vmem:[#allocation84_spill] sm:$0xff]  ;;  %v10738_v55 = vld [vmem:[#allocation86_spill] sm:$0xff] }
 0x240   : > { %4102 = vmatpush.bf16.msrb.mxu0 %v10710_v3  ;;  %v3583_v30 = vpop.f32.mrf.mxu2 }
 0x241   : > { %4115 = vmatpush.bf16.msrb.mxu1 %v10711_v7  ;;  %v10739_v7 = vld [vmem:[#allocation87_spill] sm:$0xff] }
 0x242   : > { %4128 = vmatpush.bf16.msrb.mxu2 %v10712_v8  ;;  %4141 = vmatpush.bf16.msrb.mxu3 %v10713_v0  ;;  %v3596_v62 = vpop.f32.mrf.mxu3  ;;  %v10740_v0 = vld [vmem:[#allocation88_spill] sm:$0xff]  ;;  %v10747_v30 = vld [vmem:[#allocation95_spill] sm:$0xff] }
 0x244   : > { %4103 = vmatpush.bf16.msrb.mxu0 %v10714_v29  ;;  %v10742_v29 = vld [vmem:[#allocation90_spill] sm:$0xff] }
 0x245   : > { %4116 = vmatpush.bf16.msrb.mxu1 %v10715_v44 }
 0x246   : > { %4129 = vmatpush.bf16.msrb.mxu2 %v10716_v45  ;;  %4142 = vmatpush.bf16.msrb.mxu3 %v10717_v46  ;;  %v10744_v45 = vld [vmem:[#allocation92_spill] sm:$0xff]  ;;  %v10745_v46 = vld [vmem:[#allocation93_spill] sm:$0xff] }
 0x248   : > { %4104 = vmatpush.bf16.msrb.mxu0 %v10718_v50  ;;  %v10746_v50 = vld [vmem:[#allocation94_spill] sm:$0xff] }
 0x249   : > { %4117 = vmatpush.bf16.msrb.mxu1 %v10719_v56 }
 0x24a   : > { %4130 = vmatpush.bf16.msrb.mxu2 %v10720_v57  ;;  %4143 = vmatpush.bf16.msrb.mxu3 %v10721_v58 }
 0x24c   : > { %4105 = vmatpush.bf16.msrb.mxu0 %v10722_v4  ;;  %v10748_v4 = vld [vmem:[#allocation96_spill] sm:$0xff] }
 0x24d   : > { %4118 = vmatpush.bf16.msrb.mxu1 %v10723_v9  ;;  %v10749_v9 = vld [vmem:[#allocation97_spill] sm:$0xff] }
 0x24e   : > { %4131 = vmatpush.bf16.msrb.mxu2 %v10724_v23  ;;  %4144 = vmatpush.bf16.msrb.mxu3 %v10725_v27  ;;  %v10750_v23 = vld [vmem:[#allocation98_spill] sm:$0xff]  ;;  %v10752_v27 = vld [vmem:[#allocation100_spill] sm:$0xff] }
 0x250   : > { %4106 = vmatpush.bf16.msrb.mxu0 %v10726_v28  ;;  %v3607_v3 = vpop.f32.mrf.mxu0  ;;  %v10753_v28 = vld [vmem:[#allocation101_spill] sm:$0xff] }
 0x251   : > { %4119 = vmatpush.bf16.msrb.mxu1 %v10727_v35  ;;  %v3608_v8 = vadd.f32 %v3607_v3, %v3594_v21  ;;  %v3620_v12 = vpop.f32.mrf.mxu1  ;;  %v10754_v35 = vld [vmem:[#allocation102_spill] sm:$0xff]  ;;  %v10763_v3 = vld [vmem:[#allocation111_spill] sm:$0xff] }
 0x252   : > { %4132 = vmatpush.bf16.msrb.mxu2 %v10728_v49  ;;  %4145 = vmatpush.bf16.msrb.mxu3 %v10729_v42 }
 0x253   : > { %4107 = vmatmul.bf16.vlgmr.msrb.gmra.mxu0 %v10734_v40  ;;  %v3621_v34 = vadd.f32 %v3620_v12, %v3608_v8  ;;  %v10765_v8 = vld [vmem:[#allocation113_spill] sm:$0xff]  ;;  %v10766_v12 = vld [vmem:[#allocation114_spill] sm:$0xff] }
 0x254   : > { %4151 = vmatpush.bf16.msra.mxu0 %v10730_v41  ;;  %4120 = vmatmul.bf16.vlgmr.msrb.gmra.mxu1 %v10700_v31  ;;  %v10755_v41 = vld [vmem:[#allocation103_spill] sm:$0xff] }
 0x255   : > { %4164 = vmatpush.bf16.msra.mxu1 %v10731_v54  ;;  %4133 = vmatmul.bf16.vlgmr.msrb.gmra.mxu2 %v10701_v43  ;;  %v9273_v44 = vadd.f32 %v3621_v34, %v9153_v16  ;;  %v10751_v16 = vld [vmem:[#allocation99_spill] sm:$0xff]  ;;  %v10756_v54 = vld [vmem:[#allocation104_spill] sm:$0xff]  ;;  %v10769_v34 = vld [vmem:[#allocation117_spill] sm:$0xff] }
 0x256   : > { %4177 = vmatpush.bf16.msra.mxu2 %v10732_v37  ;;  %4190 = vmatpush.bf16.msra.mxu3 %v10733_v53  ;;  %v10757_v37 = vld [vmem:[#allocation105_spill] sm:$0xff]  ;;  %v10758_v53 = vld [vmem:[#allocation106_spill] sm:$0xff] }
 0x257   : > { %4146 = vmatmul.bf16.vlgmr.msrb.gmra.mxu3 %v10734_v40 }
 0x258   : > { %4152 = vmatpush.bf16.msra.mxu0 %v10735_v59  ;;  %v3924_v21 = vpop.f32.mrf.mxu2  ;;  %v3609_v56 = vpop.f32.mrf.mxu0  ;;  %v10759_v59 = vld [vmem:[#allocation107_spill] sm:$0xff] }
 0x259   : > { %4165 = vmatpush.bf16.msra.mxu1 %v10736_v61  ;;  %v3622_v62 = vpop.f32.mrf.mxu1  ;;  %v10760_v61 = vld [vmem:[#allocation108_spill] sm:$0xff] }
 0x25a   : > { %4178 = vmatpush.bf16.msra.mxu2 %v10737_v52  ;;  %4191 = vmatpush.bf16.msra.mxu3 %v10738_v55  ;;  %v3937_v57 = vpop.f32.mrf.mxu3  ;;  %v10761_v52 = vld [vmem:[#allocation109_spill] sm:$0xff]  ;;  %v10762_v55 = vld [vmem:[#allocation110_spill] sm:$0xff]  ;;  %v10772_v56 = vld [vmem:[#allocation120_spill] sm:$0xff] }
 0x25b   : > { %v3938_v58 = vadd.f32 %v3937_v57, %v3924_v21  ;;  %v10773_v57 = vld [vmem:[#allocation121_spill] sm:$0xff]  ;;  %v10774_v62 = vld [vmem:[#allocation122_spill] sm:$0xff] }
 0x25c   : > { %4153 = vmatpush.bf16.msra.mxu0 %v10739_v7  ;;  %v10764_v7 = vld [vmem:[#allocation112_spill] sm:$0xff] }
 0x25d   : > { %4166 = vmatpush.bf16.msra.mxu1 %v10740_v0  ;;  %v4803_v0 = vld [vmem:[#allocation4] sm:$0x3] }
 0x25e   : > { %4179 = vmatpush.bf16.msra.mxu2 %v10741_v17  ;;  %4192 = vmatpush.bf16.msra.mxu3 %v10742_v29  ;;  %v10767_v17 = vld [vmem:[#allocation115_spill] sm:$0xff]  ;;  %v10768_v29 = vld [vmem:[#allocation116_spill] sm:$0xff] }
 0x260   : > { %4154 = vmatpush.bf16.msra.mxu0 %v10743_v38  ;;  %v3926_v49 = vpop.f32.mrf.mxu2  ;;  %v9305_v38 = vperm.slane %v4803_v0, 0 }
 0x261   : > { %4167 = vmatpush.bf16.msra.mxu1 %v10744_v45  ;;  %v10770_v45 = vld [vmem:[#allocation118_spill] sm:$0xff] }
 0x262   : > { %4180 = vmatpush.bf16.msra.mxu2 %v10745_v46  ;;  %4193 = vmatpush.bf16.msra.mxu3 %v10746_v50  ;;  %v3939_v42 = vpop.f32.mrf.mxu3  ;;  %v10771_v50 = vld [vmem:[#allocation119_spill] sm:$0xff] }
 0x264   : > { %4155 = vmatpush.bf16.msra.mxu0 %v10747_v30  ;;  %v4809_v30 = vadd.f32 %v9305_v38, %v9238_v33 }
 0x265   : > { %4168 = vmatpush.bf16.msra.mxu1 %v10748_v4 }
 0x266   : > { %4181 = vmatpush.bf16.msra.mxu2 %v10749_v9  ;;  %4194 = vmatpush.bf16.msra.mxu3 %v10750_v23  ;;  %v10775_v23 = vld [vmem:[#allocation123_spill] sm:$0xff] }
 0x268   : > { %4156 = vmatpush.bf16.msra.mxu0 %v10751_v16  ;;  %v10776_v16 = vld [vmem:[#allocation124_spill] sm:$0xff] }
 0x269   : > { %4169 = vmatpush.bf16.msra.mxu1 %v10752_v27  ;;  %v10777_v27 = vld [vmem:[#allocation125_spill] sm:$0xff] }
 0x26a   : > { %4182 = vmatpush.bf16.msra.mxu2 %v10753_v28  ;;  %4195 = vmatpush.bf16.msra.mxu3 %v10754_v35  ;;  %v10778_v35 = vld [vmem:[#allocation126_spill] sm:$0xff] }
 0x26c   : > { %4157 = vmatpush.bf16.msra.mxu0 %v10755_v41  ;;  %v9320_v41 = vperm.slane %v4803_v0, 1  ;;  %v10784_v0 = vld [vmem:[#allocation132_spill] sm:$0xff] }
 0x26d   : > { %4170 = vmatpush.bf16.msra.mxu1 %v10756_v54 }
 0x26e   : > { %4183 = vmatpush.bf16.msra.mxu2 %v10757_v37  ;;  %4196 = vmatpush.bf16.msra.mxu3 %v10758_v53  ;;  %v10780_v53 = vld [vmem:[#allocation128_spill] sm:$0xff] }
 0x270   : > { %4158 = vmatpush.bf16.msra.mxu0 %v10759_v59  ;;  %v3950_v46 = vpop.f32.mrf.mxu0  ;;  %v10781_v59 = vld [vmem:[#allocation129_spill] sm:$0xff] }
 0x271   : > { %4171 = vmatpush.bf16.msra.mxu1 %v10760_v61  ;;  %v3951_v21 = vadd.f32 %v3950_v46, %v3938_v58  ;;  %v4811_v58 = vmax.f32 %v4809_v30, 0.0  ;;  %v10792_v30 = vld [vmem:[#allocation140_spill] sm:$0xff] }
 0x272   : > { %4184 = vmatpush.bf16.msra.mxu2 %v10761_v52  ;;  %4197 = vmatpush.bf16.msra.mxu3 %v10762_v55  ;;  %v10782_v55 = vld [vmem:[#allocation130_spill] sm:$0xff] }
 0x273   : > { %4159 = vmatmul.bf16.vlgmr.msra.gmra.mxu0 %v10666_v6  ;;  %v3993_v4 = vadd.f32 %v3951_v21, %v9191_v24  ;;  %v10779_v24 = vld [vmem:[#allocation127_spill] sm:$0xff] }
 0x274   : > { %4203 = vmatpush.bf16.msrb.mxu0 %v10763_v3  ;;  %4172 = vmatmul.bf16.vlgmr.msra.gmra.mxu1 %v10668_v14  ;;  %v4810_v3 = vadd.f32 %v9320_v41, %v9273_v44  ;;  %v10787_v21 = vld [vmem:[#allocation135_spill] sm:$0xff]  ;;  %v10788_v44 = vld [vmem:[#allocation136_spill] sm:$0xff] }
 0x275   : > { %4216 = vmatpush.bf16.msrb.mxu1 %v10764_v7  ;;  %4185 = vmatmul.bf16.vlgmr.msra.gmra.mxu2 %v10665_v5  ;;  %v4813_v9 = vadd.f32 %v9305_v38, %v3993_v4  ;;  %v10794_v4 = vld [vmem:[#allocation142_spill] sm:$0xff] }
 0x276   : > { %4229 = vmatpush.bf16.msrb.mxu2 %v10765_v8  ;;  %4242 = vmatpush.bf16.msrb.mxu3 %v10766_v12  ;;  %v10783_v8 = vld [vmem:[#allocation131_spill] sm:$0xff]  ;;  %v4812_v46 = vmax.f32 %v4810_v3, 0.0  ;;  %v10810_v3 = vld [vmem:[#allocation158_spill] sm:$0xff] }
 0x277   : > { %4198 = vmatmul.bf16.vlgmr.msra.gmra.mxu3 %v10666_v6  ;;  %v3963_v6 = vpop.f32.mrf.mxu1  ;;  %v4815_v28 = vmax.f32 %v4813_v9, 0.0  ;;  %v10795_v9 = vld [vmem:[#allocation143_spill] sm:$0xff] }
 0x278   : > { %4204 = vmatpush.bf16.msrb.mxu0 %v10767_v17  ;;  %v3976_v49 = vpop.f32.mrf.mxu2  ;;  %v3952_v54 = vpop.f32.mrf.mxu0  ;;  %v10785_v17 = vld [vmem:[#allocation133_spill] sm:$0xff] }
 0x279   : > { %4217 = vmatpush.bf16.msrb.mxu1 %v10768_v29  ;;  %v3977_v33 = vadd.f32 %v3976_v49, %v3963_v6  ;;  %v9322_v37 = vmax.f32 %v4811_v58, %v4815_v28  ;;  %v10786_v29 = vld [vmem:[#allocation134_spill] sm:$0xff]  ;;  %v10791_v6 = vld [vmem:[#allocation139_spill] sm:$0xff]  ;;  %v10800_v28 = vld [vmem:[#allocation148_spill] sm:$0xff] }
 0x27a   : > { %4230 = vmatpush.bf16.msrb.mxu2 %v10769_v34  ;;  %4243 = vmatpush.bf16.msrb.mxu3 %v10770_v45  ;;  %v3989_v42 = vpop.f32.mrf.mxu3  ;;  %v10799_v58 = vld [vmem:[#allocation147_spill] sm:$0xff]  ;;  %v10802_v49 = vld [vmem:[#allocation150_spill] sm:$0xff]  ;;  %v10804_v54 = vld [vmem:[#allocation152_spill] sm:$0xff] }
 0x27b   : > { %v3990_v61 = vadd.f32 %v3989_v42, %v3977_v33  ;;  %v10803_v42 = vld [vmem:[#allocation151_spill] sm:$0xff] }
 0x27c   : > { %4205 = vmatpush.bf16.msrb.mxu0 %v10771_v50 }
 0x27d   : > { %4218 = vmatpush.bf16.msrb.mxu1 %v10772_v56  ;;  %v3994_v7 = vadd.f32 %v3990_v61, %v9202_v25  ;;  %v10789_v25 = vld [vmem:[#allocation137_spill] sm:$0xff]  ;;  %v10807_v61 = vld [vmem:[#allocation155_spill] sm:$0xff] }
 0x27e   : > { %4231 = vmatpush.bf16.msrb.mxu2 %v10773_v57  ;;  %4244 = vmatpush.bf16.msrb.mxu3 %v10774_v62  ;;  %v10790_v57 = vld [vmem:[#allocation138_spill] sm:$0xff]  ;;  %v10793_v62 = vld [vmem:[#allocation141_spill] sm:$0xff] }
 0x27f   : > { %v3965_v52 = vpop.f32.mrf.mxu1  ;;  %v4814_v12 = vadd.f32 %v9320_v41, %v3994_v7 }
 0x280   : > { %4206 = vmatpush.bf16.msrb.mxu0 %v10775_v23  ;;  %v3978_v34 = vpop.f32.mrf.mxu2  ;;  %v10796_v23 = vld [vmem:[#allocation144_spill] sm:$0xff]  ;;  %v10809_v52 = vld [vmem:[#allocation157_spill] sm:$0xff] }
 0x281   : > { %4219 = vmatpush.bf16.msrb.mxu1 %v10776_v16  ;;  %v4816_v50 = vmax.f32 %v4814_v12, 0.0  ;;  %v10797_v16 = vld [vmem:[#allocation145_spill] sm:$0xff] }
 0x282   : > { %4232 = vmatpush.bf16.msrb.mxu2 %v10777_v27  ;;  %4245 = vmatpush.bf16.msrb.mxu3 %v10778_v35  ;;  %v3991_v45 = vpop.f32.mrf.mxu3  ;;  %v10798_v27 = vld [vmem:[#allocation146_spill] sm:$0xff]  ;;  %v10801_v35 = vld [vmem:[#allocation149_spill] sm:$0xff] }
 0x283   : > { %v9337_v56 = vmax.f32 %v4812_v46, %v4816_v50  ;;  %v10814_v45 = vld [vmem:[#allocation162_spill] sm:$0xff]  ;;  %v10815_v46 = vld [vmem:[#allocation163_spill] sm:$0xff]  ;;  %v10816_v50 = vld [vmem:[#allocation164_spill] sm:$0xff] }
 0x284   : > { %4207 = vmatpush.bf16.msrb.mxu0 %v10779_v24  ;;  %v10805_v24 = vld [vmem:[#allocation153_spill] sm:$0xff] }
 0x285   : > { %4220 = vmatpush.bf16.msrb.mxu1 %v10780_v53 }
 0x286   : > { %4233 = vmatpush.bf16.msrb.mxu2 %v10781_v59  ;;  %4246 = vmatpush.bf16.msrb.mxu3 %v10782_v55  ;;  %v10806_v59 = vld [vmem:[#allocation154_spill] sm:$0xff] }
 0x288   : > { %4208 = vmatpush.bf16.msrb.mxu0 %v10783_v8  ;;  %v10811_v8 = vld [vmem:[#allocation159_spill] sm:$0xff] }
 0x289   : > { %4221 = vmatpush.bf16.msrb.mxu1 %v10784_v0 }
 0x28a   : > { %4234 = vmatpush.bf16.msrb.mxu2 %v10785_v17  ;;  %4247 = vmatpush.bf16.msrb.mxu3 %v10786_v29  ;;  %v10812_v17 = vld [vmem:[#allocation160_spill] sm:$0xff]  ;;  %v10813_v29 = vld [vmem:[#allocation161_spill] sm:$0xff] }
 0x28c   : > { %4209 = vmatpush.bf16.msrb.mxu0 %v10787_v21  ;;  %v10817_v21 = vld [vmem:[#allocation165_spill] sm:$0xff] }
 0x28d   : > { %4222 = vmatpush.bf16.msrb.mxu1 %v10788_v44 }
 0x28e   : > { %4235 = vmatpush.bf16.msrb.mxu2 %v10789_v25  ;;  %4248 = vmatpush.bf16.msrb.mxu3 %v10790_v57  ;;  %v10818_v25 = vld [vmem:[#allocation166_spill] sm:$0xff] }
 0x290   : > { %4210 = vmatpush.bf16.msrb.mxu0 %v10791_v6  ;;  %v4004_v33 = vpop.f32.mrf.mxu0  ;;  %v10819_v6 = vld [vmem:[#allocation167_spill] sm:$0xff] }
 0x291   : > { %4223 = vmatpush.bf16.msrb.mxu1 %v10792_v30  ;;  %v4017_v53 = vpop.f32.mrf.mxu1  ;;  %v10820_v30 = vld [vmem:[#allocation168_spill] sm:$0xff] }
 0x292   : > { %4236 = vmatpush.bf16.msrb.mxu2 %v10793_v62  ;;  %4249 = vmatpush.bf16.msrb.mxu3 %v10794_v4  ;;  %v10821_v62 = vld [vmem:[#allocation169_spill] sm:$0xff]  ;;  %v10822_v4 = vld [vmem:[#allocation170_spill] sm:$0xff] }
 0x293   : > { %4211 = vmatmul.bf16.vlgmr.msrb.gmra.mxu0 %v10668_v14  ;;  %v4018_v14 = vadd.f32 %v4017_v53, %v4004_v33  ;;  %v10832_v33 = vld [vmem:[#allocation180_spill] sm:$0xff]  ;;  %v10835_v53 = vld [vmem:[#allocation183_spill] sm:$0xff] }
 0x294   : > { %4255 = vmatpush.bf16.msra.mxu0 %v10795_v9  ;;  %4224 = vmatmul.bf16.vlgmr.msrb.gmra.mxu1 %v10665_v5  ;;  %v10808_v5 = vld [vmem:[#allocation156_spill] sm:$0xff]  ;;  %v10823_v9 = vld [vmem:[#allocation171_spill] sm:$0xff] }
 0x295   : > { %4268 = vmatpush.bf16.msra.mxu1 %v10796_v23  ;;  %4237 = vmatmul.bf16.vlgmr.msrb.gmra.mxu2 %v10700_v31  ;;  %v10824_v23 = vld [vmem:[#allocation172_spill] sm:$0xff] }
 0x296   : > { %4281 = vmatpush.bf16.msra.mxu2 %v10797_v16  ;;  %4294 = vmatpush.bf16.msra.mxu3 %v10798_v27  ;;  %v10825_v16 = vld [vmem:[#allocation173_spill] sm:$0xff]  ;;  %v10826_v27 = vld [vmem:[#allocation174_spill] sm:$0xff] }
 0x297   : > { %4250 = vmatmul.bf16.vlgmr.msrb.gmra.mxu3 %v10701_v43 }
 0x298   : > { %4256 = vmatpush.bf16.msra.mxu0 %v10799_v58  ;;  %v4030_v55 = vpop.f32.mrf.mxu2  ;;  %v4006_v12 = vpop.f32.mrf.mxu0  ;;  %v10827_v58 = vld [vmem:[#allocation175_spill] sm:$0xff] }
 0x299   : > { %4269 = vmatpush.bf16.msra.mxu1 %v10800_v28  ;;  %v4031_v0 = vadd.f32 %v4030_v55, %v4018_v14  ;;  %v4019_v34 = vpop.f32.mrf.mxu1  ;;  %v10828_v28 = vld [vmem:[#allocation176_spill] sm:$0xff]  ;;  %v10842_v12 = vld [vmem:[#allocation190_spill] sm:$0xff] }
 0x29a   : > { %4282 = vmatpush.bf16.msra.mxu2 %v10801_v35  ;;  %4295 = vmatpush.bf16.msra.mxu3 %v10802_v49  ;;  %v4043_v7 = vpop.f32.mrf.mxu3  ;;  %v10829_v35 = vld [vmem:[#allocation177_spill] sm:$0xff]  ;;  %v10830_v49 = vld [vmem:[#allocation178_spill] sm:$0xff]  ;;  %v10836_v14 = vld [vmem:[#allocation184_spill] sm:$0xff] }
 0x29b   : > { %v10840_v55 = vld [vmem:[#allocation188_spill] sm:$0xff]  ;;  %v10843_v34 = vld [vmem:[#allocation191_spill] sm:$0xff] }
 0x29c   : > { %4257 = vmatpush.bf16.msra.mxu0 %v10803_v42  ;;  %v10831_v42 = vld [vmem:[#allocation179_spill] sm:$0xff] }
 0x29d   : > { %4270 = vmatpush.bf16.msra.mxu1 %v10804_v54  ;;  %v10833_v54 = vld [vmem:[#allocation181_spill] sm:$0xff] }
 0x29e   : > { %4283 = vmatpush.bf16.msra.mxu2 %v10805_v24  ;;  %4296 = vmatpush.bf16.msra.mxu3 %v10806_v59  ;;  %v10834_v24 = vld [vmem:[#allocation182_spill] sm:$0xff] }
 0x2a0   : > { %4258 = vmatpush.bf16.msra.mxu0 %v10807_v61  ;;  %v4032_v44 = vpop.f32.mrf.mxu2  ;;  %v10837_v61 = vld [vmem:[#allocation185_spill] sm:$0xff] }
 0x2a1   : > { %4271 = vmatpush.bf16.msra.mxu1 %v10808_v5  ;;  %v10846_v44 = vld [vmem:[#allocation194_spill] sm:$0xff] }
 0x2a2   : > { %4284 = vmatpush.bf16.msra.mxu2 %v10809_v52  ;;  %4297 = vmatpush.bf16.msra.mxu3 %v10810_v3  ;;  %v4045_v57 = vpop.f32.mrf.mxu3  ;;  %v10839_v52 = vld [vmem:[#allocation187_spill] sm:$0xff]  ;;  %v10841_v3 = vld [vmem:[#allocation189_spill] sm:$0xff] }
 0x2a3   : > { %v10848_v57 = vld [vmem:[#allocation196_spill] sm:$0xff] }
 0x2a4   : > { %4259 = vmatpush.bf16.msra.mxu0 %v10811_v8 }
 0x2a5   : > { %4272 = vmatpush.bf16.msra.mxu1 %v10812_v17 }
 0x2a6   : > { %4285 = vmatpush.bf16.msra.mxu2 %v10813_v29  ;;  %4298 = vmatpush.bf16.msra.mxu3 %v10814_v45 }
 0x2a8   : > { %4260 = vmatpush.bf16.msra.mxu0 %v10815_v46 }
 0x2a9   : > { %4273 = vmatpush.bf16.msra.mxu1 %v10816_v50  ;;  %v10845_v50 = vld [vmem:[#allocation193_spill] sm:$0xff] }
 0x2aa   : > { %4286 = vmatpush.bf16.msra.mxu2 %v10817_v21  ;;  %4299 = vmatpush.bf16.msra.mxu3 %v10818_v25  ;;  %v10847_v25 = vld [vmem:[#allocation195_spill] sm:$0xff] }
 0x2ac   : > { %4261 = vmatpush.bf16.msra.mxu0 %v10819_v6  ;;  %v10849_v6 = vld [vmem:[#allocation197_spill] sm:$0xff] }
 0x2ad   : > { %4274 = vmatpush.bf16.msra.mxu1 %v10820_v30 }
 0x2ae   : > { %4287 = vmatpush.bf16.msra.mxu2 %v10821_v62  ;;  %4300 = vmatpush.bf16.msra.mxu3 %v10822_v4  ;;  %v10851_v4 = vld [vmem:[#allocation199_spill] sm:$0xff] }
 0x2b0   : > { %4262 = vmatpush.bf16.msra.mxu0 %v10823_v9  ;;  %v4056_v59 = vpop.f32.mrf.mxu0  ;;  %v10852_v9 = vld [vmem:[#allocation200_spill] sm:$0xff] }
 0x2b1   : > { %4275 = vmatpush.bf16.msra.mxu1 %v10824_v23  ;;  %v4069_v5 = vpop.f32.mrf.mxu1  ;;  %v10853_v23 = vld [vmem:[#allocation201_spill] sm:$0xff] }
 0x2b2   : > { %4288 = vmatpush.bf16.msra.mxu2 %v10825_v16  ;;  %4301 = vmatpush.bf16.msra.mxu3 %v10826_v27  ;;  %v10854_v16 = vld [vmem:[#allocation202_spill] sm:$0xff]  ;;  %v10855_v27 = vld [vmem:[#allocation203_spill] sm:$0xff] }
 0x2b3   : > { %4263 = vmatmul.bf16.vlgmr.msra.gmra.mxu0 %v10734_v40 }
 0x2b4   : > { %4307 = vmatpush.bf16.msrb.mxu0 %v10827_v58  ;;  %4276 = vmatmul.bf16.vlgmr.msra.gmra.mxu1 %v10700_v31  ;;  %v4057_v31 = vadd.f32 %v4056_v59, %v4043_v7  ;;  %v10844_v7 = vld [vmem:[#allocation192_spill] sm:$0xff]  ;;  %v10865_v59 = vld [vmem:[#allocation215_spill] sm:$0xff] }
 0x2b5   : > { %4320 = vmatpush.bf16.msrb.mxu1 %v10828_v28  ;;  %4289 = vmatmul.bf16.vlgmr.msra.gmra.mxu2 %v10701_v43  ;;  %v10838_v43 = vld [vmem:[#allocation186_spill] sm:$0xff]  ;;  %v10856_v58 = vld [vmem:[#allocation204_spill] sm:$0xff]  ;;  %v10857_v28 = vld [vmem:[#allocation205_spill] sm:$0xff] }
 0x2b6   : > { %4333 = vmatpush.bf16.msrb.mxu2 %v10829_v35  ;;  %4346 = vmatpush.bf16.msrb.mxu3 %v10830_v49  ;;  %v10858_v35 = vld [vmem:[#allocation206_spill] sm:$0xff]  ;;  %v10859_v49 = vld [vmem:[#allocation207_spill] sm:$0xff] }
 0x2b7   : > { %4302 = vmatmul.bf16.vlgmr.msra.gmra.mxu3 %v10734_v40  ;;  %v4070_v40 = vadd.f32 %v4069_v5, %v4057_v31  ;;  %v10868_v5 = vld [vmem:[#allocation218_spill] sm:$0xff] }
 0x2b8   : > { %4308 = vmatpush.bf16.msrb.mxu0 %v10831_v42  ;;  %v4082_v8 = vpop.f32.mrf.mxu2  ;;  %v4058_v46 = vpop.f32.mrf.mxu0  ;;  %v10860_v42 = vld [vmem:[#allocation208_spill] sm:$0xff] }
 0x2b9   : > { %4321 = vmatpush.bf16.msrb.mxu1 %v10832_v33  ;;  %v4083_v17 = vadd.f32 %v4082_v8, %v4031_v0  ;;  %v4071_v21 = vpop.f32.mrf.mxu1  ;;  %v10850_v0 = vld [vmem:[#allocation198_spill] sm:$0xff]  ;;  %v10861_v33 = vld [vmem:[#allocation209_spill] sm:$0xff] }
 0x2ba   : > { %4334 = vmatpush.bf16.msrb.mxu2 %v10833_v54  ;;  %4347 = vmatpush.bf16.msrb.mxu3 %v10834_v24  ;;  %v4095_v29 = vpop.f32.mrf.mxu3  ;;  %v10862_v54 = vld [vmem:[#allocation210_spill] sm:$0xff]  ;;  %v10875_v46 = vld [vmem:[#allocation225_spill] sm:$0xff] }
 0x2bb   : > { %v4096_v45 = vadd.f32 %v4095_v29, %v4083_v17  ;;  %v10863_v24 = vld [vmem:[#allocation310_spill] sm:$0xff]  ;;  %v10873_v29 = vld [vmem:[#allocation223_spill] sm:$0xff] }
 0x2bc   : > { %4309 = vmatpush.bf16.msrb.mxu0 %v10835_v53  ;;  %v10864_v53 = vld [vmem:[#allocation214_spill] sm:$0xff] }
 0x2bd   : > { %4322 = vmatpush.bf16.msrb.mxu1 %v10836_v14  ;;  %v10866_v14 = vld [vmem:[#allocation216_spill] sm:$0xff]  ;;  %v10872_v17 = vld [vmem:[#allocation222_spill] sm:$0xff] }
 0x2be   : > { %4335 = vmatpush.bf16.msrb.mxu2 %v10837_v61  ;;  %4348 = vmatpush.bf16.msrb.mxu3 %v10838_v43  ;;  %v10867_v61 = vld [vmem:[#allocation217_spill] sm:$0xff] }
 0x2c0   : > { %4310 = vmatpush.bf16.msrb.mxu0 %v10839_v52  ;;  %v4084_v30 = vpop.f32.mrf.mxu2 }
 0x2c1   : > { %4323 = vmatpush.bf16.msrb.mxu1 %v10840_v55  ;;  %v10869_v55 = vld [vmem:[#allocation219_spill] sm:$0xff]  ;;  %v10879_v30 = vld [vmem:[#allocation229_spill] sm:$0xff] }
 0x2c2   : > { %4336 = vmatpush.bf16.msrb.mxu2 %v10841_v3  ;;  %4349 = vmatpush.bf16.msrb.mxu3 %v10842_v12  ;;  %v4097_v62 = vpop.f32.mrf.mxu3  ;;  %v10870_v3 = vld [vmem:[#allocation220_spill] sm:$0xff]  ;;  %v10871_v12 = vld [vmem:[#allocation221_spill] sm:$0xff] }
 0x2c3   : > { %v10881_v62 = vld [vmem:[#allocation231_spill] sm:$0xff] }
 0x2c4   : > { %4311 = vmatpush.bf16.msrb.mxu0 %v10843_v34  ;;  %v10874_v34 = vld [vmem:[#allocation224_spill] sm:$0xff] }
 0x2c5   : > { %4324 = vmatpush.bf16.msrb.mxu1 %v10844_v7 }
 0x2c6   : > { %4337 = vmatpush.bf16.msrb.mxu2 %v10845_v50  ;;  %4350 = vmatpush.bf16.msrb.mxu3 %v10846_v44  ;;  %v10876_v44 = vld [vmem:[#allocation226_spill] sm:$0xff] }
 0x2c8   : > { %4312 = vmatpush.bf16.msrb.mxu0 %v10847_v25 }
 0x2c9   : > { %4325 = vmatpush.bf16.msrb.mxu1 %v10848_v57  ;;  %v10877_v57 = vld [vmem:[#allocation227_spill] sm:$0xff] }
 0x2ca   : > { %4338 = vmatpush.bf16.msrb.mxu2 %v10849_v6  ;;  %4351 = vmatpush.bf16.msrb.mxu3 %v10850_v0  ;;  %v10880_v0 = vld [vmem:[#allocation230_spill] sm:$0xff] }
 0x2cc   : > { %4313 = vmatpush.bf16.msrb.mxu0 %v10851_v4  ;;  %v10882_v4 = vld [vmem:[#allocation232_spill] sm:$0xff] }
 0x2cd   : > { %4326 = vmatpush.bf16.msrb.mxu1 %v10852_v9  ;;  %v10883_v9 = vld [vmem:[#allocation233_spill] sm:$0xff] }
 0x2ce   : > { %4339 = vmatpush.bf16.msrb.mxu2 %v10853_v23  ;;  %4352 = vmatpush.bf16.msrb.mxu3 %v10854_v16 }
 0x2d0   : > { %4314 = vmatpush.bf16.msrb.mxu0 %v10855_v27  ;;  %v4108_v31 = vpop.f32.mrf.mxu0  ;;  %v10884_v27 = vld [vmem:[#allocation234_spill] sm:$0xff] }
 0x2d1   : > { %4327 = vmatpush.bf16.msrb.mxu1 %v10856_v58  ;;  %v9431_v43 = vadd.f32 %v4108_v31, %v4096_v45  ;;  %v4121_v52 = vpop.f32.mrf.mxu1  ;;  %v10885_v58 = vld [vmem:[#allocation235_spill] sm:$0xff]  ;;  %v10896_v31 = vld [vmem:[#allocation246_spill] sm:$0xff] }
 0x2d2   : > { %4340 = vmatpush.bf16.msrb.mxu2 %v10857_v28  ;;  %4353 = vmatpush.bf16.msrb.mxu3 %v10858_v35  ;;  %v4122_v8 = vadd.f32 %v4121_v52, %v4070_v40  ;;  %v10878_v40 = vld [vmem:[#allocation228_spill] sm:$0xff]  ;;  %v10887_v35 = vld [vmem:[#allocation237_spill] sm:$0xff] }
 0x2d3   : > { %4315 = vmatmul.bf16.vlgmr.msrb.gmra.mxu0 %v8600_v22  ;;  %v10886_v28 = vld [vmem:[#allocation236_spill] sm:$0xff] }
 0x2d4   : > { %4359 = vmatpush.bf16.msra.mxu0 %v10859_v49  ;;  %4328 = vmatmul.bf16.vlgmr.msrb.gmra.mxu1 %v10863_v24  ;;  %v10888_v49 = vld [vmem:[#allocation238_spill] sm:$0xff]  ;;  %v10898_v52 = vld [vmem:[#allocation248_spill] sm:$0xff] }
 0x2d5   : > { %4372 = vmatpush.bf16.msra.mxu1 %v10860_v42  ;;  %4341 = vmatmul.bf16.vlgmr.msrb.gmra.mxu2 %v8596_v15  ;;  %v10889_v42 = vld [vmem:[#allocation239_spill] sm:$0xff] }
 0x2d6   : > { %4387 = vmatpush.bf16.msra.mxu2 %v10861_v33  ;;  %4400 = vmatpush.bf16.msra.mxu3 %v10862_v54  ;;  %v10890_v33 = vld [vmem:[#allocation240_spill] sm:$0xff]  ;;  %v10891_v54 = vld [vmem:[#allocation241_spill] sm:$0xff] }
 0x2d7   : > { %4354 = vmatmul.bf16.vlgmr.msrb.gmra.mxu3 %v8600_v22 }
 0x2d8   : > { %4360 = vmatpush.bf16.msra.mxu0 %v10864_v53  ;;  %v4134_v7 = vpop.f32.mrf.mxu2  ;;  %v4110_v21 = vpop.f32.mrf.mxu0  ;;  %v10892_v53 = vld [vmem:[#allocation242_spill] sm:$0xff] }
 0x2d9   : > { %4373 = vmatpush.bf16.msra.mxu1 %v10865_v59  ;;  %v4135_v50 = vadd.f32 %v4134_v7, %v4122_v8  ;;  %v4123_v25 = vpop.f32.mrf.mxu1  ;;  %v10893_v59 = vld [vmem:[#allocation243_spill] sm:$0xff]  ;;  %v10904_v7 = vld [vmem:[#allocation254_spill] sm:$0xff] }
 0x2da   : > { %4388 = vmatpush.bf16.msra.mxu2 %v10866_v14  ;;  %4401 = vmatpush.bf16.msra.mxu3 %v10867_v61  ;;  %v4147_v45 = vpop.f32.mrf.mxu3  ;;  %v10894_v14 = vld [vmem:[#allocation244_spill] sm:$0xff]  ;;  %v10895_v61 = vld [vmem:[#allocation245_spill] sm:$0xff] }
 0x2db   : > { %v9443_v6 = vadd.f32 %v4147_v45, %v4135_v50  ;;  %v10905_v50 = vld [vmem:[#allocation255_spill] sm:$0xff]  ;;  %v10906_v45 = vld [vmem:[#allocation256_spill] sm:$0xff] }
 0x2dc   : > { %4361 = vmatpush.bf16.msra.mxu0 %v10868_v5  ;;  %v10897_v5 = vld [vmem:[#allocation247_spill] sm:$0xff] }
 0x2dd   : > { %4374 = vmatpush.bf16.msra.mxu1 %v10869_v55  ;;  %v10899_v55 = vld [vmem:[#allocation249_spill] sm:$0xff] }
 0x2de   : > { %4389 = vmatpush.bf16.msra.mxu2 %v10870_v3  ;;  %4402 = vmatpush.bf16.msra.mxu3 %v10871_v12  ;;  %v10900_v3 = vld [vmem:[#allocation250_spill] sm:$0xff]  ;;  %v10901_v12 = vld [vmem:[#allocation251_spill] sm:$0xff] }
 0x2e0   : > { %4362 = vmatpush.bf16.msra.mxu0 %v10872_v17  ;;  %v4136_v23 = vpop.f32.mrf.mxu2  ;;  %v10902_v17 = vld [vmem:[#allocation252_spill] sm:$0xff] }
 0x2e1   : > { %4375 = vmatpush.bf16.msra.mxu1 %v10873_v29  ;;  %v10912_v23 = vld [vmem:[#allocation262_spill] sm:$0xff] }
 0x2e2   : > { %4390 = vmatpush.bf16.msra.mxu2 %v10874_v34  ;;  %4403 = vmatpush.bf16.msra.mxu3 %v10875_v46  ;;  %v4149_v16 = vpop.f32.mrf.mxu3  ;;  %v10903_v34 = vld [vmem:[#allocation253_spill] sm:$0xff] }
 0x2e3   : > { %v10913_v16 = vld [vmem:[#allocation263_spill] sm:$0xff] }
 0x2e4   : > { %4363 = vmatpush.bf16.msra.mxu0 %v10876_v44  ;;  %v10907_v44 = vld [vmem:[#allocation257_spill] sm:$0xff] }
 0x2e5   : > { %4376 = vmatpush.bf16.msra.mxu1 %v10877_v57  ;;  %v10908_v57 = vld [vmem:[#allocation258_spill] sm:$0xff] }
 0x2e6   : > { %4391 = vmatpush.bf16.msra.mxu2 %v10878_v40  ;;  %4404 = vmatpush.bf16.msra.mxu3 %v10879_v30 }
 0x2e8   : > { %4364 = vmatpush.bf16.msra.mxu0 %v10880_v0  ;;  %v10909_v0 = vld [vmem:[#allocation259_spill] sm:$0xff] }
 0x2e9   : > { %4377 = vmatpush.bf16.msra.mxu1 %v10881_v62  ;;  %v10910_v62 = vld [vmem:[#allocation260_spill] sm:$0xff] }
 0x2ea   : > { %4392 = vmatpush.bf16.msra.mxu2 %v10882_v4  ;;  %4405 = vmatpush.bf16.msra.mxu3 %v10883_v9  ;;  %v10911_v9 = vld [vmem:[#allocation261_spill] sm:$0xff] }
 0x2ec   : > { %4365 = vmatpush.bf16.msra.mxu0 %v10884_v27  ;;  %v10914_v27 = vld [vmem:[#allocation264_spill] sm:$0xff] }
 0x2ed   : > { %4378 = vmatpush.bf16.msra.mxu1 %v10885_v58 }
 0x2ee   : > { %4393 = vmatpush.bf16.msra.mxu2 %v10886_v28  ;;  %4406 = vmatpush.bf16.msra.mxu3 %v10887_v35  ;;  %v10915_v28 = vld [vmem:[#allocation265_spill] sm:$0xff] }
 0x2f0   : > { %4366 = vmatpush.bf16.msra.mxu0 %v10888_v49  ;;  %v4160_v8 = vpop.f32.mrf.mxu0  ;;  %v10916_v49 = vld [vmem:[#allocation266_spill] sm:$0xff] }
 0x2f1   : > { %4379 = vmatpush.bf16.msra.mxu1 %v10889_v42  ;;  %v4173_v29 = vpop.f32.mrf.mxu1  ;;  %v10917_v42 = vld [vmem:[#allocation267_spill] sm:$0xff] }
 0x2f2   : > { %4394 = vmatpush.bf16.msra.mxu2 %v10890_v33  ;;  %4407 = vmatpush.bf16.msra.mxu3 %v10891_v54  ;;  %v4174_v46 = vadd.f32 %v4173_v29, %v4160_v8  ;;  %v10918_v33 = vld [vmem:[#allocation268_spill] sm:$0xff]  ;;  %v10919_v54 = vld [vmem:[#allocation269_spill] sm:$0xff]  ;;  %v10929_v8 = vld [vmem:[#allocation279_spill] sm:$0xff] }
 0x2f3   : > { %4367 = vmatmul.bf16.vlgmr.msra.gmra.mxu0 %v10863_v24  ;;  %v10932_v29 = vld [vmem:[#allocation282_spill] sm:$0xff] }
 0x2f4   : > { %4413 = vmatpush.bf16.msrb.mxu0 %v10892_v53  ;;  %4380 = vmatmul.bf16.vlgmr.msra.gmra.mxu1 %v8596_v15  ;;  %v10920_v53 = vld [vmem:[#allocation270_spill] sm:$0xff] }
 0x2f5   : > { %4426 = vmatpush.bf16.msrb.mxu1 %v10893_v59  ;;  %4395 = vmatmul.bf16.vlgmr.msra.gmra.mxu2 %v8600_v22  ;;  %v10921_v59 = vld [vmem:[#allocation271_spill] sm:$0xff] }
 0x2f6   : > { %4439 = vmatpush.bf16.msrb.mxu2 %v10894_v14  ;;  %4452 = vmatpush.bf16.msrb.mxu3 %v10895_v61  ;;  %v10922_v14 = vld [vmem:[#allocation272_spill] sm:$0xff]  ;;  %v10923_v61 = vld [vmem:[#allocation273_spill] sm:$0xff] }
 0x2f7   : > { %4408 = vmatmul.bf16.vlgmr.msra.gmra.mxu3 %v10863_v24 }
 0x2f8   : > { %4414 = vmatpush.bf16.msrb.mxu0 %v10896_v31  ;;  %v4186_v21 = vpop.f32.mrf.mxu2  ;;  %v4162_v40 = vpop.f32.mrf.mxu0  ;;  %v10924_v31 = vld [vmem:[#allocation274_spill] sm:$0xff] }
 0x2f9   : > { %4427 = vmatpush.bf16.msrb.mxu1 %v10897_v5  ;;  %v4187_v30 = vadd.f32 %v4186_v21, %v4174_v46  ;;  %v4175_v4 = vpop.f32.mrf.mxu1  ;;  %v10925_v5 = vld [vmem:[#allocation275_spill] sm:$0xff]  ;;  %v10936_v21 = vld [vmem:[#allocation286_spill] sm:$0xff]  ;;  %v10939_v40 = vld [vmem:[#allocation289_spill] sm:$0xff] }
 0x2fa   : > { %4440 = vmatpush.bf16.msrb.mxu2 %v10898_v52  ;;  %4453 = vmatpush.bf16.msrb.mxu3 %v10899_v55  ;;  %v4199_v25 = vpop.f32.mrf.mxu3  ;;  %v10926_v52 = vld [vmem:[#allocation276_spill] sm:$0xff]  ;;  %v10927_v55 = vld [vmem:[#allocation277_spill] sm:$0xff]  ;;  %v10933_v46 = vld [vmem:[#allocation283_spill] sm:$0xff] }
 0x2fb   : > { %v10940_v4 = vld [vmem:[#allocation290_spill] sm:$0xff] }
 0x2fc   : > { %4415 = vmatpush.bf16.msrb.mxu0 %v10900_v3  ;;  %v10928_v3 = vld [vmem:[#allocation278_spill] sm:$0xff] }
 0x2fd   : > { %4428 = vmatpush.bf16.msrb.mxu1 %v10901_v12  ;;  %v10930_v12 = vld [vmem:[#allocation280_spill] sm:$0xff] }
 0x2fe   : > { %4441 = vmatpush.bf16.msrb.mxu2 %v10902_v17  ;;  %4454 = vmatpush.bf16.msrb.mxu3 %v10903_v34  ;;  %v10931_v17 = vld [vmem:[#allocation281_spill] sm:$0xff] }
 0x300   : > { %4416 = vmatpush.bf16.msrb.mxu0 %v10904_v7  ;;  %v4188_v58 = vpop.f32.mrf.mxu2  ;;  %v10934_v7 = vld [vmem:[#allocation284_spill] sm:$0xff] }
 0x301   : > { %4429 = vmatpush.bf16.msrb.mxu1 %v10905_v50  ;;  %v10943_v58 = vld [vmem:[#allocation293_spill] sm:$0xff] }
 0x302   : > { %4442 = vmatpush.bf16.msrb.mxu2 %v10906_v45  ;;  %4455 = vmatpush.bf16.msrb.mxu3 %v10907_v44  ;;  %v4201_v35 = vpop.f32.mrf.mxu3  ;;  %v10938_v44 = vld [vmem:[#allocation288_spill] sm:$0xff] }
 0x303   : > { %v10945_v35 = vld [vmem:[#allocation295_spill] sm:$0xff] }
 0x304   : > { %4417 = vmatpush.bf16.msrb.mxu0 %v10908_v57 }
 0x305   : > { %4430 = vmatpush.bf16.msrb.mxu1 %v10909_v0 }
 0x306   : > { %4443 = vmatpush.bf16.msrb.mxu2 %v10910_v62  ;;  %4456 = vmatpush.bf16.msrb.mxu3 %v10911_v9 }
 0x308   : > { %4418 = vmatpush.bf16.msrb.mxu0 %v10912_v23 }
 0x309   : > { %4431 = vmatpush.bf16.msrb.mxu1 %v10913_v16  ;;  %v10942_v16 = vld [vmem:[#allocation292_spill] sm:$0xff] }
 0x30a   : > { %4444 = vmatpush.bf16.msrb.mxu2 %v10914_v27  ;;  %4457 = vmatpush.bf16.msrb.mxu3 %v10915_v28  ;;  %v10944_v28 = vld [vmem:[#allocation294_spill] sm:$0xff] }
 0x30c   : > { %4419 = vmatpush.bf16.msrb.mxu0 %v10916_v49  ;;  %v10946_v49 = vld [vmem:[#allocation296_spill] sm:$0xff] }
 0x30d   : > { %4432 = vmatpush.bf16.msrb.mxu1 %v10917_v42 }
 0x30e   : > { %4445 = vmatpush.bf16.msrb.mxu2 %v10918_v33  ;;  %4458 = vmatpush.bf16.msrb.mxu3 %v10919_v54  ;;  %v10948_v54 = vld [vmem:[#allocation298_spill] sm:$0xff] }
 0x310   : > { %4420 = vmatpush.bf16.msrb.mxu0 %v10920_v53  ;;  %v4212_v34 = vpop.f32.mrf.mxu0  ;;  %v10949_v53 = vld [vmem:[#allocation299_spill] sm:$0xff] }
 0x311   : > { %4433 = vmatpush.bf16.msrb.mxu1 %v10921_v59  ;;  %v4225_v50 = vpop.f32.mrf.mxu1  ;;  %v10950_v59 = vld [vmem:[#allocation300_spill] sm:$0xff] }
 0x312   : > { %4446 = vmatpush.bf16.msrb.mxu2 %v10922_v14  ;;  %4459 = vmatpush.bf16.msrb.mxu3 %v10923_v61  ;;  %v10951_v14 = vld [vmem:[#allocation301_spill] sm:$0xff]  ;;  %v10952_v61 = vld [vmem:[#allocation302_spill] sm:$0xff] }
 0x313   : > { %4421 = vmatmul.bf16.vlgmr.msrb.gmra.mxu0 %v8596_v15 }
 0x314   : > { %4467 = vmatpush.bf16.msra.mxu0 %v10924_v31  ;;  %4434 = vmatmul.bf16.vlgmr.msrb.gmra.mxu1 %v8600_v22  ;;  %v10937_v22 = vld [vmem:[#allocation287_spill] sm:$0xff] }
 0x315   : > { %4480 = vmatpush.bf16.msra.mxu1 %v10925_v5  ;;  %4447 = vmatmul.bf16.vlgmr.msrb.gmra.mxu2 %v10863_v24  ;;  %v4213_v24 = vadd.f32 %v4212_v34, %v4199_v25  ;;  %v10941_v25 = vld [vmem:[#allocation291_spill] sm:$0xff]  ;;  %v10954_v5 = vld [vmem:[#allocation304_spill] sm:$0xff]  ;;  %v10962_v34 = vld [vmem:[#allocation313_spill] sm:$0xff] }
 0x316   : > { %4493 = vmatpush.bf16.msra.mxu2 %v10926_v52  ;;  %4506 = vmatpush.bf16.msra.mxu3 %v10927_v55  ;;  %v10953_v31 = vld [vmem:[#allocation303_spill] sm:$0xff]  ;;  %v10955_v52 = vld [vmem:[#allocation305_spill] sm:$0xff]  ;;  %v10956_v55 = vld [vmem:[#allocation306_spill] sm:$0xff] }
 0x317   : > { %4460 = vmatmul.bf16.vlgmr.msrb.gmra.mxu3 %v8596_v15  ;;  %v10935_v15 = vld [vmem:[#allocation285_spill] sm:$0xff]  ;;  %v4226_v45 = vadd.f32 %v4225_v50, %v4213_v24  ;;  %v10964_v24 = vld [vmem:[#allocation315_spill] sm:$0xff] }
 0x318   : > { %4468 = vmatpush.bf16.msra.mxu0 %v10928_v3  ;;  %v4238_v57 = vpop.f32.mrf.mxu2  ;;  %v4214_v23 = vpop.f32.mrf.mxu0  ;;  %v10957_v3 = vld [vmem:[#allocation307_spill] sm:$0xff] }
 0x319   : > { %4481 = vmatpush.bf16.msra.mxu1 %v10929_v8  ;;  %v4239_v0 = vadd.f32 %v4238_v57, %v4187_v30  ;;  %v4227_v27 = vpop.f32.mrf.mxu1  ;;  %v10947_v30 = vld [vmem:[#allocation297_spill] sm:$0xff]  ;;  %v10958_v8 = vld [vmem:[#allocation308_spill] sm:$0xff]  ;;  %v10967_v57 = vld [vmem:[#allocation318_spill] sm:$0xff] }
 0x31a   : > { %4494 = vmatpush.bf16.msra.mxu2 %v10930_v12  ;;  %4507 = vmatpush.bf16.msra.mxu3 %v10931_v17  ;;  %v4251_v62 = vpop.f32.mrf.mxu3  ;;  %v10959_v12 = vld [vmem:[#allocation309_spill] sm:$0xff]  ;;  %v10960_v17 = vld [vmem:[#allocation311_spill] sm:$0xff] }
 0x31b   : > { %v4252_v9 = vadd.f32 %v4251_v62, %v4239_v0  ;;  %v10969_v0 = vld [vmem:[#allocation320_spill] sm:$0xff]  ;;  %v10970_v62 = vld [vmem:[#allocation321_spill] sm:$0xff]  ;;  %v10972_v27 = vld [vmem:[#allocation323_spill] sm:$0xff] }
 0x31c   : > { %4469 = vmatpush.bf16.msra.mxu0 %v10932_v29  ;;  %v10961_v29 = vld [vmem:[#allocation312_spill] sm:$0xff] }
 0x31d   : > { %4482 = vmatpush.bf16.msra.mxu1 %v10933_v46  ;;  %v10963_v46 = vld [vmem:[#allocation314_spill] sm:$0xff] }
 0x31e   : > { %4495 = vmatpush.bf16.msra.mxu2 %v10934_v7  ;;  %4508 = vmatpush.bf16.msra.mxu3 %v10935_v15 }
 0x320   : > { %4470 = vmatpush.bf16.msra.mxu0 %v10936_v21  ;;  %v4240_v42 = vpop.f32.mrf.mxu2  ;;  %v10965_v21 = vld [vmem:[#allocation316_spill] sm:$0xff] }
 0x321   : > { %4483 = vmatpush.bf16.msra.mxu1 %v10937_v22  ;;  %v10966_v22 = vld [vmem:[#allocation317_spill] sm:$0xff]  ;;  %v10976_v42 = vld [vmem:[#allocation327_spill] sm:$0xff] }
 0x322   : > { %4496 = vmatpush.bf16.msra.mxu2 %v10938_v44  ;;  %4509 = vmatpush.bf16.msra.mxu3 %v10939_v40  ;;  %v4253_v33 = vpop.f32.mrf.mxu3  ;;  %v10968_v40 = vld [vmem:[#allocation319_spill] sm:$0xff] }
 0x323   : > { %v10978_v33 = vld [vmem:[#allocation329_spill] sm:$0xff] }
 0x324   : > { %4471 = vmatpush.bf16.msra.mxu0 %v10940_v4  ;;  %v10971_v4 = vld [vmem:[#allocation322_spill] sm:$0xff] }
 0x325   : > { %4484 = vmatpush.bf16.msra.mxu1 %v10941_v25 }
 0x326   : > { %4497 = vmatpush.bf16.msra.mxu2 %v10942_v16  ;;  %4510 = vmatpush.bf16.msra.mxu3 %v10943_v58 }
 0x328   : > { %4472 = vmatpush.bf16.msra.mxu0 %v10944_v28  ;;  %v10973_v28 = vld [vmem:[#allocation324_spill] sm:$0xff] }
 0x329   : > { %4485 = vmatpush.bf16.msra.mxu1 %v10945_v35 }
 0x32a   : > { %4498 = vmatpush.bf16.msra.mxu2 %v10946_v49  ;;  %4511 = vmatpush.bf16.msra.mxu3 %v10947_v30  ;;  %v10975_v49 = vld [vmem:[#allocation326_spill] sm:$0xff]  ;;  %v10977_v30 = vld [vmem:[#allocation328_spill] sm:$0xff] }
 0x32c   : > { %4473 = vmatpush.bf16.msra.mxu0 %v10948_v54  ;;  %v10979_v54 = vld [vmem:[#allocation330_spill] sm:$0xff] }
 0x32d   : > { %4486 = vmatpush.bf16.msra.mxu1 %v10949_v53 }
 0x32e   : > { %4499 = vmatpush.bf16.msra.mxu2 %v10950_v59  ;;  %4512 = vmatpush.bf16.msra.mxu3 %v10951_v14  ;;  %v10980_v14 = vld [vmem:[#allocation331_spill] sm:$0xff] }
 0x330   : > { %4474 = vmatpush.bf16.msra.mxu0 %v10952_v61  ;;  %v4264_v7 = vpop.f32.mrf.mxu0  ;;  %v10981_v61 = vld [vmem:[#allocation332_spill] sm:$0xff] }
 0x331   : > { %4487 = vmatpush.bf16.msra.mxu1 %v10953_v31  ;;  %v9543_v50 = vadd.f32 %v4264_v7, %v4252_v9  ;;  %v4277_v15 = vpop.f32.mrf.mxu1  ;;  %v10982_v31 = vld [vmem:[#allocation333_spill] sm:$0xff]  ;;  %v10993_v7 = vld [vmem:[#allocation344_spill] sm:$0xff] }
 0x332   : > { %4500 = vmatpush.bf16.msra.mxu2 %v10954_v5  ;;  %4513 = vmatpush.bf16.msra.mxu3 %v10955_v52  ;;  %v4278_v44 = vadd.f32 %v4277_v15, %v4226_v45  ;;  %v10974_v45 = vld [vmem:[#allocation325_spill] sm:$0xff]  ;;  %v10983_v5 = vld [vmem:[#allocation334_spill] sm:$0xff]  ;;  %v10984_v52 = vld [vmem:[#allocation335_spill] sm:$0xff] }
 0x333   : > { %4475 = vmatmul.bf16.vlgmr.msra.gmra.mxu0 %v8925_v11  ;;  %v10995_v15 = vld [vmem:[#allocation346_spill] sm:$0xff] }
 0x334   : > { %4519 = vmatpush.bf16.msrb.mxu0 %v10956_v55  ;;  %4488 = vmatmul.bf16.vlgmr.msra.gmra.mxu1 %v8927_v60  ;;  %v10985_v55 = vld [vmem:[#allocation336_spill] sm:$0xff] }
 0x335   : > { %4532 = vmatpush.bf16.msrb.mxu1 %v10957_v3  ;;  %4501 = vmatmul.bf16.vlgmr.msra.gmra.mxu2 %v8921_v48  ;;  %v10986_v3 = vld [vmem:[#allocation337_spill] sm:$0xff] }
 0x336   : > { %4547 = vmatpush.bf16.msrb.mxu2 %v10958_v8  ;;  %4560 = vmatpush.bf16.msrb.mxu3 %v10959_v12  ;;  %v10987_v8 = vld [vmem:[#allocation338_spill] sm:$0xff]  ;;  %v10988_v12 = vld [vmem:[#allocation339_spill] sm:$0xff] }
 0x337   : > { %4514 = vmatmul.bf16.vlgmr.msra.gmra.mxu3 %v8925_v11 }
 0x338   : > { %4520 = vmatpush.bf16.msrb.mxu0 %v10960_v17  ;;  %v4290_v23 = vpop.f32.mrf.mxu2  ;;  %v4266_v16 = vpop.f32.mrf.mxu0  ;;  %v10989_v17 = vld [vmem:[#allocation340_spill] sm:$0xff] }
 0x339   : > { %4533 = vmatpush.bf16.msrb.mxu1 %v10961_v29  ;;  %v4291_v25 = vadd.f32 %v4290_v23, %v4278_v44  ;;  %v4279_v58 = vpop.f32.mrf.mxu1  ;;  %v10990_v29 = vld [vmem:[#allocation341_spill] sm:$0xff]  ;;  %v11001_v23 = vld [vmem:[#allocation352_spill] sm:$0xff]  ;;  %v11003_v16 = vld [vmem:[#allocation354_spill] sm:$0xff] }
 0x33a   : > { %4548 = vmatpush.bf16.msrb.mxu2 %v10962_v34  ;;  %4561 = vmatpush.bf16.msrb.mxu3 %v10963_v46  ;;  %v4303_v9 = vpop.f32.mrf.mxu3  ;;  %v10991_v34 = vld [vmem:[#allocation342_spill] sm:$0xff]  ;;  %v10992_v46 = vld [vmem:[#allocation343_spill] sm:$0xff] }
 0x33b   : > { %v9555_v35 = vadd.f32 %v4303_v9, %v4291_v25  ;;  %v11002_v25 = vld [vmem:[#allocation353_spill] sm:$0xff] }
 0x33c   : > { %4521 = vmatpush.bf16.msrb.mxu0 %v10964_v24  ;;  %v10994_v24 = vld [vmem:[#allocation345_spill] sm:$0xff] }
 0x33d   : > { %4534 = vmatpush.bf16.msrb.mxu1 %v10965_v21  ;;  %v10996_v21 = vld [vmem:[#allocation347_spill] sm:$0xff] }
 0x33e   : > { %4549 = vmatpush.bf16.msrb.mxu2 %v10966_v22  ;;  %4562 = vmatpush.bf16.msrb.mxu3 %v10967_v57  ;;  %v10997_v57 = vld [vmem:[#allocation348_spill] sm:$0xff] }
 0x340   : > { %4522 = vmatpush.bf16.msrb.mxu0 %v10968_v40  ;;  %v4292_v53 = vpop.f32.mrf.mxu2  ;;  %v10998_v40 = vld [vmem:[#allocation349_spill] sm:$0xff] }
 0x341   : > { %4535 = vmatpush.bf16.msrb.mxu1 %v10969_v0  ;;  %v11008_v53 = vld [vmem:[#allocation359_spill] sm:$0xff] }
 0x342   : > { %4550 = vmatpush.bf16.msrb.mxu2 %v10970_v62  ;;  %4563 = vmatpush.bf16.msrb.mxu3 %v10971_v4  ;;  %v4305_v59 = vpop.f32.mrf.mxu3  ;;  %v10999_v62 = vld [vmem:[#allocation350_spill] sm:$0xff]  ;;  %v11000_v4 = vld [vmem:[#allocation351_spill] sm:$0xff] }
 0x343   : > { %v11009_v59 = vld [vmem:[#allocation360_spill] sm:$0xff] }
 0x344   : > { %4523 = vmatpush.bf16.msrb.mxu0 %v10972_v27 }
 0x345   : > { %4536 = vmatpush.bf16.msrb.mxu1 %v10973_v28  ;;  %v11004_v28 = vld [vmem:[#allocation355_spill] sm:$0xff] }
 0x346   : > { %4551 = vmatpush.bf16.msrb.mxu2 %v10974_v45  ;;  %4564 = vmatpush.bf16.msrb.mxu3 %v10975_v49 }
 0x348   : > { %4524 = vmatpush.bf16.msrb.mxu0 %v10976_v42 }
 0x349   : > { %4537 = vmatpush.bf16.msrb.mxu1 %v10977_v30  ;;  %v11005_v30 = vld [vmem:[#allocation356_spill] sm:$0xff] }
 0x34a   : > { %4552 = vmatpush.bf16.msrb.mxu2 %v10978_v33  ;;  %4565 = vmatpush.bf16.msrb.mxu3 %v10979_v54  ;;  %v11006_v33 = vld [vmem:[#allocation357_spill] sm:$0xff]  ;;  %v11007_v54 = vld [vmem:[#allocation358_spill] sm:$0xff] }
 0x34c   : > { %4525 = vmatpush.bf16.msrb.mxu0 %v10980_v14  ;;  %v11010_v14 = vld [vmem:[#allocation361_spill] sm:$0xff] }
 0x34d   : > { %4538 = vmatpush.bf16.msrb.mxu1 %v10981_v61 }
 0x34e   : > { %4553 = vmatpush.bf16.msrb.mxu2 %v10982_v31  ;;  %4566 = vmatpush.bf16.msrb.mxu3 %v10983_v5  ;;  %v11011_v31 = vld [vmem:[#allocation362_spill] sm:$0xff] }
 0x350   : > { %4526 = vmatpush.bf16.msrb.mxu0 %v10984_v52  ;;  %v4316_v22 = vpop.f32.mrf.mxu0  ;;  %v11013_v52 = vld [vmem:[#allocation364_spill] sm:$0xff] }
 0x351   : > { %4539 = vmatpush.bf16.msrb.mxu1 %v10985_v55  ;;  %v4329_v44 = vpop.f32.mrf.mxu1  ;;  %v11014_v55 = vld [vmem:[#allocation365_spill] sm:$0xff] }
 0x352   : > { %4554 = vmatpush.bf16.msrb.mxu2 %v10986_v3  ;;  %4567 = vmatpush.bf16.msrb.mxu3 %v10987_v8  ;;  %v4330_v0 = vadd.f32 %v4329_v44, %v4316_v22  ;;  %v11015_v3 = vld [vmem:[#allocation366_spill] sm:$0xff]  ;;  %v11016_v8 = vld [vmem:[#allocation367_spill] sm:$0xff]  ;;  %v11026_v22 = vld [vmem:[#allocation377_spill] sm:$0xff] }
 0x353   : > { %4527 = vmatmul.bf16.vlgmr.msrb.gmra.mxu0 %v8927_v60  ;;  %v11027_v44 = vld [vmem:[#allocation378_spill] sm:$0xff] }
 0x354   : > { %4573 = vmatpush.bf16.msra.mxu0 %v10988_v12  ;;  %4540 = vmatmul.bf16.vlgmr.msrb.gmra.mxu1 %v8921_v48  ;;  %v11017_v12 = vld [vmem:[#allocation368_spill] sm:$0xff] }
 0x355   : > { %4586 = vmatpush.bf16.msra.mxu1 %v10989_v17  ;;  %4555 = vmatmul.bf16.vlgmr.msrb.gmra.mxu2 %v8925_v11  ;;  %v11018_v17 = vld [vmem:[#allocation369_spill] sm:$0xff] }
 0x356   : > { %4599 = vmatpush.bf16.msra.mxu2 %v10990_v29  ;;  %4612 = vmatpush.bf16.msra.mxu3 %v10991_v34  ;;  %v11019_v29 = vld [vmem:[#allocation370_spill] sm:$0xff]  ;;  %v11020_v34 = vld [vmem:[#allocation371_spill] sm:$0xff] }
 0x357   : > { %4568 = vmatmul.bf16.vlgmr.msrb.gmra.mxu3 %v8927_v60 }
 0x358   : > { %4574 = vmatpush.bf16.msra.mxu0 %v10992_v46  ;;  %v4342_v9 = vpop.f32.mrf.mxu2  ;;  %v4318_v49 = vpop.f32.mrf.mxu0  ;;  %v11021_v46 = vld [vmem:[#allocation372_spill] sm:$0xff] }
 0x359   : > { %4587 = vmatpush.bf16.msra.mxu1 %v10993_v7  ;;  %v4343_v27 = vadd.f32 %v4342_v9, %v4330_v0  ;;  %v4331_v42 = vpop.f32.mrf.mxu1  ;;  %v11022_v7 = vld [vmem:[#allocation373_spill] sm:$0xff]  ;;  %v11033_v9 = vld [vmem:[#allocation384_spill] sm:$0xff] }
 0x35a   : > { %4600 = vmatpush.bf16.msra.mxu2 %v10994_v24  ;;  %4613 = vmatpush.bf16.msra.mxu3 %v10995_v15  ;;  %v4355_v58 = vpop.f32.mrf.mxu3  ;;  %v11023_v24 = vld [vmem:[#allocation374_spill] sm:$0xff]  ;;  %v11024_v15 = vld [vmem:[#allocation375_spill] sm:$0xff] }
 0x35b   : > { %v9592_v45 = vadd.f32 %v4343_v27, %v9431_v43  ;;  %v11012_v43 = vld [vmem:[#allocation363_spill] sm:$0xff]  ;;  %v11035_v27 = vld [vmem:[#allocation386_spill] sm:$0xff] }
 0x35c   : > { %4575 = vmatpush.bf16.msra.mxu0 %v10996_v21  ;;  %v11025_v21 = vld [vmem:[#allocation376_spill] sm:$0xff]  ;;  %v11036_v42 = vld [vmem:[#allocation387_spill] sm:$0xff] }
 0x35d   : > { %4588 = vmatpush.bf16.msra.mxu1 %v10997_v57 }
 0x35e   : > { %4601 = vmatpush.bf16.msra.mxu2 %v10998_v40  ;;  %4614 = vmatpush.bf16.msra.mxu3 %v10999_v62  ;;  %v11028_v40 = vld [vmem:[#allocation379_spill] sm:$0xff] }
 0x360   : > { %4576 = vmatpush.bf16.msra.mxu0 %v11000_v4  ;;  %v4344_v61 = vpop.f32.mrf.mxu2  ;;  %v11029_v4 = vld [vmem:[#allocation380_spill] sm:$0xff] }
 0x361   : > { %4589 = vmatpush.bf16.msra.mxu1 %v11001_v23  ;;  %v11040_v61 = vld [vmem:[#allocation391_spill] sm:$0xff] }
 0x362   : > { %4602 = vmatpush.bf16.msra.mxu2 %v11002_v25  ;;  %4615 = vmatpush.bf16.msra.mxu3 %v11003_v16  ;;  %v4357_v5 = vpop.f32.mrf.mxu3  ;;  %v11034_v16 = vld [vmem:[#allocation385_spill] sm:$0xff] }
 0x363   : > { %v11041_v5 = vld [vmem:[#allocation392_spill] sm:$0xff] }
 0x364   : > { %4577 = vmatpush.bf16.msra.mxu0 %v11004_v28 }
 0x365   : > { %4590 = vmatpush.bf16.msra.mxu1 %v11005_v30 }
 0x366   : > { %4603 = vmatpush.bf16.msra.mxu2 %v11006_v33  ;;  %4616 = vmatpush.bf16.msra.mxu3 %v11007_v54  ;;  %v11037_v54 = vld [vmem:[#allocation388_spill] sm:$0xff] }
 0x368   : > { %4578 = vmatpush.bf16.msra.mxu0 %v11008_v53  ;;  %v11038_v53 = vld [vmem:[#allocation389_spill] sm:$0xff] }
 0x369   : > { %4591 = vmatpush.bf16.msra.mxu1 %v11009_v59  ;;  %v6854_v59 = vld [vmem:[%s7611_s30 + $0x14] sm:$0x6] }
 0x36a   : > { %4604 = vmatpush.bf16.msra.mxu2 %v11010_v14  ;;  %4617 = vmatpush.bf16.msra.mxu3 %v11011_v31  ;;  %v6853_v14 = vld [vmem:[%s7611_s30 + $0xc] sm:$0x66]  ;;  %v4633_v31 = vunpack.c.l.b16 %v6854_v59  ;;  %v11064_v59 = vld [vmem:[#allocation415_spill] sm:$0xff] }
 0x36c   : > { %4579 = vmatpush.bf16.msra.mxu0 %v11012_v43  ;;  %v11042_v43 = vld [vmem:[#allocation393_spill] sm:$0xff] }
 0x36d   : > { %4592 = vmatpush.bf16.msra.mxu1 %v11013_v52  ;;  %v4631_v52 = vunpack.c.l.b16 %v6853_v14 }
 0x36e   : > { %4605 = vmatpush.bf16.msra.mxu2 %v11014_v55  ;;  %4618 = vmatpush.bf16.msra.mxu3 %v11015_v3  ;;  %v4632_v55 = vunpack.c.h.b16 %v6853_v14  ;;  %v11043_v3 = vld [vmem:[#allocation394_spill] sm:$0xff]  ;;  %v11066_v14 = vld [vmem:[#allocation417_spill] sm:$0xff] }
 0x370   : > { %4580 = vmatpush.bf16.msra.mxu0 %v11016_v8  ;;  %v4368_v57 = vpop.f32.mrf.mxu0 }
 0x371   : > { %4593 = vmatpush.bf16.msra.mxu1 %v11017_v12  ;;  %v4369_v0 = vadd.f32 %v4368_v57, %v4355_v58  ;;  %v4381_v62 = vpop.f32.mrf.mxu1 }
 0x372   : > { %4606 = vmatpush.bf16.msra.mxu2 %v11018_v17  ;;  %4619 = vmatpush.bf16.msra.mxu3 %v11019_v29  ;;  %v11044_v17 = vld [vmem:[#allocation395_spill] sm:$0xff]  ;;  %v4636_v29 = vpack.c.b16 %v4633_v31, %v4633_v31 }
 0x373   : > { %4581 = vmatmul.bf16.vlgmr.msra.gmra.mxu0 %v8921_v48  ;;  %v4382_v23 = vadd.f32 %v4381_v62, %v4369_v0  ;;  %v11050_v0 = vld [vmem:[#allocation401_spill] sm:$0xff]  ;;  %v11051_v62 = vld [vmem:[#allocation402_spill] sm:$0xff] }
 0x374   : > { %4643 = vmatpush.bf16.msrb.mxu0 %v11020_v34  ;;  %4594 = vmatmul.bf16.vlgmr.msra.gmra.mxu1 %v8925_v11  ;;  %v11032_v11 = vld [vmem:[#allocation383_spill] sm:$0xff]  ;;  %v11045_v34 = vld [vmem:[#allocation396_spill] sm:$0xff] }
 0x375   : > { %4656 = vmatpush.bf16.msrb.mxu1 %v11021_v46  ;;  %4607 = vmatmul.bf16.vlgmr.msra.gmra.mxu2 %v8927_v60  ;;  %v11030_v60 = vld [vmem:[#allocation381_spill] sm:$0xff]  ;;  %v9627_v25 = vadd.f32 %v4382_v23, %v9443_v6  ;;  %v11039_v6 = vld [vmem:[#allocation390_spill] sm:$0xff]  ;;  %v11056_v23 = vld [vmem:[#allocation407_spill] sm:$0xff] }
 0x376   : > { %4669 = vmatpush.bf16.msrb.mxu2 %v11022_v7  ;;  %4682 = vmatpush.bf16.msrb.mxu3 %v11023_v24  ;;  %v11046_v46 = vld [vmem:[#allocation397_spill] sm:$0xff]  ;;  %v4634_v7 = vpack.c.b16 %v4631_v52, %v4631_v52  ;;  %v4635_v24 = vpack.c.b16 %v4632_v55, %v4632_v55  ;;  %v11068_v52 = vld [vmem:[#allocation419_spill] sm:$0xff]  ;;  %v11069_v55 = vld [vmem:[#allocation420_spill] sm:$0xff] }
 0x377   : > { %4620 = vmatmul.bf16.vlgmr.msra.gmra.mxu3 %v8921_v48  ;;  %v11031_v48 = vld [vmem:[#allocation382_spill] sm:$0xff] }
 0x378   : > { %4644 = vmatpush.bf16.msrb.mxu0 %v11024_v15  ;;  %v4396_v58 = vpop.f32.mrf.mxu2  ;;  %v4370_v28 = vpop.f32.mrf.mxu0  ;;  %v11047_v15 = vld [vmem:[#allocation398_spill] sm:$0xff]  ;;  %v9651_v57 = vrot.slane %v4634_v7, 1 }
 0x379   : > { %4657 = vmatpush.bf16.msrb.mxu1 %v11025_v21  ;;  %v4383_v33 = vpop.f32.mrf.mxu1  ;;  %v9647_v21 = vrot.slane %v4636_v29, 1  ;;  %v11060_v28 = vld [vmem:[#allocation411_spill] sm:$0xff] }
 0x37a   : > { %4670 = vmatpush.bf16.msrb.mxu2 %v11026_v22  ;;  %4683 = vmatpush.bf16.msrb.mxu3 %v11027_v44  ;;  %v4409_v49 = vpop.f32.mrf.mxu3  ;;  %v11048_v22 = vld [vmem:[#allocation399_spill] sm:$0xff]  ;;  %v11049_v44 = vld [vmem:[#allocation400_spill] sm:$0xff]  ;;  %v11062_v33 = vld [vmem:[#allocation413_spill] sm:$0xff] }
 0x37b   : > { %v4410_v30 = vadd.f32 %v4409_v49, %v4396_v58  ;;  %v11061_v49 = vld [vmem:[#allocation412_spill] sm:$0xff]  ;;  %v11072_v29 = vld [vmem:[#allocation423_spill] sm:$0xff] }
 0x37c   : > { %4645 = vmatpush.bf16.msrb.mxu0 %v11028_v40  ;;  %v9653_v40 = vrot.slane %v4635_v24, 1 }
 0x37d   : > { %4658 = vmatpush.bf16.msrb.mxu1 %v11029_v4  ;;  %v11052_v4 = vld [vmem:[#allocation403_spill] sm:$0xff] }
 0x37e   : > { %4671 = vmatpush.bf16.msrb.mxu2 %v11030_v60  ;;  %4684 = vmatpush.bf16.msrb.mxu3 %v11031_v48  ;;  %v11053_v60 = vld [vmem:[#allocation404_spill] sm:$0xff]  ;;  %v11055_v48 = vld [vmem:[#allocation406_spill] sm:$0xff] }
 0x380   : > { %4646 = vmatpush.bf16.msrb.mxu0 %v11032_v11  ;;  %v4398_v8 = vpop.f32.mrf.mxu2  ;;  %v11057_v11 = vld [vmem:[#allocation408_spill] sm:$0xff] }
 0x381   : > { %4659 = vmatpush.bf16.msrb.mxu1 %v11033_v9  ;;  %v11058_v9 = vld [vmem:[#allocation409_spill] sm:$0xff] }
 0x382   : > { %4672 = vmatpush.bf16.msrb.mxu2 %v11034_v16  ;;  %4685 = vmatpush.bf16.msrb.mxu3 %v11035_v27  ;;  %v4411_v12 = vpop.f32.mrf.mxu3  ;;  %v11059_v27 = vld [vmem:[#allocation410_spill] sm:$0xff]  ;;  %v11070_v8 = vld [vmem:[#allocation421_spill] sm:$0xff] }
 0x384   : > { %4647 = vmatpush.bf16.msrb.mxu0 %v11036_v42 }
 0x385   : > { %4660 = vmatpush.bf16.msrb.mxu1 %v11037_v54 }
 0x386   : > { %4673 = vmatpush.bf16.msrb.mxu2 %v11038_v53  ;;  %4686 = vmatpush.bf16.msrb.mxu3 %v11039_v6  ;;  %v11063_v53 = vld [vmem:[#allocation414_spill] sm:$0xff]  ;;  %v11065_v6 = vld [vmem:[#allocation416_spill] sm:$0xff] }
 0x388   : > { %4648 = vmatpush.bf16.msrb.mxu0 %v11040_v61 }
 0x389   : > { %4661 = vmatpush.bf16.msrb.mxu1 %v11041_v5 }
 0x38a   : > { %4674 = vmatpush.bf16.msrb.mxu2 %v11042_v43  ;;  %4687 = vmatpush.bf16.msrb.mxu3 %v11043_v3  ;;  %v11067_v43 = vld [vmem:[#allocation418_spill] sm:$0xff] }
 0x38c   : > { %4649 = vmatpush.bf16.msrb.mxu0 %v11044_v17  ;;  %v11071_v17 = vld [vmem:[#allocation422_spill] sm:$0xff] }
 0x38d   : > { %4662 = vmatpush.bf16.msrb.mxu1 %v11045_v34  ;;  %v11073_v34 = vld [vmem:[#allocation424_spill] sm:$0xff] }
 0x38e   : > { %4675 = vmatpush.bf16.msrb.mxu2 %v11046_v46  ;;  %4688 = vmatpush.bf16.msrb.mxu3 %v8898_v10  ;;  %v11054_v10 = vld [vmem:[#allocation405_spill] sm:$0xff] }
 0x38f   : > { %v11074_v46 = vld [vmem:[#allocation425_spill] sm:$0xff] }
 0x390   : > { %4650 = vmatpush.bf16.msrb.mxu0 %v11047_v15  ;;  %v4422_v16 = vpop.f32.mrf.mxu0  ;;  %v11075_v15 = vld [vmem:[#allocation426_spill] sm:$0xff] }
 0x391   : > { %4663 = vmatpush.bf16.msrb.mxu1 %v11048_v22  ;;  %v4423_v58 = vadd.f32 %v4422_v16, %v4410_v30  ;;  %v4435_v42 = vpop.f32.mrf.mxu1  ;;  %v11076_v22 = vld [vmem:[#allocation427_spill] sm:$0xff] }
 0x392   : > { %4676 = vmatpush.bf16.msrb.mxu2 %v11049_v44  ;;  %4689 = vmatpush.bf16.msrb.mxu3 %v11050_v0  ;;  %v11078_v44 = vld [vmem:[#allocation429_spill] sm:$0xff]  ;;  %v11079_v0 = vld [vmem:[#allocation430_spill] sm:$0xff] }
 0x393   : > { %4651 = vmatmul.bf16.vlgmr.msrb.gmra.mxu0 %v9651_v57  ;;  %v9673_v54 = vadd.f32 %v4423_v58, %v9543_v50  ;;  %v11090_v58 = vld [vmem:[#allocation441_spill] sm:$0xff] }
 0x394   : > { %4695 = vmatpush.bf16.msra.mxu0 %v11051_v62  ;;  %4664 = vmatmul.bf16.vlgmr.msrb.gmra.mxu1 %v9653_v40  ;;  %v11080_v62 = vld [vmem:[#allocation431_spill] sm:$0xff] }
 0x395   : > { %4708 = vmatpush.bf16.msra.mxu1 %v11052_v4  ;;  %4677 = vmatmul.bf16.vlgmr.msrb.gmra.mxu2 %v9647_v21  ;;  %v11081_v4 = vld [vmem:[#allocation432_spill] sm:$0xff] }
 0x396   : > { %4723 = vmatpush.bf16.msra.mxu2 %v11053_v60  ;;  %4736 = vmatpush.bf16.msra.mxu3 %v11054_v10  ;;  %v11082_v60 = vld [vmem:[#allocation433_spill] sm:$0xff]  ;;  %v11083_v10 = vld [vmem:[#allocation434_spill] sm:$0xff] }
 0x397   : > { %4690 = vmatmul.bf16.vlgmr.msrb.gmra.mxu3 %v9651_v57 }
 0x398   : > { %4696 = vmatpush.bf16.msra.mxu0 %v11055_v48  ;;  %v4448_v61 = vpop.f32.mrf.mxu2  ;;  %v4424_v5 = vpop.f32.mrf.mxu0  ;;  %v11084_v48 = vld [vmem:[#allocation435_spill] sm:$0xff] }
 0x399   : > { %4709 = vmatpush.bf16.msra.mxu1 %v11056_v23  ;;  %v4449_v31 = vadd.f32 %v4448_v61, %v4435_v42  ;;  %v4437_v3 = vpop.f32.mrf.mxu1  ;;  %v11087_v23 = vld [vmem:[#allocation438_spill] sm:$0xff]  ;;  %v11092_v42 = vld [vmem:[#allocation443_spill] sm:$0xff] }
 0x39a   : > { %4724 = vmatpush.bf16.msra.mxu2 %v11057_v11  ;;  %4737 = vmatpush.bf16.msra.mxu3 %v11058_v9  ;;  %v4461_v30 = vpop.f32.mrf.mxu3  ;;  %v11088_v11 = vld [vmem:[#allocation439_spill] sm:$0xff]  ;;  %v11089_v9 = vld [vmem:[#allocation440_spill] sm:$0xff] }
 0x39b   : > { %v4462_v50 = vadd.f32 %v4461_v30, %v4449_v31  ;;  %v11096_v30 = vld [vmem:[#allocation447_spill] sm:$0xff] }
 0x39c   : > { %4697 = vmatpush.bf16.msra.mxu0 %v11059_v27  ;;  %v11100_v3 = vld [vmem:[#allocation451_spill] sm:$0xff] }
 0x39d   : > { %4710 = vmatpush.bf16.msra.mxu1 %v11060_v28  ;;  %v9684_v12 = vadd.f32 %v4462_v50, %v9555_v35  ;;  %v11077_v35 = vld [vmem:[#allocation428_spill] sm:$0xff]  ;;  %v11091_v28 = vld [vmem:[#allocation442_spill] sm:$0xff] }
 0x39e   : > { %4725 = vmatpush.bf16.msra.mxu2 %v11061_v49  ;;  %4738 = vmatpush.bf16.msra.mxu3 %v11062_v33  ;;  %v11093_v33 = vld [vmem:[#allocation444_spill] sm:$0xff]  ;;  %v11099_v50 = vld [vmem:[#allocation450_spill] sm:$0xff] }
 0x3a0   : > { %4698 = vmatpush.bf16.msra.mxu0 %v11063_v53  ;;  %v4450_v7 = vpop.f32.mrf.mxu2  ;;  %v11094_v53 = vld [vmem:[#allocation445_spill] sm:$0xff] }
 0x3a1   : > { %4711 = vmatpush.bf16.msra.mxu1 %v11064_v59 }
 0x3a2   : > { %4726 = vmatpush.bf16.msra.mxu2 %v11065_v6  ;;  %4739 = vmatpush.bf16.msra.mxu3 %v11066_v14  ;;  %v4463_v24 = vpop.f32.mrf.mxu3  ;;  %v11095_v6 = vld [vmem:[#allocation446_spill] sm:$0xff] }
 0x3a4   : > { %4699 = vmatpush.bf16.msra.mxu0 %v11067_v43 }
 0x3a5   : > { %4712 = vmatpush.bf16.msra.mxu1 %v11068_v52  ;;  %v11097_v52 = vld [vmem:[#allocation448_spill] sm:$0xff] }
 0x3a6   : > { %4727 = vmatpush.bf16.msra.mxu2 %v11069_v55  ;;  %4740 = vmatpush.bf16.msra.mxu3 %v11070_v8  ;;  %v11098_v55 = vld [vmem:[#allocation449_spill] sm:$0xff] }
 0x3a8   : > { %4700 = vmatpush.bf16.msra.mxu0 %v11071_v17 }
 0x3a9   : > { %4713 = vmatpush.bf16.msra.mxu1 %v11072_v29 }
 0x3aa   : > { %4728 = vmatpush.bf16.msra.mxu2 %v11073_v34  ;;  %4741 = vmatpush.bf16.msra.mxu3 %v11074_v46 }
 0x3ac   : > { %4701 = vmatpush.bf16.msra.mxu0 %v11075_v15 }
 0x3ad   : > { %4714 = vmatpush.bf16.msra.mxu1 %v11076_v22 }
 0x3ae   : > { %4729 = vmatpush.bf16.msra.mxu2 %v9008_v20  ;;  %4742 = vmatpush.bf16.msra.mxu3 %v9011_v26  ;;  %v11085_v20 = vld [vmem:[#allocation436_spill] sm:$0xff]  ;;  %v11086_v26 = vld [vmem:[#allocation437_spill] sm:$0xff] }
 0x3b0   : > { %4702 = vmatpush.bf16.msra.mxu0 %v11077_v35  ;;  %v4476_v16 = vpop.f32.mrf.mxu0 }
 0x3b1   : > { %4715 = vmatpush.bf16.msra.mxu1 %v11078_v44  ;;  %v4489_v27 = vpop.f32.mrf.mxu1 }
 0x3b2   : > { %4730 = vmatpush.bf16.msra.mxu2 %v11079_v0  ;;  %4743 = vmatpush.bf16.msra.mxu3 %v11080_v62  ;;  %v4490_v49 = vadd.f32 %v4489_v27, %v4476_v16 }
 0x3b3   : > { %4703 = vmatmul.bf16.vlgmr.msra.gmra.mxu0 %v9653_v40 }
 0x3b4   : > { %4749 = vmatpush.bf16.msrb.mxu0 %v11081_v4  ;;  %4716 = vmatmul.bf16.vlgmr.msra.gmra.mxu1 %v9647_v21 }
 0x3b5   : > { %4762 = vmatpush.bf16.msrb.mxu1 %v11082_v60  ;;  %4731 = vmatmul.bf16.vlgmr.msra.gmra.mxu2 %v9651_v57 }
 0x3b6   : > { %4775 = vmatpush.bf16.msrb.mxu2 %v11083_v10  ;;  %4788 = vmatpush.bf16.msrb.mxu3 %v11084_v48 }
 0x3b7   : > { %4744 = vmatmul.bf16.vlgmr.msra.gmra.mxu3 %v9653_v40 }
 0x3b8   : > { %4750 = vmatpush.bf16.msrb.mxu0 %v11085_v20  ;;  %v4502_v59 = vpop.f32.mrf.mxu2  ;;  %v4478_v5 = vpop.f32.mrf.mxu0 }
 0x3b9   : > { %4763 = vmatpush.bf16.msrb.mxu1 %v11086_v26  ;;  %v4503_v14 = vadd.f32 %v4502_v59, %v4490_v49  ;;  %v4491_v43 = vpop.f32.mrf.mxu1 }
 0x3ba   : > { %4776 = vmatpush.bf16.msrb.mxu2 %v11087_v23  ;;  %4789 = vmatpush.bf16.msrb.mxu3 %v11088_v11  ;;  %v4515_v61 = vpop.f32.mrf.mxu3 }
 0x3bb   : > { %v4545_v31 = vadd.f32 %v4503_v14, %v9592_v45 }
 0x3bc   : > { %4751 = vmatpush.bf16.msrb.mxu0 %v11089_v9 }
 0x3bd   : > { %4764 = vmatpush.bf16.msrb.mxu1 %v11090_v58 }
 0x3be   : > { %4777 = vmatpush.bf16.msrb.mxu2 %v11091_v28  ;;  %4790 = vmatpush.bf16.msrb.mxu3 %v11092_v42 }
 0x3c0   : > { %4752 = vmatpush.bf16.msrb.mxu0 %v11093_v33  ;;  %v4504_v8 = vpop.f32.mrf.mxu2 }
 0x3c1   : > { %4765 = vmatpush.bf16.msrb.mxu1 %v11094_v53 }
 0x3c2   : > { %4778 = vmatpush.bf16.msrb.mxu2 %v9072_v39  ;;  %4791 = vmatpush.bf16.msrb.mxu3 %v11095_v6  ;;  %v11101_v39 = vld [vmem:[#allocation452_spill] sm:$0xff]  ;;  %v4517_v17 = vpop.f32.mrf.mxu3 }
 0x3c4   : > { %4753 = vmatpush.bf16.msrb.mxu0 %v11096_v30 }
 0x3c5   : > { %4766 = vmatpush.bf16.msrb.mxu1 %v11097_v52 }
 0x3c6   : > { %4779 = vmatpush.bf16.msrb.mxu2 %v11098_v55  ;;  %4792 = vmatpush.bf16.msrb.mxu3 %v11099_v50 }
 0x3c8   : > { %4754 = vmatpush.bf16.msrb.mxu0 %v11100_v3 }
 0x3c9   : > { %4767 = vmatpush.bf16.msrb.mxu1 %v11101_v39 }
 0x3ca   : > { %4780 = vmatpush.bf16.msrb.mxu2 %v9101_v63  ;;  %4793 = vmatpush.bf16.msrb.mxu3 %v9104_v13 }
 0x3cc   : > { %4755 = vmatpush.bf16.msrb.mxu0 %v9107_v2 }
 0x3cd   : > { %4768 = vmatpush.bf16.msrb.mxu1 %v9111_v19 }
 0x3ce   : > { %4781 = vmatpush.bf16.msrb.mxu2 %v9113_v47  ;;  %4794 = vmatpush.bf16.msrb.mxu3 %v9116_v18 }
 0x3d0   : > { %4756 = vmatpush.bf16.msrb.mxu0 %v9119_v36  ;;  %v4528_v13 = vpop.f32.mrf.mxu0 }
 0x3d1   : > { %4769 = vmatpush.bf16.msrb.mxu1 %v9123_v32  ;;  %v4529_v63 = vadd.f32 %v4528_v13, %v4515_v61  ;;  %v4541_v2 = vpop.f32.mrf.mxu1 }
 0x3d2   : > { %4782 = vmatpush.bf16.msrb.mxu2 %v9125_v1  ;;  %4795 = vmatpush.bf16.msrb.mxu3 %v9128_v51 }
 0x3d3   : > { %4757 = vmatmul.bf16.vlgmr.msrb.gmra.mxu0 %v9647_v21  ;;  %v4542_v18 = vadd.f32 %v4541_v2, %v4529_v63 }
 0x3d4   : > { %4770 = vmatmul.bf16.vlgmr.msrb.gmra.mxu1 %v9651_v57 }
 0x3d5   : > { %4783 = vmatmul.bf16.vlgmr.msrb.gmra.mxu2 %v9653_v40  ;;  %4796 = vmatmul.bf16.vlgmr.msrb.gmra.mxu3 %v9647_v21  ;;  %v4546_v19 = vadd.f32 %v4542_v18, %v9627_v25 }
 0x3d8   : > { %v4556_v47 = vpop.f32.mrf.mxu2  ;;  %v4530_v36 = vpop.f32.mrf.mxu0 }
 0x3d9   : > { %v4543_v45 = vpop.f32.mrf.mxu1 }
 0x3da   : > { %v4569_v32 = vpop.f32.mrf.mxu3 }
 0x3db   : > { %v4570_v1 = vadd.f32 %v4569_v32, %v4556_v47 }
 0x3e0   : > { %v4558_v51 = vpop.f32.mrf.mxu2 }
 0x3e2   : > { %v4571_v29 = vpop.f32.mrf.mxu3 }
 0x3f0   : > { %v4582_v34 = vpop.f32.mrf.mxu0 }
 0x3f1   : > { %v4583_v46 = vadd.f32 %v4582_v34, %v4570_v1  ;;  %v4595_v57 = vpop.f32.mrf.mxu1 }
 0x3f3   : > { %v4625_v40 = vadd.f32 %v4583_v46, %v9673_v54 }
 0x3f8   : > { %v4608_v7 = vpop.f32.mrf.mxu2  ;;  %v4584_v15 = vpop.f32.mrf.mxu0 }
 0x3f9   : > { %v4609_v24 = vadd.f32 %v4608_v7, %v4595_v57  ;;  %v4597_v35 = vpop.f32.mrf.mxu1 }
 0x3fa   : > { %v4621_v21 = vpop.f32.mrf.mxu3 }
 0x3fb   : > { %v4622_v22 = vadd.f32 %v4621_v21, %v4609_v24 }
 0x3fd   : > { %v4626_v25 = vadd.f32 %v4622_v22, %v9684_v12 }
 0x400   : > { %v4610_v44 = vpop.f32.mrf.mxu2 }
 0x402   : > { %v4623_v0 = vpop.f32.mrf.mxu3 }
 0x410   : > { %v4652_v62 = vpop.f32.mrf.mxu0 }
 0x411   : > { %v4665_v4 = vpop.f32.mrf.mxu1 }
 0x412   : > { %v4666_v60 = vadd.f32 %v4665_v4, %v4652_v62 }
 0x418   : > { %v4678_v10 = vpop.f32.mrf.mxu2  ;;  %v4654_v23 = vpop.f32.mrf.mxu0 }
 0x419   : > { %v4679_v48 = vadd.f32 %v4678_v10, %v4666_v60  ;;  %v4667_v11 = vpop.f32.mrf.mxu1 }
 0x41a   : > { %v4691_v20 = vpop.f32.mrf.mxu3 }
 0x41b   : > { %v4721_v26 = vadd.f32 %v4679_v48, %v4545_v31 }
 0x41d   : > { %v4819_v54 = vadd.f32 %v9305_v38, %v4721_v26 }
 0x41f   : > { %v4821_v9 = vmax.f32 %v4819_v54, 0.0 }
 0x420   : > { %v4680_v16 = vpop.f32.mrf.mxu2 }
 0x421   : > { %v4823_v27 = vmax.f32 %v9322_v37, %v4821_v9 }
 0x422   : > { %v4693_v58 = vpop.f32.mrf.mxu3 }
 0x430   : > { %v4704_v28 = vpop.f32.mrf.mxu0 }
 0x431   : > { %v4705_v12 = vadd.f32 %v4704_v28, %v4691_v20  ;;  %v4717_v49 = vpop.f32.mrf.mxu1 }
 0x433   : > { %v4718_v42 = vadd.f32 %v4717_v49, %v4705_v12 }
 0x435   : > { %v4722_v33 = vadd.f32 %v4718_v42, %v4546_v19 }
 0x437   : > { %v4820_v53 = vadd.f32 %v9320_v41, %v4722_v33 }
 0x438   : > { %v4732_v59 = vpop.f32.mrf.mxu2  ;;  %v4706_v14 = vpop.f32.mrf.mxu0 }
 0x439   : > { %v4822_v61 = vmax.f32 %v4820_v53, 0.0  ;;  %v4719_v30 = vpop.f32.mrf.mxu1 }
 0x43a   : > { %v4745_v6 = vpop.f32.mrf.mxu3 }
 0x43b   : > { %v4824_v31 = vmax.f32 %v9337_v56, %v4822_v61  ;;  %v4746_v52 = vadd.f32 %v4745_v6, %v4732_v59 }
 0x440   : > { %v4734_v5 = vpop.f32.mrf.mxu2 }
 0x442   : > { %v4747_v43 = vpop.f32.mrf.mxu3 }
 0x450   : > { %v4758_v55 = vpop.f32.mrf.mxu0 }
 0x451   : > { %v4759_v37 = vadd.f32 %v4758_v55, %v4746_v52  ;;  %v4771_v50 = vpop.f32.mrf.mxu1 }
 0x453   : > { %v4801_v3 = vadd.f32 %v4759_v37, %v4625_v40 }
 0x455   : > { %v4825_v39 = vadd.f32 %v9305_v38, %v4801_v3 }
 0x457   : > { %v4827_v8 = vmax.f32 %v4825_v39, 0.0 }
 0x458   : > { %v4784_v17 = vpop.f32.mrf.mxu2  ;;  %v4797_v63 = vpop.f32.mrf.mxu3 }
 0x459   : > { %v4785_v13 = vadd.f32 %v4784_v17, %v4771_v50  ;;  %v4760_v2 = vpop.f32.mrf.mxu0  ;;  %v4829_v18 = vmax.f32 %v4823_v27, %v4827_v8  ;;  %v4773_v19 = vpop.f32.mrf.mxu1 }
 0x45b   : > { %v4798_v47 = vadd.f32 %v4797_v63, %v4785_v13 }
 0x45d   : > { %v4802_v36 = vadd.f32 %v4798_v47, %v4626_v25 }
 0x45f   : > { %v4826_v56 = vadd.f32 %v9320_v41, %v4802_v36 }
 0x460   : > { %v4786_v32 = vpop.f32.mrf.mxu2  ;;  %v4799_v45 = vpop.f32.mrf.mxu3 }
 0x461   : > { %v4828_v1 = vmax.f32 %v4826_v56, 0.0 }
 0x463   : > { %v4830_v51 = vmax.f32 %v4824_v31, %v4828_v1 }
 0x465   : > { %v4831_v29 = vpack.c.bf16 %v4830_v51, %v4829_v18 }
 0x467   : > { %v4833_v38 = vrot.slane %v4831_v29, 2 }
 0x469   : > { %v4837_v34 = vsel %vm4834_vm0, %v4831_v29, %v4833_v38 }
 0x46a   : > { %4839 = vst [vmem:[%s202_s7] sm:$0xf] %v4837_v34 }
 0x46b PF: > { %s15_s12 = sadd.s32 1, %s7444_s12  }
 0x46c   : > { %p12_p7 = scmp.ge.s32.totalorder %s15_s12, 4  }
 0x46e   :  { %14 = sbr.rel (!%p12_p7) target bundleno = 2 (0x2), region = 81 }
 0x473   :  { %4861 = vsyncpa [#allocation3], 1 }
 0x474   :  { %4863 = vsyncpa [#allocation3 + $0x1], 1 }
 0x475   :  { %4864 = vsyncpa [#allocation5], 1 }

</bundles_post_ra>
